<compile_context>
chip_gen: v6e
topology: v6e:2x2x1
jax: 0.10.0
libtpu: 0.0.40
codegen_flags: <defaults>
</compile_context>

<pallas_src>
import functools

import jax
import jax.numpy as jnp
from jax.experimental import pallas as pl
from jax.experimental.pallas import tpu as pltpu


# ----------------------------------------------------------------------------
# Bicubic upsample (exact PyTorch semantics: align_corners=False, A=-0.75).
# ----------------------------------------------------------------------------
def _cubic_weights(t, A=-0.75):
    def c1(x):  # |x| <= 1
        return ((A + 2.0) * x - (A + 3.0)) * x * x + 1.0

    def c2(x):  # 1 < |x| < 2
        return ((A * x - 5.0 * A) * x + 8.0 * A) * x - 4.0 * A

    return jnp.stack([c2(t + 1.0), c1(t), c1(1.0 - t), c2(2.0 - t)], axis=0)


def _upsample_bicubic_axis(x, axis, scale):
    size = x.shape[axis]
    out = size * scale
    o = jnp.arange(out, dtype=jnp.float32)
    src = (o + 0.5) / float(scale) - 0.5
    x0 = jnp.floor(src)
    t = src - x0
    x0 = x0.astype(jnp.int32)
    w = _cubic_weights(t)                                         # (4, out)
    idx = jnp.clip(jnp.stack([x0 - 1, x0, x0 + 1, x0 + 2], 0), 0, size - 1)
    g = jnp.take(x, idx.reshape(-1), axis=axis)
    new_shape = x.shape[:axis] + (4, out) + x.shape[axis + 1:]
    g = g.reshape(new_shape)
    wshape = [1] * len(new_shape)
    wshape[axis], wshape[axis + 1] = 4, out
    return jnp.sum(g * w.reshape(wshape), axis=axis)


def bicubic_upsample_nhwc(x, scale):
    x = _upsample_bicubic_axis(x, 1, scale)   # H
    x = _upsample_bicubic_axis(x, 2, scale)   # W
    return x


# ----------------------------------------------------------------------------
# Fused conv0 -> relu -> conv1 -> relu -> conv2 Pallas kernel (per image).
#
# Canvas bookkeeping: work happens on a flat canvas of NCAN = Hc*WC points
# (Hc = H + 4, WC = W + 4), canvas (i, j) <-> conv output position (i-2, j-2).
# conv0/conv1 are evaluated at every canvas point, the border is zeroed with a
# precomputed mask (== conv2's zero padding), and conv2 becomes one K=800
# matmul against a VMEM im2col whose rows are lane-shifted slices of the flat
# canvas.  Output columns are b = r*WC + c (r<H, all c<WC); columns c >= W are
# junk and cropped by the wrapper.
# ----------------------------------------------------------------------------
def _srcnn_kernel(xr_ref, w0_ref, b0_ref, w1_ref, b1_ref, w2_ref, b2_ref,
                  mask_ref, o_ref, y1s_ref, col_ref, *,
                  WC, NCAN, NOUT, KH2, KW2):
    f32 = jnp.float32
    C1 = w1_ref.shape[0]

    # ---- conv0 (9x9, 3->64): one MXU contraction, K = 9*9*3 = 243 ----------
    y0 = jnp.dot(w0_ref[...], xr_ref[0], preferred_element_type=f32)
    y0 = jnp.maximum(y0 + b0_ref[...], 0.0)                # (64, NCAN)

    # ---- conv1 (1x1, 64->32): single K=64 matmul ----------------------------
    y1 = jnp.dot(w1_ref[...], y0, preferred_element_type=f32)
    y1 = jnp.maximum(y1 + b1_ref[...], 0.0)                # (32, NCAN)

    # conv2 zero padding: zero everything outside the valid HxW block.
    y1 = y1 * mask_ref[...]

    # Flat, slightly over-allocated canvas so every conv2 tap below is a
    # plain static lane-offset slice (no per-tap H/W relayout copies).
    y1s_ref[...] = jnp.zeros_like(y1s_ref)
    y1s_ref[:, :NCAN] = y1

    # ---- conv2 (5x5, 32->3): im2col in VMEM (taps folded into K = 800),
    #      then ONE lane-dense matmul (3, 800) @ (800, NOUT) -----------------
    for kh in range(KH2):
        for kw in range(KW2):
            t = kh * KW2 + kw
            off = kh * WC + kw
            col_ref[t * C1:(t + 1) * C1, :] = y1s_ref[:, off:off + NOUT]

    acc = jnp.dot(w2_ref[...], col_ref[...], preferred_element_type=f32)
    o_ref[0] = (acc + b2_ref[...]).astype(o_ref.dtype)     # (3, NOUT)


def srcnn_convs_pallas(x_nhwc, params):
    """Fused conv0/conv1/conv2 of SRCNN.  x: (N,H,W,3) -> (N,3,H,W) NCHW."""
    N, H, W, Cin = x_nhwc.shape
    KH0, KW0, _, C0 = params["w0"].shape          # (9, 9, 3, 64)
    KH2, KW2, C1, C2 = params["w2"].shape         # (5, 5, 32, 3)
    p0 = KH0 // 2
    p2h, p2w = KH2 // 2, KW2 // 2

    Hc, WC = H + 2 * p2h, W + 2 * p2w             # canvas (36, 36)
    NCAN = Hc * WC                                # 1296
    NOUT = H * WC                                 # 1152 = 9 * 128 (lane-dense)
    LW = NCAN + KW2 - 1                           # canvas + widest tap overrun
    K0 = KH0 * KW0 * Cin                          # 243
    K2 = KH2 * KW2 * C1                           # 800

    # Zero-pad the upsampled image once and im2col it (channels-first,
    # flattened spatial in the lane dimension): xr[n, tap*Cin+c, i*WC+j].
    Hin, Win = Hc + KH0 - 1, WC + KW0 - 1
    pad_t, pad_l = p0 + p2h, p0 + p2w
    xp = jnp.pad(x_nhwc, ((0, 0),
                          (pad_t, Hin - H - pad_t),
                          (pad_l, Win - W - pad_l),
                          (0, 0)))
    taps = [xp[:, kh:kh + Hc, kw:kw + WC, :]
            for kh in range(KH0) for kw in range(KW0)]
    xr = jnp.stack(taps, axis=3).reshape(N, NCAN, K0)
    xr = jnp.transpose(xr, (0, 2, 1))             # (N, 243, NCAN)

    # conv2 zero-padding mask over the canvas (precomputed, one multiply).
    ii = jnp.arange(Hc)[:, None]
    jj = jnp.arange(WC)[None, :]
    mask = (((ii >= p2h) & (ii < p2h + H) & (jj >= p2w) & (jj < p2w + W))
            .astype(jnp.float32).reshape(1, NCAN))

    w0f = jnp.transpose(params["w0"], (3, 0, 1, 2)).reshape(C0, K0)
    b0 = params["b0"].reshape(C0, 1)
    w1f = params["w1"].reshape(C0, C1).T          # (32, 64)
    b1 = params["b1"].reshape(C1, 1)
    w2f = jnp.transpose(params["w2"], (3, 0, 1, 2)).reshape(C2, K2)
    b2 = params["b2"].reshape(C2, 1)

    kernel = functools.partial(_srcnn_kernel, WC=WC, NCAN=NCAN, NOUT=NOUT,
                               KH2=KH2, KW2=KW2)

    out = pl.pallas_call(
        kernel,
        out_shape=jax.ShapeDtypeStruct((N, C2, NOUT), x_nhwc.dtype),
        grid=(N,),
        in_specs=[
            pl.BlockSpec((1, K0, NCAN), lambda n: (n, 0, 0)),
            pl.BlockSpec((C0, K0), lambda n: (0, 0)),
            pl.BlockSpec((C0, 1), lambda n: (0, 0)),
            pl.BlockSpec((C1, C0), lambda n: (0, 0)),
            pl.BlockSpec((C1, 1), lambda n: (0, 0)),
            pl.BlockSpec((C2, K2), lambda n: (0, 0)),
            pl.BlockSpec((C2, 1), lambda n: (0, 0)),
            pl.BlockSpec((1, NCAN), lambda n: (0, 0)),
        ],
        out_specs=pl.BlockSpec((1, C2, NOUT), lambda n: (n, 0, 0)),
        scratch_shapes=[pltpu.VMEM((C1, LW), jnp.float32),
                        pltpu.VMEM((K2, NOUT), jnp.float32)],
        compiler_params=pltpu.CompilerParams(
            dimension_semantics=("parallel",),
            vmem_limit_bytes=16 * 1024 * 1024),
    )(xr, w0f, b0, w1f, b1, w2f, b2, mask)

    # (N, 3, H, WC) -> crop the WC-W junk columns -> NCHW output.
    return out.reshape(N, C2, H, WC)[:, :, :, :W]


# ----------------------------------------------------------------------------
# srcnn915 forward
# ----------------------------------------------------------------------------
def srcnn915_forward(x_nchw, params, upf=4):
    x = jnp.transpose(x_nchw, (0, 2, 3, 1))                 # NCHW -> NHWC
    x = bicubic_upsample_nhwc(x, upf)                       # preprocess
    return srcnn_convs_pallas(x, params)                    # fused 3 convs, NCHW


def init_params(key, in_channel=3):
    def conv_init(k, kh, kw, cin, cout):
        kw_, kb = jax.random.split(k)
        bound = 1.0 / jnp.sqrt(float(cin * kh * kw))
        w = jax.random.uniform(kw_, (kh, kw, cin, cout), jnp.float32,
                               -bound, bound)
        b = jax.random.uniform(kb, (cout,), jnp.float32, -bound, bound)
        return w, b

    k0, k1, k2 = jax.random.split(key, 3)
    w0, b0 = conv_init(k0, 9, 9, in_channel, 64)
    w1, b1 = conv_init(k1, 1, 1, 64, 32)
    w2, b2 = conv_init(k2, 5, 5, 32, in_channel)
    return {"w0": w0, "b0": b0, "w1": w1, "b1": b1, "w2": w2, "b2": b2}


# ----------------------------------------------------------------------------
# Plain-JAX reference for a correctness sanity check.
# ----------------------------------------------------------------------------
def _conv_ref(x, w, b, relu):
    y = jax.lax.conv_general_dilated(
        x, w, (1, 1), padding="SAME",
        dimension_numbers=("NHWC", "HWIO", "NHWC")) + b[None, None, None, :]
    return jnp.maximum(y, 0.0) if relu else y


def _forward_ref(x_nchw, params, upf=4):
    x = jnp.transpose(x_nchw, (0, 2, 3, 1))
    x = bicubic_upsample_nhwc(x, upf)
    x = _conv_ref(x, params["w0"], params["b0"], True)
    x = _conv_ref(x, params["w1"], params["b1"], True)
    x = _conv_ref(x, params["w2"], params["b2"], False)
    return jnp.transpose(x, (0, 3, 1, 2))


if __name__ == "__main__":
    UPF = 4
    key = jax.random.PRNGKey(0)
    kx, kp = jax.random.split(key)
    x = jax.random.normal(kx, (2, 3, 8, 8), jnp.float32)    # NCHW, like PyTorch
    params = init_params(kp, in_channel=3)

    fwd = jax.jit(functools.partial(srcnn915_forward, upf=UPF))
    y = jax.block_until_ready(fwd(x, params))
    assert y.shape == (2, 3, 8 * UPF, 8 * UPF), y.shape

    y_ref = jax.block_until_ready(_forward_ref(x, params, upf=UPF))
    assert jnp.allclose(y, y_ref, atol=1e-3, rtol=1e-3), (
        float(jnp.max(jnp.abs(y - y_ref))))

    print("KERNEL_OK")
</pallas_src>

<mosaic_0001>
module attributes {stable_mosaic.version = 11 : i64} {
  func.func @_srcnn_kernel(%arg0: i32, %arg1: memref<1x243x1296xf32, #tpu.memory_space<vmem>>, %arg2: memref<64x243xf32, #tpu.memory_space<vmem>>, %arg3: memref<64x1xf32, #tpu.memory_space<vmem>>, %arg4: memref<32x64xf32, #tpu.memory_space<vmem>>, %arg5: memref<32x1xf32, #tpu.memory_space<vmem>>, %arg6: memref<3x800xf32, #tpu.memory_space<vmem>>, %arg7: memref<3x1xf32, #tpu.memory_space<vmem>>, %arg8: memref<1x1296xf32, #tpu.memory_space<vmem>>, %arg9: memref<1x3x1152xf32, #tpu.memory_space<vmem>>, %arg10: memref<32x1300xf32, #tpu.memory_space<vmem>>, %arg11: memref<800x1152xf32, #tpu.memory_space<vmem>>) attributes {dimension_semantics = [#tpu.dimension_semantics<parallel>], iteration_bounds = array<i64: 2>, scalar_prefetch = 0 : i64, scratch_operands = 2 : i64, tpu.core_type = #tpu.core_type<tc>, window_params = [{transform_indices = @transform_0, window_bounds = array<i64: 1, 243, 1296>}, {pipeline_mode = #tpu.pipeline_mode<synchronous>, transform_indices = @transform_1, window_bounds = array<i64: 64, 243>}, {pipeline_mode = #tpu.pipeline_mode<synchronous>, transform_indices = @transform_2, window_bounds = array<i64: 64, 1>}, {pipeline_mode = #tpu.pipeline_mode<synchronous>, transform_indices = @transform_3, window_bounds = array<i64: 32, 64>}, {pipeline_mode = #tpu.pipeline_mode<synchronous>, transform_indices = @transform_4, window_bounds = array<i64: 32, 1>}, {pipeline_mode = #tpu.pipeline_mode<synchronous>, transform_indices = @transform_5, window_bounds = array<i64: 3, 800>}, {pipeline_mode = #tpu.pipeline_mode<synchronous>, transform_indices = @transform_6, window_bounds = array<i64: 3, 1>}, {pipeline_mode = #tpu.pipeline_mode<synchronous>, transform_indices = @transform_7, window_bounds = array<i64: 1, 1296>}, {transform_indices = @transform_8, window_bounds = array<i64: 1, 3, 1152>}]} {
    %c0 = arith.constant 0 : index
    %c0_0 = arith.constant 0 : index
    %0 = vector.load %arg2[%c0, %c0_0] : memref<64x243xf32, #tpu.memory_space<vmem>>, vector<64x243xf32>
    %c0_1 = arith.constant 0 : index
    %c0_2 = arith.constant 0 : index
    %c0_3 = arith.constant 0 : index
    %1 = vector.load %arg1[%c0_1, %c0_2, %c0_3] : memref<1x243x1296xf32, #tpu.memory_space<vmem>>, vector<1x243x1296xf32>
    %2 = vector.shape_cast %1 : vector<1x243x1296xf32> to vector<243x1296xf32>
    %cst = arith.constant dense<0.000000e+00> : vector<64x1296xf32>
    %3 = tpu.matmul %0, %2, %cst {dimension_numbers = #tpu.dot_dimension_numbers<[1], [0], [0], [1], [0, 0, 1, 1], [], []>} : vector<64x243xf32>, vector<243x1296xf32>, vector<64x1296xf32> -> vector<64x1296xf32>
    %c0_4 = arith.constant 0 : index
    %c0_5 = arith.constant 0 : index
    %4 = vector.load %arg3[%c0_4, %c0_5] : memref<64x1xf32, #tpu.memory_space<vmem>>, vector<64x1xf32>
    %5 = vector.broadcast %4 : vector<64x1xf32> to vector<64x1296xf32>
    %6 = arith.addf %3, %5 : vector<64x1296xf32>
    %cst_6 = arith.constant 0.000000e+00 : f32
    %7 = vector.broadcast %cst_6 : f32 to vector<64x1296xf32>
    %8 = arith.maximumf %6, %7 : vector<64x1296xf32>
    %c0_7 = arith.constant 0 : index
    %c0_8 = arith.constant 0 : index
    %9 = vector.load %arg4[%c0_7, %c0_8] : memref<32x64xf32, #tpu.memory_space<vmem>>, vector<32x64xf32>
    %cst_9 = arith.constant dense<0.000000e+00> : vector<32x1296xf32>
    %10 = tpu.matmul %9, %8, %cst_9 {dimension_numbers = #tpu.dot_dimension_numbers<[1], [0], [0], [1], [0, 0, 1, 1], [], []>} : vector<32x64xf32>, vector<64x1296xf32>, vector<32x1296xf32> -> vector<32x1296xf32>
    %c0_10 = arith.constant 0 : index
    %c0_11 = arith.constant 0 : index
    %11 = vector.load %arg5[%c0_10, %c0_11] : memref<32x1xf32, #tpu.memory_space<vmem>>, vector<32x1xf32>
    %12 = vector.broadcast %11 : vector<32x1xf32> to vector<32x1296xf32>
    %13 = arith.addf %10, %12 : vector<32x1296xf32>
    %cst_12 = arith.constant 0.000000e+00 : f32
    %14 = vector.broadcast %cst_12 : f32 to vector<32x1296xf32>
    %15 = arith.maximumf %13, %14 : vector<32x1296xf32>
    %c0_13 = arith.constant 0 : index
    %c0_14 = arith.constant 0 : index
    %16 = vector.load %arg8[%c0_13, %c0_14] : memref<1x1296xf32, #tpu.memory_space<vmem>>, vector<1x1296xf32>
    %17 = vector.broadcast %16 : vector<1x1296xf32> to vector<32x1296xf32>
    %18 = arith.mulf %15, %17 : vector<32x1296xf32>
    %cst_15 = arith.constant 0.000000e+00 : f32
    %19 = vector.broadcast %cst_15 : f32 to vector<32x1300xf32>
    %c0_16 = arith.constant 0 : index
    %c0_17 = arith.constant 0 : index
    %20 = vector.load %arg10[%c0_16, %c0_17] : memref<32x1300xf32, #tpu.memory_space<vmem>>, vector<32x1300xf32>
    tpu.vector_store %arg10[%c0_16, %c0_17], %19 {strides = array<i32>} : memref<32x1300xf32, #tpu.memory_space<vmem>>, vector<32x1300xf32>,
    %c0_18 = arith.constant 0 : index
    %c0_19 = arith.constant 0 : index
    %21 = vector.load %arg10[%c0_18, %c0_19] : memref<32x1300xf32, #tpu.memory_space<vmem>>, vector<32x1296xf32>
    tpu.vector_store %arg10[%c0_18, %c0_19], %18 {strides = array<i32>} : memref<32x1300xf32, #tpu.memory_space<vmem>>, vector<32x1296xf32>,
    %c0_20 = arith.constant 0 : index
    %c0_21 = arith.constant 0 : index
    %22 = vector.load %arg10[%c0_20, %c0_21] : memref<32x1300xf32, #tpu.memory_space<vmem>>, vector<32x1152xf32>
    %c0_22 = arith.constant 0 : index
    %c0_23 = arith.constant 0 : index
    %23 = vector.load %arg11[%c0_22, %c0_23] : memref<800x1152xf32, #tpu.memory_space<vmem>>, vector<32x1152xf32>
    tpu.vector_store %arg11[%c0_22, %c0_23], %22 {strides = array<i32>} : memref<800x1152xf32, #tpu.memory_space<vmem>>, vector<32x1152xf32>,
    %c0_24 = arith.constant 0 : index
    %c1 = arith.constant 1 : index
    %24 = vector.load %arg10[%c0_24, %c1] : memref<32x1300xf32, #tpu.memory_space<vmem>>, vector<32x1152xf32>
    %c32 = arith.constant 32 : index
    %c0_25 = arith.constant 0 : index
    %25 = vector.load %arg11[%c32, %c0_25] : memref<800x1152xf32, #tpu.memory_space<vmem>>, vector<32x1152xf32>
    tpu.vector_store %arg11[%c32, %c0_25], %24 {strides = array<i32>} : memref<800x1152xf32, #tpu.memory_space<vmem>>, vector<32x1152xf32>,
    %c0_26 = arith.constant 0 : index
    %c2 = arith.constant 2 : index
    %26 = vector.load %arg10[%c0_26, %c2] : memref<32x1300xf32, #tpu.memory_space<vmem>>, vector<32x1152xf32>
    %c64 = arith.constant 64 : index
    %c0_27 = arith.constant 0 : index
    %27 = vector.load %arg11[%c64, %c0_27] : memref<800x1152xf32, #tpu.memory_space<vmem>>, vector<32x1152xf32>
    tpu.vector_store %arg11[%c64, %c0_27], %26 {strides = array<i32>} : memref<800x1152xf32, #tpu.memory_space<vmem>>, vector<32x1152xf32>,
    %c0_28 = arith.constant 0 : index
    %c3 = arith.constant 3 : index
    %28 = vector.load %arg10[%c0_28, %c3] : memref<32x1300xf32, #tpu.memory_space<vmem>>, vector<32x1152xf32>
    %c96 = arith.constant 96 : index
    %c0_29 = arith.constant 0 : index
    %29 = vector.load %arg11[%c96, %c0_29] : memref<800x1152xf32, #tpu.memory_space<vmem>>, vector<32x1152xf32>
    tpu.vector_store %arg11[%c96, %c0_29], %28 {strides = array<i32>} : memref<800x1152xf32, #tpu.memory_space<vmem>>, vector<32x1152xf32>,
    %c0_30 = arith.constant 0 : index
    %c4 = arith.constant 4 : index
    %30 = vector.load %arg10[%c0_30, %c4] : memref<32x1300xf32, #tpu.memory_space<vmem>>, vector<32x1152xf32>
    %c128 = arith.constant 128 : index
    %c0_31 = arith.constant 0 : index
    %31 = vector.load %arg11[%c128, %c0_31] : memref<800x1152xf32, #tpu.memory_space<vmem>>, vector<32x1152xf32>
    tpu.vector_store %arg11[%c128, %c0_31], %30 {strides = array<i32>} : memref<800x1152xf32, #tpu.memory_space<vmem>>, vector<32x1152xf32>,
    %c0_32 = arith.constant 0 : index
    %c36 = arith.constant 36 : index
    %32 = vector.load %arg10[%c0_32, %c36] : memref<32x1300xf32, #tpu.memory_space<vmem>>, vector<32x1152xf32>
    %c160 = arith.constant 160 : index
    %c0_33 = arith.constant 0 : index
    %33 = vector.load %arg11[%c160, %c0_33] : memref<800x1152xf32, #tpu.memory_space<vmem>>, vector<32x1152xf32>
    tpu.vector_store %arg11[%c160, %c0_33], %32 {strides = array<i32>} : memref<800x1152xf32, #tpu.memory_space<vmem>>, vector<32x1152xf32>,
    %c0_34 = arith.constant 0 : index
    %c37 = arith.constant 37 : index
    %34 = vector.load %arg10[%c0_34, %c37] : memref<32x1300xf32, #tpu.memory_space<vmem>>, vector<32x1152xf32>
    %c192 = arith.constant 192 : index
    %c0_35 = arith.constant 0 : index
    %35 = vector.load %arg11[%c192, %c0_35] : memref<800x1152xf32, #tpu.memory_space<vmem>>, vector<32x1152xf32>
    tpu.vector_store %arg11[%c192, %c0_35], %34 {strides = array<i32>} : memref<800x1152xf32, #tpu.memory_space<vmem>>, vector<32x1152xf32>,
    %c0_36 = arith.constant 0 : index
    %c38 = arith.constant 38 : index
    %36 = vector.load %arg10[%c0_36, %c38] : memref<32x1300xf32, #tpu.memory_space<vmem>>, vector<32x1152xf32>
    %c224 = arith.constant 224 : index
    %c0_37 = arith.constant 0 : index
    %37 = vector.load %arg11[%c224, %c0_37] : memref<800x1152xf32, #tpu.memory_space<vmem>>, vector<32x1152xf32>
    tpu.vector_store %arg11[%c224, %c0_37], %36 {strides = array<i32>} : memref<800x1152xf32, #tpu.memory_space<vmem>>, vector<32x1152xf32>,
    %c0_38 = arith.constant 0 : index
    %c39 = arith.constant 39 : index
    %38 = vector.load %arg10[%c0_38, %c39] : memref<32x1300xf32, #tpu.memory_space<vmem>>, vector<32x1152xf32>
    %c256 = arith.constant 256 : index
    %c0_39 = arith.constant 0 : index
    %39 = vector.load %arg11[%c256, %c0_39] : memref<800x1152xf32, #tpu.memory_space<vmem>>, vector<32x1152xf32>
    tpu.vector_store %arg11[%c256, %c0_39], %38 {strides = array<i32>} : memref<800x1152xf32, #tpu.memory_space<vmem>>, vector<32x1152xf32>,
    %c0_40 = arith.constant 0 : index
    %c40 = arith.constant 40 : index
    %40 = vector.load %arg10[%c0_40, %c40] : memref<32x1300xf32, #tpu.memory_space<vmem>>, vector<32x1152xf32>
    %c288 = arith.constant 288 : index
    %c0_41 = arith.constant 0 : index
    %41 = vector.load %arg11[%c288, %c0_41] : memref<800x1152xf32, #tpu.memory_space<vmem>>, vector<32x1152xf32>
    tpu.vector_store %arg11[%c288, %c0_41], %40 {strides = array<i32>} : memref<800x1152xf32, #tpu.memory_space<vmem>>, vector<32x1152xf32>,
    %c0_42 = arith.constant 0 : index
    %c72 = arith.constant 72 : index
    %42 = vector.load %arg10[%c0_42, %c72] : memref<32x1300xf32, #tpu.memory_space<vmem>>, vector<32x1152xf32>
    %c320 = arith.constant 320 : index
    %c0_43 = arith.constant 0 : index
    %43 = vector.load %arg11[%c320, %c0_43] : memref<800x1152xf32, #tpu.memory_space<vmem>>, vector<32x1152xf32>
    tpu.vector_store %arg11[%c320, %c0_43], %42 {strides = array<i32>} : memref<800x1152xf32, #tpu.memory_space<vmem>>, vector<32x1152xf32>,
    %c0_44 = arith.constant 0 : index
    %c73 = arith.constant 73 : index
    %44 = vector.load %arg10[%c0_44, %c73] : memref<32x1300xf32, #tpu.memory_space<vmem>>, vector<32x1152xf32>
    %c352 = arith.constant 352 : index
    %c0_45 = arith.constant 0 : index
    %45 = vector.load %arg11[%c352, %c0_45] : memref<800x1152xf32, #tpu.memory_space<vmem>>, vector<32x1152xf32>
    tpu.vector_store %arg11[%c352, %c0_45], %44 {strides = array<i32>} : memref<800x1152xf32, #tpu.memory_space<vmem>>, vector<32x1152xf32>,
    %c0_46 = arith.constant 0 : index
    %c74 = arith.constant 74 : index
    %46 = vector.load %arg10[%c0_46, %c74] : memref<32x1300xf32, #tpu.memory_space<vmem>>, vector<32x1152xf32>
    %c384 = arith.constant 384 : index
    %c0_47 = arith.constant 0 : index
    %47 = vector.load %arg11[%c384, %c0_47] : memref<800x1152xf32, #tpu.memory_space<vmem>>, vector<32x1152xf32>
    tpu.vector_store %arg11[%c384, %c0_47], %46 {strides = array<i32>} : memref<800x1152xf32, #tpu.memory_space<vmem>>, vector<32x1152xf32>,
    %c0_48 = arith.constant 0 : index
    %c75 = arith.constant 75 : index
    %48 = vector.load %arg10[%c0_48, %c75] : memref<32x1300xf32, #tpu.memory_space<vmem>>, vector<32x1152xf32>
    %c416 = arith.constant 416 : index
    %c0_49 = arith.constant 0 : index
    %49 = vector.load %arg11[%c416, %c0_49] : memref<800x1152xf32, #tpu.memory_space<vmem>>, vector<32x1152xf32>
    tpu.vector_store %arg11[%c416, %c0_49], %48 {strides = array<i32>} : memref<800x1152xf32, #tpu.memory_space<vmem>>, vector<32x1152xf32>,
    %c0_50 = arith.constant 0 : index
    %c76 = arith.constant 76 : index
    %50 = vector.load %arg10[%c0_50, %c76] : memref<32x1300xf32, #tpu.memory_space<vmem>>, vector<32x1152xf32>
    %c448 = arith.constant 448 : index
    %c0_51 = arith.constant 0 : index
    %51 = vector.load %arg11[%c448, %c0_51] : memref<800x1152xf32, #tpu.memory_space<vmem>>, vector<32x1152xf32>
    tpu.vector_store %arg11[%c448, %c0_51], %50 {strides = array<i32>} : memref<800x1152xf32, #tpu.memory_space<vmem>>, vector<32x1152xf32>,
    %c0_52 = arith.constant 0 : index
    %c108 = arith.constant 108 : index
    %52 = vector.load %arg10[%c0_52, %c108] : memref<32x1300xf32, #tpu.memory_space<vmem>>, vector<32x1152xf32>
    %c480 = arith.constant 480 : index
    %c0_53 = arith.constant 0 : index
    %53 = vector.load %arg11[%c480, %c0_53] : memref<800x1152xf32, #tpu.memory_space<vmem>>, vector<32x1152xf32>
    tpu.vector_store %arg11[%c480, %c0_53], %52 {strides = array<i32>} : memref<800x1152xf32, #tpu.memory_space<vmem>>, vector<32x1152xf32>,
    %c0_54 = arith.constant 0 : index
    %c109 = arith.constant 109 : index
    %54 = vector.load %arg10[%c0_54, %c109] : memref<32x1300xf32, #tpu.memory_space<vmem>>, vector<32x1152xf32>
    %c512 = arith.constant 512 : index
    %c0_55 = arith.constant 0 : index
    %55 = vector.load %arg11[%c512, %c0_55] : memref<800x1152xf32, #tpu.memory_space<vmem>>, vector<32x1152xf32>
    tpu.vector_store %arg11[%c512, %c0_55], %54 {strides = array<i32>} : memref<800x1152xf32, #tpu.memory_space<vmem>>, vector<32x1152xf32>,
    %c0_56 = arith.constant 0 : index
    %c110 = arith.constant 110 : index
    %56 = vector.load %arg10[%c0_56, %c110] : memref<32x1300xf32, #tpu.memory_space<vmem>>, vector<32x1152xf32>
    %c544 = arith.constant 544 : index
    %c0_57 = arith.constant 0 : index
    %57 = vector.load %arg11[%c544, %c0_57] : memref<800x1152xf32, #tpu.memory_space<vmem>>, vector<32x1152xf32>
    tpu.vector_store %arg11[%c544, %c0_57], %56 {strides = array<i32>} : memref<800x1152xf32, #tpu.memory_space<vmem>>, vector<32x1152xf32>,
    %c0_58 = arith.constant 0 : index
    %c111 = arith.constant 111 : index
    %58 = vector.load %arg10[%c0_58, %c111] : memref<32x1300xf32, #tpu.memory_space<vmem>>, vector<32x1152xf32>
    %c576 = arith.constant 576 : index
    %c0_59 = arith.constant 0 : index
    %59 = vector.load %arg11[%c576, %c0_59] : memref<800x1152xf32, #tpu.memory_space<vmem>>, vector<32x1152xf32>
    tpu.vector_store %arg11[%c576, %c0_59], %58 {strides = array<i32>} : memref<800x1152xf32, #tpu.memory_space<vmem>>, vector<32x1152xf32>,
    %c0_60 = arith.constant 0 : index
    %c112 = arith.constant 112 : index
    %60 = vector.load %arg10[%c0_60, %c112] : memref<32x1300xf32, #tpu.memory_space<vmem>>, vector<32x1152xf32>
    %c608 = arith.constant 608 : index
    %c0_61 = arith.constant 0 : index
    %61 = vector.load %arg11[%c608, %c0_61] : memref<800x1152xf32, #tpu.memory_space<vmem>>, vector<32x1152xf32>
    tpu.vector_store %arg11[%c608, %c0_61], %60 {strides = array<i32>} : memref<800x1152xf32, #tpu.memory_space<vmem>>, vector<32x1152xf32>,
    %c0_62 = arith.constant 0 : index
    %c144 = arith.constant 144 : index
    %62 = vector.load %arg10[%c0_62, %c144] : memref<32x1300xf32, #tpu.memory_space<vmem>>, vector<32x1152xf32>
    %c640 = arith.constant 640 : index
    %c0_63 = arith.constant 0 : index
    %63 = vector.load %arg11[%c640, %c0_63] : memref<800x1152xf32, #tpu.memory_space<vmem>>, vector<32x1152xf32>
    tpu.vector_store %arg11[%c640, %c0_63], %62 {strides = array<i32>} : memref<800x1152xf32, #tpu.memory_space<vmem>>, vector<32x1152xf32>,
    %c0_64 = arith.constant 0 : index
    %c145 = arith.constant 145 : index
    %64 = vector.load %arg10[%c0_64, %c145] : memref<32x1300xf32, #tpu.memory_space<vmem>>, vector<32x1152xf32>
    %c672 = arith.constant 672 : index
    %c0_65 = arith.constant 0 : index
    %65 = vector.load %arg11[%c672, %c0_65] : memref<800x1152xf32, #tpu.memory_space<vmem>>, vector<32x1152xf32>
    tpu.vector_store %arg11[%c672, %c0_65], %64 {strides = array<i32>} : memref<800x1152xf32, #tpu.memory_space<vmem>>, vector<32x1152xf32>,
    %c0_66 = arith.constant 0 : index
    %c146 = arith.constant 146 : index
    %66 = vector.load %arg10[%c0_66, %c146] : memref<32x1300xf32, #tpu.memory_space<vmem>>, vector<32x1152xf32>
    %c704 = arith.constant 704 : index
    %c0_67 = arith.constant 0 : index
    %67 = vector.load %arg11[%c704, %c0_67] : memref<800x1152xf32, #tpu.memory_space<vmem>>, vector<32x1152xf32>
    tpu.vector_store %arg11[%c704, %c0_67], %66 {strides = array<i32>} : memref<800x1152xf32, #tpu.memory_space<vmem>>, vector<32x1152xf32>,
    %c0_68 = arith.constant 0 : index
    %c147 = arith.constant 147 : index
    %68 = vector.load %arg10[%c0_68, %c147] : memref<32x1300xf32, #tpu.memory_space<vmem>>, vector<32x1152xf32>
    %c736 = arith.constant 736 : index
    %c0_69 = arith.constant 0 : index
    %69 = vector.load %arg11[%c736, %c0_69] : memref<800x1152xf32, #tpu.memory_space<vmem>>, vector<32x1152xf32>
    tpu.vector_store %arg11[%c736, %c0_69], %68 {strides = array<i32>} : memref<800x1152xf32, #tpu.memory_space<vmem>>, vector<32x1152xf32>,
    %c0_70 = arith.constant 0 : index
    %c148 = arith.constant 148 : index
    %70 = vector.load %arg10[%c0_70, %c148] : memref<32x1300xf32, #tpu.memory_space<vmem>>, vector<32x1152xf32>
    %c768 = arith.constant 768 : index
    %c0_71 = arith.constant 0 : index
    %71 = vector.load %arg11[%c768, %c0_71] : memref<800x1152xf32, #tpu.memory_space<vmem>>, vector<32x1152xf32>
    tpu.vector_store %arg11[%c768, %c0_71], %70 {strides = array<i32>} : memref<800x1152xf32, #tpu.memory_space<vmem>>, vector<32x1152xf32>,
    %c0_72 = arith.constant 0 : index
    %c0_73 = arith.constant 0 : index
    %72 = vector.load %arg6[%c0_72, %c0_73] : memref<3x800xf32, #tpu.memory_space<vmem>>, vector<3x800xf32>
    %c0_74 = arith.constant 0 : index
    %c0_75 = arith.constant 0 : index
    %73 = vector.load %arg11[%c0_74, %c0_75] : memref<800x1152xf32, #tpu.memory_space<vmem>>, vector<800x1152xf32>
    %cst_76 = arith.constant dense<0.000000e+00> : vector<3x1152xf32>
    %74 = tpu.matmul %72, %73, %cst_76 {dimension_numbers = #tpu.dot_dimension_numbers<[1], [0], [0], [1], [0, 0, 1, 1], [], []>} : vector<3x800xf32>, vector<800x1152xf32>, vector<3x1152xf32> -> vector<3x1152xf32>
    %c0_77 = arith.constant 0 : index
    %c0_78 = arith.constant 0 : index
    %75 = vector.load %arg7[%c0_77, %c0_78] : memref<3x1xf32, #tpu.memory_space<vmem>>, vector<3x1xf32>
    %76 = vector.broadcast %75 : vector<3x1xf32> to vector<3x1152xf32>
    %77 = arith.addf %74, %76 : vector<3x1152xf32>
    %c0_79 = arith.constant 0 : index
    %c0_80 = arith.constant 0 : index
    %c0_81 = arith.constant 0 : index
    %78 = vector.load %arg9[%c0_79, %c0_80, %c0_81] : memref<1x3x1152xf32, #tpu.memory_space<vmem>>, vector<1x3x1152xf32>
    %79 = vector.shape_cast %78 : vector<1x3x1152xf32> to vector<3x1152xf32>
    %80 = vector.shape_cast %77 : vector<3x1152xf32> to vector<1x3x1152xf32>
    tpu.vector_store %arg9[%c0_79, %c0_80, %c0_81], %80 {strides = array<i32>} : memref<1x3x1152xf32, #tpu.memory_space<vmem>>, vector<1x3x1152xf32>,
    return
  }
  func.func @transform_0(%arg0: i32) -> (i32, i32, i32) {
    %c0_i32 = arith.constant 0 : i32
    %c0_i32_0 = arith.constant 0 : i32
    %c0_i32_1 = arith.constant 0 : i32
    return %arg0, %c0_i32, %c0_i32_0 : i32, i32, i32
  }
  func.func @transform_1(%arg0: i32) -> (i32, i32) {
    %c0_i32 = arith.constant 0 : i32
    %c0_i32_0 = arith.constant 0 : i32
    %c0_i32_1 = arith.constant 0 : i32
    return %c0_i32, %c0_i32_0 : i32, i32
  }
  func.func @transform_2(%arg0: i32) -> (i32, i32) {
    %c0_i32 = arith.constant 0 : i32
    %c0_i32_0 = arith.constant 0 : i32
    %c0_i32_1 = arith.constant 0 : i32
    return %c0_i32, %c0_i32_0 : i32, i32
  }
  func.func @transform_3(%arg0: i32) -> (i32, i32) {
    %c0_i32 = arith.constant 0 : i32
    %c0_i32_0 = arith.constant 0 : i32
    %c0_i32_1 = arith.constant 0 : i32
    return %c0_i32, %c0_i32_0 : i32, i32
  }
  func.func @transform_4(%arg0: i32) -> (i32, i32) {
    %c0_i32 = arith.constant 0 : i32
    %c0_i32_0 = arith.constant 0 : i32
    %c0_i32_1 = arith.constant 0 : i32
    return %c0_i32, %c0_i32_0 : i32, i32
  }
  func.func @transform_5(%arg0: i32) -> (i32, i32) {
    %c0_i32 = arith.constant 0 : i32
    %c0_i32_0 = arith.constant 0 : i32
    %c0_i32_1 = arith.constant 0 : i32
    return %c0_i32, %c0_i32_0 : i32, i32
  }
  func.func @transform_6(%arg0: i32) -> (i32, i32) {
    %c0_i32 = arith.constant 0 : i32
    %c0_i32_0 = arith.constant 0 : i32
    %c0_i32_1 = arith.constant 0 : i32
    return %c0_i32, %c0_i32_0 : i32, i32
  }
  func.func @transform_7(%arg0: i32) -> (i32, i32) {
    %c0_i32 = arith.constant 0 : i32
    %c0_i32_0 = arith.constant 0 : i32
    %c0_i32_1 = arith.constant 0 : i32
    return %c0_i32, %c0_i32_0 : i32, i32
  }
  func.func @transform_8(%arg0: i32) -> (i32, i32, i32) {
    %c0_i32 = arith.constant 0 : i32
    %c0_i32_0 = arith.constant 0 : i32
    %c0_i32_1 = arith.constant 0 : i32
    return %arg0, %c0_i32, %c0_i32_0 : i32, i32, i32
  }
}

</mosaic_0001>

<bundles_post_ra>
// kernel: srcnn915_forward.1
= control target key start
LH: loop header
LB: loop body
LE: loop exit
PB: predicated region body
PF: predicated region fallthrough
CT: control target
= control target key end

     0   :  { %s11671_s27 = smov 0   ;;  %s18985_s0 = inlined_call_operand.vmem [shape: f32[2,243,1296], index: 0, kind: input, shape index: {}]   ;;  %s18986_s1 = inlined_call_operand.vmem [shape: f32[64,243], index: 1, kind: input, shape index: {}]   ;;  %s18987_s2 = inlined_call_operand.vmem [shape: f32[64,1], index: 2, kind: input, shape index: {}]   ;;  %s18988_s3 = inlined_call_operand.vmem [shape: f32[32,64], index: 3, kind: input, shape index: {}]   ;;  %s18989_s4 = inlined_call_operand.vmem [shape: f32[32,1], index: 4, kind: input, shape index: {}]   ;;  %s18990_s5 = inlined_call_operand.vmem [shape: f32[3,800], index: 5, kind: input, shape index: {}]   ;;  %s18991_s6 = inlined_call_operand.vmem [shape: f32[3,1], index: 6, kind: input, shape index: {}]   ;;  %s18992_s7 = inlined_call_operand.vmem [shape: f32[1,1296], index: 7, kind: input, shape index: {}]   ;;  %s18993_s8 = inlined_call_operand.vmem [shape: f32[2,3,1152], index: 8, kind: output, shape index: {}]  }
   0x1 LB: > { %s11277_s28 = sadd.s32 4294967295, %s11597_s27   ;;  %p11281_p0 = scmp.ge.s32.totalorder %s11597_s27, 1  ;;  %s11597_s27 = sphi %s11671_s27, %s18_s27  }
   0x2   : > { %p262_p1 = scmp.lt.s32.totalorder %s11597_s27, 3 }
   0x4   : > { %p263_p2 = pnand %p11281_p0, %p262_p1 }
   0x6   : > { %266 = sbr.rel (%p263_p2) target bundleno = 2788 (0xae4), region = 52 }
   0xb   : > { %p296_p3 = scmp.lt.s32.totalorder %s11277_s28, 1  ;;  %v307_v0 = vld [vmem:[%s18986_s1 + $0x8] sm:$0xff]  ;;  %vm711_vm0 = vcmask 941056   ;;  %vm736_vm1 = vcmask 1042432   ;;  %vm1556_vm2 = vcmask 523264   ;;  %s11602_s16 = smov 126  }
   0xc   : > { %11286 = vmatprep.mubr.msk.f32.mxu0 %vm711_vm0, %v307_v0  ;;  %11296 = vmatprep.mubr.msk.f32.mxu1 %vm711_vm0, %v307_v0  ;;  %s11603_s17 = smov 125   ;;  %s11604_s18 = smov 124   ;;  %vm19432_vm3 = vcmask 162816   ;;  %vm19512_vm4 = vcmask 130048   ;;  %vm3106_vm5 = vcmask 1022976   ;;  %vm2837_vm6 = vcmask 1031168  }
   0xd   : > { %s21073_s28 = smov (!%p296_p3, %s11277_s28), 1  ;;  %s11605_s19 = smov 92   ;;  %vm19449_vm7 = vcmask 1039360   ;;  %vm4182_vm8 = vcmask 736256   ;;  %vm19453_vm9 = vcmask 744448   ;;  %vm3644_vm10 = vcmask 752640  }
   0xe   : > { %s11529_s9 = smul.u32 2728, %s21073_s28  ;;  %s11606_s20 = smov 91   ;;  %vm3375_vm11 = vcmask 1014784   ;;  %vm5258_vm12 = vcmask 449536   ;;  %vm19465_vm13 = vcmask 457728   ;;  %vm19464_vm14 = vcmask 719872  }
   0xf   : > { %s11607_s21 = smov 90   ;;  %s11608_s22 = smov 89   ;;  %vm19466_vm15 = vcmask 728064  }
  0x10   : > { %s11690_s12 = scalar_lea.vmem %s18985_s0, %s11529_s9  ;;  %s11609_s25 = smov 88  }
  0x11   : > { %v488_v1 = vld [vmem:[%s11690_s12 + $0x530] sm:$0xff]  ;;  %v490_v2 = vld [vmem:[%s11690_s12 + $0x540] sm:$0xff]  ;;  %v487_v3 = vld [vmem:[%s11690_s12 + $0x528] sm:$0xff]  ;;  %s11610_s26 = smov 56   ;;  %s11611_s29 = smov 55  }
  0x12   : > { %770 = vmatprep.subr.mxu0 %v488_v1  ;;  %883 = vmatprep.subr.mxu1 %v490_v2  ;;  %v489_v4 = vld [vmem:[%s11690_s12 + $0x538] sm:$0xff]  ;;  %v479_v6 = vld [vmem:[%s11690_s12 + $0x4e8] sm:$0xff]  ;;  %v476_v7 = vld [vmem:[%s11690_s12 + $0x4d0] sm:$0xff]  ;;  %s11612_s30 = smov 54   ;;  %s11613_s9 = smov 53  }
  0x13   : > { %v477_v5 = vld [vmem:[%s11690_s12 + $0x4d8] sm:$0xff]  ;;  %771 = vmatpush1.msra.mxu0 %v487_v3  ;;  %884 = vmatpush1.msra.mxu1 %v489_v4  ;;  %v478_v8 = vld [vmem:[%s11690_s12 + $0x4e0] sm:$0xff]  ;;  %v468_v10 = vld [vmem:[%s11690_s12 + $0x490] sm:$0xff]  ;;  %s11614_s10 = smov 52   ;;  %s11615_s11 = smov 20  }
  0x14   : > { %v466_v9 = vld [vmem:[%s11690_s12 + $0x480] sm:$0xff]  ;;  %772 = vmatprep.subr.mxu0 %v477_v5  ;;  %885 = vmatprep.subr.mxu1 %v479_v6  ;;  %v465_v11 = vld [vmem:[%s11690_s12 + $0x478] sm:$0xff]  ;;  %v467_v12 = vld [vmem:[%s11690_s12 + $0x488] sm:$0xff]  ;;  %s11616_s13 = smov 19   ;;  %s11623_s23 = smov 111  }
  0x15   : > { %773 = vmatpush1.msra.mxu0 %v476_v7  ;;  %886 = vmatpush1.msra.mxu1 %v478_v8  ;;  %v455_v13 = vld [vmem:[%s11690_s12 + $0x428] sm:$0xff]  ;;  %v457_v14 = vld [vmem:[%s11690_s12 + $0x438] sm:$0xff]  ;;  %v454_v15 = vld [vmem:[%s11690_s12 + $0x420] sm:$0xff]  ;;  %s11624_s24 = smov 112  }
  0x16   : > { %774 = vmatprep.subr.mxu0 %v466_v9  ;;  %887 = vmatprep.subr.mxu1 %v468_v10  ;;  %v456_v16 = vld [vmem:[%s11690_s12 + $0x430] sm:$0xff]  ;;  %v446_v18 = vld [vmem:[%s11690_s12 + $0x3e0] sm:$0xff]  ;;  %v443_v19 = vld [vmem:[%s11690_s12 + $0x3c8] sm:$0xff] }
  0x17   : > { %775 = vmatpush1.msra.mxu0 %v465_v11  ;;  %888 = vmatpush1.msra.mxu1 %v467_v12  ;;  %v444_v17 = vld [vmem:[%s11690_s12 + $0x3d0] sm:$0xff]  ;;  %v445_v20 = vld [vmem:[%s11690_s12 + $0x3d8] sm:$0xff]  ;;  %v435_v22 = vld [vmem:[%s11690_s12 + $0x388] sm:$0xff] }
  0x18   : > { %776 = vmatprep.subr.mxu0 %v455_v13  ;;  %889 = vmatprep.subr.mxu1 %v457_v14  ;;  %v433_v21 = vld [vmem:[%s11690_s12 + $0x378] sm:$0xff]  ;;  %v432_v23 = vld [vmem:[%s11690_s12 + $0x370] sm:$0xff]  ;;  %v434_v24 = vld [vmem:[%s11690_s12 + $0x380] sm:$0xff] }
  0x19   : > { %777 = vmatpush1.msra.mxu0 %v454_v15  ;;  %890 = vmatpush1.msra.mxu1 %v456_v16  ;;  %v422_v25 = vld [vmem:[%s11690_s12 + $0x320] sm:$0xff]  ;;  %v424_v26 = vld [vmem:[%s11690_s12 + $0x330] sm:$0xff]  ;;  %v421_v27 = vld [vmem:[%s11690_s12 + $0x318] sm:$0xff] }
  0x1a   : > { %778 = vmatprep.subr.mxu0 %v444_v17  ;;  %891 = vmatprep.subr.mxu1 %v446_v18  ;;  %v423_v28 = vld [vmem:[%s11690_s12 + $0x328] sm:$0xff]  ;;  %v413_v30 = vld [vmem:[%s11690_s12 + $0x2d8] sm:$0xff]  ;;  %v410_v31 = vld [vmem:[%s11690_s12 + $0x2c0] sm:$0xff] }
  0x1b   : > { %779 = vmatpush1.msra.mxu0 %v443_v19  ;;  %892 = vmatpush1.msra.mxu1 %v445_v20  ;;  %v411_v29 = vld [vmem:[%s11690_s12 + $0x2c8] sm:$0xff]  ;;  %v412_v32 = vld [vmem:[%s11690_s12 + $0x2d0] sm:$0xff]  ;;  %v402_v34 = vld [vmem:[%s11690_s12 + $0x280] sm:$0xff] }
  0x1c   : > { %780 = vmatprep.subr.mxu0 %v433_v21  ;;  %893 = vmatprep.subr.mxu1 %v435_v22  ;;  %v400_v33 = vld [vmem:[%s11690_s12 + $0x270] sm:$0xff]  ;;  %v399_v35 = vld [vmem:[%s11690_s12 + $0x268] sm:$0xff]  ;;  %v401_v36 = vld [vmem:[%s11690_s12 + $0x278] sm:$0xff] }
  0x1d   : > { %781 = vmatpush1.msra.mxu0 %v432_v23  ;;  %894 = vmatpush1.msra.mxu1 %v434_v24  ;;  %v389_v37 = vld [vmem:[%s11690_s12 + $0x218] sm:$0xff]  ;;  %v391_v38 = vld [vmem:[%s11690_s12 + $0x228] sm:$0xff]  ;;  %v388_v39 = vld [vmem:[%s11690_s12 + $0x210] sm:$0xff] }
  0x1e   : > { %782 = vmatprep.subr.mxu0 %v422_v25  ;;  %895 = vmatprep.subr.mxu1 %v424_v26  ;;  %v390_v40 = vld [vmem:[%s11690_s12 + $0x220] sm:$0xff]  ;;  %v380_v42 = vld [vmem:[%s11690_s12 + $0x1d0] sm:$0xff]  ;;  %v377_v43 = vld [vmem:[%s11690_s12 + $0x1b8] sm:$0xff] }
  0x1f   : > { %783 = vmatpush1.msra.mxu0 %v421_v27  ;;  %896 = vmatpush1.msra.mxu1 %v423_v28  ;;  %v378_v41 = vld [vmem:[%s11690_s12 + $0x1c0] sm:$0xff]  ;;  %v379_v44 = vld [vmem:[%s11690_s12 + $0x1c8] sm:$0xff]  ;;  %v369_v46 = vld [vmem:[%s11690_s12 + $0x178] sm:$0xff] }
  0x20   : > { %784 = vmatprep.subr.mxu0 %v411_v29  ;;  %897 = vmatprep.subr.mxu1 %v413_v30  ;;  %v367_v45 = vld [vmem:[%s11690_s12 + $0x168] sm:$0xff]  ;;  %v366_v47 = vld [vmem:[%s11690_s12 + $0x160] sm:$0xff]  ;;  %v368_v48 = vld [vmem:[%s11690_s12 + $0x170] sm:$0xff] }
  0x21   : > { %785 = vmatpush1.msra.mxu0 %v410_v31  ;;  %898 = vmatpush1.msra.mxu1 %v412_v32  ;;  %v356_v49 = vld [vmem:[%s11690_s12 + $0x110] sm:$0xff]  ;;  %v358_v50 = vld [vmem:[%s11690_s12 + $0x120] sm:$0xff]  ;;  %v355_v51 = vld [vmem:[%s11690_s12 + $0x108] sm:$0xff] }
  0x22   : > { %786 = vmatprep.subr.mxu0 %v400_v33  ;;  %899 = vmatprep.subr.mxu1 %v402_v34  ;;  %v357_v52 = vld [vmem:[%s11690_s12 + $0x118] sm:$0xff]  ;;  %v347_v54 = vld [vmem:[%s11690_s12 + $0xc8] sm:$0xff]  ;;  %v344_v55 = vld [vmem:[%s11690_s12 + $0xb0] sm:$0xff] }
  0x23   : > { %787 = vmatpush1.msra.mxu0 %v399_v35  ;;  %900 = vmatpush1.msra.mxu1 %v401_v36  ;;  %v345_v53 = vld [vmem:[%s11690_s12 + $0xb8] sm:$0xff]  ;;  %v346_v56 = vld [vmem:[%s11690_s12 + $0xc0] sm:$0xff]  ;;  %v336_v58 = vld [vmem:[%s11690_s12 + $0x70] sm:$0xff] }
  0x24   : > { %788 = vmatprep.subr.mxu0 %v389_v37  ;;  %901 = vmatprep.subr.mxu1 %v391_v38  ;;  %v334_v57 = vld [vmem:[%s11690_s12 + $0x60] sm:$0xff]  ;;  %v333_v59 = vld [vmem:[%s11690_s12 + $0x58] sm:$0xff]  ;;  %v335_v60 = vld [vmem:[%s11690_s12 + $0x68] sm:$0xff] }
  0x25   : > { %789 = vmatpush1.msra.mxu0 %v388_v39  ;;  %902 = vmatpush1.msra.mxu1 %v390_v40  ;;  %v323_v61 = vld [vmem:[%s11690_s12 + $0x8] sm:$0xff]  ;;  %v325_v62 = vld [vmem:[%s11690_s12 + $0x18] sm:$0xff]  ;;  %v322_v63 = vld [vmem:[%s11690_s12] sm:$0xff] }
  0x26   : > { %790 = vmatprep.subr.mxu0 %v378_v41  ;;  %903 = vmatprep.subr.mxu1 %v380_v42  ;;  %v324_v0 = vld [vmem:[%s11690_s12 + $0x10] sm:$0xff]  ;;  %v653_v1 = vld [vmem:[%s11690_s12 + $0xa58] sm:$0x7]  ;;  %v655_v2 = vld [vmem:[%s11690_s12 + $0xa68] sm:$0x7] }
  0x27   : > { %791 = vmatpush1.msra.mxu0 %v377_v43  ;;  %904 = vmatpush1.msra.mxu1 %v379_v44  ;;  %v652_v3 = vld [vmem:[%s11690_s12 + $0xa50] sm:$0x7]  ;;  %v654_v4 = vld [vmem:[%s11690_s12 + $0xa60] sm:$0x7]  ;;  %v641_v7 = vld [vmem:[%s11690_s12 + $0x9f8] sm:$0xff] }
  0x28   : > { %792 = vmatprep.subr.mxu0 %v367_v45  ;;  %905 = vmatprep.subr.mxu1 %v369_v46  ;;  %v642_v5 = vld [vmem:[%s11690_s12 + $0xa00] sm:$0xff]  ;;  %v644_v6 = vld [vmem:[%s11690_s12 + $0xa10] sm:$0xff]  ;;  %v643_v8 = vld [vmem:[%s11690_s12 + $0xa08] sm:$0xff] }
  0x29   : > { %793 = vmatpush1.msra.mxu0 %v366_v47  ;;  %906 = vmatpush1.msra.mxu1 %v368_v48  ;;  %v631_v9 = vld [vmem:[%s11690_s12 + $0x9a8] sm:$0xff]  ;;  %v633_v10 = vld [vmem:[%s11690_s12 + $0x9b8] sm:$0xff]  ;;  %v630_v11 = vld [vmem:[%s11690_s12 + $0x9a0] sm:$0xff] }
  0x2a   : > { %794 = vmatprep.subr.mxu0 %v356_v49  ;;  %907 = vmatprep.subr.mxu1 %v358_v50  ;;  %v632_v12 = vld [vmem:[%s11690_s12 + $0x9b0] sm:$0xff]  ;;  %v622_v14 = vld [vmem:[%s11690_s12 + $0x960] sm:$0xff]  ;;  %v619_v15 = vld [vmem:[%s11690_s12 + $0x948] sm:$0xff] }
  0x2b   : > { %795 = vmatpush1.msra.mxu0 %v355_v51  ;;  %908 = vmatpush1.msra.mxu1 %v357_v52  ;;  %v620_v13 = vld [vmem:[%s11690_s12 + $0x950] sm:$0xff]  ;;  %v621_v16 = vld [vmem:[%s11690_s12 + $0x958] sm:$0xff]  ;;  %v611_v18 = vld [vmem:[%s11690_s12 + $0x908] sm:$0xff] }
  0x2c   : > { %796 = vmatprep.subr.mxu0 %v345_v53  ;;  %909 = vmatprep.subr.mxu1 %v347_v54  ;;  %v609_v17 = vld [vmem:[%s11690_s12 + $0x8f8] sm:$0xff]  ;;  %v608_v19 = vld [vmem:[%s11690_s12 + $0x8f0] sm:$0xff]  ;;  %v610_v20 = vld [vmem:[%s11690_s12 + $0x900] sm:$0xff] }
  0x2d   : > { %797 = vmatpush1.msra.mxu0 %v344_v55  ;;  %910 = vmatpush1.msra.mxu1 %v346_v56  ;;  %v598_v21 = vld [vmem:[%s11690_s12 + $0x8a0] sm:$0xff]  ;;  %v600_v22 = vld [vmem:[%s11690_s12 + $0x8b0] sm:$0xff]  ;;  %v597_v23 = vld [vmem:[%s11690_s12 + $0x898] sm:$0xff] }
  0x2e   : > { %798 = vmatprep.subr.mxu0 %v334_v57  ;;  %911 = vmatprep.subr.mxu1 %v336_v58  ;;  %v599_v24 = vld [vmem:[%s11690_s12 + $0x8a8] sm:$0xff]  ;;  %v589_v26 = vld [vmem:[%s11690_s12 + $0x858] sm:$0xff]  ;;  %v586_v27 = vld [vmem:[%s11690_s12 + $0x840] sm:$0xff] }
  0x2f   : > { %799 = vmatpush1.msra.mxu0 %v333_v59  ;;  %912 = vmatpush1.msra.mxu1 %v335_v60  ;;  %v587_v25 = vld [vmem:[%s11690_s12 + $0x848] sm:$0xff]  ;;  %v588_v28 = vld [vmem:[%s11690_s12 + $0x850] sm:$0xff]  ;;  %v578_v30 = vld [vmem:[%s11690_s12 + $0x800] sm:$0xff] }
  0x30   : > { %800 = vmatprep.subr.mxu0 %v323_v61  ;;  %913 = vmatprep.subr.mxu1 %v325_v62  ;;  %v576_v29 = vld [vmem:[%s11690_s12 + $0x7f0] sm:$0xff]  ;;  %v575_v31 = vld [vmem:[%s11690_s12 + $0x7e8] sm:$0xff]  ;;  %v577_v32 = vld [vmem:[%s11690_s12 + $0x7f8] sm:$0xff] }
  0x31   : > { %801 = vmatpush1.msra.mxu0 %v322_v63  ;;  %914 = vmatpush1.msra.mxu1 %v324_v0  ;;  %v565_v33 = vld [vmem:[%s11690_s12 + $0x798] sm:$0xff]  ;;  %v567_v34 = vld [vmem:[%s11690_s12 + $0x7a8] sm:$0xff]  ;;  %v564_v35 = vld [vmem:[%s11690_s12 + $0x790] sm:$0xff] }
  0x32   : > { %11284 = vmatprep.subr.msk.mxu0 %vm736_vm1, %v653_v1  ;;  %11294 = vmatprep.subr.msk.mxu1 %vm736_vm1, %v655_v2  ;;  %v566_v36 = vld [vmem:[%s11690_s12 + $0x7a0] sm:$0xff]  ;;  %v556_v38 = vld [vmem:[%s11690_s12 + $0x750] sm:$0xff]  ;;  %v553_v39 = vld [vmem:[%s11690_s12 + $0x738] sm:$0xff] }
  0x33   : > { %11285 = vmatpush2.msk.msra.mxu0 %vm736_vm1, %v652_v3  ;;  %11295 = vmatpush2.msk.msra.mxu1 %vm736_vm1, %v654_v4  ;;  %v554_v37 = vld [vmem:[%s11690_s12 + $0x740] sm:$0xff]  ;;  %v555_v40 = vld [vmem:[%s11690_s12 + $0x748] sm:$0xff]  ;;  %v545_v42 = vld [vmem:[%s11690_s12 + $0x6f8] sm:$0xff] }
  0x34   : > { %806 = vmatprep.subr.mxu0 %v642_v5  ;;  %919 = vmatprep.subr.mxu1 %v644_v6  ;;  %v543_v41 = vld [vmem:[%s11690_s12 + $0x6e8] sm:$0xff]  ;;  %v542_v43 = vld [vmem:[%s11690_s12 + $0x6e0] sm:$0xff]  ;;  %v544_v44 = vld [vmem:[%s11690_s12 + $0x6f0] sm:$0xff] }
  0x35   : > { %807 = vmatpush2.msra.mxu0 %v641_v7  ;;  %920 = vmatpush2.msra.mxu1 %v643_v8  ;;  %v532_v45 = vld [vmem:[%s11690_s12 + $0x690] sm:$0xff]  ;;  %v534_v46 = vld [vmem:[%s11690_s12 + $0x6a0] sm:$0xff]  ;;  %v531_v47 = vld [vmem:[%s11690_s12 + $0x688] sm:$0xff] }
  0x36   : > { %808 = vmatprep.subr.mxu0 %v631_v9  ;;  %921 = vmatprep.subr.mxu1 %v633_v10  ;;  %v533_v48 = vld [vmem:[%s11690_s12 + $0x698] sm:$0xff]  ;;  %v523_v50 = vld [vmem:[%s11690_s12 + $0x648] sm:$0xff]  ;;  %v520_v51 = vld [vmem:[%s11690_s12 + $0x630] sm:$0xff] }
  0x37   : > { %809 = vmatpush2.msra.mxu0 %v630_v11  ;;  %922 = vmatpush2.msra.mxu1 %v632_v12  ;;  %v521_v49 = vld [vmem:[%s11690_s12 + $0x638] sm:$0xff]  ;;  %v522_v52 = vld [vmem:[%s11690_s12 + $0x640] sm:$0xff]  ;;  %v512_v54 = vld [vmem:[%s11690_s12 + $0x5f0] sm:$0xff] }
  0x38   : > { %810 = vmatprep.subr.mxu0 %v620_v13  ;;  %923 = vmatprep.subr.mxu1 %v622_v14  ;;  %v510_v53 = vld [vmem:[%s11690_s12 + $0x5e0] sm:$0xff]  ;;  %v509_v55 = vld [vmem:[%s11690_s12 + $0x5d8] sm:$0xff]  ;;  %v511_v56 = vld [vmem:[%s11690_s12 + $0x5e8] sm:$0xff] }
  0x39   : > { %811 = vmatpush2.msra.mxu0 %v619_v15  ;;  %924 = vmatpush2.msra.mxu1 %v621_v16  ;;  %v499_v57 = vld [vmem:[%s11690_s12 + $0x588] sm:$0xff]  ;;  %v501_v58 = vld [vmem:[%s11690_s12 + $0x598] sm:$0xff]  ;;  %v498_v59 = vld [vmem:[%s11690_s12 + $0x580] sm:$0xff] }
  0x3a   : > { %812 = vmatprep.subr.mxu0 %v609_v17  ;;  %925 = vmatprep.subr.mxu1 %v611_v18  ;;  %v500_v60 = vld [vmem:[%s11690_s12 + $0x590] sm:$0xff]  ;;  %v11823_v61 = vld [vmem:[%s18986_s1] sm:$0xff]  ;;  %v491_v0 = vld [vmem:[%s11690_s12 + $0x548] sm:$0xff] }
  0x3b   : > { %813 = vmatpush2.msra.mxu0 %v608_v19  ;;  %926 = vmatpush2.msra.mxu1 %v610_v20  ;;  %v492_v62 = vld [vmem:[%s11690_s12 + $0x550] sm:$0xff]  ;;  %v494_v63 = vld [vmem:[%s11690_s12 + $0x560] sm:$0xff]  ;;  %v493_v1 = vld [vmem:[%s11690_s12 + $0x558] sm:$0xff] }
  0x3c   : > { %814 = vmatprep.subr.mxu0 %v598_v21  ;;  %927 = vmatprep.subr.mxu1 %v600_v22  ;;  %v481_v2 = vld [vmem:[%s11690_s12 + $0x4f8] sm:$0xff]  ;;  %v483_v3 = vld [vmem:[%s11690_s12 + $0x508] sm:$0xff]  ;;  %v480_v5 = vld [vmem:[%s11690_s12 + $0x4f0] sm:$0xff] }
  0x3d   : > { %815 = vmatpush2.msra.mxu0 %v597_v23  ;;  %928 = vmatpush2.msra.mxu1 %v599_v24  ;;  %v11836_v4 = vld [vmem:[%s18986_s1 + $0x18] sm:$0xff]  ;;  %v482_v6 = vld [vmem:[%s11690_s12 + $0x500] sm:$0xff]  ;;  %v11843_v7 = vld [vmem:[%s18986_s1 + $0x10] sm:$0xff] }
  0x3e   : > { %816 = vmatprep.subr.mxu0 %v587_v25  ;;  %929 = vmatprep.subr.mxu1 %v589_v26  ;;  %v470_v8 = vld [vmem:[%s11690_s12 + $0x4a0] sm:$0xff]  ;;  %v472_v9 = vld [vmem:[%s11690_s12 + $0x4b0] sm:$0xff]  ;;  %v469_v10 = vld [vmem:[%s11690_s12 + $0x498] sm:$0xff] }
  0x3f   : > { %817 = vmatpush2.msra.mxu0 %v586_v27  ;;  %930 = vmatpush2.msra.mxu1 %v588_v28  ;;  %v471_v11 = vld [vmem:[%s11690_s12 + $0x4a8] sm:$0xff]  ;;  %v461_v13 = vld [vmem:[%s11690_s12 + $0x458] sm:$0xff]  ;;  %v458_v15 = vld [vmem:[%s11690_s12 + $0x440] sm:$0xff] }
  0x40   : > { %818 = vmatprep.subr.mxu0 %v576_v29  ;;  %931 = vmatprep.subr.mxu1 %v578_v30  ;;  %v459_v12 = vld [vmem:[%s11690_s12 + $0x448] sm:$0xff]  ;;  %v460_v16 = vld [vmem:[%s11690_s12 + $0x450] sm:$0xff]  ;;  %v11867_v17 = vld [vmem:[%s18986_s1 + $0x20] sm:$0xff] }
  0x41   : > { %819 = vmatpush2.msra.mxu0 %v575_v31  ;;  %932 = vmatpush2.msra.mxu1 %v577_v32  ;;  %v11860_v14 = vld [vmem:[%s18986_s1 + $0x28] sm:$0xff]  ;;  %v448_v18 = vld [vmem:[%s11690_s12 + $0x3f0] sm:$0xff]  ;;  %v450_v19 = vld [vmem:[%s11690_s12 + $0x400] sm:$0xff] }
  0x42   : > { %820 = vmatprep.subr.mxu0 %v565_v33  ;;  %933 = vmatprep.subr.mxu1 %v567_v34  ;;  %v447_v20 = vld [vmem:[%s11690_s12 + $0x3e8] sm:$0xff]  ;;  %v449_v21 = vld [vmem:[%s11690_s12 + $0x3f8] sm:$0xff]  ;;  %v436_v25 = vld [vmem:[%s11690_s12 + $0x390] sm:$0xff] }
  0x43   : > { %821 = vmatpush2.msra.mxu0 %v564_v35  ;;  %934 = vmatpush2.msra.mxu1 %v566_v36  ;;  %v437_v22 = vld [vmem:[%s11690_s12 + $0x398] sm:$0xff]  ;;  %v439_v23 = vld [vmem:[%s11690_s12 + $0x3a8] sm:$0xff]  ;;  %v438_v26 = vld [vmem:[%s11690_s12 + $0x3a0] sm:$0xff] }
  0x44   : > { %822 = vmatprep.subr.mxu0 %v554_v37  ;;  %935 = vmatprep.subr.mxu1 %v556_v38  ;;  %v11884_v24 = vld [vmem:[%s18986_s1 + $0x38] sm:$0xff]  ;;  %v11891_v27 = vld [vmem:[%s18986_s1 + $0x30] sm:$0xff]  ;;  %v426_v28 = vld [vmem:[%s11690_s12 + $0x340] sm:$0xff] }
  0x45   : > { %823 = vmatpush2.msra.mxu0 %v553_v39  ;;  %936 = vmatpush2.msra.mxu1 %v555_v40  ;;  %v428_v29 = vld [vmem:[%s11690_s12 + $0x350] sm:$0xff]  ;;  %v425_v30 = vld [vmem:[%s11690_s12 + $0x338] sm:$0xff]  ;;  %v427_v31 = vld [vmem:[%s11690_s12 + $0x348] sm:$0xff] }
  0x46   : > { %824 = vmatprep.subr.mxu0 %v543_v41  ;;  %937 = vmatprep.subr.mxu1 %v545_v42  ;;  %v415_v32 = vld [vmem:[%s11690_s12 + $0x2e8] sm:$0xff]  ;;  %v417_v33 = vld [vmem:[%s11690_s12 + $0x2f8] sm:$0xff]  ;;  %v414_v35 = vld [vmem:[%s11690_s12 + $0x2e0] sm:$0xff] }
  0x47   : > { %825 = vmatpush2.msra.mxu0 %v542_v43  ;;  %938 = vmatpush2.msra.mxu1 %v544_v44  ;;  %v11908_v34 = vld [vmem:[%s18986_s1 + $0x48] sm:$0xff]  ;;  %v416_v36 = vld [vmem:[%s11690_s12 + $0x2f0] sm:$0xff]  ;;  %v11915_v37 = vld [vmem:[%s18986_s1 + $0x40] sm:$0xff] }
  0x48   : > { %826 = vmatprep.subr.mxu0 %v532_v45  ;;  %939 = vmatprep.subr.mxu1 %v534_v46  ;;  %v404_v38 = vld [vmem:[%s11690_s12 + $0x290] sm:$0xff]  ;;  %v406_v39 = vld [vmem:[%s11690_s12 + $0x2a0] sm:$0xff]  ;;  %v403_v40 = vld [vmem:[%s11690_s12 + $0x288] sm:$0xff] }
  0x49   : > { %827 = vmatpush2.msra.mxu0 %v531_v47  ;;  %940 = vmatpush2.msra.mxu1 %v533_v48  ;;  %v405_v41 = vld [vmem:[%s11690_s12 + $0x298] sm:$0xff]  ;;  %v395_v43 = vld [vmem:[%s11690_s12 + $0x248] sm:$0xff]  ;;  %v392_v45 = vld [vmem:[%s11690_s12 + $0x230] sm:$0xff] }
  0x4a   : > { %828 = vmatprep.subr.mxu0 %v521_v49  ;;  %941 = vmatprep.subr.mxu1 %v523_v50  ;;  %v393_v42 = vld [vmem:[%s11690_s12 + $0x238] sm:$0xff]  ;;  %v394_v46 = vld [vmem:[%s11690_s12 + $0x240] sm:$0xff]  ;;  %v11939_v47 = vld [vmem:[%s18986_s1 + $0x50] sm:$0xff] }
  0x4b   : > { %829 = vmatpush2.msra.mxu0 %v520_v51  ;;  %942 = vmatpush2.msra.mxu1 %v522_v52  ;;  %v11932_v44 = vld [vmem:[%s18986_s1 + $0x58] sm:$0xff]  ;;  %v382_v48 = vld [vmem:[%s11690_s12 + $0x1e0] sm:$0xff]  ;;  %v384_v49 = vld [vmem:[%s11690_s12 + $0x1f0] sm:$0xff] }
  0x4c   : > { %830 = vmatprep.subr.mxu0 %v510_v53  ;;  %943 = vmatprep.subr.mxu1 %v512_v54  ;;  %v381_v50 = vld [vmem:[%s11690_s12 + $0x1d8] sm:$0xff]  ;;  %v383_v51 = vld [vmem:[%s11690_s12 + $0x1e8] sm:$0xff] }
  0x4d   : > { %831 = vmatpush2.msra.mxu0 %v509_v55  ;;  %944 = vmatpush2.msra.mxu1 %v511_v56  ;;  %v371_v52 = vld [vmem:[%s11690_s12 + $0x188] sm:$0xff]  ;;  %v373_v53 = vld [vmem:[%s11690_s12 + $0x198] sm:$0xff]  ;;  %v370_v55 = vld [vmem:[%s11690_s12 + $0x180] sm:$0xff] }
  0x4e   : > { %832 = vmatprep.subr.mxu0 %v499_v57  ;;  %945 = vmatprep.subr.mxu1 %v501_v58  ;;  %v11956_v54 = vld [vmem:[%s18986_s1 + $0x68] sm:$0xff]  ;;  %v372_v56 = vld [vmem:[%s11690_s12 + $0x190] sm:$0xff]  ;;  %v11963_v57 = vld [vmem:[%s18986_s1 + $0x60] sm:$0xff] }
  0x4f   : > { %833 = vmatpush2.msra.mxu0 %v498_v59  ;;  %946 = vmatpush2.msra.mxu1 %v500_v60  ;;  %v360_v58 = vld [vmem:[%s11690_s12 + $0x130] sm:$0xff]  ;;  %v362_v59 = vld [vmem:[%s11690_s12 + $0x140] sm:$0xff]  ;;  %v359_v60 = vld [vmem:[%s11690_s12 + $0x128] sm:$0xff] }
  0x50   : > { %835 = vmatmul.mubr.f32.vlgmr.msra.gmra.mxu0 %v11823_v61  ;;  %948 = vmatmul.mubr.f32.vlgmr.msra.gmra.mxu1 %v11823_v61 }
  0x51   : > { %996 = vmatprep.subr.mxu0 %v492_v62  ;;  %1109 = vmatprep.subr.mxu1 %v494_v63  ;;  %v361_v62 = vld [vmem:[%s11690_s12 + $0x138] sm:$0xff] }
  0x52   : > { %997 = vmatpush1.msra.mxu0 %v491_v0  ;;  %1110 = vmatpush1.msra.mxu1 %v493_v1  ;;  %v349_v63 = vld [vmem:[%s11690_s12 + $0xd8] sm:$0xff]  ;;  %v351_v0 = vld [vmem:[%s11690_s12 + $0xe8] sm:$0xff] }
  0x53   : > { %998 = vmatprep.subr.mxu0 %v481_v2  ;;  %1111 = vmatprep.subr.mxu1 %v483_v3  ;;  %v11980_v1 = vld [vmem:[%s18986_s1 + $0x78] sm:$0xff]  ;;  %v348_v2 = vld [vmem:[%s11690_s12 + $0xd0] sm:$0xff]  ;;  %v350_v3 = vld [vmem:[%s11690_s12 + $0xe0] sm:$0xff] }
  0x54   : > { %11287 = vmatprep.mubr.msk.f32.mxu0 %vm711_vm0, %v11836_v4  ;;  %11297 = vmatprep.mubr.msk.f32.mxu1 %vm711_vm0, %v11836_v4 }
  0x55   : > { %999 = vmatpush1.msra.mxu0 %v480_v5  ;;  %1112 = vmatpush1.msra.mxu1 %v482_v6  ;;  %v11987_v5 = vld [vmem:[%s18986_s1 + $0x70] sm:$0xff]  ;;  %v338_v6 = vld [vmem:[%s11690_s12 + $0x80] sm:$0xff] }
  0x56   : > { %841 = vmatmul.mubr.f32.gmra.mxu0 %v11843_v7  ;;  %954 = vmatmul.mubr.f32.gmra.mxu1 %v11843_v7 }
  0x57   : > { %1000 = vmatprep.subr.mxu0 %v470_v8  ;;  %1113 = vmatprep.subr.mxu1 %v472_v9  ;;  %v340_v8 = vld [vmem:[%s11690_s12 + $0x90] sm:$0xff]  ;;  %v337_v9 = vld [vmem:[%s11690_s12 + $0x78] sm:$0xff] }
  0x58   : > { %1001 = vmatpush1.msra.mxu0 %v469_v10  ;;  %1114 = vmatpush1.msra.mxu1 %v471_v11  ;;  %v339_v10 = vld [vmem:[%s11690_s12 + $0x88] sm:$0xff] }
  0x59   : > { %1002 = vmatprep.subr.mxu0 %v459_v12  ;;  %1115 = vmatprep.subr.mxu1 %v461_v13  ;;  %v327_v11 = vld [vmem:[%s11690_s12 + $0x28] sm:$0xff]  ;;  %v329_v12 = vld [vmem:[%s11690_s12 + $0x38] sm:$0xff]  ;;  %v326_v13 = vld [vmem:[%s11690_s12 + $0x20] sm:$0xff] }
  0x5a   : > { %11288 = vmatprep.mubr.msk.f32.mxu0 %vm711_vm0, %v11860_v14  ;;  %11298 = vmatprep.mubr.msk.f32.mxu1 %vm711_vm0, %v11860_v14 }
  0x5b   : > { %1003 = vmatpush1.msra.mxu0 %v458_v15  ;;  %1116 = vmatpush1.msra.mxu1 %v460_v16  ;;  %v328_v15 = vld [vmem:[%s11690_s12 + $0x30] sm:$0xff]  ;;  %v657_v16 = vld [vmem:[%s11690_s12 + $0xa78] sm:$0x7] }
  0x5c   : > { %847 = vmatmul.mubr.f32.gmra.mxu0 %v11867_v17  ;;  %960 = vmatmul.mubr.f32.gmra.mxu1 %v11867_v17 }
  0x5d   : > { %1004 = vmatprep.subr.mxu0 %v448_v18  ;;  %1117 = vmatprep.subr.mxu1 %v450_v19  ;;  %v659_v18 = vld [vmem:[%s11690_s12 + $0xa88] sm:$0x7]  ;;  %v656_v19 = vld [vmem:[%s11690_s12 + $0xa70] sm:$0x7] }
  0x5e   : > { %1005 = vmatpush1.msra.mxu0 %v447_v20  ;;  %1118 = vmatpush1.msra.mxu1 %v449_v21  ;;  %v658_v20 = vld [vmem:[%s11690_s12 + $0xa80] sm:$0x7] }
  0x5f   : > { %1006 = vmatprep.subr.mxu0 %v437_v22  ;;  %1119 = vmatprep.subr.mxu1 %v439_v23  ;;  %v646_v21 = vld [vmem:[%s11690_s12 + $0xa20] sm:$0xff]  ;;  %v648_v22 = vld [vmem:[%s11690_s12 + $0xa30] sm:$0xff]  ;;  %v645_v23 = vld [vmem:[%s11690_s12 + $0xa18] sm:$0xff] }
  0x60   : > { %11289 = vmatprep.mubr.msk.f32.mxu0 %vm711_vm0, %v11884_v24  ;;  %11299 = vmatprep.mubr.msk.f32.mxu1 %vm711_vm0, %v11884_v24 }
  0x61   : > { %1007 = vmatpush1.msra.mxu0 %v436_v25  ;;  %1120 = vmatpush1.msra.mxu1 %v438_v26  ;;  %v647_v25 = vld [vmem:[%s11690_s12 + $0xa28] sm:$0xff] }
  0x62   : > { %853 = vmatmul.mubr.f32.gmra.mxu0 %v11891_v27  ;;  %966 = vmatmul.mubr.f32.gmra.mxu1 %v11891_v27  ;;  %v635_v26 = vld [vmem:[%s11690_s12 + $0x9c8] sm:$0xff] }
  0x63   : > { %1008 = vmatprep.subr.mxu0 %v426_v28  ;;  %1121 = vmatprep.subr.mxu1 %v428_v29  ;;  %v637_v28 = vld [vmem:[%s11690_s12 + $0x9d8] sm:$0xff]  ;;  %v634_v29 = vld [vmem:[%s11690_s12 + $0x9c0] sm:$0xff] }
  0x64   : > { %1009 = vmatpush1.msra.mxu0 %v425_v30  ;;  %1122 = vmatpush1.msra.mxu1 %v427_v31  ;;  %v636_v30 = vld [vmem:[%s11690_s12 + $0x9d0] sm:$0xff] }
  0x65   : > { %1010 = vmatprep.subr.mxu0 %v415_v32  ;;  %1123 = vmatprep.subr.mxu1 %v417_v33  ;;  %v624_v31 = vld [vmem:[%s11690_s12 + $0x970] sm:$0xff]  ;;  %v626_v32 = vld [vmem:[%s11690_s12 + $0x980] sm:$0xff]  ;;  %v623_v33 = vld [vmem:[%s11690_s12 + $0x968] sm:$0xff] }
  0x66   : > { %11290 = vmatprep.mubr.msk.f32.mxu0 %vm711_vm0, %v11908_v34  ;;  %11300 = vmatprep.mubr.msk.f32.mxu1 %vm711_vm0, %v11908_v34 }
  0x67   : > { %1011 = vmatpush1.msra.mxu0 %v414_v35  ;;  %1124 = vmatpush1.msra.mxu1 %v416_v36  ;;  %v625_v35 = vld [vmem:[%s11690_s12 + $0x978] sm:$0xff] }
  0x68   : > { %859 = vmatmul.mubr.f32.gmra.mxu0 %v11915_v37  ;;  %972 = vmatmul.mubr.f32.gmra.mxu1 %v11915_v37  ;;  %v613_v36 = vld [vmem:[%s11690_s12 + $0x918] sm:$0xff] }
  0x69   : > { %1012 = vmatprep.subr.mxu0 %v404_v38  ;;  %1125 = vmatprep.subr.mxu1 %v406_v39  ;;  %v615_v38 = vld [vmem:[%s11690_s12 + $0x928] sm:$0xff]  ;;  %v612_v39 = vld [vmem:[%s11690_s12 + $0x910] sm:$0xff] }
  0x6a   : > { %1013 = vmatpush1.msra.mxu0 %v403_v40  ;;  %1126 = vmatpush1.msra.mxu1 %v405_v41  ;;  %v614_v40 = vld [vmem:[%s11690_s12 + $0x920] sm:$0xff] }
  0x6b   : > { %1014 = vmatprep.subr.mxu0 %v393_v42  ;;  %1127 = vmatprep.subr.mxu1 %v395_v43  ;;  %v602_v41 = vld [vmem:[%s11690_s12 + $0x8c0] sm:$0xff]  ;;  %v604_v42 = vld [vmem:[%s11690_s12 + $0x8d0] sm:$0xff]  ;;  %v601_v43 = vld [vmem:[%s11690_s12 + $0x8b8] sm:$0xff] }
  0x6c   : > { %11291 = vmatprep.mubr.msk.f32.mxu0 %vm711_vm0, %v11932_v44  ;;  %11301 = vmatprep.mubr.msk.f32.mxu1 %vm711_vm0, %v11932_v44 }
  0x6d   : > { %1015 = vmatpush1.msra.mxu0 %v392_v45  ;;  %1128 = vmatpush1.msra.mxu1 %v394_v46  ;;  %v603_v45 = vld [vmem:[%s11690_s12 + $0x8c8] sm:$0xff] }
  0x6e   : > { %865 = vmatmul.mubr.f32.gmra.mxu0 %v11939_v47  ;;  %978 = vmatmul.mubr.f32.gmra.mxu1 %v11939_v47  ;;  %v591_v46 = vld [vmem:[%s11690_s12 + $0x868] sm:$0xff] }
  0x6f   : > { %1016 = vmatprep.subr.mxu0 %v382_v48  ;;  %1129 = vmatprep.subr.mxu1 %v384_v49  ;;  %v593_v48 = vld [vmem:[%s11690_s12 + $0x878] sm:$0xff]  ;;  %v590_v49 = vld [vmem:[%s11690_s12 + $0x860] sm:$0xff] }
  0x70   : > { %1017 = vmatpush1.msra.mxu0 %v381_v50  ;;  %1130 = vmatpush1.msra.mxu1 %v383_v51  ;;  %v592_v50 = vld [vmem:[%s11690_s12 + $0x870] sm:$0xff] }
  0x71   : > { %1018 = vmatprep.subr.mxu0 %v371_v52  ;;  %1131 = vmatprep.subr.mxu1 %v373_v53  ;;  %v580_v51 = vld [vmem:[%s11690_s12 + $0x810] sm:$0xff]  ;;  %v582_v52 = vld [vmem:[%s11690_s12 + $0x820] sm:$0xff]  ;;  %v579_v53 = vld [vmem:[%s11690_s12 + $0x808] sm:$0xff] }
  0x72   : > { %11292 = vmatprep.mubr.msk.f32.mxu0 %vm711_vm0, %v11956_v54  ;;  %11302 = vmatprep.mubr.msk.f32.mxu1 %vm711_vm0, %v11956_v54 }
  0x73   : > { %1019 = vmatpush1.msra.mxu0 %v370_v55  ;;  %1132 = vmatpush1.msra.mxu1 %v372_v56  ;;  %v581_v55 = vld [vmem:[%s11690_s12 + $0x818] sm:$0xff] }
  0x74   : > { %871 = vmatmul.mubr.f32.gmra.mxu0 %v11963_v57  ;;  %984 = vmatmul.mubr.f32.gmra.mxu1 %v11963_v57  ;;  %v569_v56 = vld [vmem:[%s11690_s12 + $0x7b8] sm:$0xff] }
  0x75   : > { %1020 = vmatprep.subr.mxu0 %v360_v58  ;;  %1133 = vmatprep.subr.mxu1 %v362_v59  ;;  %v571_v58 = vld [vmem:[%s11690_s12 + $0x7c8] sm:$0xff]  ;;  %v568_v59 = vld [vmem:[%s11690_s12 + $0x7b0] sm:$0xff] }
  0x76   : > { %1021 = vmatpush1.msra.mxu0 %v359_v60  ;;  %1134 = vmatpush1.msra.mxu1 %v361_v62  ;;  %v570_v60 = vld [vmem:[%s11690_s12 + $0x7c0] sm:$0xff] }
  0x77   : > { %1022 = vmatprep.subr.mxu0 %v349_v63  ;;  %1135 = vmatprep.subr.mxu1 %v351_v0  ;;  %v558_v62 = vld [vmem:[%s11690_s12 + $0x760] sm:$0xff]  ;;  %v560_v63 = vld [vmem:[%s11690_s12 + $0x770] sm:$0xff]  ;;  %v557_v0 = vld [vmem:[%s11690_s12 + $0x758] sm:$0xff] }
  0x78   : > { %11293 = vmatprep.mubr.msk.f32.mxu0 %vm711_vm0, %v11980_v1  ;;  %11303 = vmatprep.mubr.msk.f32.mxu1 %vm711_vm0, %v11980_v1 }
  0x79   : > { %1023 = vmatpush1.msra.mxu0 %v348_v2  ;;  %1136 = vmatpush1.msra.mxu1 %v350_v3  ;;  %v559_v2 = vld [vmem:[%s11690_s12 + $0x768] sm:$0xff] }
  0x7a   : > { %877 = vmatmul.mubr.f32.gmra.mxu0 %v11987_v5  ;;  %990 = vmatmul.mubr.f32.gmra.mxu1 %v11987_v5  ;;  %v547_v3 = vld [vmem:[%s11690_s12 + $0x708] sm:$0xff] }
  0x7b   : > { %1024 = vmatprep.subr.mxu0 %v338_v6  ;;  %1137 = vmatprep.subr.mxu1 %v340_v8  ;;  %v549_v6 = vld [vmem:[%s11690_s12 + $0x718] sm:$0xff]  ;;  %v546_v8 = vld [vmem:[%s11690_s12 + $0x700] sm:$0xff] }
  0x7c   : > { %1025 = vmatpush1.msra.mxu0 %v337_v9  ;;  %1138 = vmatpush1.msra.mxu1 %v339_v10  ;;  %v548_v9 = vld [vmem:[%s11690_s12 + $0x710] sm:$0xff] }
  0x7d   : > { %1026 = vmatprep.subr.mxu0 %v327_v11  ;;  %1139 = vmatprep.subr.mxu1 %v329_v12  ;;  %v536_v10 = vld [vmem:[%s11690_s12 + $0x6b0] sm:$0xff]  ;;  %v538_v11 = vld [vmem:[%s11690_s12 + $0x6c0] sm:$0xff]  ;;  %v535_v12 = vld [vmem:[%s11690_s12 + $0x6a8] sm:$0xff] }
  0x7e   : > { %1027 = vmatpush1.msra.mxu0 %v326_v13  ;;  %1140 = vmatpush1.msra.mxu1 %v328_v15  ;;  %v537_v13 = vld [vmem:[%s11690_s12 + $0x6b8] sm:$0xff] }
  0x7f   : > { %11304 = vmatprep.subr.msk.mxu0 %vm736_vm1, %v657_v16  ;;  %11314 = vmatprep.subr.msk.mxu1 %vm736_vm1, %v659_v18  ;;  %v525_v15 = vld [vmem:[%s11690_s12 + $0x658] sm:$0xff]  ;;  %v527_v16 = vld [vmem:[%s11690_s12 + $0x668] sm:$0xff]  ;;  %v524_v18 = vld [vmem:[%s11690_s12 + $0x650] sm:$0xff] }
  0x80   : > { %11305 = vmatpush2.msk.msra.mxu0 %vm736_vm1, %v656_v19  ;;  %11315 = vmatpush2.msk.msra.mxu1 %vm736_vm1, %v658_v20  ;;  %v526_v19 = vld [vmem:[%s11690_s12 + $0x660] sm:$0xff] }
  0x81   : > { %1032 = vmatprep.subr.mxu0 %v646_v21  ;;  %1145 = vmatprep.subr.mxu1 %v648_v22  ;;  %v514_v20 = vld [vmem:[%s11690_s12 + $0x600] sm:$0xff]  ;;  %v516_v21 = vld [vmem:[%s11690_s12 + $0x610] sm:$0xff]  ;;  %v513_v22 = vld [vmem:[%s11690_s12 + $0x5f8] sm:$0xff] }
  0x82   : > { %1033 = vmatpush2.msra.mxu0 %v645_v23  ;;  %1146 = vmatpush2.msra.mxu1 %v647_v25  ;;  %v515_v23 = vld [vmem:[%s11690_s12 + $0x608] sm:$0xff] }
  0x83   : > { %1034 = vmatprep.subr.mxu0 %v635_v26  ;;  %1147 = vmatprep.subr.mxu1 %v637_v28  ;;  %v503_v25 = vld [vmem:[%s11690_s12 + $0x5a8] sm:$0xff]  ;;  %v505_v26 = vld [vmem:[%s11690_s12 + $0x5b8] sm:$0xff]  ;;  %v502_v28 = vld [vmem:[%s11690_s12 + $0x5a0] sm:$0xff] }
  0x84   : > { %1035 = vmatpush2.msra.mxu0 %v634_v29  ;;  %1148 = vmatpush2.msra.mxu1 %v636_v30  ;;  %v504_v29 = vld [vmem:[%s11690_s12 + $0x5b0] sm:$0xff]  ;;  %v12070_v30 = vld [vmem:[%s18986_s1 + $0x8] sm:$0xff] }
  0x85   : > { %1036 = vmatprep.subr.mxu0 %v624_v31  ;;  %1149 = vmatprep.subr.mxu1 %v626_v32  ;;  %v496_v31 = vld [vmem:[%s11690_s12 + $0x570] sm:$0xff]  ;;  %v495_v32 = vld [vmem:[%s11690_s12 + $0x568] sm:$0xff] }
  0x86   : > { %1037 = vmatpush2.msra.mxu0 %v623_v33  ;;  %1150 = vmatpush2.msra.mxu1 %v625_v35  ;;  %v497_v33 = vld [vmem:[%s11690_s12 + $0x578] sm:$0xff] }
  0x87   : > { %1038 = vmatprep.subr.mxu0 %v613_v36  ;;  %1151 = vmatprep.subr.mxu1 %v615_v38  ;;  %v485_v35 = vld [vmem:[%s11690_s12 + $0x518] sm:$0xff]  ;;  %v18994_v36 = vmov 0.0   ;;  %v484_v38 = vld [vmem:[%s11690_s12 + $0x510] sm:$0xff] }
  0x88   : > { %1039 = vmatpush2.msra.mxu0 %v612_v39  ;;  %1152 = vmatpush2.msra.mxu1 %v614_v40  ;;  %v486_v39 = vld [vmem:[%s11690_s12 + $0x520] sm:$0xff]  ;;  %v665_v40 = vld [vmem:[%s18987_s2 + $0x10] sm:$0xff]  ;;  %2268 = vst.msk [vmem:[#allocation2 + $0xa8] sm:$0xff] %vm19432_vm3, %v18994_v36  ;;  %2257 = vst.msk [vmem:[#allocation2 + $0x50] sm:$0xff] %vm19432_vm3, %v18994_v36 }
  0x89   : > { %1040 = vmatprep.subr.mxu0 %v602_v41  ;;  %1153 = vmatprep.subr.mxu1 %v604_v42  ;;  %v11600_v41 = vmov 0   ;;  %v473_v42 = vld [vmem:[%s11690_s12 + $0x4b8] sm:$0xff]  ;;  %2279 = vst.msk [vmem:[#allocation2 + $0x100] sm:$0xff] %vm19432_vm3, %v18994_v36  ;;  %2290 = vst.msk [vmem:[#allocation2 + $0x158] sm:$0xff] %vm19432_vm3, %v18994_v36 }
  0x8a   : > { %1041 = vmatpush2.msra.mxu0 %v601_v43  ;;  %1154 = vmatpush2.msra.mxu1 %v603_v45  ;;  %v475_v43 = vld [vmem:[%s11690_s12 + $0x4c8] sm:$0xff]  ;;  %v663_v45 = vld [vmem:[%s18987_s2] sm:$0xff] }
  0x8b   : > { %1042 = vmatprep.subr.mxu0 %v591_v46  ;;  %1155 = vmatprep.subr.mxu1 %v593_v48  ;;  %v462_v46 = vld [vmem:[%s11690_s12 + $0x460] sm:$0xff]  ;;  %v464_v48 = vld [vmem:[%s11690_s12 + $0x470] sm:$0xff] }
  0x8c   : > { %1043 = vmatpush2.msra.mxu0 %v590_v49  ;;  %1156 = vmatpush2.msra.mxu1 %v592_v50  ;;  %v666_v49 = vld [vmem:[%s18987_s2 + $0x18] sm:$0xff]  ;;  %v451_v50 = vld [vmem:[%s11690_s12 + $0x408] sm:$0xff] }
  0x8d   : > { %1044 = vmatprep.subr.mxu0 %v580_v51  ;;  %1157 = vmatprep.subr.mxu1 %v582_v52  ;;  %v453_v51 = vld [vmem:[%s11690_s12 + $0x418] sm:$0xff] }
  0x8e   : > { %1045 = vmatpush2.msra.mxu0 %v579_v53  ;;  %1158 = vmatpush2.msra.mxu1 %v581_v55  ;;  %v441_v52 = vld [vmem:[%s11690_s12 + $0x3b8] sm:$0xff]  ;;  %v440_v53 = vld [vmem:[%s11690_s12 + $0x3b0] sm:$0xff]  ;;  %v442_v55 = vld [vmem:[%s11690_s12 + $0x3c0] sm:$0xff] }
  0x8f   : > { %1046 = vmatprep.subr.mxu0 %v569_v56  ;;  %1159 = vmatprep.subr.mxu1 %v571_v58  ;;  %v668_v56 = vld [vmem:[%s18987_s2 + $0x28] sm:$0xff]  ;;  %v429_v58 = vld [vmem:[%s11690_s12 + $0x358] sm:$0xff] }
  0x90   : > { %1047 = vmatpush2.msra.mxu0 %v568_v59  ;;  %1160 = vmatpush2.msra.mxu1 %v570_v60  ;;  %v431_v59 = vld [vmem:[%s11690_s12 + $0x368] sm:$0xff] }
  0x91   : > { %1048 = vmatprep.subr.mxu0 %v558_v62  ;;  %1161 = vmatprep.subr.mxu1 %v560_v63  ;;  %v419_v60 = vld [vmem:[%s11690_s12 + $0x308] sm:$0xff]  ;;  %v420_v62 = vld [vmem:[%s11690_s12 + $0x310] sm:$0xff]  ;;  %v670_v63 = vld [vmem:[%s18987_s2 + $0x38] sm:$0xff] }
  0x92   : > { %1049 = vmatpush2.msra.mxu0 %v557_v0  ;;  %1162 = vmatpush2.msra.mxu1 %v559_v2  ;;  %v667_v0 = vld [vmem:[%s18987_s2 + $0x20] sm:$0xff]  ;;  %v407_v2 = vld [vmem:[%s11690_s12 + $0x2a8] sm:$0xff] }
  0x93   : > { %1050 = vmatprep.subr.mxu0 %v547_v3  ;;  %1163 = vmatprep.subr.mxu1 %v549_v6  ;;  %v409_v3 = vld [vmem:[%s11690_s12 + $0x2b8] sm:$0xff] }
  0x94   : > { %1051 = vmatpush2.msra.mxu0 %v546_v8  ;;  %1164 = vmatpush2.msra.mxu1 %v548_v9  ;;  %v397_v6 = vld [vmem:[%s11690_s12 + $0x258] sm:$0xff]  ;;  %v396_v8 = vld [vmem:[%s11690_s12 + $0x250] sm:$0xff]  ;;  %v398_v9 = vld [vmem:[%s11690_s12 + $0x260] sm:$0xff] }
  0x95   : > { %1052 = vmatprep.subr.mxu0 %v536_v10  ;;  %1165 = vmatprep.subr.mxu1 %v538_v11  ;;  %v386_v10 = vld [vmem:[%s11690_s12 + $0x200] sm:$0xff]  ;;  %v1533_v11 = vld [vmem:[%s18989_s4 + $0x8] sm:$0xff] }
  0x96   : > { %1053 = vmatpush2.msra.mxu0 %v535_v12  ;;  %1166 = vmatpush2.msra.mxu1 %v537_v13  ;;  %v669_v12 = vld [vmem:[%s18987_s2 + $0x30] sm:$0xff]  ;;  %v385_v13 = vld [vmem:[%s11690_s12 + $0x1f8] sm:$0xff] }
  0x97   : > { %1054 = vmatprep.subr.mxu0 %v525_v15  ;;  %1167 = vmatprep.subr.mxu1 %v527_v16  ;;  %v387_v15 = vld [vmem:[%s11690_s12 + $0x208] sm:$0xff] }
  0x98   : > { %1055 = vmatpush2.msra.mxu0 %v524_v18  ;;  %1168 = vmatpush2.msra.mxu1 %v526_v19  ;;  %v375_v16 = vld [vmem:[%s11690_s12 + $0x1a8] sm:$0xff]  ;;  %v374_v18 = vld [vmem:[%s11690_s12 + $0x1a0] sm:$0xff]  ;;  %v376_v19 = vld [vmem:[%s11690_s12 + $0x1b0] sm:$0xff] }
  0x99   : > { %1056 = vmatprep.subr.mxu0 %v514_v20  ;;  %1169 = vmatprep.subr.mxu1 %v516_v21  ;;  %v364_v20 = vld [vmem:[%s11690_s12 + $0x150] sm:$0xff]  ;;  %v1535_v21 = vld [vmem:[%s18989_s4 + $0x18] sm:$0xff] }
  0x9a   : > { %1057 = vmatpush2.msra.mxu0 %v513_v22  ;;  %1170 = vmatpush2.msra.mxu1 %v515_v23  ;;  %v1532_v22 = vld [vmem:[%s18989_s4] sm:$0xff]  ;;  %v363_v23 = vld [vmem:[%s11690_s12 + $0x148] sm:$0xff] }
  0x9b   : > { %1058 = vmatprep.subr.mxu0 %v503_v25  ;;  %1171 = vmatprep.subr.mxu1 %v505_v26  ;;  %v365_v25 = vld [vmem:[%s11690_s12 + $0x158] sm:$0xff] }
  0x9c   : > { %1059 = vmatpush2.msra.mxu0 %v502_v28  ;;  %11306 = vmatprep.mubr.msk.f32.mxu0 %vm711_vm0, %v12070_v30  ;;  %v353_v26 = vld [vmem:[%s11690_s12 + $0xf8] sm:$0xff]  ;;  %v352_v28 = vld [vmem:[%s11690_s12 + $0xf0] sm:$0xff] }
  0x9d   : > { %1172 = vmatpush2.msra.mxu1 %v504_v29  ;;  %11316 = vmatprep.mubr.msk.f32.mxu1 %vm711_vm0, %v12070_v30  ;;  %v354_v29 = vld [vmem:[%s11690_s12 + $0x100] sm:$0xff] }
  0x9e   : > { %1061 = vmatmul.mubr.f32.vlgmr.msra.gmra.mxu0 %v11823_v61  ;;  %1174 = vmatmul.mubr.f32.vlgmr.msra.gmra.mxu1 %v11823_v61  ;;  %v474_v61 = vld [vmem:[%s11690_s12 + $0x4c0] sm:$0xff] }
  0x9f   : > { %1222 = vmatprep.subr.mxu0 %v496_v31  ;;  %1335 = vmatprep.subr.mxu1 %v18994_v36  ;;  %v342_v31 = vld [vmem:[%s11690_s12 + $0xa0] sm:$0xff] }
  0xa0   : > { %1223 = vmatpush1.msra.mxu0 %v495_v32  ;;  %1336 = vmatpush1.msra.mxu1 %v497_v33  ;;  %v1534_v32 = vld [vmem:[%s18989_s4 + $0x10] sm:$0xff]  ;;  %v341_v33 = vld [vmem:[%s11690_s12 + $0x98] sm:$0xff] }
  0xa1   : > { %1224 = vmatprep.subr.mxu0 %v485_v35  ;;  %1337 = vmatprep.subr.mxu1 %v18994_v36  ;;  %v343_v35 = vld [vmem:[%s11690_s12 + $0xa8] sm:$0xff] }
  0xa2   : > { %11307 = vmatprep.mubr.msk.f32.mxu0 %vm711_vm0, %v11836_v4  ;;  %11317 = vmatprep.mubr.msk.f32.mxu1 %vm711_vm0, %v11836_v4  ;;  %v463_v4 = vld [vmem:[%s11690_s12 + $0x468] sm:$0xff] }
  0xa3   : > { %1225 = vmatpush1.msra.mxu0 %v484_v38  ;;  %1338 = vmatpush1.msra.mxu1 %v486_v39  ;;  %v331_v38 = vld [vmem:[%s11690_s12 + $0x48] sm:$0xff]  ;;  %v330_v39 = vld [vmem:[%s11690_s12 + $0x40] sm:$0xff] }
  0xa4   : > { %11567 = vset.pattern.permute.xlu1 %v11600_v41  ;;  %1067 = vmatmul.mubr.f32.gmra.mxu0 %v11843_v7 }
  0xa5   : > { %1180 = vmatmul.mubr.f32.gmra.mxu1 %v11843_v7  ;;  %1226 = vmatprep.subr.mxu0 %v474_v61  ;;  %v452_v7 = vld [vmem:[%s11690_s12 + $0x410] sm:$0xff] }
  0xa6   : > { %1339 = vmatprep.subr.mxu1 %v18994_v36  ;;  %683 = vperm.xlu1 %11567, %v665_v40   ;;  %v332_v61 = vld [vmem:[%s11690_s12 + $0x50] sm:$0xff]  ;;  %v661_v40 = vld [vmem:[%s11690_s12 + $0xa98] sm:$0x7] }
  0xa7   : > { %1227 = vmatpush1.msra.mxu0 %v473_v42  ;;  %1340 = vmatpush1.msra.mxu1 %v475_v43  ;;  %v662_v42 = vld [vmem:[%s11690_s12 + $0xaa0] sm:$0x7] }
  0xa8   : > { %11566 = vset.pattern.permute.xlu0 %v11600_v41  ;;  %1228 = vmatprep.subr.mxu0 %v463_v4  ;;  %v660_v41 = vld [vmem:[%s11690_s12 + $0xa90] sm:$0x7]  ;;  %v650_v43 = vld [vmem:[%s11690_s12 + $0xa40] sm:$0xff]  ;;  %v649_v4 = vld [vmem:[%s11690_s12 + $0xa38] sm:$0xff] }
  0xa9   : > { %1341 = vmatprep.subr.mxu1 %v18994_v36  ;;  %673 = vperm.xlu0 %11566, %v663_v45   ;;  %v651_v45 = vld [vmem:[%s11690_s12 + $0xa48] sm:$0xff] }
  0xaa   : > { %11308 = vmatprep.mubr.msk.f32.mxu0 %vm711_vm0, %v11860_v14  ;;  %11318 = vmatprep.mubr.msk.f32.mxu1 %vm711_vm0, %v11860_v14  ;;  %v664_v14 = vld [vmem:[%s18987_s2 + $0x8] sm:$0xff] }
  0xab   : > { %1229 = vmatpush1.msra.mxu0 %v462_v46  ;;  %1342 = vmatpush1.msra.mxu1 %v464_v48  ;;  %v639_v46 = vld [vmem:[%s11690_s12 + $0x9e8] sm:$0xff]  ;;  %v638_v48 = vld [vmem:[%s11690_s12 + $0x9e0] sm:$0xff] }
  0xac   : > { %1073 = vmatmul.mubr.f32.gmra.mxu0 %v11867_v17  ;;  %1186 = vmatmul.mubr.f32.gmra.mxu1 %v11867_v17  ;;  %v430_v17 = vld [vmem:[%s11690_s12 + $0x360] sm:$0xff] }
  0xad   : > { %1230 = vmatprep.subr.mxu0 %v452_v7  ;;  %1343 = vmatprep.subr.mxu1 %v18994_v36  ;;  %v640_v7 = vld [vmem:[%s11690_s12 + $0x9f0] sm:$0xff] }
  0xae   : > { %688 = vperm.xlu1 %11567, %v666_v49   ;;  %1231 = vmatpush1.msra.mxu0 %v451_v50  ;;  %v628_v49 = vld [vmem:[%s11690_s12 + $0x990] sm:$0xff]  ;;  %v627_v50 = vld [vmem:[%s11690_s12 + $0x988] sm:$0xff] }
  0xaf   : > { %1344 = vmatpush1.msra.mxu1 %v453_v51  ;;  %1232 = vmatprep.subr.mxu0 %v441_v52  ;;  %v629_v51 = vld [vmem:[%s11690_s12 + $0x998] sm:$0xff] }
  0xb0   : > { %1345 = vmatprep.subr.mxu1 %v18994_v36  ;;  %678 = vperm.xlu0 %11566, %v664_v14   ;;  %v617_v52 = vld [vmem:[%s11690_s12 + $0x938] sm:$0xff]  ;;  %v616_v14 = vld [vmem:[%s11690_s12 + $0x930] sm:$0xff] }
  0xb1   : > { %11309 = vmatprep.mubr.msk.f32.mxu0 %vm711_vm0, %v11884_v24  ;;  %11319 = vmatprep.mubr.msk.f32.mxu1 %vm711_vm0, %v11884_v24  ;;  %v418_v24 = vld [vmem:[%s11690_s12 + $0x300] sm:$0xff] }
  0xb2   : > { %1233 = vmatpush1.msra.mxu0 %v440_v53  ;;  %1346 = vmatpush1.msra.mxu1 %v442_v55  ;;  %v618_v53 = vld [vmem:[%s11690_s12 + $0x940] sm:$0xff] }
  0xb3   : > { %1079 = vmatmul.mubr.f32.gmra.mxu0 %v11891_v27  ;;  %1192 = vmatmul.mubr.f32.gmra.mxu1 %v11891_v27  ;;  %v408_v27 = vld [vmem:[%s11690_s12 + $0x2b0] sm:$0xff]  ;;  %v606_v55 = vld [vmem:[%s11690_s12 + $0x8e0] sm:$0xff] }
  0xb4   : > { %1234 = vmatprep.subr.mxu0 %v430_v17  ;;  %1347 = vmatprep.subr.mxu1 %v18994_v36  ;;  %v605_v17 = vld [vmem:[%s11690_s12 + $0x8d8] sm:$0xff] }
  0xb5   : > { %698 = vperm.xlu1 %11567, %v668_v56   ;;  %1235 = vmatpush1.msra.mxu0 %v429_v58  ;;  %v607_v56 = vld [vmem:[%s11690_s12 + $0x8e8] sm:$0xff] }
  0xb6   : > { %1348 = vmatpush1.msra.mxu1 %v431_v59  ;;  %1236 = vmatprep.subr.mxu0 %v419_v60  ;;  %v595_v58 = vld [vmem:[%s11690_s12 + $0x888] sm:$0xff]  ;;  %v594_v59 = vld [vmem:[%s11690_s12 + $0x880] sm:$0xff]  ;;  %v596_v60 = vld [vmem:[%s11690_s12 + $0x890] sm:$0xff] }
  0xb7   : > { %1349 = vmatprep.subr.mxu1 %v18994_v36  ;;  %11310 = vmatprep.mubr.msk.f32.mxu0 %vm711_vm0, %v11908_v34 }
  0xb8   : > { %11320 = vmatprep.mubr.msk.f32.mxu1 %vm711_vm0, %v11908_v34  ;;  %1237 = vmatpush1.msra.mxu0 %v418_v24  ;;  %v584_v24 = vld [vmem:[%s11690_s12 + $0x830] sm:$0xff] }
  0xb9   : > { %1350 = vmatpush1.msra.mxu1 %v420_v62  ;;  %1085 = vmatmul.mubr.f32.gmra.mxu0 %v11915_v37  ;;  %v583_v62 = vld [vmem:[%s11690_s12 + $0x828] sm:$0xff] }
  0xba   : > { %1198 = vmatmul.mubr.f32.gmra.mxu1 %v11915_v37  ;;  %1238 = vmatprep.subr.mxu0 %v408_v27  ;;  %v585_v27 = vld [vmem:[%s11690_s12 + $0x838] sm:$0xff] }
  0xbb   : > { %1351 = vmatprep.subr.mxu1 %v18994_v36  ;;  %708 = vperm.xlu1 %11567, %v670_v63   ;;  %v573_v63 = vld [vmem:[%s11690_s12 + $0x7d8] sm:$0xff] }
  0xbc   : > { %693 = vperm.xlu0 %11566, %v667_v0   ;;  %1239 = vmatpush1.msra.mxu0 %v407_v2  ;;  %v572_v0 = vld [vmem:[%s11690_s12 + $0x7d0] sm:$0xff]  ;;  %v574_v2 = vld [vmem:[%s11690_s12 + $0x7e0] sm:$0xff] }
  0xbd   : > { %1352 = vmatpush1.msra.mxu1 %v409_v3  ;;  %1240 = vmatprep.subr.mxu0 %v397_v6  ;;  %v562_v3 = vld [vmem:[%s11690_s12 + $0x780] sm:$0xff]  ;;  %v561_v6 = vld [vmem:[%s11690_s12 + $0x778] sm:$0xff] }
  0xbe   : > { %1353 = vmatprep.subr.mxu1 %v18994_v36  ;;  %11311 = vmatprep.mubr.msk.f32.mxu0 %vm711_vm0, %v11932_v44 }
  0xbf   : > { %11321 = vmatprep.mubr.msk.f32.mxu1 %vm711_vm0, %v11932_v44  ;;  %1241 = vmatpush1.msra.mxu0 %v396_v8  ;;  %v563_v8 = vld [vmem:[%s11690_s12 + $0x788] sm:$0xff] }
  0xc0   : > { %1354 = vmatpush1.msra.mxu1 %v398_v9  ;;  %1091 = vmatmul.mubr.f32.gmra.mxu0 %v11939_v47  ;;  %v551_v9 = vld [vmem:[%s11690_s12 + $0x728] sm:$0xff] }
  0xc1   : > { %1204 = vmatmul.mubr.f32.gmra.mxu1 %v11939_v47  ;;  %1242 = vmatprep.subr.mxu0 %v386_v10  ;;  %v550_v10 = vld [vmem:[%s11690_s12 + $0x720] sm:$0xff] }
  0xc2   : > { %1355 = vmatprep.subr.mxu1 %v18994_v36  ;;  %1543 = vperm.xlu1 %11567, %v1533_v11   ;;  %v552_v11 = vld [vmem:[%s11690_s12 + $0x730] sm:$0xff] }
  0xc3   : > { %703 = vperm.xlu0 %11566, %v669_v12   ;;  %1243 = vmatpush1.msra.mxu0 %v385_v13  ;;  %v540_v12 = vld [vmem:[%s11690_s12 + $0x6d0] sm:$0xff]  ;;  %v539_v13 = vld [vmem:[%s11690_s12 + $0x6c8] sm:$0xff] }
  0xc4   : > { %1356 = vmatpush1.msra.mxu1 %v387_v15  ;;  %1244 = vmatprep.subr.mxu0 %v375_v16  ;;  %v541_v15 = vld [vmem:[%s11690_s12 + $0x6d8] sm:$0xff] }
  0xc5   : > { %1357 = vmatprep.subr.mxu1 %v18994_v36  ;;  %11312 = vmatprep.mubr.msk.f32.mxu0 %vm711_vm0, %v11956_v54  ;;  %v529_v16 = vld [vmem:[%s11690_s12 + $0x678] sm:$0xff] }
  0xc6   : > { %11322 = vmatprep.mubr.msk.f32.mxu1 %vm711_vm0, %v11956_v54  ;;  %1245 = vmatpush1.msra.mxu0 %v374_v18  ;;  %v528_v18 = vld [vmem:[%s11690_s12 + $0x670] sm:$0xff] }
  0xc7   : > { %1358 = vmatpush1.msra.mxu1 %v376_v19  ;;  %1097 = vmatmul.mubr.f32.gmra.mxu0 %v11963_v57  ;;  %v530_v19 = vld [vmem:[%s11690_s12 + $0x680] sm:$0xff] }
  0xc8   : > { %1210 = vmatmul.mubr.f32.gmra.mxu1 %v11963_v57  ;;  %1246 = vmatprep.subr.mxu0 %v364_v20  ;;  %v518_v20 = vld [vmem:[%s11690_s12 + $0x620] sm:$0xff] }
  0xc9   : > { %1359 = vmatprep.subr.mxu1 %v18994_v36  ;;  %1553 = vperm.xlu1 %11567, %v1535_v21   ;;  %v517_v21 = vld [vmem:[%s11690_s12 + $0x618] sm:$0xff] }
  0xca   : > { %1538 = vperm.xlu0 %11566, %v1532_v22   ;;  %1247 = vmatpush1.msra.mxu0 %v363_v23  ;;  %v519_v22 = vld [vmem:[%s11690_s12 + $0x628] sm:$0xff] }
  0xcb   : > { %1360 = vmatpush1.msra.mxu1 %v365_v25  ;;  %1248 = vmatprep.subr.mxu0 %v353_v26  ;;  %v507_v23 = vld [vmem:[%s11690_s12 + $0x5c8] sm:$0xff]  ;;  %v506_v25 = vld [vmem:[%s11690_s12 + $0x5c0] sm:$0xff]  ;;  %v508_v26 = vld [vmem:[%s11690_s12 + $0x5d0] sm:$0xff]  ;;  %s11601_s12 = smov 127  }
  0xcc   : > { %1361 = vmatprep.subr.mxu1 %v18994_v36  ;;  %11313 = vmatprep.mubr.msk.f32.mxu0 %vm711_vm0, %v11980_v1 }
  0xcd   : > { %11323 = vmatprep.mubr.msk.f32.mxu1 %vm711_vm0, %v11980_v1  ;;  %1249 = vmatpush1.msra.mxu0 %v352_v28  ;;  %v11572_v28 = vld [vmem:[%s18986_s1] sm:$0xff] }
  0xce   : > { %1362 = vmatpush1.msra.mxu1 %v354_v29  ;;  %1103 = vmatmul.mubr.f32.gmra.mxu0 %v11987_v5  ;;  %v11573_v29 = vld [vmem:[%s18986_s1 + $0x18] sm:$0xff] }
  0xcf   : > { %1216 = vmatmul.mubr.f32.gmra.mxu1 %v11987_v5  ;;  %1250 = vmatprep.subr.mxu0 %v342_v31  ;;  %v11574_v31 = vld [vmem:[%s18986_s1 + $0x10] sm:$0xff] }
  0xd0   : > { %1363 = vmatprep.subr.mxu1 %v18994_v36  ;;  %1548 = vperm.xlu0 %11566, %v1534_v32   ;;  %v11576_v32 = vld [vmem:[%s18986_s1 + $0x20] sm:$0xff] }
  0xd1   : > { %1251 = vmatpush1.msra.mxu0 %v341_v33  ;;  %1364 = vmatpush1.msra.mxu1 %v343_v35  ;;  %v11577_v33 = vld [vmem:[%s18986_s1 + $0x38] sm:$0xff]  ;;  %v11578_v35 = vld [vmem:[%s18986_s1 + $0x30] sm:$0xff] }
  0xd2   : > { %1252 = vmatprep.subr.mxu0 %v331_v38  ;;  %1365 = vmatprep.subr.mxu1 %v18994_v36 }
  0xd3   : > { %1253 = vmatpush1.msra.mxu0 %v330_v39  ;;  %1366 = vmatpush1.msra.mxu1 %v332_v61 }
  0xd4   : > { %11324 = vmatprep.subr.msk.mxu0 %vm736_vm1, %v661_v40  ;;  %1369 = vmatprep.subr.mxu1 %v18994_v36 }
  0xd5   : > { %11325 = vmatpush2.msk.msra.mxu0 %vm736_vm1, %v660_v41  ;;  %11334 = vmatpush2.msk.msra.mxu1 %vm736_vm1, %v662_v42  ;;  %vm19426_vm1 = vcmask 433152  }
  0xd6   : > { %1258 = vmatprep.subr.mxu0 %v650_v43  ;;  %1371 = vmatprep.subr.mxu1 %v18994_v36 }
  0xd7   : > { %1259 = vmatpush2.msra.mxu0 %v649_v4  ;;  %1372 = vmatpush2.msra.mxu1 %v651_v45 }
  0xd8   : > { %1260 = vmatprep.subr.mxu0 %v639_v46  ;;  %1373 = vmatprep.subr.mxu1 %v18994_v36 }
  0xd9   : > { %1261 = vmatpush2.msra.mxu0 %v638_v48  ;;  %1374 = vmatpush2.msra.mxu1 %v640_v7 }
  0xda   : > { %1262 = vmatprep.subr.mxu0 %v628_v49  ;;  %1375 = vmatprep.subr.mxu1 %v18994_v36 }
  0xdb   : > { %1263 = vmatpush2.msra.mxu0 %v627_v50  ;;  %1376 = vmatpush2.msra.mxu1 %v629_v51 }
  0xdc   : > { %1264 = vmatprep.subr.mxu0 %v617_v52  ;;  %1377 = vmatprep.subr.mxu1 %v18994_v36 }
  0xdd   : > { %1265 = vmatpush2.msra.mxu0 %v616_v14  ;;  %1378 = vmatpush2.msra.mxu1 %v618_v53 }
  0xde   : > { %1266 = vmatprep.subr.mxu0 %v606_v55  ;;  %1379 = vmatprep.subr.mxu1 %v18994_v36 }
  0xdf   : > { %1267 = vmatpush2.msra.mxu0 %v605_v17  ;;  %1380 = vmatpush2.msra.mxu1 %v607_v56 }
  0xe0   : > { %1268 = vmatprep.subr.mxu0 %v595_v58  ;;  %1381 = vmatprep.subr.mxu1 %v18994_v36 }
  0xe1   : > { %1269 = vmatpush2.msra.mxu0 %v594_v59  ;;  %1382 = vmatpush2.msra.mxu1 %v596_v60 }
  0xe2   : > { %1270 = vmatprep.subr.mxu0 %v584_v24  ;;  %1383 = vmatprep.subr.mxu1 %v18994_v36 }
  0xe3   : > { %1271 = vmatpush2.msra.mxu0 %v583_v62  ;;  %1384 = vmatpush2.msra.mxu1 %v585_v27 }
  0xe4   : > { %1272 = vmatprep.subr.mxu0 %v573_v63  ;;  %1385 = vmatprep.subr.mxu1 %v18994_v36 }
  0xe5   : > { %1273 = vmatpush2.msra.mxu0 %v572_v0  ;;  %1386 = vmatpush2.msra.mxu1 %v574_v2 }
  0xe6   : > { %1274 = vmatprep.subr.mxu0 %v562_v3  ;;  %1387 = vmatprep.subr.mxu1 %v18994_v36 }
  0xe7   : > { %1275 = vmatpush2.msra.mxu0 %v561_v6  ;;  %1388 = vmatpush2.msra.mxu1 %v563_v8 }
  0xe8   : > { %1276 = vmatprep.subr.mxu0 %v551_v9  ;;  %1389 = vmatprep.subr.mxu1 %v18994_v36 }
  0xe9   : > { %1277 = vmatpush2.msra.mxu0 %v550_v10  ;;  %1390 = vmatpush2.msra.mxu1 %v552_v11 }
  0xea   : > { %1278 = vmatprep.subr.mxu0 %v540_v12  ;;  %1391 = vmatprep.subr.mxu1 %v18994_v36 }
  0xeb   : > { %1279 = vmatpush2.msra.mxu0 %v539_v13  ;;  %1392 = vmatpush2.msra.mxu1 %v541_v15 }
  0xec   : > { %1280 = vmatprep.subr.mxu0 %v529_v16  ;;  %1393 = vmatprep.subr.mxu1 %v18994_v36 }
  0xed   : > { %1281 = vmatpush2.msra.mxu0 %v528_v18  ;;  %1394 = vmatpush2.msra.mxu1 %v530_v19 }
  0xee   : > { %1282 = vmatprep.subr.mxu0 %v518_v20  ;;  %1395 = vmatprep.subr.mxu1 %v18994_v36 }
  0xef   : > { %1283 = vmatpush2.msra.mxu0 %v517_v21  ;;  %1396 = vmatpush2.msra.mxu1 %v519_v22 }
  0xf0   : > { %1284 = vmatprep.subr.mxu0 %v507_v23  ;;  %1397 = vmatprep.subr.mxu1 %v18994_v36 }
  0xf1   : > { %1285 = vmatpush2.msra.mxu0 %v506_v25  ;;  %11326 = vmatprep.mubr.msk.f32.mxu0 %vm711_vm0, %v12070_v30 }
  0xf2   : > { %1398 = vmatpush2.msra.mxu1 %v508_v26  ;;  %11335 = vmatprep.mubr.msk.f32.mxu1 %vm711_vm0, %v12070_v30  ;;  %v11575_v30 = vld [vmem:[%s18986_s1 + $0x28] sm:$0xff] }
  0xf3   : > { %1287 = vmatmul.mubr.f32.vlgmr.msra.gmra.mxu0 %v11572_v28  ;;  %1400 = vmatmul.mubr.f32.vlgmr.msra.gmra.mxu1 %v11572_v28 }
  0xf4   : > { %11327 = vmatprep.mubr.msk.f32.mxu0 %vm711_vm0, %v11573_v29  ;;  %11336 = vmatprep.mubr.msk.f32.mxu1 %vm711_vm0, %v11573_v29 }
  0xf7   : > { %1293 = vmatmul.mubr.f32.gmra.mxu0 %v11574_v31  ;;  %1405 = vmatmul.mubr.f32.gmra.mxu1 %v11574_v31 }
  0xf8   : > { %11328 = vmatprep.mubr.msk.f32.mxu0 %vm711_vm0, %v11575_v30  ;;  %11337 = vmatprep.mubr.msk.f32.mxu1 %vm711_vm0, %v11575_v30 }
  0xfb   : > { %1299 = vmatmul.mubr.f32.gmra.mxu0 %v11576_v32  ;;  %1410 = vmatmul.mubr.f32.gmra.mxu1 %v11576_v32 }
  0xfc   : > { %11329 = vmatprep.mubr.msk.f32.mxu0 %vm711_vm0, %v11577_v33  ;;  %11338 = vmatprep.mubr.msk.f32.mxu1 %vm711_vm0, %v11577_v33 }
  0xff   : > { %1305 = vmatmul.mubr.f32.gmra.mxu0 %v11578_v35  ;;  %1415 = vmatmul.mubr.f32.gmra.mxu1 %v11578_v35 }
 0x100   : > { %11330 = vmatprep.mubr.msk.f32.mxu0 %vm711_vm0, %v11908_v34  ;;  %11339 = vmatprep.mubr.msk.f32.mxu1 %vm711_vm0, %v11908_v34 }
 0x103   : > { %1311 = vmatmul.mubr.f32.gmra.mxu0 %v11915_v37  ;;  %1420 = vmatmul.mubr.f32.gmra.mxu1 %v11915_v37 }
 0x104   : > { %11331 = vmatprep.mubr.msk.f32.mxu0 %vm711_vm0, %v11932_v44  ;;  %11340 = vmatprep.mubr.msk.f32.mxu1 %vm711_vm0, %v11932_v44 }
 0x107   : > { %1317 = vmatmul.mubr.f32.gmra.mxu0 %v11939_v47  ;;  %1425 = vmatmul.mubr.f32.gmra.mxu1 %v11939_v47 }
 0x108   : > { %11332 = vmatprep.mubr.msk.f32.mxu0 %vm711_vm0, %v11956_v54  ;;  %11341 = vmatprep.mubr.msk.f32.mxu1 %vm711_vm0, %v11956_v54 }
 0x10b   : > { %1323 = vmatmul.mubr.f32.gmra.mxu0 %v11963_v57  ;;  %1430 = vmatmul.mubr.f32.gmra.mxu1 %v11963_v57 }
 0x10c   : > { %11333 = vmatprep.mubr.msk.f32.mxu0 %vm711_vm0, %v11980_v1  ;;  %11342 = vmatprep.mubr.msk.f32.mxu1 %vm711_vm0, %v11980_v1  ;;  %vm19430_vm0 = vcmask 424960  }
 0x10f   : > { %1329 = vmatmul.mubr.f32.gmra.mxu0 %v11987_v5  ;;  %1435 = vmatmul.mubr.f32.gmra.mxu1 %v11987_v5 }
 0x110   : > { %v12338_v34 = vpop.f32.mrf.mxu0  ;;  %v12340_v37 = vpop.f32.mrf.mxu1  ;;  %1633 = vmatprep.mubr.f32.mxu1 %v18994_v36  ;;  %1811 = vmatprep.mubr.f32.mxu0 %v18994_v36 }
 0x112   : > { %v12344_v44 = vpop.f32.mrf.mxu0  ;;  %v12346_v47 = vpop.f32.mrf.mxu1 }
 0x116   : > { %v12348_v54 = vpop.f32.mrf.mxu0  ;;  %v12350_v57 = vpop.f32.mrf.mxu1 }
 0x118   : > { %v844_v1 = vpop.f32.mrf.mxu0  ;;  %v12352_v38 = vpop.f32.mrf.mxu1 }
 0x11c   : > { %v848_v5 = vpop.f32.mrf.mxu0  ;;  %v12354_v39 = vpop.f32.mrf.mxu1 }
 0x11e   : > { %v850_v61 = vpop.f32.mrf.mxu0  ;;  %v12356_v40 = vpop.f32.mrf.mxu1 }
 0x121   : > { %v12362_v46 = vpop.permute.xlu1 %683 }
 0x122   : > { %v854_v41 = vpop.f32.mrf.mxu0  ;;  %v12358_v43 = vpop.f32.mrf.mxu1  ;;  %v851_v26 = vadd.f32 %v850_v61, %v12362_v46  ;;  %v849_v29 = vadd.f32 %v848_v5, %v12362_v46 }
 0x124   : > { %v856_v42 = vpop.f32.mrf.mxu0  ;;  %v12360_v45 = vpop.f32.mrf.mxu1  ;;  %v1463_v61 = vmax.f32 %v851_v26, 0.0 }
 0x125   : > { %v12364_v7 = vpop.permute.xlu0 %673 }
 0x126   : > { %v837_v5 = vadd.f32 %v12338_v34, %v12364_v7  ;;  %v12410_v34 = vld [vmem:[%s18988_s3] sm:$0xff] }
 0x128   : > { %v860_v4 = vpop.f32.mrf.mxu0  ;;  %v12366_v49 = vpop.f32.mrf.mxu1 }
 0x129   : > { %v12368_v51 = vpop.permute.xlu1 %688 }
 0x12a   : > { %v862_v48 = vpop.f32.mrf.mxu0  ;;  %v12370_v14 = vpop.f32.mrf.mxu1  ;;  %v857_v20 = vadd.f32 %v856_v42, %v12368_v51  ;;  %v855_v22 = vadd.f32 %v854_v41, %v12368_v51  ;;  %v839_v42 = vadd.f32 %v12344_v44, %v12364_v7  ;;  %v1440_v44 = vmax.f32 %v837_v5, 0.0 }
 0x12b   : > { %v12372_v53 = vpop.permute.xlu0 %678 }
 0x12c   : > { %v845_v30 = vadd.f32 %v844_v1, %v12372_v53  ;;  %v1474_v32 = vmax.f32 %v857_v20, 0.0  ;;  %v843_v33 = vadd.f32 %v12348_v54, %v12372_v53  ;;  %v1473_v35 = vmax.f32 %v855_v22, 0.0 }
 0x12d   : > { %v950_v20 = vadd.f32 %v12340_v37, %v12364_v7 }
 0x12e   : > { %v866_v50 = vpop.f32.mrf.mxu0  ;;  %v12374_v17 = vpop.f32.mrf.mxu1 }
 0x12f   : > { %v1442_v37 = vmax.f32 %v950_v20, 0.0 }
 0x130   : > { %v868_v52 = vpop.f32.mrf.mxu0  ;;  %v12376_v56 = vpop.permute.xlu1 %698 }
 0x131   : > { %v981_v60 = vpop.f32.mrf.mxu1  ;;  %v869_v9 = vadd.f32 %v868_v52, %v12376_v56  ;;  %v867_v11 = vadd.f32 %v866_v50, %v12376_v56  ;;  %v1451_v50 = vmax.f32 %v843_v33, 0.0  ;;  %v1441_v52 = vmax.f32 %v839_v42, 0.0 }
 0x133   : > { %v1496_v21 = vmax.f32 %v869_v9, 0.0  ;;  %v1495_v23 = vmax.f32 %v867_v11, 0.0 }
 0x134   : > { %v872_v55 = vpop.f32.mrf.mxu0  ;;  %v985_v63 = vpop.f32.mrf.mxu1 }
 0x136   : > { %v874_v58 = vpop.f32.mrf.mxu0  ;;  %v12380_v62 = vpop.permute.xlu1 %708 }
 0x137   : > { %v12378_v59 = vpop.permute.xlu0 %693  ;;  %v987_v12 = vpop.f32.mrf.mxu1 }
 0x138   : > { %v863_v15 = vadd.f32 %v862_v48, %v12378_v59  ;;  %v861_v18 = vadd.f32 %v860_v4, %v12378_v59  ;;  %v1462_v4 = vmax.f32 %v849_v29, 0.0  ;;  %v1452_v48 = vmax.f32 %v845_v30, 0.0 }
 0x13a   : > { %v878_v24 = vpop.f32.mrf.mxu0  ;;  %v991_v25 = vpop.f32.mrf.mxu1  ;;  %v1485_v28 = vmax.f32 %v863_v15, 0.0  ;;  %v1484_v31 = vmax.f32 %v861_v18, 0.0 }
 0x13b   : > { %v879_v0 = vadd.f32 %v878_v24, %v12380_v62  ;;  %v992_v54 = vadd.f32 %v991_v25, %v12380_v62  ;;  %v982_v24 = vadd.f32 %v981_v60, %v12376_v56 }
 0x13c   : > { %v880_v27 = vpop.f32.mrf.mxu0  ;;  %v993_v41 = vpop.f32.mrf.mxu1 }
 0x13d   : > { %v881_v2 = vadd.f32 %v880_v27, %v12380_v62  ;;  %v1517_v13 = vmax.f32 %v879_v0, 0.0  ;;  %v994_v1 = vadd.f32 %v993_v41, %v12380_v62  ;;  %v980_v0 = vadd.f32 %v12374_v17, %v12376_v56  ;;  %v12425_v17 = vld [vmem:[%s18988_s3 + $0x8] sm:$0xff] }
 0x13e   : > { %v12384_v3 = vpop.permute.xlu0 %703  ;;  %v1498_v60 = vmax.f32 %v982_v24, 0.0 }
 0x13f   : > { %v873_v6 = vadd.f32 %v872_v55, %v12384_v3  ;;  %v875_v8 = vadd.f32 %v874_v58, %v12384_v3  ;;  %v1518_v10 = vmax.f32 %v881_v2, 0.0  ;;  %v988_v55 = vadd.f32 %v987_v12, %v12384_v3 }
 0x140   : > { %v986_v58 = vadd.f32 %v985_v63, %v12384_v3  ;;  %v1520_v27 = vmax.f32 %v994_v1, 0.0  ;;  %v1519_v2 = vmax.f32 %v992_v54, 0.0  ;;  %v1497_v11 = vmax.f32 %v980_v0, 0.0 }
 0x141   : > { %v1507_v16 = vmax.f32 %v875_v8, 0.0  ;;  %1585 = vmatprep.subr.mxu1 %v1518_v10  ;;  %v1506_v19 = vmax.f32 %v873_v6, 0.0  ;;  %v976_v6 = vadd.f32 %v12370_v14, %v12378_v59  ;;  %v1509_v63 = vmax.f32 %v988_v55, 0.0 }
 0x142   : > { %1586 = vmatpush1.msra.mxu1 %v1517_v13  ;;  %v974_v8 = vadd.f32 %v12366_v49, %v12378_v59  ;;  %v1508_v9 = vmax.f32 %v986_v58, 0.0  ;;  %v970_v14 = vadd.f32 %v12360_v45, %v12368_v51  ;;  %v968_v10 = vadd.f32 %v12358_v43, %v12368_v51  ;;  %v12441_v43 = vld [vmem:[%s18988_s3 + $0x10] sm:$0xff] }
 0x143   : > { %1587 = vmatprep.subr.mxu1 %v1507_v16  ;;  %v964_v49 = vadd.f32 %v12356_v40, %v12362_v46  ;;  %v1487_v12 = vmax.f32 %v976_v6, 0.0  ;;  %v962_v13 = vadd.f32 %v12354_v39, %v12362_v46  ;;  %v958_v40 = vadd.f32 %v12352_v38, %v12372_v53 }
 0x144   : > { %1588 = vmatpush1.msra.mxu1 %v1506_v19  ;;  %v1486_v15 = vmax.f32 %v974_v8, 0.0  ;;  %v1476_v45 = vmax.f32 %v970_v14, 0.0  ;;  %v956_v16 = vadd.f32 %v12350_v57, %v12372_v53  ;;  %v1475_v18 = vmax.f32 %v968_v10, 0.0  ;;  %v12457_v57 = vld [vmem:[%s18988_s3 + $0x18] sm:$0xff] }
 0x145   : > { %1589 = vmatprep.subr.mxu1 %v1496_v21  ;;  %v952_v39 = vadd.f32 %v12346_v47, %v12364_v7  ;;  %v1465_v19 = vmax.f32 %v964_v49, 0.0  ;;  %v1464_v21 = vmax.f32 %v962_v13, 0.0  ;;  %v1454_v38 = vmax.f32 %v958_v40, 0.0 }
 0x146   : > { %1590 = vmatpush1.msra.mxu1 %v1495_v23  ;;  %v1453_v47 = vmax.f32 %v956_v16, 0.0 }
 0x147   : > { %1591 = vmatprep.subr.mxu1 %v1485_v28  ;;  %v1443_v22 = vmax.f32 %v952_v39, 0.0 }
 0x148   : > { %1592 = vmatpush1.msra.mxu1 %v1484_v31 }
 0x149   : > { %1593 = vmatprep.subr.mxu1 %v1474_v32 }
 0x14a   : > { %1594 = vmatpush1.msra.mxu1 %v1473_v35 }
 0x14b   : > { %1595 = vmatprep.subr.mxu1 %v1463_v61 }
 0x14c   : > { %1596 = vmatpush1.msra.mxu1 %v1462_v4 }
 0x14d   : > { %1597 = vmatprep.subr.mxu1 %v1452_v48 }
 0x14e   : > { %1598 = vmatpush1.msra.mxu1 %v1451_v50 }
 0x14f   : > { %1599 = vmatprep.subr.mxu1 %v1441_v52 }
 0x150   : > { %1600 = vmatpush1.msra.mxu1 %v1440_v44 }
 0x151   : > { %11343 = vmatmul.mubr.msk.f32.vlgmr.msra.gmra.mxu1 %vm1556_vm2, %v12410_v34  ;;  %1674 = vmatprep.subr.mxu1 %v1520_v27 }
 0x152   : > { %1675 = vmatpush1.msra.mxu1 %v1519_v2  ;;  %1639 = vmatprep.mubr.f32.mxu1 %v18994_v36 }
 0x153   : > { %1676 = vmatprep.subr.mxu1 %v1509_v63 }
 0x154   : > { %1677 = vmatpush1.msra.mxu1 %v1508_v9 }
 0x155   : > { %11344 = vmatmul.mubr.msk.f32.gmra.mxu1 %vm1556_vm2, %v12425_v17  ;;  %1678 = vmatprep.subr.mxu1 %v1498_v60 }
 0x156   : > { %1679 = vmatpush1.msra.mxu1 %v1497_v11  ;;  %1645 = vmatprep.mubr.f32.mxu1 %v18994_v36 }
 0x157   : > { %1680 = vmatprep.subr.mxu1 %v1487_v12 }
 0x158   : > { %1681 = vmatpush1.msra.mxu1 %v1486_v15 }
 0x159   : > { %11345 = vmatmul.mubr.msk.f32.gmra.mxu1 %vm1556_vm2, %v12441_v43  ;;  %1682 = vmatprep.subr.mxu1 %v1476_v45 }
 0x15a   : > { %1683 = vmatpush1.msra.mxu1 %v1475_v18  ;;  %1651 = vmatprep.mubr.f32.mxu1 %v18994_v36 }
 0x15b   : > { %1684 = vmatprep.subr.mxu1 %v1465_v19 }
 0x15c   : > { %1685 = vmatpush1.msra.mxu1 %v1464_v21 }
 0x15d   : > { %11346 = vmatmul.mubr.msk.f32.gmra.mxu1 %vm1556_vm2, %v12457_v57  ;;  %1686 = vmatprep.subr.mxu1 %v1454_v38 }
 0x15e   : > { %v12459_v23 = vpop.f32.mrf.mxu0  ;;  %v12461_v25 = vpop.f32.mrf.mxu1  ;;  %1687 = vmatpush1.msra.mxu1 %v1453_v47  ;;  %1722 = vmatprep.mubr.f32.mxu1 %v18994_v36 }
 0x15f   : > { %1688 = vmatprep.subr.mxu1 %v1443_v22 }
 0x160   : > { %v12466_v26 = vpop.f32.mrf.mxu0  ;;  %v12468_v28 = vpop.f32.mrf.mxu1  ;;  %1689 = vmatpush1.msra.mxu1 %v1442_v37 }
 0x161   : > { %11347 = vmatmul.mubr.msk.f32.vlgmr.msra.gmra.mxu1 %vm1556_vm2, %v12410_v34 }
 0x162   : > { %1728 = vmatprep.mubr.f32.mxu1 %v18994_v36 }
 0x164   : > { %v12473_v29 = vpop.f32.mrf.mxu0 }
 0x165   : > { %v12475_v31 = vpop.f32.mrf.mxu1  ;;  %11348 = vmatmul.mubr.msk.f32.gmra.mxu1 %vm1556_vm2, %v12425_v17 }
 0x166   : > { %1734 = vmatprep.mubr.f32.mxu1 %v18994_v36  ;;  %v12480_v30 = vpop.f32.mrf.mxu0 }
 0x167   : > { %v12482_v32 = vpop.f32.mrf.mxu1 }
 0x169   : > { %11349 = vmatmul.mubr.msk.f32.gmra.mxu1 %vm1556_vm2, %v12441_v43 }
 0x16a   : > { %1740 = vmatprep.mubr.f32.mxu1 %v18994_v36 }
 0x16c   : > { %v12487_v33 = vpop.f32.mrf.mxu0  ;;  %v12489_v35 = vpop.f32.mrf.mxu1 }
 0x16d   : > { %11350 = vmatmul.mubr.msk.f32.gmra.mxu1 %vm1556_vm2, %v12457_v57 }
 0x16e   : > { %v1076_v41 = vpop.f32.mrf.mxu0  ;;  %v12493_v42 = vpop.f32.mrf.mxu1  ;;  %1900 = vmatprep.mubr.f32.mxu1 %v18994_v36 }
 0x173   : > { %v1080_v61 = vpop.f32.mrf.mxu0  ;;  %v1193_v5 = vpop.f32.mrf.mxu1 }
 0x175   : > { %v1082_v4 = vpop.f32.mrf.mxu0  ;;  %v1195_v48 = vpop.f32.mrf.mxu1 }
 0x179   : > { %v1086_v1 = vpop.f32.mrf.mxu0 }
 0x17a   : > { %v1199_v50 = vpop.f32.mrf.mxu1  ;;  %v1087_v37 = vadd.f32 %v1086_v1, %v12378_v59 }
 0x17b   : > { %v1088_v54 = vpop.f32.mrf.mxu0 }
 0x17c   : > { %v1201_v52 = vpop.f32.mrf.mxu1  ;;  %v1089_v21 = vadd.f32 %v1088_v54, %v12378_v59  ;;  %v1081_v54 = vadd.f32 %v1080_v61, %v12368_v51  ;;  %v1190_v61 = vadd.f32 %v12493_v42, %v12362_v46  ;;  %v1184_v42 = vadd.f32 %v12482_v32, %v12372_v53 }
 0x17d   : > { %v1178_v32 = vadd.f32 %v12468_v28, %v12364_v7 }
 0x180   : > { %v1092_v55 = vpop.f32.mrf.mxu0 }
 0x181   : > { %v1205_v44 = vpop.f32.mrf.mxu1  ;;  %v1093_v18 = vadd.f32 %v1092_v55, %v12376_v56  ;;  %v1083_v55 = vadd.f32 %v1082_v4, %v12368_v51 }
 0x182   : > { %v1094_v58 = vpop.f32.mrf.mxu0  ;;  %v1206_v38 = vadd.f32 %v1205_v44, %v12376_v56  ;;  %v1196_v44 = vadd.f32 %v1195_v48, %v12368_v51 }
 0x183   : > { %v1207_v24 = vpop.f32.mrf.mxu1  ;;  %v1095_v40 = vadd.f32 %v1094_v58, %v12376_v56  ;;  %v1202_v58 = vadd.f32 %v1201_v52, %v12378_v59  ;;  %v1077_v52 = vadd.f32 %v1076_v41, %v12362_v46  ;;  %v1188_v41 = vadd.f32 %v12489_v35, %v12362_v46 }
 0x184   : > { %v1208_v39 = vadd.f32 %v1207_v24, %v12376_v56  ;;  %v1200_v24 = vadd.f32 %v1199_v50, %v12378_v59  ;;  %v1501_v4 = vmax.f32 %v1206_v38, 0.0  ;;  %v1075_v50 = vadd.f32 %v12487_v33, %v12362_v46 }
 0x185   : > { %v1491_v48 = vmax.f32 %v1202_v58, 0.0  ;;  %v1069_v33 = vadd.f32 %v12473_v29, %v12372_v53  ;;  %v1182_v35 = vadd.f32 %v12475_v31, %v12372_v53  ;;  %v1063_v29 = vadd.f32 %v12459_v23, %v12364_v7 }
 0x186   : > { %v1502_v1 = vmax.f32 %v1208_v39, 0.0 }
 0x187   : > { %v1098_v27 = vpop.f32.mrf.mxu0  ;;  %v1455_v31 = vmax.f32 %v1069_v33, 0.0  ;;  %v1457_v23 = vmax.f32 %v1182_v35, 0.0  ;;  %v1444_v28 = vmax.f32 %v1063_v29, 0.0 }
 0x188   : > { %v1211_v0 = vpop.f32.mrf.mxu1  ;;  %v1099_v12 = vadd.f32 %v1098_v27, %v12384_v3 }
 0x189   : > { %v1100_v2 = vpop.f32.mrf.mxu0  ;;  %v1212_v45 = vadd.f32 %v1211_v0, %v12384_v3 }
 0x18a   : > { %v1213_v6 = vpop.f32.mrf.mxu1  ;;  %v1101_v60 = vadd.f32 %v1100_v2, %v12384_v3  ;;  %v1510_v27 = vmax.f32 %v1099_v12, 0.0  ;;  %v1500_v2 = vmax.f32 %v1095_v40, 0.0  ;;  %v1467_v12 = vmax.f32 %v1077_v52, 0.0 }
 0x18b   : > { %v1214_v13 = vadd.f32 %v1213_v6, %v12384_v3  ;;  %v1512_v6 = vmax.f32 %v1212_v45, 0.0  ;;  %v1469_v40 = vmax.f32 %v1190_v61, 0.0 }
 0x18c   : > { %v1511_v47 = vmax.f32 %v1101_v60, 0.0  ;;  %v1071_v60 = vadd.f32 %v12480_v30, %v12372_v53  ;;  %v1065_v30 = vadd.f32 %v12466_v26, %v12364_v7  ;;  %v1176_v26 = vadd.f32 %v12461_v25, %v12364_v7 }
 0x18d   : > { %v1513_v0 = vmax.f32 %v1214_v13, 0.0 }
 0x18e   : > { %v1104_v63 = vpop.f32.mrf.mxu0  ;;  %v1456_v45 = vmax.f32 %v1071_v60, 0.0  ;;  %v1445_v39 = vmax.f32 %v1065_v30, 0.0 }
 0x18f   : > { %v1217_v8 = vpop.f32.mrf.mxu1  ;;  %v1105_v9 = vadd.f32 %v1104_v63, %v12380_v62  ;;  %v1499_v63 = vmax.f32 %v1093_v18, 0.0  ;;  %v1458_v18 = vmax.f32 %v1184_v42, 0.0 }
 0x190   : > { %v1106_v14 = vpop.f32.mrf.mxu0  ;;  %v1218_v10 = vadd.f32 %v1217_v8, %v12380_v62  ;;  %v1194_v8 = vadd.f32 %v1193_v5, %v12368_v51  ;;  %v1478_v5 = vmax.f32 %v1083_v55, 0.0 }
 0x191   : > { %v1107_v11 = vadd.f32 %v1106_v14, %v12380_v62  ;;  %v1219_v49 = vpop.f32.mrf.mxu1  ;;  %v1521_v19 = vmax.f32 %v1105_v9, 0.0  ;;  %v1489_v9 = vmax.f32 %v1089_v21, 0.0  ;;  %v1488_v14 = vmax.f32 %v1087_v37, 0.0 }
 0x192   : > { %v1220_v15 = vadd.f32 %v1219_v49, %v12380_v62  ;;  %v1523_v22 = vmax.f32 %v1218_v10, 0.0  ;;  %v1490_v10 = vmax.f32 %v1200_v24, 0.0  ;;  %v1480_v49 = vmax.f32 %v1196_v44, 0.0 }
 0x193   : > { %v1522_v16 = vmax.f32 %v1107_v11, 0.0  ;;  %v1477_v11 = vmax.f32 %v1081_v54, 0.0  ;;  %v1479_v13 = vmax.f32 %v1194_v8, 0.0 }
 0x194   : > { %v1524_v20 = vmax.f32 %v1220_v15, 0.0  ;;  %v1466_v15 = vmax.f32 %v1075_v50, 0.0 }
 0x195   : > { %1763 = vmatprep.subr.mxu0 %v1522_v16  ;;  %v1468_v16 = vmax.f32 %v1188_v41, 0.0 }
 0x196   : > { %1852 = vmatprep.subr.mxu1 %v1524_v20  ;;  %1764 = vmatpush1.msra.mxu0 %v1521_v19  ;;  %v1447_v19 = vmax.f32 %v1178_v32, 0.0  ;;  %v1446_v20 = vmax.f32 %v1176_v26, 0.0 }
 0x197   : > { %1853 = vmatpush1.msra.mxu1 %v1523_v22  ;;  %1765 = vmatprep.subr.mxu0 %v1511_v47 }
 0x198   : > { %1854 = vmatprep.subr.mxu1 %v1513_v0  ;;  %1766 = vmatpush1.msra.mxu0 %v1510_v27 }
 0x199   : > { %1855 = vmatpush1.msra.mxu1 %v1512_v6  ;;  %1767 = vmatprep.subr.mxu0 %v1500_v2 }
 0x19a   : > { %1856 = vmatprep.subr.mxu1 %v1502_v1  ;;  %1768 = vmatpush1.msra.mxu0 %v1499_v63 }
 0x19b   : > { %1857 = vmatpush1.msra.mxu1 %v1501_v4  ;;  %1769 = vmatprep.subr.mxu0 %v1489_v9 }
 0x19c   : > { %1858 = vmatprep.subr.mxu1 %v1491_v48  ;;  %1770 = vmatpush1.msra.mxu0 %v1488_v14 }
 0x19d   : > { %1859 = vmatpush1.msra.mxu1 %v1490_v10  ;;  %1771 = vmatprep.subr.mxu0 %v1478_v5 }
 0x19e   : > { %1860 = vmatprep.subr.mxu1 %v1480_v49  ;;  %1772 = vmatpush1.msra.mxu0 %v1477_v11 }
 0x19f   : > { %1861 = vmatpush1.msra.mxu1 %v1479_v13  ;;  %1773 = vmatprep.subr.mxu0 %v1467_v12 }
 0x1a0   : > { %1862 = vmatprep.subr.mxu1 %v1469_v40  ;;  %1774 = vmatpush1.msra.mxu0 %v1466_v15 }
 0x1a1   : > { %1863 = vmatpush1.msra.mxu1 %v1468_v16  ;;  %1775 = vmatprep.subr.mxu0 %v1456_v45 }
 0x1a2   : > { %1864 = vmatprep.subr.mxu1 %v1458_v18  ;;  %1776 = vmatpush1.msra.mxu0 %v1455_v31 }
 0x1a3   : > { %1865 = vmatpush1.msra.mxu1 %v1457_v23  ;;  %1777 = vmatprep.subr.mxu0 %v1445_v39 }
 0x1a4   : > { %1866 = vmatprep.subr.mxu1 %v1447_v19  ;;  %1778 = vmatpush1.msra.mxu0 %v1444_v28 }
 0x1a5   : > { %1867 = vmatpush1.msra.mxu1 %v1446_v20  ;;  %11351 = vmatmul.mubr.msk.f32.vlgmr.msra.gmra.mxu0 %vm1556_vm2, %v12410_v34 }
 0x1a6   : > { %11355 = vmatmul.mubr.msk.f32.vlgmr.msra.gmra.mxu1 %vm1556_vm2, %v12410_v34  ;;  %1817 = vmatprep.mubr.f32.mxu0 %v18994_v36 }
 0x1a7   : > { %1906 = vmatprep.mubr.f32.mxu1 %v18994_v36 }
 0x1a9   : > { %11352 = vmatmul.mubr.msk.f32.gmra.mxu0 %vm1556_vm2, %v12425_v17 }
 0x1aa   : > { %11356 = vmatmul.mubr.msk.f32.gmra.mxu1 %vm1556_vm2, %v12425_v17  ;;  %1823 = vmatprep.mubr.f32.mxu0 %v18994_v36 }
 0x1ab   : > { %1912 = vmatprep.mubr.f32.mxu1 %v18994_v36 }
 0x1ad   : > { %11353 = vmatmul.mubr.msk.f32.gmra.mxu0 %vm1556_vm2, %v12441_v43 }
 0x1ae   : > { %11357 = vmatmul.mubr.msk.f32.gmra.mxu1 %vm1556_vm2, %v12441_v43  ;;  %1829 = vmatprep.mubr.f32.mxu0 %v18994_v36 }
 0x1af   : > { %1918 = vmatprep.mubr.f32.mxu1 %v18994_v36 }
 0x1b1   : > { %11354 = vmatmul.mubr.msk.f32.gmra.mxu0 %vm1556_vm2, %v12457_v57 }
 0x1b2   : > { %11358 = vmatmul.mubr.msk.f32.gmra.mxu1 %vm1556_vm2, %v12457_v57  ;;  %1989 = vmatprep.mubr.f32.mxu0 %v18994_v36 }
 0x1b3   : > { %v12562_v25 = vpop.f32.mrf.mxu0  ;;  %v12564_v21 = vpop.f32.mrf.mxu1  ;;  %11512 = vmatprep.mubr.msk.f32.mxu1 %vm1556_vm2, %v12410_v34 }
 0x1b5   : > { %v12568_v38 = vpop.f32.mrf.mxu0  ;;  %v1403_v47 = vpop.f32.mrf.mxu1 }
 0x1b7   : > { %v12570_v22 = vpop.f32.mrf.mxu0  ;;  %v12572_v37 = vpop.f32.mrf.mxu1 }
 0x1b9   : > { %v12574_v58 = vpop.f32.mrf.mxu0  ;;  %v1408_v27 = vpop.f32.mrf.mxu1 }
 0x1bb   : > { %v12576_v0 = vpop.f32.mrf.mxu0  ;;  %v1411_v55 = vpop.f32.mrf.mxu1 }
 0x1bc   : > { %v1412_v20 = vadd.f32 %v1411_v55, %v12362_v46  ;;  %v1301_v55 = vadd.f32 %v12576_v0, %v12362_v46 }
 0x1bd   : > { %v1302_v24 = vpop.f32.mrf.mxu0  ;;  %v1413_v2 = vpop.f32.mrf.mxu1 }
 0x1bf   : > { %v1306_v6 = vpop.f32.mrf.mxu0  ;;  %v1416_v54 = vpop.f32.mrf.mxu1 }
 0x1c0   : > { %v1417_v39 = vadd.f32 %v1416_v54, %v12368_v51  ;;  %v1307_v2 = vadd.f32 %v1306_v6, %v12368_v51  ;;  %v1297_v6 = vadd.f32 %v12574_v58, %v12372_v53  ;;  %v1470_v58 = vmax.f32 %v1301_v55, 0.0 }
 0x1c1   : > { %v1308_v44 = vpop.f32.mrf.mxu0  ;;  %v1418_v63 = vpop.f32.mrf.mxu1 }
 0x1c2   : > { %v1309_v47 = vadd.f32 %v1308_v44, %v12368_v51  ;;  %v1407_v63 = vadd.f32 %v12572_v37, %v12372_v53  ;;  %v1402_v51 = vadd.f32 %v12564_v21, %v12364_v7  ;;  %v1289_v21 = vadd.f32 %v12562_v25, %v12364_v7 }
 0x1c3   : > { %v1312_v1 = vpop.f32.mrf.mxu0  ;;  %v1421_v52 = vpop.f32.mrf.mxu1 }
 0x1c4   : > { %v1422_v40 = vadd.f32 %v1421_v52, %v12378_v59  ;;  %v1482_v37 = vmax.f32 %v1309_v47, 0.0  ;;  %v1461_v0 = vmax.f32 %v1407_v63, 0.0 }
 0x1c5   : > { %v1314_v8 = vpop.f32.mrf.mxu0  ;;  %v1423_v9 = vpop.f32.mrf.mxu1 }
 0x1c6   : > { %v1315_v23 = vadd.f32 %v1314_v8, %v12378_v59  ;;  %v1472_v8 = vmax.f32 %v1412_v20, 0.0  ;;  %v1481_v9 = vmax.f32 %v1307_v2, 0.0 }
 0x1c7   : > { %v1318_v4 = vpop.f32.mrf.mxu0  ;;  %v1426_v50 = vpop.f32.mrf.mxu1 }
 0x1c8   : > { %v1427_v12 = vadd.f32 %v1426_v50, %v12376_v56  ;;  %v1319_v31 = vadd.f32 %v1318_v4, %v12376_v56  ;;  %v1493_v52 = vmax.f32 %v1315_v23, 0.0  ;;  %v1450_v50 = vmax.f32 %v1402_v51, 0.0 }
 0x1c9   : > { %v1320_v61 = vpop.f32.mrf.mxu0  ;;  %v1428_v14 = vpop.f32.mrf.mxu1 }
 0x1ca   : > { %v1321_v26 = vadd.f32 %v1320_v61, %v12376_v56  ;;  %v1505_v28 = vmax.f32 %v1427_v12, 0.0  ;;  %v1494_v56 = vmax.f32 %v1422_v40, 0.0  ;;  %v1503_v54 = vmax.f32 %v1319_v31, 0.0  ;;  %v12632_v14 = vld [vmem:[%s18992_s7] sm:$0xff] }
 0x1cb   : > { %v1324_v48 = vpop.f32.mrf.mxu0  ;;  %v1431_v60 = vpop.f32.mrf.mxu1  ;;  %v1460_v61 = vmax.f32 %v1297_v6, 0.0 }
 0x1cc   : > { %v1432_v42 = vadd.f32 %v1431_v60, %v12384_v3  ;;  %v1325_v15 = vadd.f32 %v1324_v48, %v12384_v3  ;;  %v1504_v27 = vmax.f32 %v1321_v26, 0.0  ;;  %v12635_v48 = vpop.permute.xlu0 %1538 }
 0x1cd   : > { %v1326_v41 = vpop.f32.mrf.mxu0  ;;  %v1433_v5 = vpop.f32.mrf.mxu1 }
 0x1ce   : > { %v1327_v13 = vadd.f32 %v1326_v41, %v12384_v3  ;;  %v1516_v45 = vmax.f32 %v1432_v42, 0.0  ;;  %v1514_v3 = vmax.f32 %v1325_v15, 0.0  ;;  %v12645_v42 = vpop.permute.xlu1 %1543 }
 0x1cf   : > { %v1330_v10 = vpop.f32.mrf.mxu0  ;;  %v1436_v33 = vpop.f32.mrf.mxu1 }
 0x1d0   : > { %v1437_v11 = vadd.f32 %v1436_v33, %v12380_v62  ;;  %v1331_v49 = vadd.f32 %v1330_v10, %v12380_v62  ;;  %v1515_v19 = vmax.f32 %v1327_v13, 0.0  ;;  %v12656_v15 = vpop.permute.xlu0 %1548 }
 0x1d1   : > { %v1332_v30 = vpop.f32.mrf.mxu0  ;;  %v1438_v35 = vpop.f32.mrf.mxu1 }
 0x1d2   : > { %v1527_v29 = vmax.f32 %v1437_v11, 0.0  ;;  %v1333_v32 = vadd.f32 %v1332_v30, %v12380_v62  ;;  %v1525_v18 = vmax.f32 %v1331_v49, 0.0  ;;  %v1313_v62 = vadd.f32 %v1312_v1, %v12378_v59 }
 0x1d3   : > { %v1303_v59 = vadd.f32 %v1302_v24, %v12362_v46  ;;  %v1483_v1 = vmax.f32 %v1417_v39, 0.0  ;;  %v1295_v24 = vadd.f32 %v12570_v22, %v12372_v53  ;;  %v1291_v46 = vadd.f32 %v12568_v38, %v12364_v7 }
 0x1d4   : > { %v1526_v16 = vmax.f32 %v1333_v32, 0.0  ;;  %11496 = vmatprep.subr.mxu1 %v1527_v29  ;;  %v1492_v44 = vmax.f32 %v1313_v62, 0.0  ;;  %v1448_v38 = vmax.f32 %v1289_v21, 0.0  ;;  %v2147_v7 = vlaneseq }
 0x1d5   : > { %11497 = vmatpush3.msra.mxu1 %v1527_v29  ;;  %v1471_v4 = vmax.f32 %v1303_v59, 0.0  ;;  %v1459_v53 = vmax.f32 %v1295_v24, 0.0  ;;  %v1449_v22 = vmax.f32 %v1291_v46, 0.0 }
 0x1d6   : > { %1941 = vmatprep.subr.mxu0 %v1526_v16  ;;  %11498 = vmatprep.subr.mxu1 %v1516_v45 }
 0x1d7   : > { %1942 = vmatpush1.msra.mxu0 %v1525_v18  ;;  %11499 = vmatpush3.msra.mxu1 %v1516_v45 }
 0x1d8   : > { %1943 = vmatprep.subr.mxu0 %v1515_v19  ;;  %11500 = vmatprep.subr.mxu1 %v1505_v28 }
 0x1d9   : > { %1944 = vmatpush1.msra.mxu0 %v1514_v3  ;;  %11501 = vmatpush3.msra.mxu1 %v1505_v28  ;;  %v12670_v28 = vpop.permute.xlu1 %1553 }
 0x1da   : > { %1945 = vmatprep.subr.mxu0 %v1504_v27  ;;  %11502 = vmatprep.subr.mxu1 %v1494_v56 }
 0x1db   : > { %1946 = vmatpush1.msra.mxu0 %v1503_v54  ;;  %11503 = vmatpush3.msra.mxu1 %v1494_v56 }
 0x1dc   : > { %1947 = vmatprep.subr.mxu0 %v1493_v52  ;;  %11504 = vmatprep.subr.mxu1 %v1483_v1 }
 0x1dd   : > { %1948 = vmatpush1.msra.mxu0 %v1492_v44  ;;  %11505 = vmatpush3.msra.mxu1 %v1483_v1 }
 0x1de   : > { %1949 = vmatprep.subr.mxu0 %v1482_v37  ;;  %11506 = vmatprep.subr.mxu1 %v1472_v8 }
 0x1df   : > { %1950 = vmatpush1.msra.mxu0 %v1481_v9  ;;  %11507 = vmatpush3.msra.mxu1 %v1472_v8 }
 0x1e0   : > { %1951 = vmatprep.subr.mxu0 %v1471_v4  ;;  %11508 = vmatprep.subr.mxu1 %v1461_v0 }
 0x1e1   : > { %1952 = vmatpush1.msra.mxu0 %v1470_v58  ;;  %11509 = vmatpush3.msra.mxu1 %v1461_v0 }
 0x1e2   : > { %1953 = vmatprep.subr.mxu0 %v1460_v61  ;;  %11510 = vmatprep.subr.mxu1 %v1450_v50 }
 0x1e3   : > { %1954 = vmatpush1.msra.mxu0 %v1459_v53  ;;  %11511 = vmatpush3.msra.mxu1 %v1450_v50 }
 0x1e4   : > { %1955 = vmatprep.subr.mxu0 %v1449_v22  ;;  %11513 = vmatmul.mubr.msk.f32.vlgmr.msra.gmra.mxu1 %vm1556_vm2, %v12425_v17 }
 0x1e5   : > { %1956 = vmatpush1.msra.mxu0 %v1448_v38  ;;  %11515 = vmatprep.mubr.msk.f32.mxu1 %vm1556_vm2, %v12441_v43 }
 0x1e6   : > { %11359 = vmatmul.mubr.msk.f32.vlgmr.msra.gmra.mxu0 %vm1556_vm2, %v12410_v34  ;;  %v12626_v34 = vshrl.u32 %v2147_v7, 7 }
 0x1e7   : > { %1995 = vmatprep.mubr.f32.mxu0 %v18994_v36 }
 0x1e8   : > { %11516 = vmatmul.mubr.msk.f32.gmra.mxu1 %vm1556_vm2, %v12457_v57  ;;  %v2149_v25 = vsub.s32 0, %v12626_v34  ;;  %v2157_v47 = vsub.s32 2, %v12626_v34  ;;  %v2161_v63 = vsub.s32 3, %v12626_v34 }
 0x1ea   : > { %11360 = vmatmul.mubr.msk.f32.gmra.mxu0 %vm1556_vm2, %v12425_v17  ;;  %v2153_v17 = vsub.s32 1, %v12626_v34  ;;  %v2158_v44 = vrot.slane %v12632_v14, %v2157_v47  ;;  %v2162_v24 = vrot.slane %v12632_v14, %v2161_v63 }
 0x1eb   : > { %2001 = vmatprep.mubr.f32.mxu0 %v18994_v36 }
 0x1ec   : > { %v2154_v33 = vrot.slane %v12632_v14, %v2153_v17 }
 0x1ee   : > { %11361 = vmatmul.mubr.msk.f32.gmra.mxu0 %vm1556_vm2, %v12441_v43 }
 0x1ef   : > { %2007 = vmatprep.mubr.f32.mxu0 %v18994_v36 }
 0x1f2   : > { %11362 = vmatmul.mubr.msk.f32.gmra.mxu0 %vm1556_vm2, %v12457_v57  ;;  %v2150_v57 = vrot.slane %v12632_v14, %v2149_v25  ;;  %vm19421_vm2 = vcmask 441344  }
 0x211   : > { %v1635_v43 = vpop.f32.mrf.mxu1 }
 0x212   : > { %v1636_v60 = vadd.f32 %v1635_v43, %v12635_v48 }
 0x213   : > { %v1637_v41 = vpop.f32.mrf.mxu1 }
 0x214   : > { %v2099_v5 = vmax.f32 %v1636_v60, 0.0  ;;  %v1638_v10 = vadd.f32 %v1637_v41, %v12635_v48 }
 0x215   : > { %v1641_v11 = vpop.f32.mrf.mxu1 }
 0x216   : > { %v12647_v49 = vmul.f32 %v2150_v57, %v2099_v5  ;;  %v2100_v30 = vmax.f32 %v1638_v10, 0.0  ;;  %v1642_v35 = vadd.f32 %v1641_v11, %v12645_v42 }
 0x217   : > { %v1643_v12 = vpop.f32.mrf.mxu1 }
 0x218   : > { %2291 = vst [vmem:[#allocation2] sm:$0xff] %v12647_v49  ;;  %v12651_v13 = vmul.f32 %v2154_v33, %v2100_v30  ;;  %v2110_v29 = vmax.f32 %v1642_v35, 0.0  ;;  %v1644_v32 = vadd.f32 %v1643_v12, %v12645_v42  ;;  %2488 = vrot.lane.b32.xlu0 %v12647_v49, %s11601_s12 }
 0x219   : > { %v1647_v40 = vpop.f32.mrf.mxu1 }
 0x21a   : > { %2292 = vst [vmem:[#allocation2 + $0x8] sm:$0xff] %v12651_v13  ;;  %v12659_v26 = vmul.f32 %v2150_v57, %v2110_v29  ;;  %v2111_v45 = vmax.f32 %v1644_v32, 0.0  ;;  %v1648_v16 = vadd.f32 %v1647_v40, %v12656_v15  ;;  %2490 = vrot.lane.b32.xlu1 %v12651_v13, %s11601_s12 }
 0x21b   : > { %v1649_v31 = vpop.f32.mrf.mxu1 }
 0x21c   : > { %2303 = vst [vmem:[#allocation2 + $0x58] sm:$0xff] %v12659_v26  ;;  %v12665_v18 = vmul.f32 %v2154_v33, %v2111_v45  ;;  %v2121_v39 = vmax.f32 %v1648_v16, 0.0  ;;  %v1650_v23 = vadd.f32 %v1649_v31, %v12656_v15  ;;  %2757 = vrot.lane.b32.xlu0 %v12647_v49, %s11602_s16  ;;  %v2177_v31 = vsub.s32 7, %v12626_v34 }
 0x21d   : > { %v1653_v19 = vpop.f32.mrf.mxu1 }
 0x21e   : > { %2304 = vst [vmem:[#allocation2 + $0x60] sm:$0xff] %v12665_v18  ;;  %v12673_v62 = vmul.f32 %v2150_v57, %v2121_v39  ;;  %v2122_v3 = vmax.f32 %v1650_v23, 0.0  ;;  %v1654_v20 = vadd.f32 %v1653_v19, %v12670_v28  ;;  %2759 = vrot.lane.b32.xlu1 %v12651_v13, %s11602_s16 }
 0x21f   : > { %v1655_v56 = vpop.f32.mrf.mxu1 }
 0x220   : > { %2314 = vst [vmem:[#allocation2 + $0xb0] sm:$0xff] %v12673_v62  ;;  %v12680_v27 = vmul.f32 %v2154_v33, %v2122_v3  ;;  %v2132_v2 = vmax.f32 %v1654_v20, 0.0  ;;  %v1656_v54 = vadd.f32 %v1655_v56, %v12670_v28  ;;  %3026 = vrot.lane.b32.xlu0 %v12647_v49, %s11603_s17 }
 0x221   : > { %v1724_v59 = vpop.f32.mrf.mxu1 }
 0x222   : > { %2315 = vst [vmem:[#allocation2 + $0xb8] sm:$0xff] %v12680_v27  ;;  %v12687_v1 = vmul.f32 %v2150_v57, %v2132_v2  ;;  %v2133_v52 = vmax.f32 %v1656_v54, 0.0  ;;  %v1725_v55 = vadd.f32 %v1724_v59, %v12635_v48  ;;  %3028 = vrot.lane.b32.xlu1 %v12651_v13, %s11603_s17 }
 0x223   : > { %v1726_v51 = vpop.f32.mrf.mxu1 }
 0x224   : > { %2325 = vst [vmem:[#allocation2 + $0x108] sm:$0xff] %v12687_v1  ;;  %v12696_v6 = vmul.f32 %v2154_v33, %v2133_v52  ;;  %v2101_v8 = vmax.f32 %v1725_v55, 0.0  ;;  %v1727_v37 = vadd.f32 %v1726_v51, %v12635_v48  ;;  %3295 = vrot.lane.b32.xlu0 %v12647_v49, %s11604_s18  ;;  %v12825_v55 = vrot.slane %v12632_v14, %v2177_v31 }
 0x225   : > { %v1730_v9 = vpop.f32.mrf.mxu1 }
 0x226   : > { %2326 = vst [vmem:[#allocation2 + $0x110] sm:$0xff] %v12696_v6  ;;  %v12703_v46 = vmul.f32 %v2158_v44, %v2101_v8  ;;  %v2102_v0 = vmax.f32 %v1727_v37, 0.0  ;;  %v1731_v4 = vadd.f32 %v1730_v9, %v12645_v42  ;;  %3297 = vrot.lane.b32.xlu1 %v12651_v13, %s11604_s18 }
 0x227   : > { %v1732_v21 = vpop.f32.mrf.mxu1 }
 0x228   : > { %2293 = vst [vmem:[#allocation2 + $0x10] sm:$0xff] %v12703_v46  ;;  %v12709_v58 = vmul.f32 %v2162_v24, %v2102_v0  ;;  %v2112_v50 = vmax.f32 %v1731_v4, 0.0  ;;  %v1733_v61 = vadd.f32 %v1732_v21, %v12645_v42  ;;  %3564 = vrot.lane.b32.xlu0 %v12647_v49, %s11605_s19 }
 0x229   : > { %v1736_v53 = vpop.f32.mrf.mxu1 }
 0x22a   : > { %2294 = vst [vmem:[#allocation2 + $0x18] sm:$0xff] %v12709_v58  ;;  %v12723_v22 = vmul.f32 %v2158_v44, %v2112_v50  ;;  %v2113_v38 = vmax.f32 %v1733_v61, 0.0  ;;  %v1737_v7 = vadd.f32 %v1736_v53, %v12656_v15  ;;  %3566 = vrot.lane.b32.xlu1 %v12651_v13, %s11605_s19 }
 0x22b   : > { %v1738_v43 = vpop.f32.mrf.mxu1 }
 0x22c   : > { %2305 = vst [vmem:[#allocation2 + $0x68] sm:$0xff] %v12723_v22  ;;  %v12729_v60 = vmul.f32 %v2162_v24, %v2113_v38  ;;  %v2123_v57 = vmax.f32 %v1737_v7, 0.0  ;;  %v1739_v41 = vadd.f32 %v1738_v43, %v12656_v15  ;;  %3833 = vrot.lane.b32.xlu0 %v12647_v49, %s11606_s20 }
 0x22d   : > { %v1742_v5 = vpop.f32.mrf.mxu1 }
 0x22e   : > { %2306 = vst [vmem:[#allocation2 + $0x70] sm:$0xff] %v12729_v60  ;;  %v12735_v10 = vmul.f32 %v2158_v44, %v2123_v57  ;;  %v2124_v33 = vmax.f32 %v1739_v41, 0.0  ;;  %v1743_v11 = vadd.f32 %v1742_v5, %v12670_v28  ;;  %3835 = vrot.lane.b32.xlu1 %v12651_v13, %s11606_s20 }
 0x22f   : > { %v1744_v30 = vpop.f32.mrf.mxu1 }
 0x230   : > { %2316 = vst [vmem:[#allocation2 + $0xc0] sm:$0xff] %v12735_v10  ;;  %v12741_v35 = vmul.f32 %v2162_v24, %v2124_v33  ;;  %v2134_v12 = vmax.f32 %v1743_v11, 0.0  ;;  %v1745_v29 = vadd.f32 %v1744_v30, %v12670_v28  ;;  %4102 = vrot.lane.b32.xlu0 %v12647_v49, %s11607_s21 }
 0x232   : > { %2317 = vst [vmem:[#allocation2 + $0xc8] sm:$0xff] %v12741_v35  ;;  %v12747_v32 = vmul.f32 %v2158_v44, %v2134_v12  ;;  %v2135_v40 = vmax.f32 %v1745_v29, 0.0  ;;  %4104 = vrot.lane.b32.xlu1 %v12651_v13, %s11607_s21 }
 0x234   : > { %2327 = vst [vmem:[#allocation2 + $0x118] sm:$0xff] %v12747_v32  ;;  %v12752_v45 = vmul.f32 %v2162_v24, %v2135_v40  ;;  %4371 = vrot.lane.b32.xlu0 %v12647_v49, %s11608_s22  ;;  %v2165_v49 = vsub.s32 4, %v12626_v34 }
 0x236   : > { %2328 = vst [vmem:[#allocation2 + $0x120] sm:$0xff] %v12752_v45  ;;  %4373 = vrot.lane.b32.xlu1 %v12651_v13, %s11608_s22  ;;  %v2173_v13 = vsub.s32 6, %v12626_v34  ;;  %v12811_v39 = vrot.slane %v12632_v14, %v2165_v49 }
 0x238   : > { %2508 = vrot.lane.b32.xlu0 %v12659_v26, %s11601_s12  ;;  %v12815_v3 = vrot.slane %v12632_v14, %v2173_v13 }
 0x23a   : > { %2510 = vrot.lane.b32.xlu1 %v12665_v18, %s11601_s12 }
 0x23c   : > { %2777 = vrot.lane.b32.xlu0 %v12659_v26, %s11602_s16 }
 0x23e   : > { %2779 = vrot.lane.b32.xlu1 %v12665_v18, %s11602_s16 }
 0x240   : > { %3046 = vrot.lane.b32.xlu0 %v12659_v26, %s11603_s17 }
 0x242   : > { %3048 = vrot.lane.b32.xlu1 %v12665_v18, %s11603_s17 }
 0x244   : > { %3315 = vrot.lane.b32.xlu0 %v12659_v26, %s11604_s18 }
 0x246   : > { %3317 = vrot.lane.b32.xlu1 %v12665_v18, %s11604_s18 }
 0x248   : > { %3584 = vrot.lane.b32.xlu0 %v12659_v26, %s11605_s19 }
 0x24a   : > { %3586 = vrot.lane.b32.xlu1 %v12665_v18, %s11605_s19 }
 0x24c   : > { %3853 = vrot.lane.b32.xlu0 %v12659_v26, %s11606_s20 }
 0x24e   : > { %3855 = vrot.lane.b32.xlu1 %v12665_v18, %s11606_s20 }
 0x250   : > { %4122 = vrot.lane.b32.xlu0 %v12659_v26, %s11607_s21 }
 0x252   : > { %4124 = vrot.lane.b32.xlu1 %v12665_v18, %s11607_s21 }
 0x254   : > { %4391 = vrot.lane.b32.xlu0 %v12659_v26, %s11608_s22  ;;  %v2169_v26 = vsub.s32 5, %v12626_v34 }
 0x256   : > { %4393 = vrot.lane.b32.xlu1 %v12665_v18, %s11608_s22  ;;  %v12821_v54 = vrot.slane %v12632_v14, %v2169_v26 }
 0x258   : > { %2528 = vrot.lane.b32.xlu0 %v12673_v62, %s11601_s12 }
 0x25a   : > { %2530 = vrot.lane.b32.xlu1 %v12680_v27, %s11601_s12 }
 0x25c   : > { %2797 = vrot.lane.b32.xlu0 %v12673_v62, %s11602_s16 }
 0x25e   : > { %2799 = vrot.lane.b32.xlu1 %v12680_v27, %s11602_s16 }
 0x260   : > { %3066 = vrot.lane.b32.xlu0 %v12673_v62, %s11603_s17 }
 0x262   : > { %3068 = vrot.lane.b32.xlu1 %v12680_v27, %s11603_s17 }
 0x264   : > { %3335 = vrot.lane.b32.xlu0 %v12673_v62, %s11604_s18 }
 0x265   : > { %v1813_v16 = vpop.f32.mrf.mxu0 }
 0x266   : > { %v1814_v18 = vadd.f32 %v1813_v16, %v12635_v48  ;;  %v1902_v23 = vpop.f32.mrf.mxu1  ;;  %3337 = vrot.lane.b32.xlu1 %v12680_v27, %s11604_s18 }
 0x267   : > { %v1903_v19 = vadd.f32 %v1902_v23, %v12635_v48  ;;  %v1815_v20 = vpop.f32.mrf.mxu0 }
 0x268   : > { %v2103_v56 = vmax.f32 %v1814_v18, 0.0  ;;  %v1816_v2 = vadd.f32 %v1815_v20, %v12635_v48  ;;  %v1904_v63 = vpop.f32.mrf.mxu1  ;;  %3604 = vrot.lane.b32.xlu0 %v12673_v62, %s11605_s19 }
 0x269   : > { %v2105_v59 = vmax.f32 %v1903_v19, 0.0  ;;  %v1905_v52 = vadd.f32 %v1904_v63, %v12635_v48  ;;  %v1819_v44 = vpop.f32.mrf.mxu0 }
 0x26a   : > { %v12830_v51 = vmul.f32 %v12811_v39, %v2103_v56  ;;  %v2104_v8 = vmax.f32 %v1816_v2, 0.0  ;;  %v1820_v37 = vadd.f32 %v1819_v44, %v12645_v42  ;;  %v1908_v24 = vpop.f32.mrf.mxu1  ;;  %3606 = vrot.lane.b32.xlu1 %v12680_v27, %s11605_s19 }
 0x26b   : > { %v12834_v9 = vmul.f32 %v12815_v3, %v2105_v59  ;;  %v2106_v0 = vmax.f32 %v1905_v52, 0.0  ;;  %v1909_v4 = vadd.f32 %v1908_v24, %v12645_v42  ;;  %v1821_v21 = vpop.f32.mrf.mxu0 }
 0x26c   : > { %2295 = vst [vmem:[#allocation2 + $0x20] sm:$0xff] %v12830_v51  ;;  %v12841_v14 = vmul.f32 %v12821_v54, %v2104_v8  ;;  %v2114_v50 = vmax.f32 %v1820_v37, 0.0  ;;  %v1822_v61 = vadd.f32 %v1821_v21, %v12645_v42  ;;  %v1910_v53 = vpop.f32.mrf.mxu1  ;;  %3873 = vrot.lane.b32.xlu0 %v12673_v62, %s11606_s20 }
 0x26d   : > { %2297 = vst [vmem:[#allocation2 + $0x30] sm:$0xff] %v12834_v9  ;;  %v12846_v38 = vmul.f32 %v12825_v55, %v2106_v0  ;;  %v2116_v7 = vmax.f32 %v1909_v4, 0.0  ;;  %v1911_v43 = vadd.f32 %v1910_v53, %v12645_v42  ;;  %v1825_v57 = vpop.f32.mrf.mxu0 }
 0x26e   : > { %2296 = vst [vmem:[#allocation2 + $0x28] sm:$0xff] %v12841_v14  ;;  %v12853_v41 = vmul.f32 %v12811_v39, %v2114_v50  ;;  %v2115_v5 = vmax.f32 %v1822_v61, 0.0  ;;  %v1826_v33 = vadd.f32 %v1825_v57, %v12656_v15  ;;  %v1914_v11 = vpop.f32.mrf.mxu1  ;;  %3875 = vrot.lane.b32.xlu1 %v12680_v27, %s11606_s20 }
 0x26f   : > { %2298 = vst [vmem:[#allocation2 + $0x38] sm:$0xff] %v12846_v38  ;;  %v12858_v30 = vmul.f32 %v12815_v3, %v2116_v7  ;;  %v2117_v12 = vmax.f32 %v1911_v43, 0.0  ;;  %v1915_v29 = vadd.f32 %v1914_v11, %v12656_v15  ;;  %v1827_v40 = vpop.f32.mrf.mxu0 }
 0x270   : > { %2307 = vst [vmem:[#allocation2 + $0x78] sm:$0xff] %v12853_v41  ;;  %v12865_v49 = vmul.f32 %v12821_v54, %v2115_v5  ;;  %v2125_v13 = vmax.f32 %v1826_v33, 0.0  ;;  %v1828_v26 = vadd.f32 %v1827_v40, %v12656_v15  ;;  %v1916_v16 = vpop.f32.mrf.mxu1  ;;  %4142 = vrot.lane.b32.xlu0 %v12673_v62, %s11607_s21 }
 0x271   : > { %2309 = vst [vmem:[#allocation2 + $0x88] sm:$0xff] %v12858_v30  ;;  %v12870_v31 = vmul.f32 %v12825_v55, %v2117_v12  ;;  %v2127_v18 = vmax.f32 %v1915_v29, 0.0  ;;  %v1917_v23 = vadd.f32 %v1916_v16, %v12656_v15  ;;  %v1831_v19 = vpop.f32.mrf.mxu0 }
 0x272   : > { %2308 = vst [vmem:[#allocation2 + $0x80] sm:$0xff] %v12865_v49  ;;  %v2228_v20 = vmul.f32 %v12811_v39, %v2125_v13  ;;  %v2126_v56 = vmax.f32 %v1828_v26, 0.0  ;;  %v1832_v2 = vadd.f32 %v1831_v19, %v12670_v28  ;;  %v1920_v63 = vpop.f32.mrf.mxu1  ;;  %4144 = vrot.lane.b32.xlu1 %v12680_v27, %s11607_s21  ;;  %v2144_v13 = vld [vmem:[%s18992_s7 + $0x8] sm:$0x7] }
 0x273   : > { %2310 = vst [vmem:[#allocation2 + $0x90] sm:$0xff] %v12870_v31  ;;  %v2230_v59 = vmul.f32 %v12815_v3, %v2127_v18  ;;  %v2128_v52 = vmax.f32 %v1917_v23, 0.0  ;;  %v1921_v44 = vadd.f32 %v1920_v63, %v12670_v28  ;;  %v1833_v8 = vpop.f32.mrf.mxu0  ;;  %v2190_v23 = vrot.slane %v2144_v13, %v2157_v47 }
 0x274   : > { %2318 = vst [vmem:[#allocation2 + $0xd0] sm:$0xff] %v2228_v20  ;;  %v2229_v37 = vmul.f32 %v12821_v54, %v2126_v56  ;;  %v2136_v24 = vmax.f32 %v1832_v2, 0.0  ;;  %v1834_v0 = vadd.f32 %v1833_v8, %v12670_v28  ;;  %v1922_v4 = vpop.f32.mrf.mxu1  ;;  %4411 = vrot.lane.b32.xlu0 %v12673_v62, %s11608_s22  ;;  %v12987_v8 = vrot.slane %v2144_v13, %v2153_v17 }
 0x275   : > { %2320 = vst [vmem:[#allocation2 + $0xe0] sm:$0xff] %v2230_v59  ;;  %v2231_v21 = vmul.f32 %v12825_v55, %v2128_v52  ;;  %v2138_v50 = vmax.f32 %v1921_v44, 0.0  ;;  %v1923_v61 = vadd.f32 %v1922_v4, %v12670_v28  ;;  %v12978_v59 = vrot.slane %v2144_v13, %v2149_v25 }
 0x276   : > { %2319 = vst [vmem:[#allocation2 + $0xd8] sm:$0xff] %v2229_v37  ;;  %v2239_v53 = vmul.f32 %v12811_v39, %v2136_v24  ;;  %v2137_v7 = vmax.f32 %v1834_v0, 0.0  ;;  %4413 = vrot.lane.b32.xlu1 %v12680_v27, %s11608_s22 }
 0x277   : > { %2321 = vst [vmem:[#allocation2 + $0xe8] sm:$0xff] %v2231_v21  ;;  %v2241_v43 = vmul.f32 %v12815_v3, %v2138_v50  ;;  %v2139_v57 = vmax.f32 %v1923_v61, 0.0 }
 0x278   : > { %2329 = vst [vmem:[#allocation2 + $0x128] sm:$0xff] %v2239_v53  ;;  %v2240_v5 = vmul.f32 %v12821_v54, %v2137_v7  ;;  %2548 = vrot.lane.b32.xlu0 %v12687_v1, %s11601_s12 }
 0x279   : > { %2331 = vst [vmem:[#allocation2 + $0x138] sm:$0xff] %v2241_v43  ;;  %v2242_v33 = vmul.f32 %v12825_v55, %v2139_v57 }
 0x27a   : > { %2330 = vst [vmem:[#allocation2 + $0x130] sm:$0xff] %v2240_v5  ;;  %2550 = vrot.lane.b32.xlu1 %v12696_v6, %s11601_s12 }
 0x27b   : > { %2332 = vst [vmem:[#allocation2 + $0x140] sm:$0xff] %v2242_v33 }
 0x27c   : > { %2817 = vrot.lane.b32.xlu0 %v12687_v1, %s11602_s16 }
 0x27e   : > { %2819 = vrot.lane.b32.xlu1 %v12696_v6, %s11602_s16 }
 0x280   : > { %3086 = vrot.lane.b32.xlu0 %v12687_v1, %s11603_s17 }
 0x282   : > { %3088 = vrot.lane.b32.xlu1 %v12696_v6, %s11603_s17 }
 0x284   : > { %3355 = vrot.lane.b32.xlu0 %v12687_v1, %s11604_s18 }
 0x286   : > { %3357 = vrot.lane.b32.xlu1 %v12696_v6, %s11604_s18 }
 0x288   : > { %3624 = vrot.lane.b32.xlu0 %v12687_v1, %s11605_s19 }
 0x28a   : > { %3626 = vrot.lane.b32.xlu1 %v12696_v6, %s11605_s19  ;;  %v12915_v62 = vpop.permute.xlu0 %2488 }
 0x28c   : > { %v12917_v27 = vpop.permute.xlu1 %2490  ;;  %3893 = vrot.lane.b32.xlu0 %v12687_v1, %s11606_s20 }
 0x28e   : > { %3895 = vrot.lane.b32.xlu1 %v12696_v6, %s11606_s20  ;;  %v12923_v39 = vpop.permute.xlu0 %2757 }
 0x290   : > { %v12925_v3 = vpop.permute.xlu1 %2759  ;;  %4162 = vrot.lane.b32.xlu0 %v12687_v1, %s11607_s21 }
 0x292   : > { %4164 = vrot.lane.b32.xlu1 %v12696_v6, %s11607_s21  ;;  %v12931_v54 = vpop.permute.xlu0 %3026 }
 0x294   : > { %v12933_v55 = vpop.permute.xlu1 %3028  ;;  %4431 = vrot.lane.b32.xlu0 %v12687_v1, %s11608_s22 }
 0x296   : > { %4433 = vrot.lane.b32.xlu1 %v12696_v6, %s11608_s22  ;;  %v12939_v11 = vpop.permute.xlu0 %3295 }
 0x297   : > { %19518 = vst [vmem:[#allocation4_spill] sm:$0xff] %v12939_v11 }
 0x298   : > { %v12941_v12 = vpop.permute.xlu1 %3297  ;;  %2492 = vrot.lane.b32.xlu0 %v12703_v46, %s11601_s12 }
 0x299   : > { %19519 = vst [vmem:[#allocation5_spill] sm:$0xff] %v12941_v12 }
 0x29a   : > { %2494 = vrot.lane.b32.xlu1 %v12709_v58, %s11601_s12  ;;  %v12947_v29 = vpop.permute.xlu0 %3564 }
 0x29b   : > { %19520 = vst [vmem:[#allocation6_spill] sm:$0xff] %v12947_v29 }
 0x29c   : > { %v12949_v40 = vpop.permute.xlu1 %3566  ;;  %2761 = vrot.lane.b32.xlu0 %v12703_v46, %s11602_s16 }
 0x29d   : > { %19521 = vst [vmem:[#allocation7_spill] sm:$0xff] %v12949_v40 }
 0x29e   : > { %2763 = vrot.lane.b32.xlu1 %v12709_v58, %s11602_s16  ;;  %v12955_v1 = vpop.permute.xlu0 %3833 }
 0x29f   : > { %19522 = vst [vmem:[#allocation8_spill] sm:$0xff] %v12955_v1 }
 0x2a0   : > { %v12957_v6 = vpop.permute.xlu1 %3835  ;;  %3030 = vrot.lane.b32.xlu0 %v12703_v46, %s11603_s17 }
 0x2a1   : > { %19523 = vst [vmem:[#allocation9_spill] sm:$0xff] %v12957_v6 }
 0x2a2   : > { %3032 = vrot.lane.b32.xlu1 %v12709_v58, %s11603_s17  ;;  %v12966_v26 = vpop.permute.xlu0 %4102 }
 0x2a4   : > { %v11514_v16 = vpop.f32.mrf.mxu1  ;;  %v12971_v19 = vpop.permute.xlu1 %4104  ;;  %3299 = vrot.lane.b32.xlu0 %v12703_v46, %s11604_s18 }
 0x2a5   : > { %v2086_v18 = vadd.f32 %v11514_v16, %v12645_v42 }
 0x2a6   : > { %v1991_v20 = vpop.f32.mrf.mxu0  ;;  %v2080_v56 = vpop.f32.mrf.mxu1  ;;  %3301 = vrot.lane.b32.xlu1 %v12709_v58, %s11604_s18 }
 0x2a7   : > { %v2120_v2 = vmax.f32 %v2086_v18, 0.0  ;;  %v1992_v63 = vadd.f32 %v1991_v20, %v12635_v48  ;;  %v2081_v52 = vadd.f32 %v2080_v56, %v12635_v48  ;;  %v12983_v47 = vpop.permute.xlu0 %4371 }
 0x2a8   : > { %19524 = vst [vmem:[#allocation10_spill] sm:$0xff] %v12983_v47  ;;  %v1993_v44 = vpop.f32.mrf.mxu0  ;;  %v11517_v37 = vpop.f32.mrf.mxu1  ;;  %3568 = vrot.lane.b32.xlu0 %v12703_v46, %s11605_s19 }
 0x2a9   : > { %v2223_v24 = vmul.f32 %v2190_v23, %v2120_v2  ;;  %v2107_v0 = vmax.f32 %v1992_v63, 0.0  ;;  %v2109_v4 = vmax.f32 %v2081_v52, 0.0  ;;  %v1994_v25 = vadd.f32 %v1993_v44, %v12635_v48  ;;  %v12990_v21 = vpop.permute.xlu1 %4373 }
 0x2aa   : > { %19525 = vst [vmem:[#allocation11_spill] sm:$0xff] %v12990_v21  ;;  %v2096_v50 = vadd.f32 %v11517_v37, %v12670_v28  ;;  %v1997_v61 = vpop.f32.mrf.mxu0  ;;  %v2090_v53 = vpop.f32.mrf.mxu1  ;;  %3570 = vrot.lane.b32.xlu1 %v12709_v58, %s11605_s19 }
 0x2ab   : > { %2313 = vst.msk [vmem:[#allocation2 + $0xa8] sm:$0xff] %vm19512_vm4, %v2223_v24  ;;  %v2210_v34 = vmul.f32 %v12978_v59, %v2107_v0  ;;  %v2212_v17 = vmul.f32 %v2190_v23, %v2109_v4  ;;  %v2108_v7 = vmax.f32 %v1994_v25, 0.0  ;;  %v1998_v43 = vadd.f32 %v1997_v61, %v12645_v42  ;;  %v13000_v48 = vpop.permute.xlu0 %2508 }
 0x2ac   : > { %v2142_v57 = vmax.f32 %v2096_v50, 0.0  ;;  %v2091_v5 = vadd.f32 %v2090_v53, %v12656_v15  ;;  %v1999_v33 = vpop.f32.mrf.mxu0  ;;  %3837 = vrot.lane.b32.xlu0 %v12703_v46, %s11606_s20 }
 0x2ad   : > { %2299 = vst [vmem:[#allocation2 + $0x40] sm:$0xff] %v2210_v34  ;;  %2302 = vst.msk [vmem:[#allocation2 + $0x50] sm:$0xff] %vm19512_vm4, %v2212_v17  ;;  %v2211_v13 = vmul.f32 %v12987_v8, %v2108_v7  ;;  %v2118_v16 = vmax.f32 %v1998_v43, 0.0  ;;  %v2000_v18 = vadd.f32 %v1999_v33, %v12645_v42  ;;  %v13006_v20 = vpop.permute.xlu1 %2510 }
 0x2ae   : > { %v2245_v56 = vmul.f32 %v2190_v23, %v2142_v57  ;;  %v2131_v2 = vmax.f32 %v2091_v5, 0.0  ;;  %v2003_v63 = vpop.f32.mrf.mxu0  ;;  %3839 = vrot.lane.b32.xlu1 %v12709_v58, %s11606_s20 }
 0x2af   : > { %2300 = vst [vmem:[#allocation2 + $0x48] sm:$0xff] %v2211_v13  ;;  %v2221_v52 = vmul.f32 %v12978_v59, %v2118_v16  ;;  %v2119_v44 = vmax.f32 %v2000_v18, 0.0  ;;  %v2004_v37 = vadd.f32 %v2003_v63, %v12656_v15  ;;  %v13014_v24 = vpop.permute.xlu0 %2777 }
 0x2b0   : > { %2335 = vst.msk [vmem:[#allocation2 + $0x158] sm:$0xff] %vm19512_vm4, %v2245_v56  ;;  %v2234_v42 = vmul.f32 %v2190_v23, %v2131_v2  ;;  %v2005_v0 = vpop.f32.mrf.mxu0  ;;  %4106 = vrot.lane.b32.xlu0 %v12703_v46, %s11607_s21 }
 0x2b1   : > { %2311 = vst [vmem:[#allocation2 + $0x98] sm:$0xff] %v2221_v52  ;;  %v2222_v4 = vmul.f32 %v12987_v8, %v2119_v44  ;;  %v2129_v25 = vmax.f32 %v2004_v37, 0.0  ;;  %v2006_v50 = vadd.f32 %v2005_v0, %v12656_v15  ;;  %v13019_v61 = vpop.permute.xlu1 %2779 }
 0x2b2   : > { %2324 = vst.msk [vmem:[#allocation2 + $0x100] sm:$0xff] %vm19512_vm4, %v2234_v42  ;;  %v2009_v53 = vpop.f32.mrf.mxu0  ;;  %4108 = vrot.lane.b32.xlu1 %v12709_v58, %s11607_s21 }
 0x2b3   : > { %2312 = vst [vmem:[#allocation2 + $0xa0] sm:$0xff] %v2222_v4  ;;  %v2232_v34 = vmul.f32 %v12978_v59, %v2129_v25  ;;  %v2130_v17 = vmax.f32 %v2006_v50, 0.0  ;;  %v2010_v23 = vadd.f32 %v2009_v53, %v12670_v28  ;;  %v13028_v7 = vpop.permute.xlu0 %3046 }
 0x2b4   : > { %v2011_v15 = vpop.f32.mrf.mxu0  ;;  %4375 = vrot.lane.b32.xlu0 %v12703_v46, %s11608_s22 }
 0x2b5   : > { %2322 = vst [vmem:[#allocation2 + $0xf0] sm:$0xff] %v2232_v34  ;;  %v2233_v43 = vmul.f32 %v12987_v8, %v2130_v17  ;;  %v2140_v57 = vmax.f32 %v2010_v23, 0.0  ;;  %v2012_v5 = vadd.f32 %v2011_v15, %v12670_v28  ;;  %v13032_v33 = vpop.permute.xlu1 %3048 }
 0x2b6   : > { %4377 = vrot.lane.b32.xlu1 %v12709_v58, %s11608_s22 }
 0x2b7   : > { %2323 = vst [vmem:[#allocation2 + $0xf8] sm:$0xff] %v2233_v43  ;;  %v2243_v13 = vmul.f32 %v12978_v59, %v2140_v57  ;;  %v2141_v16 = vmax.f32 %v2012_v5, 0.0  ;;  %v13039_v18 = vpop.permute.xlu0 %3315 }
 0x2b8   : > { %19526 = vst [vmem:[#allocation12_spill] sm:$0xff] %v13039_v18  ;;  %2512 = vrot.lane.b32.xlu0 %v12723_v22, %s11601_s12 }
 0x2b9   : > { %2333 = vst [vmem:[#allocation2 + $0x148] sm:$0xff] %v2243_v13  ;;  %v2244_v56 = vmul.f32 %v12987_v8, %v2141_v16  ;;  %v13042_v2 = vpop.permute.xlu1 %3317 }
 0x2ba   : > { %19527 = vst [vmem:[#allocation13_spill] sm:$0xff] %v13042_v2  ;;  %2514 = vrot.lane.b32.xlu1 %v12729_v60, %s11601_s12 }
 0x2bb   : > { %2334 = vst [vmem:[#allocation2 + $0x150] sm:$0xff] %v2244_v56  ;;  %v13048_v28 = vpop.permute.xlu0 %3584 }
 0x2bc   : > { %19528 = vst [vmem:[#allocation14_spill] sm:$0xff] %v13048_v28  ;;  %2781 = vrot.lane.b32.xlu0 %v12723_v22, %s11602_s16 }
 0x2bd   : > { %v13050_v46 = vpop.permute.xlu1 %3586 }
 0x2be   : > { %19529 = vst [vmem:[#allocation15_spill] sm:$0xff] %v13050_v46  ;;  %2783 = vrot.lane.b32.xlu1 %v12729_v60, %s11602_s16 }
 0x2bf   : > { %v13056_v58 = vpop.permute.xlu0 %3853 }
 0x2c0   : > { %3050 = vrot.lane.b32.xlu0 %v12723_v22, %s11603_s17 }
 0x2c1   : > { %v13058_v59 = vpop.permute.xlu1 %3855 }
 0x2c2   : > { %3052 = vrot.lane.b32.xlu1 %v12729_v60, %s11603_s17 }
 0x2c3   : > { %v13064_v8 = vpop.permute.xlu0 %4122 }
 0x2c4   : > { %3319 = vrot.lane.b32.xlu0 %v12723_v22, %s11604_s18 }
 0x2c5   : > { %v13066_v63 = vpop.permute.xlu1 %4124 }
 0x2c6   : > { %3321 = vrot.lane.b32.xlu1 %v12729_v60, %s11604_s18 }
 0x2c7   : > { %v13072_v52 = vpop.permute.xlu0 %4391 }
 0x2c8   : > { %19530 = vst [vmem:[#allocation16_spill] sm:$0xff] %v13072_v52  ;;  %3588 = vrot.lane.b32.xlu0 %v12723_v22, %s11605_s19 }
 0x2c9   : > { %v13074_v44 = vpop.permute.xlu1 %4393 }
 0x2ca   : > { %19531 = vst [vmem:[#allocation17_spill] sm:$0xff] %v13074_v44  ;;  %3590 = vrot.lane.b32.xlu1 %v12729_v60, %s11605_s19 }
 0x2cb   : > { %v13080_v37 = vpop.permute.xlu0 %2528 }
 0x2cc   : > { %3857 = vrot.lane.b32.xlu0 %v12723_v22, %s11606_s20 }
 0x2cd   : > { %v13082_v42 = vpop.permute.xlu1 %2530 }
 0x2ce   : > { %3859 = vrot.lane.b32.xlu1 %v12729_v60, %s11606_s20 }
 0x2cf   : > { %v13088_v0 = vpop.permute.xlu0 %2797 }
 0x2d0   : > { %4126 = vrot.lane.b32.xlu0 %v12723_v22, %s11607_s21 }
 0x2d1   : > { %v13090_v4 = vpop.permute.xlu1 %2799 }
 0x2d2   : > { %4128 = vrot.lane.b32.xlu1 %v12729_v60, %s11607_s21 }
 0x2d3   : > { %v13096_v25 = vpop.permute.xlu0 %3066 }
 0x2d4   : > { %4395 = vrot.lane.b32.xlu0 %v12723_v22, %s11608_s22 }
 0x2d5   : > { %v13098_v50 = vpop.permute.xlu1 %3068 }
 0x2d6   : > { %4397 = vrot.lane.b32.xlu1 %v12729_v60, %s11608_s22 }
 0x2d7   : > { %v13104_v53 = vpop.permute.xlu0 %3335 }
 0x2d8   : > { %19532 = vst [vmem:[#allocation18_spill] sm:$0xff] %v13104_v53  ;;  %2532 = vrot.lane.b32.xlu0 %v12735_v10, %s11601_s12 }
 0x2d9   : > { %v13106_v34 = vpop.permute.xlu1 %3337 }
 0x2da   : > { %19533 = vst [vmem:[#allocation19_spill] sm:$0xff] %v13106_v34  ;;  %2534 = vrot.lane.b32.xlu1 %v12741_v35, %s11601_s12 }
 0x2db   : > { %v13112_v17 = vpop.permute.xlu0 %3604 }
 0x2dc   : > { %19534 = vst [vmem:[#allocation20_spill] sm:$0xff] %v13112_v17  ;;  %2801 = vrot.lane.b32.xlu0 %v12735_v10, %s11602_s16 }
 0x2dd   : > { %v13114_v23 = vpop.permute.xlu1 %3606 }
 0x2de   : > { %19535 = vst [vmem:[#allocation21_spill] sm:$0xff] %v13114_v23  ;;  %2803 = vrot.lane.b32.xlu1 %v12741_v35, %s11602_s16 }
 0x2df   : > { %v13120_v22 = vpop.permute.xlu0 %3873 }
 0x2e0   : > { %3070 = vrot.lane.b32.xlu0 %v12735_v10, %s11603_s17 }
 0x2e1   : > { %v13122_v60 = vpop.permute.xlu1 %3875 }
 0x2e2   : > { %3072 = vrot.lane.b32.xlu1 %v12741_v35, %s11603_s17 }
 0x2e3   : > { %v13128_v15 = vpop.permute.xlu0 %4142 }
 0x2e4   : > { %3339 = vrot.lane.b32.xlu0 %v12735_v10, %s11604_s18 }
 0x2e5   : > { %v13130_v43 = vpop.permute.xlu1 %4144 }
 0x2e6   : > { %3341 = vrot.lane.b32.xlu1 %v12741_v35, %s11604_s18 }
 0x2e7   : > { %v13136_v57 = vpop.permute.xlu0 %4411 }
 0x2e8   : > { %19536 = vst [vmem:[#allocation22_spill] sm:$0xff] %v13136_v57  ;;  %3608 = vrot.lane.b32.xlu0 %v12735_v10, %s11605_s19 }
 0x2e9   : > { %v13138_v5 = vpop.permute.xlu1 %4413 }
 0x2ea   : > { %19537 = vst [vmem:[#allocation23_spill] sm:$0xff] %v13138_v5  ;;  %3610 = vrot.lane.b32.xlu1 %v12741_v35, %s11605_s19 }
 0x2eb   : > { %v13144_v13 = vpop.permute.xlu0 %2548 }
 0x2ec   : > { %3877 = vrot.lane.b32.xlu0 %v12735_v10, %s11606_s20 }
 0x2ed   : > { %v13146_v16 = vpop.permute.xlu1 %2550 }
 0x2ee   : > { %3879 = vrot.lane.b32.xlu1 %v12741_v35, %s11606_s20 }
 0x2ef   : > { %v13152_v56 = vpop.permute.xlu0 %2817 }
 0x2f0   : > { %4146 = vrot.lane.b32.xlu0 %v12735_v10, %s11607_s21 }
 0x2f1   : > { %v13154_v36 = vpop.permute.xlu1 %2819 }
 0x2f2   : > { %4148 = vrot.lane.b32.xlu1 %v12741_v35, %s11607_s21 }
 0x2f3   : > { %v13160_v47 = vpop.permute.xlu0 %3086 }
 0x2f4   : > { %4415 = vrot.lane.b32.xlu0 %v12735_v10, %s11608_s22 }
 0x2f5   : > { %v13162_v21 = vpop.permute.xlu1 %3088 }
 0x2f6   : > { %4417 = vrot.lane.b32.xlu1 %v12741_v35, %s11608_s22 }
 0x2f7   : > { %v13168_v52 = vpop.permute.xlu0 %3355 }
 0x2f8   : > { %19538 = vst [vmem:[#allocation24_spill] sm:$0xff] %v13168_v52  ;;  %2552 = vrot.lane.b32.xlu0 %v12747_v32, %s11601_s12 }
 0x2f9   : > { %v13170_v44 = vpop.permute.xlu1 %3357 }
 0x2fa   : > { %19539 = vst [vmem:[#allocation25_spill] sm:$0xff] %v13170_v44  ;;  %2554 = vrot.lane.b32.xlu1 %v12752_v45, %s11601_s12 }
 0x2fb   : > { %v13176_v57 = vpop.permute.xlu0 %3624 }
 0x2fc   : > { %19540 = vst [vmem:[#allocation26_spill] sm:$0xff] %v13176_v57  ;;  %2821 = vrot.lane.b32.xlu0 %v12747_v32, %s11602_s16 }
 0x2fd   : > { %v13178_v5 = vpop.permute.xlu1 %3626 }
 0x2fe   : > { %19541 = vst [vmem:[#allocation27_spill] sm:$0xff] %v13178_v5  ;;  %2823 = vrot.lane.b32.xlu1 %v12752_v45, %s11602_s16  ;;  %v4297_v5 = vld [vmem:[#allocation2 + $0x30] sm:$0xff] }
 0x2ff   : > { %v13184_v10 = vpop.permute.xlu0 %3893 }
 0x300   : > { %3090 = vrot.lane.b32.xlu0 %v12747_v32, %s11603_s17 }
 0x301   : > { %v13186_v35 = vpop.permute.xlu1 %3895 }
 0x302   : > { %3092 = vrot.lane.b32.xlu1 %v12752_v45, %s11603_s17 }
 0x303   : > { %v13192_v11 = vpop.permute.xlu0 %4162 }
 0x304   : > { %3359 = vrot.lane.b32.xlu0 %v12747_v32, %s11604_s18 }
 0x305   : > { %v13194_v12 = vpop.permute.xlu1 %4164 }
 0x306   : > { %3361 = vrot.lane.b32.xlu1 %v12752_v45, %s11604_s18 }
 0x307   : > { %v13200_v18 = vpop.permute.xlu0 %4431 }
 0x308   : > { %19542 = vst [vmem:[#allocation28_spill] sm:$0xff] %v13200_v18  ;;  %3628 = vrot.lane.b32.xlu0 %v12747_v32, %s11605_s19 }
 0x309   : > { %v13202_v2 = vpop.permute.xlu1 %4433 }
 0x30a   : > { %19543 = vst [vmem:[#allocation29_spill] sm:$0xff] %v13202_v2  ;;  %3630 = vrot.lane.b32.xlu1 %v12752_v45, %s11605_s19 }
 0x30b   : > { %v13208_v53 = vpop.permute.xlu0 %2492 }
 0x30c   : > { %19544 = vst [vmem:[#allocation30_spill] sm:$0xff] %v13208_v53  ;;  %3897 = vrot.lane.b32.xlu0 %v12747_v32, %s11606_s20 }
 0x30d   : > { %v13210_v34 = vpop.permute.xlu1 %2494 }
 0x30e   : > { %19545 = vst [vmem:[#allocation31_spill] sm:$0xff] %v13210_v34  ;;  %3899 = vrot.lane.b32.xlu1 %v12752_v45, %s11606_s20 }
 0x30f   : > { %v13216_v52 = vpop.permute.xlu0 %2761 }
 0x310   : > { %19546 = vst [vmem:[#allocation32_spill] sm:$0xff] %v13216_v52  ;;  %4166 = vrot.lane.b32.xlu0 %v12747_v32, %s11607_s21 }
 0x311   : > { %v13218_v18 = vpop.permute.xlu1 %2763 }
 0x312   : > { %19547 = vst [vmem:[#allocation33_spill] sm:$0xff] %v13218_v18  ;;  %4168 = vrot.lane.b32.xlu1 %v12752_v45, %s11607_s21 }
 0x313   : > { %v13224_v2 = vpop.permute.xlu0 %3030 }
 0x314   : > { %19548 = vst [vmem:[#allocation34_spill] sm:$0xff] %v13224_v2  ;;  %4435 = vrot.lane.b32.xlu0 %v12747_v32, %s11608_s22 }
 0x315   : > { %v13226_v44 = vpop.permute.xlu1 %3032 }
 0x316   : > { %19549 = vst [vmem:[#allocation35_spill] sm:$0xff] %v13226_v44  ;;  %4437 = vrot.lane.b32.xlu1 %v12752_v45, %s11608_s22 }
 0x317   : > { %v13232_v34 = vpop.permute.xlu0 %3299 }
 0x318   : > { %19550 = vst [vmem:[#allocation36_spill] sm:$0xff] %v13232_v34  ;;  %2496 = vrot.lane.b32.xlu0 %v12830_v51, %s11601_s12 }
 0x319   : > { %v13234_v29 = vpop.permute.xlu1 %3301 }
 0x31a   : > { %19551 = vst [vmem:[#allocation37_spill] sm:$0xff] %v13234_v29  ;;  %2498 = vrot.lane.b32.xlu1 %v12841_v14, %s11601_s12 }
 0x31b   : > { %v13240_v18 = vpop.permute.xlu0 %3568 }
 0x31c   : > { %19552 = vst [vmem:[#allocation38_spill] sm:$0xff] %v13240_v18  ;;  %2500 = vrot.lane.b32.xlu0 %v12834_v9, %s11601_s12 }
 0x31d   : > { %v13242_v40 = vpop.permute.xlu1 %3570 }
 0x31e   : > { %19553 = vst [vmem:[#allocation39_spill] sm:$0xff] %v13242_v40  ;;  %2502 = vrot.lane.b32.xlu1 %v12846_v38, %s11601_s12 }
 0x31f   : > { %v13248_v32 = vpop.permute.xlu0 %3837 }
 0x320   : > { %19554 = vst [vmem:[#allocation40_spill] sm:$0xff] %v13248_v32  ;;  %2765 = vrot.lane.b32.xlu0 %v12830_v51, %s11602_s16 }
 0x321   : > { %v13250_v45 = vpop.permute.xlu1 %3839 }
 0x322   : > { %19555 = vst [vmem:[#allocation41_spill] sm:$0xff] %v13250_v45  ;;  %2767 = vrot.lane.b32.xlu1 %v12841_v14, %s11602_s16 }
 0x323   : > { %v13256_v29 = vpop.permute.xlu0 %4106 }
 0x324   : > { %19556 = vst [vmem:[#allocation42_spill] sm:$0xff] %v13256_v29  ;;  %2769 = vrot.lane.b32.xlu0 %v12834_v9, %s11602_s16 }
 0x325   : > { %v13258_v44 = vpop.permute.xlu1 %4108 }
 0x326   : > { %19557 = vst [vmem:[#allocation43_spill] sm:$0xff] %v13258_v44  ;;  %2771 = vrot.lane.b32.xlu1 %v12846_v38, %s11602_s16 }
 0x327   : > { %v13264_v40 = vpop.permute.xlu0 %4375 }
 0x328   : > { %19558 = vst [vmem:[#allocation44_spill] sm:$0xff] %v13264_v40  ;;  %3034 = vrot.lane.b32.xlu0 %v12830_v51, %s11603_s17 }
 0x329   : > { %v13266_v34 = vpop.permute.xlu1 %4377 }
 0x32a   : > { %19559 = vst [vmem:[#allocation45_spill] sm:$0xff] %v13266_v34  ;;  %3036 = vrot.lane.b32.xlu1 %v12841_v14, %s11603_s17 }
 0x32b   : > { %v13272_v45 = vpop.permute.xlu0 %2512 }
 0x32c   : > { %19560 = vst [vmem:[#allocation46_spill] sm:$0xff] %v13272_v45  ;;  %3038 = vrot.lane.b32.xlu0 %v12834_v9, %s11603_s17 }
 0x32d   : > { %v13274_v18 = vpop.permute.xlu1 %2514 }
 0x32e   : > { %19561 = vst [vmem:[#allocation47_spill] sm:$0xff] %v13274_v18  ;;  %3040 = vrot.lane.b32.xlu1 %v12846_v38, %s11603_s17 }
 0x32f   : > { %v13280_v44 = vpop.permute.xlu0 %2781 }
 0x330   : > { %19562 = vst [vmem:[#allocation48_spill] sm:$0xff] %v13280_v44  ;;  %3303 = vrot.lane.b32.xlu0 %v12830_v51, %s11604_s18 }
 0x331   : > { %v13282_v40 = vpop.permute.xlu1 %2783 }
 0x332   : > { %19563 = vst [vmem:[#allocation49_spill] sm:$0xff] %v13282_v40  ;;  %3305 = vrot.lane.b32.xlu1 %v12841_v14, %s11604_s18 }
 0x333   : > { %v13288_v34 = vpop.permute.xlu0 %3050 }
 0x334   : > { %19564 = vst [vmem:[#allocation50_spill] sm:$0xff] %v13288_v34  ;;  %3307 = vrot.lane.b32.xlu0 %v12834_v9, %s11604_s18 }
 0x335   : > { %v13290_v28 = vpop.permute.xlu1 %3052 }
 0x336   : > { %19565 = vst [vmem:[#allocation51_spill] sm:$0xff] %v13290_v28  ;;  %3309 = vrot.lane.b32.xlu1 %v12846_v38, %s11604_s18 }
 0x337   : > { %v13296_v18 = vpop.permute.xlu0 %3319 }
 0x338   : > { %19566 = vst [vmem:[#allocation52_spill] sm:$0xff] %v13296_v18  ;;  %3572 = vrot.lane.b32.xlu0 %v12830_v51, %s11605_s19 }
 0x339   : > { %v13298_v46 = vpop.permute.xlu1 %3321 }
 0x33a   : > { %19567 = vst [vmem:[#allocation53_spill] sm:$0xff] %v13298_v46  ;;  %3574 = vrot.lane.b32.xlu1 %v12841_v14, %s11605_s19 }
 0x33b   : > { %v13304_v40 = vpop.permute.xlu0 %3588 }
 0x33c   : > { %19568 = vst [vmem:[#allocation54_spill] sm:$0xff] %v13304_v40  ;;  %3576 = vrot.lane.b32.xlu0 %v12834_v9, %s11605_s19 }
 0x33d   : > { %v13306_v17 = vpop.permute.xlu1 %3590 }
 0x33e   : > { %19569 = vst [vmem:[#allocation55_spill] sm:$0xff] %v13306_v17  ;;  %3578 = vrot.lane.b32.xlu1 %v12846_v38, %s11605_s19 }
 0x33f   : > { %v13312_v28 = vpop.permute.xlu0 %3857 }
 0x340   : > { %19570 = vst [vmem:[#allocation56_spill] sm:$0xff] %v13312_v28  ;;  %3841 = vrot.lane.b32.xlu0 %v12830_v51, %s11606_s20 }
 0x341   : > { %v13314_v18 = vpop.permute.xlu1 %3859 }
 0x342   : > { %19571 = vst [vmem:[#allocation57_spill] sm:$0xff] %v13314_v18  ;;  %3843 = vrot.lane.b32.xlu1 %v12841_v14, %s11606_s20 }
 0x343   : > { %v13320_v46 = vpop.permute.xlu0 %4126 }
 0x344   : > { %19572 = vst [vmem:[#allocation58_spill] sm:$0xff] %v13320_v46  ;;  %3845 = vrot.lane.b32.xlu0 %v12834_v9, %s11606_s20 }
 0x345   : > { %v13322_v40 = vpop.permute.xlu1 %4128 }
 0x346   : > { %19573 = vst [vmem:[#allocation59_spill] sm:$0xff] %v13322_v40  ;;  %3847 = vrot.lane.b32.xlu1 %v12846_v38, %s11606_s20 }
 0x347   : > { %v13328_v17 = vpop.permute.xlu0 %4395 }
 0x348   : > { %19574 = vst [vmem:[#allocation60_spill] sm:$0xff] %v13328_v17  ;;  %4110 = vrot.lane.b32.xlu0 %v12830_v51, %s11607_s21  ;;  %v4295_v17 = vld [vmem:[#allocation2 + $0x20] sm:$0xff] }
 0x349   : > { %v13330_v23 = vpop.permute.xlu1 %4397 }
 0x34a   : > { %19575 = vst [vmem:[#allocation61_spill] sm:$0xff] %v13330_v23  ;;  %4112 = vrot.lane.b32.xlu1 %v12841_v14, %s11607_s21 }
 0x34b   : > { %v13336_v18 = vpop.permute.xlu0 %2532 }
 0x34c   : > { %19576 = vst [vmem:[#allocation62_spill] sm:$0xff] %v13336_v18  ;;  %4114 = vrot.lane.b32.xlu0 %v12834_v9, %s11607_s21 }
 0x34d   : > { %v13338_v57 = vpop.permute.xlu1 %2534 }
 0x34e   : > { %19577 = vst [vmem:[#allocation63_spill] sm:$0xff] %v13338_v57  ;;  %4116 = vrot.lane.b32.xlu1 %v12846_v38, %s11607_s21 }
 0x34f   : > { %v13344_v40 = vpop.permute.xlu0 %2801 }
 0x350   : > { %19578 = vst [vmem:[#allocation64_spill] sm:$0xff] %v13344_v40  ;;  %4379 = vrot.lane.b32.xlu0 %v4295_v17, %s11608_s22 }
 0x351   : > { %v13346_v23 = vpop.permute.xlu1 %2803 }
 0x352   : > { %19579 = vst [vmem:[#allocation65_spill] sm:$0xff] %v13346_v23  ;;  %4381 = vrot.lane.b32.xlu1 %v12841_v14, %s11608_s22 }
 0x353   : > { %v13351_v51 = vpop.permute.xlu0 %3070 }
 0x354   : > { %19580 = vst [vmem:[#allocation66_spill] sm:$0xff] %v13351_v51  ;;  %4383 = vrot.lane.b32.xlu0 %v4297_v5, %s11608_s22  ;;  %v3126_v6 = vsel %vm3106_vm5, %v13098_v50, %v13351_v51 }
 0x355   : > { %v13353_v57 = vpop.permute.xlu1 %3072 }
 0x356   : > { %19581 = vst [vmem:[#allocation67_spill] sm:$0xff] %v13353_v57  ;;  %4385 = vrot.lane.b32.xlu1 %v12846_v38, %s11608_s22  ;;  %v13392_v57 = vld [vmem:[#allocation2 + $0x78] sm:$0xff] }
 0x357   : > { %v13358_v9 = vpop.permute.xlu0 %3339 }
 0x358   : > { %19582 = vst [vmem:[#allocation68_spill] sm:$0xff] %v13358_v9  ;;  %2516 = vrot.lane.b32.xlu0 %v12853_v41, %s11601_s12 }
 0x359   : > { %v13360_v1 = vpop.permute.xlu1 %3341 }
 0x35a   : > { %19583 = vst [vmem:[#allocation69_spill] sm:$0xff] %v13360_v1  ;;  %2518 = vrot.lane.b32.xlu1 %v12865_v49, %s11601_s12 }
 0x35b   : > { %v13366_v14 = vpop.permute.xlu0 %3608 }
 0x35c   : > { %19584 = vst [vmem:[#allocation70_spill] sm:$0xff] %v13366_v14  ;;  %2520 = vrot.lane.b32.xlu0 %v12858_v30, %s11601_s12 }
 0x35d   : > { %v13368_v17 = vpop.permute.xlu1 %3610 }
 0x35e   : > { %19585 = vst [vmem:[#allocation71_spill] sm:$0xff] %v13368_v17  ;;  %2522 = vrot.lane.b32.xlu1 %v12870_v31, %s11601_s12 }
 0x35f   : > { %v13374_v38 = vpop.permute.xlu0 %3877 }
 0x360   : > { %19586 = vst [vmem:[#allocation72_spill] sm:$0xff] %v13374_v38  ;;  %2785 = vrot.lane.b32.xlu0 %v12853_v41, %s11602_s16 }
 0x361   : > { %v13376_v5 = vpop.permute.xlu1 %3879 }
 0x362   : > { %19587 = vst [vmem:[#allocation73_spill] sm:$0xff] %v13376_v5  ;;  %2787 = vrot.lane.b32.xlu1 %v12865_v49, %s11602_s16 }
 0x363   : > { %v13382_v1 = vpop.permute.xlu0 %4146 }
 0x364   : > { %19588 = vst [vmem:[#allocation74_spill] sm:$0xff] %v13382_v1  ;;  %2789 = vrot.lane.b32.xlu0 %v12858_v30, %s11602_s16 }
 0x365   : > { %v13384_v23 = vpop.permute.xlu1 %4148 }
 0x366   : > { %19589 = vst [vmem:[#allocation75_spill] sm:$0xff] %v13384_v23  ;;  %2791 = vrot.lane.b32.xlu1 %v12870_v31, %s11602_s16  ;;  %v13402_v23 = vld [vmem:[#allocation2 + $0x88] sm:$0xff]  ;;  %v13408_v31 = vld [vmem:[#allocation2 + $0x90] sm:$0xff] }
 0x367   : > { %v13390_v17 = vpop.permute.xlu0 %4415 }
 0x368   : > { %19590 = vst [vmem:[#allocation76_spill] sm:$0xff] %v13390_v17  ;;  %3054 = vrot.lane.b32.xlu0 %v13392_v57, %s11603_s17 }
 0x369   : > { %v13394_v5 = vpop.permute.xlu1 %4417 }
 0x36a   : > { %19591 = vst [vmem:[#allocation77_spill] sm:$0xff] %v13394_v5  ;;  %3056 = vrot.lane.b32.xlu1 %v12865_v49, %s11603_s17  ;;  %v13418_v49 = vld [vmem:[#allocation2 + $0x80] sm:$0xff] }
 0x36b   : > { %v13400_v41 = vpop.permute.xlu0 %2552 }
 0x36c   : > { %19592 = vst [vmem:[#allocation78_spill] sm:$0xff] %v13400_v41  ;;  %3058 = vrot.lane.b32.xlu0 %v13402_v23, %s11603_s17 }
 0x36d   : > { %v13404_v30 = vpop.permute.xlu1 %2554 }
 0x36e   : > { %19593 = vst [vmem:[#allocation79_spill] sm:$0xff] %v13404_v30  ;;  %3060 = vrot.lane.b32.xlu1 %v13408_v31, %s11603_s17 }
 0x36f   : > { %v13412_v5 = vpop.permute.xlu0 %2821 }
 0x370   : > { %19594 = vst [vmem:[#allocation80_spill] sm:$0xff] %v13412_v5  ;;  %3323 = vrot.lane.b32.xlu0 %v13392_v57, %s11604_s18 }
 0x371   : > { %v13414_v17 = vpop.permute.xlu1 %2823 }
 0x372   : > { %19595 = vst [vmem:[#allocation81_spill] sm:$0xff] %v13414_v17  ;;  %3325 = vrot.lane.b32.xlu1 %v13418_v49, %s11604_s18  ;;  %v3134_v17 = vsel %vm3106_vm5, %v13160_v47, %v13162_v21  ;;  %v3117_v47 = vsel %vm3106_vm5, %v13032_v33, %v13288_v34  ;;  %v14802_v34 = vld [vmem:[#allocation2 + $0x48] sm:$0xff] }
 0x373   : > { %v13422_v30 = vpop.permute.xlu0 %3090 }
 0x374   : > { %19596 = vst [vmem:[#allocation82_spill] sm:$0xff] %v13422_v30  ;;  %v3135_v9 = vsel %vm3106_vm5, %v13162_v21, %v13422_v30  ;;  %3327 = vrot.lane.b32.xlu0 %v13402_v23, %s11604_s18 }
 0x375   : > { %v13427_v14 = vpop.permute.xlu1 %3092  ;;  %9785 = vmatprep.subr.mxu0 %v3135_v9  ;;  %v3107_v9 = vsel %vm3106_vm5, %v12931_v54, %v12933_v55  ;;  %v2857_v54 = vsel %vm2837_vm6, %v13090_v4, %v13344_v40 }
 0x376   : > { %19597 = vst [vmem:[#allocation83_spill] sm:$0xff] %v13427_v14  ;;  %9786 = vmatpush1.msra.mxu0 %v3134_v17  ;;  %3329 = vrot.lane.b32.xlu1 %v13408_v31, %s11604_s18  ;;  %v3125_v14 = vsel %vm3106_vm5, %v13096_v25, %v13098_v50  ;;  %v3108_v25 = vsel %vm3106_vm5, %v12933_v55, %v13224_v2 }
 0x377   : > { %9787 = vmatprep.subr.mxu0 %v3126_v6  ;;  %v13439_v30 = vpop.permute.xlu0 %3359  ;;  %v3116_v6 = vsel %vm3106_vm5, %v13028_v7, %v13032_v33  ;;  %v2866_v7 = vsel %vm2837_vm6, %v13154_v36, %v13412_v5  ;;  %v2856_v17 = vsel %vm2837_vm6, %v13088_v0, %v13090_v4  ;;  %v2839_v0 = vsel %vm2837_vm6, %v12925_v3, %v13216_v52 }
 0x378   : > { %19598 = vst [vmem:[#allocation84_spill] sm:$0xff] %v13439_v30  ;;  %9788 = vmatpush1.msra.mxu0 %v3125_v14  ;;  %3592 = vrot.lane.b32.xlu0 %v13392_v57, %s11605_s19  ;;  %v2865_v14 = vsel %vm2837_vm6, %v13152_v56, %v13154_v36  ;;  %v2848_v36 = vsel %vm2837_vm6, %v13019_v61, %v13280_v44 }
 0x379   : > { %v13447_v21 = vpop.permute.xlu1 %3361  ;;  %9789 = vmatprep.subr.mxu0 %v3117_v47  ;;  %v2847_v47 = vsel %vm2837_vm6, %v13014_v24, %v13019_v61  ;;  %v2597_v24 = vsel %vm19449_vm7, %v13146_v16, %v13400_v41  ;;  %v14572_v41 = vld [vmem:[#allocation2 + $0x128] sm:$0xff] }
 0x37a   : > { %19599 = vst [vmem:[#allocation85_spill] sm:$0xff] %v13447_v21  ;;  %9790 = vmatpush1.msra.mxu0 %v3116_v6  ;;  %3594 = vrot.lane.b32.xlu1 %v13418_v49, %s11605_s19  ;;  %v2838_v6 = vsel %vm2837_vm6, %v12923_v39, %v12925_v3  ;;  %v2588_v39 = vsel %vm19449_vm7, %v13082_v42, %v13336_v18  ;;  %v14090_v21 = vld [vmem:[#allocation2 + $0xf8] sm:$0xff] }
 0x37b   : > { %9791 = vmatprep.subr.mxu0 %v3108_v25  ;;  %v13459_v50 = vpop.permute.xlu0 %3628  ;;  %v2596_v25 = vsel %vm19449_vm7, %v13144_v13, %v13146_v16  ;;  %v2579_v13 = vsel %vm19449_vm7, %v13006_v20, %v13272_v45 }
 0x37c   : > { %19600 = vst [vmem:[#allocation86_spill] sm:$0xff] %v13459_v50  ;;  %9792 = vmatpush1.msra.mxu0 %v3107_v9  ;;  %3596 = vrot.lane.b32.xlu0 %v13402_v23, %s11605_s19  ;;  %v2587_v9 = vsel %vm19449_vm7, %v13080_v37, %v13082_v42  ;;  %v2570_v37 = vsel %vm19449_vm7, %v12917_v27, %v13208_v53 }
 0x37d   : > { %v13467_v33 = vpop.permute.xlu1 %3630  ;;  %9793 = vmatprep.subr.mxu0 %v2866_v7  ;;  %v2578_v7 = vsel %vm19449_vm7, %v13000_v48, %v13006_v20  ;;  %v2363_v48 = vld [vmem:[#allocation2 + $0x108] sm:$0xff]  ;;  %v2355_v20 = vld [vmem:[#allocation2 + $0xb8] sm:$0xff] }
 0x37e   : > { %19601 = vst [vmem:[#allocation87_spill] sm:$0xff] %v13467_v33  ;;  %9794 = vmatpush1.msra.mxu0 %v2865_v14  ;;  %3598 = vrot.lane.b32.xlu1 %v13408_v31, %s11605_s19  ;;  %v2569_v14 = vsel %vm19449_vm7, %v12915_v62, %v12917_v27  ;;  %v13552_v62 = vld [vmem:[#allocation2 + $0x60] sm:$0xff] }
 0x37f   : > { %9795 = vmatprep.subr.mxu0 %v2857_v54  ;;  %v13479_v55 = vpop.permute.xlu0 %3897  ;;  %v2364_v54 = vld [vmem:[#allocation2 + $0x110] sm:$0xff] }
 0x380   : > { %19602 = vst [vmem:[#allocation88_spill] sm:$0xff] %v13479_v55  ;;  %9796 = vmatpush1.msra.mxu0 %v2856_v17  ;;  %3861 = vrot.lane.b32.xlu0 %v13392_v57, %s11606_s20 }
 0x381   : > { %v13487_v56 = vpop.permute.xlu1 %3899  ;;  %9797 = vmatprep.subr.mxu0 %v2848_v36 }
 0x382   : > { %19603 = vst [vmem:[#allocation89_spill] sm:$0xff] %v13487_v56  ;;  %9798 = vmatpush1.msra.mxu0 %v2847_v47  ;;  %3863 = vrot.lane.b32.xlu1 %v13418_v49, %s11606_s20  ;;  %v2354_v47 = vld [vmem:[#allocation2 + $0xb0] sm:$0xff]  ;;  %v14330_v56 = vld [vmem:[#allocation2 + $0xb8] sm:$0xff] }
 0x383   : > { %9799 = vmatprep.subr.mxu0 %v2839_v0  ;;  %v13499_v4 = vpop.permute.xlu0 %4166  ;;  %v13559_v0 = vld [vmem:[#allocation2 + $0x58] sm:$0xff] }
 0x384   : > { %19604 = vst [vmem:[#allocation90_spill] sm:$0xff] %v13499_v4  ;;  %9800 = vmatpush1.msra.mxu0 %v2838_v6  ;;  %3865 = vrot.lane.b32.xlu0 %v13402_v23, %s11606_s20  ;;  %v13562_v6 = vld [vmem:[#allocation2 + $0x8] sm:$0xff] }
 0x385   : > { %v13507_v61 = vpop.permute.xlu1 %4168  ;;  %9801 = vmatprep.subr.mxu0 %v2597_v24 }
 0x386   : > { %19605 = vst [vmem:[#allocation91_spill] sm:$0xff] %v13507_v61  ;;  %9802 = vmatpush1.msra.mxu0 %v2596_v25  ;;  %3867 = vrot.lane.b32.xlu1 %v13408_v31, %s11606_s20  ;;  %v13569_v25 = vld [vmem:[#allocation2] sm:$0xff] }
 0x387   : > { %9803 = vmatprep.subr.mxu0 %v2588_v39  ;;  %v13519_v3 = vpop.permute.xlu0 %4435 }
 0x388   : > { %19606 = vst [vmem:[#allocation92_spill] sm:$0xff] %v13519_v3  ;;  %9804 = vmatpush1.msra.mxu0 %v2587_v9  ;;  %4130 = vrot.lane.b32.xlu0 %v13392_v57, %s11607_s21  ;;  %v4202_v9 = vsel %vm4182_vm8, %v13130_v43, %v13382_v1 }
 0x389   : > { %v13527_v16 = vpop.permute.xlu1 %4437  ;;  %9805 = vmatprep.subr.mxu0 %v2579_v13 }
 0x38a   : > { %19607 = vst [vmem:[#allocation93_spill] sm:$0xff] %v13527_v16  ;;  %9806 = vmatpush1.msra.mxu0 %v2578_v7  ;;  %4132 = vrot.lane.b32.xlu1 %v13418_v49, %s11607_s21  ;;  %v13592_v7 = vld [vmem:[#allocation2 + $0xd0] sm:$0xff] }
 0x38b   : > { %9807 = vmatprep.subr.mxu0 %v2570_v37  ;;  %v13539_v42 = vpop.permute.xlu0 %2496  ;;  %v13604_v37 = vld [vmem:[#allocation2 + $0xd8] sm:$0xff] }
 0x38c   : > { %19608 = vst [vmem:[#allocation94_spill] sm:$0xff] %v13539_v42  ;;  %9808 = vmatpush1.msra.mxu0 %v2569_v14  ;;  %4134 = vrot.lane.b32.xlu0 %v13402_v23, %s11607_s21  ;;  %v4183_v14 = vsel %vm4182_vm8, %v12966_v26, %v12971_v19  ;;  %v13628_v26 = vld [vmem:[#allocation2 + $0xe8] sm:$0xff] }
 0x38d   : > { %v13544_v17 = vpop.permute.xlu1 %2498  ;;  %9809 = vmatprep.subr.mxu0 %v2364_v54 }
 0x38e   : > { %19609 = vst [vmem:[#allocation95_spill] sm:$0xff] %v13544_v17  ;;  %9810 = vmatpush1.msra.mxu0 %v2363_v48  ;;  %4136 = vrot.lane.b32.xlu1 %v13408_v31, %s11607_s21  ;;  %v3941_v48 = vsel %vm19453_vm9, %v13184_v10, %v13186_v35  ;;  %v3924_v10 = vsel %vm19453_vm9, %v13058_v59, %v13312_v28 }
 0x38f   : > { %9811 = vmatprep.subr.mxu0 %v2355_v20  ;;  %v13550_v36 = vpop.permute.xlu0 %2500 }
 0x390   : > { %19610 = vst [vmem:[#allocation96_spill] sm:$0xff] %v13550_v36  ;;  %9812 = vmatpush1.msra.mxu0 %v2354_v47  ;;  %4399 = vrot.lane.b32.xlu0 %v13392_v57, %s11608_s22  ;;  %v4211_v57 = vsel %vm4182_vm8, %v13194_v12, %v13499_v4  ;;  %v3932_v47 = vsel %vm19453_vm9, %v13120_v22, %v13122_v60  ;;  %v14386_v4 = vld [vmem:[#allocation2 + $0x110] sm:$0xff] }
 0x391   : > { %v13554_v27 = vpop.permute.xlu1 %2502  ;;  %9813 = vmatprep.subr.mxu0 %v13552_v62 }
 0x392   : > { %19611 = vst [vmem:[#allocation97_spill] sm:$0xff] %v13554_v27  ;;  %9814 = vmatpush1.msra.mxu0 %v13559_v0  ;;  %4401 = vrot.lane.b32.xlu1 %v13418_v49, %s11608_s22  ;;  %v4210_v49 = vsel %vm4182_vm8, %v13192_v11, %v13194_v12  ;;  %v4193_v11 = vsel %vm4182_vm8, %v13066_v63, %v13320_v46  ;;  %v14360_v46 = vld [vmem:[#allocation2 + $0xe0] sm:$0xff] }
 0x393   : > { %9815 = vmatprep.subr.mxu0 %v13562_v6  ;;  %v13567_v24 = vpop.permute.xlu0 %2765 }
 0x394   : > { %19612 = vst [vmem:[#allocation98_spill] sm:$0xff] %v13567_v24  ;;  %9816 = vmatpush1.msra.mxu0 %v13569_v25  ;;  %4403 = vrot.lane.b32.xlu0 %v13402_v23, %s11608_s22  ;;  %v4201_v23 = vsel %vm4182_vm8, %v13128_v15, %v13130_v43  ;;  %v4184_v15 = vsel %vm4182_vm8, %v12971_v19, %v13256_v29  ;;  %v14348_v29 = vld [vmem:[#allocation2 + $0xd0] sm:$0xff] }
 0x395   : > { %v13575_v39 = vpop.permute.xlu1 %2767  ;;  %9817 = vmatprep.subr.mxu0 %v4211_v57  ;;  %v3933_v19 = vsel %vm19453_vm9, %v13122_v60, %v13374_v38  ;;  %v3923_v57 = vsel %vm19453_vm9, %v13056_v58, %v13058_v59 }
 0x396   : > { %19613 = vst [vmem:[#allocation99_spill] sm:$0xff] %v13575_v39  ;;  %9818 = vmatpush2.msra.mxu0 %v4210_v49  ;;  %4405 = vrot.lane.b32.xlu1 %v13408_v31, %s11608_s22  ;;  %v4192_v31 = vsel %vm4182_vm8, %v13064_v8, %v13066_v63  ;;  %v13616_v8 = vld [vmem:[#allocation2 + $0xe0] sm:$0xff]  ;;  %v3942_v63 = vsel %vm19453_vm9, %v13186_v35, %v13479_v55  ;;  %v19620_v49 = vld [vmem:[#allocation9_spill] sm:$0xff] }
 0x397   : > { %v13587_v13 = vpop.permute.xlu0 %2769  ;;  %9819 = vmatprep.subr.mxu0 %v4202_v9  ;;  %v3915_v22 = vsel %vm19453_vm9, %v19620_v49, %v13248_v32  ;;  %v19622_v9 = vld [vmem:[#allocation8_spill] sm:$0xff] }
 0x398   : > { %19614 = vst [vmem:[#allocation100_spill] sm:$0xff] %v13587_v13  ;;  %9820 = vmatpush2.msra.mxu0 %v4201_v23  ;;  %2536 = vrot.lane.b32.xlu0 %v13592_v7, %s11601_s12  ;;  %v3914_v23 = vsel %vm19453_vm9, %v19622_v9, %v19620_v49  ;;  %v19631_v49 = vld [vmem:[#allocation15_spill] sm:$0xff] }
 0x399   : > { %v13597_v12 = vpop.permute.xlu1 %2771  ;;  %9821 = vmatprep.subr.mxu0 %v4193_v11  ;;  %v19623_v11 = vld [vmem:[#allocation27_spill] sm:$0xff] }
 0x39a   : > { %19615 = vst [vmem:[#allocation101_spill] sm:$0xff] %v13597_v12  ;;  %9822 = vmatpush2.msra.mxu0 %v4192_v31  ;;  %2538 = vrot.lane.b32.xlu1 %v13604_v37, %s11601_s12  ;;  %v3673_v58 = vsel %vm3644_vm10, %v19623_v11, %v13459_v50  ;;  %v19625_v31 = vld [vmem:[#allocation26_spill] sm:$0xff]  ;;  %v19646_v12 = vld [vmem:[#allocation13_spill] sm:$0xff] }
 0x39b   : > { %v13611_v43 = vpop.permute.xlu0 %3034  ;;  %9823 = vmatprep.subr.mxu0 %v4184_v15  ;;  %v3672_v15 = vsel %vm3644_vm10, %v19625_v31, %v19623_v11  ;;  %v19635_v31 = vld [vmem:[#allocation7_spill] sm:$0xff] }
 0x39c   : > { %19616 = vst [vmem:[#allocation102_spill] sm:$0xff] %v13611_v43  ;;  %9824 = vmatpush2.msra.mxu0 %v4183_v14  ;;  %2540 = vrot.lane.b32.xlu0 %v13616_v8, %s11601_s12  ;;  %v19626_v14 = vld [vmem:[#allocation70_spill] sm:$0xff] }
 0x39d   : > { %v13621_v54 = vpop.permute.xlu1 %3036  ;;  %9825 = vmatprep.subr.mxu0 %v3942_v63  ;;  %v19627_v63 = vld [vmem:[#allocation21_spill] sm:$0xff] }
 0x39e   : > { %19617 = vst [vmem:[#allocation103_spill] sm:$0xff] %v13621_v54  ;;  %9826 = vmatpush2.msra.mxu0 %v3941_v48  ;;  %2542 = vrot.lane.b32.xlu1 %v13628_v26, %s11601_s12  ;;  %v3664_v48 = vsel %vm3644_vm10, %v19627_v63, %v19626_v14  ;;  %v14158_v14 = vld [vmem:[#allocation2 + $0x150] sm:$0xff] }
 0x39f   : > { %v13635_v20 = vpop.permute.xlu0 %3038  ;;  %9827 = vmatprep.subr.mxu0 %v3933_v19 }
 0x3a0   : > { %19618 = vst [vmem:[#allocation104_spill] sm:$0xff] %v13635_v20  ;;  %9828 = vmatpush2.msra.mxu0 %v3932_v47  ;;  %2805 = vrot.lane.b32.xlu0 %v13592_v7, %s11602_s16  ;;  %v19629_v47 = vld [vmem:[#allocation20_spill] sm:$0xff] }
 0x3a1   : > { %v13643_v35 = vpop.permute.xlu1 %3040  ;;  %9829 = vmatprep.subr.mxu0 %v3924_v10  ;;  %v3663_v10 = vsel %vm3644_vm10, %v19629_v47, %v19627_v63 }
 0x3a2   : > { %19619 = vst [vmem:[#allocation105_spill] sm:$0xff] %v13643_v35  ;;  %9830 = vmatpush2.msra.mxu0 %v3923_v57  ;;  %2807 = vrot.lane.b32.xlu1 %v13604_v37, %s11602_s16  ;;  %v19630_v57 = vld [vmem:[#allocation54_spill] sm:$0xff] }
 0x3a3   : > { %v13655_v60 = vpop.permute.xlu0 %3303  ;;  %9831 = vmatprep.subr.mxu0 %v3915_v22  ;;  %v3655_v22 = vsel %vm3644_vm10, %v19631_v49, %v19630_v57 }
 0x3a4   : > { %19621 = vst [vmem:[#allocation9_spill] sm:$0xff] %v13655_v60  ;;  %9832 = vmatpush2.msra.mxu0 %v3914_v23  ;;  %2809 = vrot.lane.b32.xlu0 %v13616_v8, %s11602_s16  ;;  %v19633_v23 = vld [vmem:[#allocation14_spill] sm:$0xff] }
 0x3a5   : > { %v13663_v59 = vpop.permute.xlu1 %3305  ;;  %9833 = vmatprep.subr.mxu0 %v3673_v58  ;;  %v3654_v11 = vsel %vm3644_vm10, %v19633_v23, %v19631_v49  ;;  %v19634_v58 = vld [vmem:[#allocation38_spill] sm:$0xff]  ;;  %v19640_v23 = vld [vmem:[#allocation24_spill] sm:$0xff] }
 0x3a6   : > { %19624 = vst [vmem:[#allocation8_spill] sm:$0xff] %v13663_v59  ;;  %9834 = vmatpush2.msra.mxu0 %v3672_v15  ;;  %2811 = vrot.lane.b32.xlu1 %v13628_v26, %s11602_s16  ;;  %v3646_v15 = vsel %vm3644_vm10, %v19635_v31, %v19634_v58  ;;  %v19650_v59 = vld [vmem:[#allocation5_spill] sm:$0xff] }
 0x3a7   : > { %v13675_v19 = vpop.permute.xlu0 %3307  ;;  %9835 = vmatprep.subr.mxu0 %v3664_v48  ;;  %v19637_v48 = vld [vmem:[#allocation6_spill] sm:$0xff] }
 0x3a8   : > { %19628 = vst [vmem:[#allocation27_spill] sm:$0xff] %v13675_v19  ;;  %9836 = vmatpush2.msra.mxu0 %v3663_v10  ;;  %3074 = vrot.lane.b32.xlu0 %v13592_v7, %s11603_s17  ;;  %v3645_v47 = vsel %vm3644_vm10, %v19637_v48, %v19635_v31  ;;  %v19638_v10 = vld [vmem:[#allocation25_spill] sm:$0xff] }
 0x3a9   : > { %v13683_v9 = vpop.permute.xlu1 %3309  ;;  %9837 = vmatprep.subr.mxu0 %v3655_v22  ;;  %v3404_v49 = vsel %vm3375_vm11, %v19638_v10, %v13439_v30 }
 0x3aa   : > { %19632 = vst [vmem:[#allocation26_spill] sm:$0xff] %v13683_v9  ;;  %9838 = vmatpush2.msra.mxu0 %v3654_v11  ;;  %3076 = vrot.lane.b32.xlu1 %v13604_v37, %s11603_s17  ;;  %v3403_v11 = vsel %vm3375_vm11, %v19640_v23, %v19638_v10  ;;  %v19642_v9 = vld [vmem:[#allocation19_spill] sm:$0xff] }
 0x3ab   : > { %v13695_v63 = vpop.permute.xlu0 %3572  ;;  %9839 = vmatprep.subr.mxu0 %v3646_v15  ;;  %v19641_v15 = vld [vmem:[#allocation68_spill] sm:$0xff] }
 0x3ac   : > { %19636 = vst [vmem:[#allocation21_spill] sm:$0xff] %v13695_v63  ;;  %9840 = vmatpush2.msra.mxu0 %v3645_v47  ;;  %3078 = vrot.lane.b32.xlu0 %v13616_v8, %s11603_s17  ;;  %v3395_v31 = vsel %vm3375_vm11, %v19642_v9, %v19641_v15  ;;  %v19644_v47 = vld [vmem:[#allocation18_spill] sm:$0xff] }
 0x3ad   : > { %v13703_v22 = vpop.permute.xlu1 %3574  ;;  %9841 = vmatprep.subr.mxu0 %v3404_v49  ;;  %v3394_v27 = vsel %vm3375_vm11, %v19644_v47, %v19642_v9  ;;  %v19645_v49 = vld [vmem:[#allocation52_spill] sm:$0xff] }
 0x3ae   : > { %19639 = vst [vmem:[#allocation20_spill] sm:$0xff] %v13703_v22  ;;  %9842 = vmatpush2.msra.mxu0 %v3403_v11  ;;  %3080 = vrot.lane.b32.xlu1 %v13628_v26, %s11603_s17  ;;  %v3386_v10 = vsel %vm3375_vm11, %v19646_v12, %v19645_v49  ;;  %v19648_v11 = vld [vmem:[#allocation12_spill] sm:$0xff] }
 0x3af   : > { %v13715_v48 = vpop.permute.xlu0 %3576  ;;  %9843 = vmatprep.subr.mxu0 %v3395_v31  ;;  %v3385_v35 = vsel %vm3375_vm11, %v19648_v11, %v19646_v12  ;;  %v19649_v31 = vld [vmem:[#allocation36_spill] sm:$0xff] }
 0x3b0   : > { %19643 = vst [vmem:[#allocation15_spill] sm:$0xff] %v13715_v48  ;;  %9844 = vmatpush2.msra.mxu0 %v3394_v27  ;;  %3343 = vrot.lane.b32.xlu0 %v13592_v7, %s11604_s18  ;;  %v3377_v9 = vsel %vm3375_vm11, %v19650_v59, %v19649_v31  ;;  %v19652_v47 = vld [vmem:[#allocation4_spill] sm:$0xff] }
 0x3b1   : > { %v13723_v23 = vpop.permute.xlu1 %3578  ;;  %9845 = vmatprep.subr.mxu0 %v3386_v10  ;;  %v14022_v49 = vld [vmem:[#allocation2 + $0xa0] sm:$0xff] }
 0x3b2   : > { %19647 = vst [vmem:[#allocation14_spill] sm:$0xff] %v13723_v23  ;;  %9846 = vmatpush2.msra.mxu0 %v3385_v35  ;;  %3345 = vrot.lane.b32.xlu1 %v13604_v37, %s11604_s18  ;;  %v3376_v23 = vsel %vm3375_vm11, %v19652_v47, %v19650_v59 }
 0x3b3   : > { %v13735_v27 = vpop.permute.xlu0 %3841  ;;  %9847 = vmatprep.subr.mxu0 %v3377_v9 }
 0x3b4   : > { %19651 = vst [vmem:[#allocation7_spill] sm:$0xff] %v13735_v27  ;;  %9848 = vmatpush2.msra.mxu0 %v3376_v23  ;;  %3347 = vrot.lane.b32.xlu0 %v13616_v8, %s11604_s18 }
 0x3b5   : > { %v13740_v10 = vpop.permute.xlu1 %3843 }
 0x3b6   : > { %19653 = vst [vmem:[#allocation6_spill] sm:$0xff] %v13740_v10  ;;  %3349 = vrot.lane.b32.xlu1 %v13628_v26, %s11604_s18 }
 0x3b7   : > { %v13746_v12 = vpop.permute.xlu0 %3845 }
 0x3b8   : > { %19654 = vst [vmem:[#allocation25_spill] sm:$0xff] %v13746_v12  ;;  %3612 = vrot.lane.b32.xlu0 %v13592_v7, %s11605_s19 }
 0x3b9   : > { %v13748_v35 = vpop.permute.xlu1 %3847 }
 0x3ba   : > { %19655 = vst [vmem:[#allocation24_spill] sm:$0xff] %v13748_v35  ;;  %3614 = vrot.lane.b32.xlu1 %v13604_v37, %s11605_s19 }
 0x3bb   : > { %v13754_v59 = vpop.permute.xlu0 %4110 }
 0x3bc   : > { %19656 = vst [vmem:[#allocation19_spill] sm:$0xff] %v13754_v59  ;;  %3616 = vrot.lane.b32.xlu0 %v13616_v8, %s11605_s19 }
 0x3bd   : > { %v13756_v23 = vpop.permute.xlu1 %4112 }
 0x3be   : > { %19657 = vst [vmem:[#allocation18_spill] sm:$0xff] %v13756_v23  ;;  %3618 = vrot.lane.b32.xlu1 %v13628_v26, %s11605_s19  ;;  %v13812_v23 = vld [vmem:[#allocation2 + $0x128] sm:$0xff] }
 0x3bf   : > { %v13762_v11 = vpop.permute.xlu0 %4114 }
 0x3c0   : > { %19658 = vst [vmem:[#allocation13_spill] sm:$0xff] %v13762_v11  ;;  %3881 = vrot.lane.b32.xlu0 %v13592_v7, %s11606_s20 }
 0x3c1   : > { %v13764_v9 = vpop.permute.xlu1 %4116 }
 0x3c2   : > { %19659 = vst [vmem:[#allocation12_spill] sm:$0xff] %v13764_v9  ;;  %3883 = vrot.lane.b32.xlu1 %v13604_v37, %s11606_s20 }
 0x3c3   : > { %v13770_v47 = vpop.permute.xlu0 %4379 }
 0x3c4   : > { %19660 = vst [vmem:[#allocation5_spill] sm:$0xff] %v13770_v47  ;;  %3885 = vrot.lane.b32.xlu0 %v13616_v8, %s11606_s20 }
 0x3c5   : > { %v13772_v35 = vpop.permute.xlu1 %4381 }
 0x3c6   : > { %19661 = vst [vmem:[#allocation4_spill] sm:$0xff] %v13772_v35  ;;  %3887 = vrot.lane.b32.xlu1 %v13628_v26, %s11606_s20 }
 0x3c7   : > { %v13778_v19 = vpop.permute.xlu0 %4383 }
 0x3c8   : > { %19662 = vst [vmem:[#allocation106_spill] sm:$0xff] %v13778_v19  ;;  %4150 = vrot.lane.b32.xlu0 %v13592_v7, %s11607_s21 }
 0x3c9   : > { %v13780_v22 = vpop.permute.xlu1 %4385 }
 0x3ca   : > { %19663 = vst [vmem:[#allocation107_spill] sm:$0xff] %v13780_v22  ;;  %4152 = vrot.lane.b32.xlu1 %v13604_v37, %s11607_s21 }
 0x3cb   : > { %v13786_v9 = vpop.permute.xlu0 %2516 }
 0x3cc   : > { %19664 = vst [vmem:[#allocation108_spill] sm:$0xff] %v13786_v9  ;;  %4154 = vrot.lane.b32.xlu0 %v13616_v8, %s11607_s21 }
 0x3cd   : > { %v13788_v48 = vpop.permute.xlu1 %2518 }
 0x3ce   : > { %19665 = vst [vmem:[#allocation109_spill] sm:$0xff] %v13788_v48  ;;  %4156 = vrot.lane.b32.xlu1 %v13628_v26, %s11607_s21 }
 0x3cf   : > { %v13794_v35 = vpop.permute.xlu0 %2520 }
 0x3d0   : > { %19666 = vst [vmem:[#allocation110_spill] sm:$0xff] %v13794_v35  ;;  %4419 = vrot.lane.b32.xlu0 %v13592_v7, %s11608_s22  ;;  %v13818_v7 = vld [vmem:[#allocation2 + $0x130] sm:$0xff] }
 0x3d1   : > { %v13796_v19 = vpop.permute.xlu1 %2522 }
 0x3d2   : > { %19667 = vst [vmem:[#allocation111_spill] sm:$0xff] %v13796_v19  ;;  %4421 = vrot.lane.b32.xlu1 %v13604_v37, %s11608_s22 }
 0x3d3   : > { %v13802_v22 = vpop.permute.xlu0 %2785 }
 0x3d4   : > { %19668 = vst [vmem:[#allocation112_spill] sm:$0xff] %v13802_v22  ;;  %4423 = vrot.lane.b32.xlu0 %v13616_v8, %s11608_s22  ;;  %v13824_v8 = vld [vmem:[#allocation2 + $0x138] sm:$0xff] }
 0x3d5   : > { %v13804_v10 = vpop.permute.xlu1 %2787 }
 0x3d6   : > { %19669 = vst [vmem:[#allocation113_spill] sm:$0xff] %v13804_v10  ;;  %4425 = vrot.lane.b32.xlu1 %v13628_v26, %s11608_s22  ;;  %v13830_v26 = vld [vmem:[#allocation2 + $0x140] sm:$0xff] }
 0x3d7   : > { %v13810_v12 = vpop.permute.xlu0 %2789 }
 0x3d8   : > { %19670 = vst [vmem:[#allocation114_spill] sm:$0xff] %v13810_v12  ;;  %2556 = vrot.lane.b32.xlu0 %v13812_v23, %s11601_s12 }
 0x3d9   : > { %v13814_v19 = vpop.permute.xlu1 %2791 }
 0x3da   : > { %19671 = vst [vmem:[#allocation115_spill] sm:$0xff] %v13814_v19  ;;  %2558 = vrot.lane.b32.xlu1 %v13818_v7, %s11601_s12 }
 0x3db   : > { %v13822_v37 = vpop.permute.xlu0 %3054 }
 0x3dc   : > { %19672 = vst [vmem:[#allocation116_spill] sm:$0xff] %v13822_v37  ;;  %2560 = vrot.lane.b32.xlu0 %v13824_v8, %s11601_s12 }
 0x3dd   : > { %v13826_v11 = vpop.permute.xlu1 %3056 }
 0x3de   : > { %19673 = vst [vmem:[#allocation117_spill] sm:$0xff] %v13826_v11  ;;  %2562 = vrot.lane.b32.xlu1 %v13830_v26, %s11601_s12 }
 0x3df   : > { %v13834_v19 = vpop.permute.xlu0 %3058 }
 0x3e0   : > { %19674 = vst [vmem:[#allocation118_spill] sm:$0xff] %v13834_v19  ;;  %2825 = vrot.lane.b32.xlu0 %v13812_v23, %s11602_s16  ;;  %v13954_v19 = vld [vmem:[#allocation2 + $0x48] sm:$0xff] }
 0x3e1   : > { %v13836_v17 = vpop.permute.xlu1 %3060 }
 0x3e2   : > { %19675 = vst [vmem:[#allocation119_spill] sm:$0xff] %v13836_v17  ;;  %2827 = vrot.lane.b32.xlu1 %v13818_v7, %s11602_s16 }
 0x3e3   : > { %v13842_v36 = vpop.permute.xlu0 %3323 }
 0x3e4   : > { %19676 = vst [vmem:[#allocation120_spill] sm:$0xff] %v13842_v36  ;;  %2829 = vrot.lane.b32.xlu0 %v13824_v8, %s11602_s16 }
 0x3e5   : > { %v13844_v48 = vpop.permute.xlu1 %3325 }
 0x3e6   : > { %19677 = vst [vmem:[#allocation121_spill] sm:$0xff] %v13844_v48  ;;  %2831 = vrot.lane.b32.xlu1 %v13830_v26, %s11602_s16 }
 0x3e7   : > { %v13850_v35 = vpop.permute.xlu0 %3327 }
 0x3e8   : > { %19678 = vst [vmem:[#allocation122_spill] sm:$0xff] %v13850_v35  ;;  %3094 = vrot.lane.b32.xlu0 %v13812_v23, %s11603_s17 }
 0x3e9   : > { %v13852_v39 = vpop.permute.xlu1 %3329 }
 0x3ea   : > { %19679 = vst [vmem:[#allocation123_spill] sm:$0xff] %v13852_v39  ;;  %3096 = vrot.lane.b32.xlu1 %v13818_v7, %s11603_s17 }
 0x3eb   : > { %v13858_v17 = vpop.permute.xlu0 %3592 }
 0x3ec   : > { %19680 = vst [vmem:[#allocation124_spill] sm:$0xff] %v13858_v17  ;;  %3098 = vrot.lane.b32.xlu0 %v13824_v8, %s11603_s17 }
 0x3ed   : > { %v13860_v13 = vpop.permute.xlu1 %3594 }
 0x3ee   : > { %19681 = vst [vmem:[#allocation125_spill] sm:$0xff] %v13860_v13  ;;  %3100 = vrot.lane.b32.xlu1 %v13830_v26, %s11603_s17 }
 0x3ef   : > { %v13866_v48 = vpop.permute.xlu0 %3596 }
 0x3f0   : > { %19682 = vst [vmem:[#allocation126_spill] sm:$0xff] %v13866_v48  ;;  %3363 = vrot.lane.b32.xlu0 %v13812_v23, %s11604_s18 }
 0x3f1   : > { %v13868_v35 = vpop.permute.xlu1 %3598 }
 0x3f2   : > { %19683 = vst [vmem:[#allocation127_spill] sm:$0xff] %v13868_v35  ;;  %3365 = vrot.lane.b32.xlu1 %v13818_v7, %s11604_s18 }
 0x3f3   : > { %v13874_v39 = vpop.permute.xlu0 %3861 }
 0x3f4   : > { %19684 = vst [vmem:[#allocation128_spill] sm:$0xff] %v13874_v39  ;;  %3367 = vrot.lane.b32.xlu0 %v13824_v8, %s11604_s18  ;;  %v14286_v39 = vld [vmem:[#allocation2 + $0x70] sm:$0xff] }
 0x3f5   : > { %v13876_v10 = vpop.permute.xlu1 %3863 }
 0x3f6   : > { %19685 = vst [vmem:[#allocation129_spill] sm:$0xff] %v13876_v10  ;;  %3369 = vrot.lane.b32.xlu1 %v13830_v26, %s11604_s18 }
 0x3f7   : > { %v13882_v13 = vpop.permute.xlu0 %3865 }
 0x3f8   : > { %19686 = vst [vmem:[#allocation130_spill] sm:$0xff] %v13882_v13  ;;  %3632 = vrot.lane.b32.xlu0 %v13812_v23, %s11605_s19 }
 0x3f9   : > { %v13884_v48 = vpop.permute.xlu1 %3867 }
 0x3fa   : > { %19687 = vst [vmem:[#allocation131_spill] sm:$0xff] %v13884_v48  ;;  %3634 = vrot.lane.b32.xlu1 %v13818_v7, %s11605_s19 }
 0x3fb   : > { %v13890_v35 = vpop.permute.xlu0 %4130 }
 0x3fc   : > { %19688 = vst [vmem:[#allocation132_spill] sm:$0xff] %v13890_v35  ;;  %3636 = vrot.lane.b32.xlu0 %v13824_v8, %s11605_s19 }
 0x3fd   : > { %v13892_v12 = vpop.permute.xlu1 %4132 }
 0x3fe   : > { %19689 = vst [vmem:[#allocation133_spill] sm:$0xff] %v13892_v12  ;;  %3638 = vrot.lane.b32.xlu1 %v13830_v26, %s11605_s19 }
 0x3ff   : > { %v13898_v10 = vpop.permute.xlu0 %4134 }
 0x400   : > { %19690 = vst [vmem:[#allocation134_spill] sm:$0xff] %v13898_v10  ;;  %3901 = vrot.lane.b32.xlu0 %v13812_v23, %s11606_s20 }
 0x401   : > { %v13900_v13 = vpop.permute.xlu1 %4136 }
 0x402   : > { %19691 = vst [vmem:[#allocation135_spill] sm:$0xff] %v13900_v13  ;;  %3903 = vrot.lane.b32.xlu1 %v13818_v7, %s11606_s20 }
 0x403   : > { %v13906_v48 = vpop.permute.xlu0 %4399 }
 0x404   : > { %19692 = vst [vmem:[#allocation136_spill] sm:$0xff] %v13906_v48  ;;  %3905 = vrot.lane.b32.xlu0 %v13824_v8, %s11606_s20 }
 0x405   : > { %v13908_v54 = vpop.permute.xlu1 %4401 }
 0x406   : > { %19693 = vst [vmem:[#allocation137_spill] sm:$0xff] %v13908_v54  ;;  %3907 = vrot.lane.b32.xlu1 %v13830_v26, %s11606_s20 }
 0x407   : > { %v13914_v12 = vpop.permute.xlu0 %4403 }
 0x408   : > { %19694 = vst [vmem:[#allocation138_spill] sm:$0xff] %v13914_v12  ;;  %4170 = vrot.lane.b32.xlu0 %v13812_v23, %s11607_s21 }
 0x409   : > { %v13916_v10 = vpop.permute.xlu1 %4405 }
 0x40a   : > { %19695 = vst [vmem:[#allocation139_spill] sm:$0xff] %v13916_v10  ;;  %4172 = vrot.lane.b32.xlu1 %v13818_v7, %s11607_s21 }
 0x40b   : > { %v13922_v13 = vpop.permute.xlu0 %2536 }
 0x40c   : > { %19696 = vst [vmem:[#allocation140_spill] sm:$0xff] %v13922_v13  ;;  %4174 = vrot.lane.b32.xlu0 %v13824_v8, %s11607_s21 }
 0x40d   : > { %v13924_v20 = vpop.permute.xlu1 %2538 }
 0x40e   : > { %19697 = vst [vmem:[#allocation141_spill] sm:$0xff] %v13924_v20  ;;  %4176 = vrot.lane.b32.xlu1 %v13830_v26, %s11607_s21 }
 0x40f   : > { %v13930_v54 = vpop.permute.xlu0 %2540 }
 0x410   : > { %19698 = vst [vmem:[#allocation142_spill] sm:$0xff] %v13930_v54  ;;  %4439 = vrot.lane.b32.xlu0 %v13812_v23, %s11608_s22  ;;  %v13948_v54 = vld [vmem:[#allocation2 + $0x40] sm:$0xff] }
 0x411   : > { %v13932_v12 = vpop.permute.xlu1 %2542 }
 0x412   : > { %19699 = vst [vmem:[#allocation143_spill] sm:$0xff] %v13932_v12  ;;  %4441 = vrot.lane.b32.xlu1 %v13818_v7, %s11608_s22 }
 0x413   : > { %v13938_v10 = vpop.permute.xlu0 %2805 }
 0x414   : > { %19700 = vst [vmem:[#allocation144_spill] sm:$0xff] %v13938_v10  ;;  %4443 = vrot.lane.b32.xlu0 %v13824_v8, %s11608_s22 }
 0x415   : > { %v13940_v11 = vpop.permute.xlu1 %2807 }
 0x416   : > { %19701 = vst [vmem:[#allocation145_spill] sm:$0xff] %v13940_v11  ;;  %4445 = vrot.lane.b32.xlu1 %v13830_v26, %s11608_s22 }
 0x417   : > { %v13946_v20 = vpop.permute.xlu0 %2809 }
 0x418   : > { %19702 = vst [vmem:[#allocation146_spill] sm:$0xff] %v13946_v20  ;;  %2504 = vrot.lane.b32.xlu0 %v13948_v54, %s11601_s12 }
 0x419   : > { %v13950_v12 = vpop.permute.xlu1 %2811 }
 0x41a   : > { %19703 = vst [vmem:[#allocation147_spill] sm:$0xff] %v13950_v12  ;;  %2506 = vrot.lane.b32.xlu1 %v13954_v19, %s11601_s12 }
 0x41b   : > { %v13958_v11 = vpop.permute.xlu0 %3074 }
 0x41c   : > { %19704 = vst [vmem:[#allocation148_spill] sm:$0xff] %v13958_v11  ;;  %2773 = vrot.lane.b32.xlu0 %v13948_v54, %s11602_s16 }
 0x41d   : > { %v13960_v47 = vpop.permute.xlu1 %3076 }
 0x41e   : > { %19705 = vst [vmem:[#allocation149_spill] sm:$0xff] %v13960_v47  ;;  %2775 = vrot.lane.b32.xlu1 %v13954_v19, %s11602_s16 }
 0x41f   : > { %v13966_v20 = vpop.permute.xlu0 %3078 }
 0x420   : > { %19706 = vst [vmem:[#allocation150_spill] sm:$0xff] %v13966_v20  ;;  %3042 = vrot.lane.b32.xlu0 %v13948_v54, %s11603_s17 }
 0x421   : > { %v13968_v12 = vpop.permute.xlu1 %3080 }
 0x422   : > { %19707 = vst [vmem:[#allocation151_spill] sm:$0xff] %v13968_v12  ;;  %3044 = vrot.lane.b32.xlu1 %v13954_v19, %s11603_s17 }
 0x423   : > { %v13974_v48 = vpop.permute.xlu0 %3343 }
 0x424   : > { %19708 = vst [vmem:[#allocation152_spill] sm:$0xff] %v13974_v48  ;;  %3311 = vrot.lane.b32.xlu0 %v13948_v54, %s11604_s18 }
 0x425   : > { %v13976_v16 = vpop.permute.xlu1 %3345 }
 0x426   : > { %19709 = vst [vmem:[#allocation153_spill] sm:$0xff] %v13976_v16  ;;  %3313 = vrot.lane.b32.xlu1 %v13954_v19, %s11604_s18 }
 0x427   : > { %v13982_v47 = vpop.permute.xlu0 %3347 }
 0x428   : > { %19710 = vst [vmem:[#allocation154_spill] sm:$0xff] %v13982_v47  ;;  %3580 = vrot.lane.b32.xlu0 %v13948_v54, %s11605_s19 }
 0x429   : > { %v13984_v20 = vpop.permute.xlu1 %3349 }
 0x42a   : > { %19711 = vst [vmem:[#allocation155_spill] sm:$0xff] %v13984_v20  ;;  %3582 = vrot.lane.b32.xlu1 %v13954_v19, %s11605_s19 }
 0x42b   : > { %v13990_v12 = vpop.permute.xlu0 %3612 }
 0x42c   : > { %19712 = vst [vmem:[#allocation156_spill] sm:$0xff] %v13990_v12  ;;  %3849 = vrot.lane.b32.xlu0 %v13948_v54, %s11606_s20 }
 0x42d   : > { %v13992_v31 = vpop.permute.xlu1 %3614 }
 0x42e   : > { %19713 = vst [vmem:[#allocation157_spill] sm:$0xff] %v13992_v31  ;;  %3851 = vrot.lane.b32.xlu1 %v13954_v19, %s11606_s20 }
 0x42f   : > { %v13998_v16 = vpop.permute.xlu0 %3616 }
 0x430   : > { %19714 = vst [vmem:[#allocation158_spill] sm:$0xff] %v13998_v16  ;;  %4118 = vrot.lane.b32.xlu0 %v13948_v54, %s11607_s21  ;;  %v14016_v16 = vld [vmem:[#allocation2 + $0x98] sm:$0xff] }
 0x431   : > { %v14000_v47 = vpop.permute.xlu1 %3618 }
 0x432   : > { %19715 = vst [vmem:[#allocation159_spill] sm:$0xff] %v14000_v47  ;;  %4120 = vrot.lane.b32.xlu1 %v13954_v19, %s11607_s21 }
 0x433   : > { %v14006_v20 = vpop.permute.xlu0 %3881 }
 0x434   : > { %19716 = vst [vmem:[#allocation160_spill] sm:$0xff] %v14006_v20  ;;  %4387 = vrot.lane.b32.xlu0 %v13948_v54, %s11608_s22 }
 0x435   : > { %v14008_v60 = vpop.permute.xlu1 %3883 }
 0x436   : > { %19717 = vst [vmem:[#allocation161_spill] sm:$0xff] %v14008_v60  ;;  %4389 = vrot.lane.b32.xlu1 %v13954_v19, %s11608_s22 }
 0x437   : > { %v14014_v31 = vpop.permute.xlu0 %3885 }
 0x438   : > { %19718 = vst [vmem:[#allocation162_spill] sm:$0xff] %v14014_v31  ;;  %2524 = vrot.lane.b32.xlu0 %v14016_v16, %s11601_s12 }
 0x439   : > { %v14018_v47 = vpop.permute.xlu1 %3887 }
 0x43a   : > { %19719 = vst [vmem:[#allocation163_spill] sm:$0xff] %v14018_v47  ;;  %2526 = vrot.lane.b32.xlu1 %v14022_v49, %s11601_s12 }
 0x43b   : > { %v14026_v60 = vpop.permute.xlu0 %4150 }
 0x43c   : > { %19720 = vst [vmem:[#allocation164_spill] sm:$0xff] %v14026_v60  ;;  %2793 = vrot.lane.b32.xlu0 %v14016_v16, %s11602_s16 }
 0x43d   : > { %v14028_v36 = vpop.permute.xlu1 %4152 }
 0x43e   : > { %19721 = vst [vmem:[#allocation165_spill] sm:$0xff] %v14028_v36  ;;  %2795 = vrot.lane.b32.xlu1 %v14022_v49, %s11602_s16 }
 0x43f   : > { %v14034_v31 = vpop.permute.xlu0 %4154 }
 0x440   : > { %19722 = vst [vmem:[#allocation166_spill] sm:$0xff] %v14034_v31  ;;  %3062 = vrot.lane.b32.xlu0 %v14016_v16, %s11603_s17 }
 0x441   : > { %v14036_v47 = vpop.permute.xlu1 %4156 }
 0x442   : > { %19723 = vst [vmem:[#allocation167_spill] sm:$0xff] %v14036_v47  ;;  %3064 = vrot.lane.b32.xlu1 %v14022_v49, %s11603_s17 }
 0x443   : > { %v14042_v15 = vpop.permute.xlu0 %4419 }
 0x444   : > { %19724 = vst [vmem:[#allocation168_spill] sm:$0xff] %v14042_v15  ;;  %3331 = vrot.lane.b32.xlu0 %v14016_v16, %s11604_s18 }
 0x445   : > { %v14044_v48 = vpop.permute.xlu1 %4421 }
 0x446   : > { %19725 = vst [vmem:[#allocation169_spill] sm:$0xff] %v14044_v48  ;;  %3333 = vrot.lane.b32.xlu1 %v14022_v49, %s11604_s18 }
 0x447   : > { %v14050_v36 = vpop.permute.xlu0 %4423 }
 0x448   : > { %19726 = vst [vmem:[#allocation170_spill] sm:$0xff] %v14050_v36  ;;  %3600 = vrot.lane.b32.xlu0 %v14016_v16, %s11605_s19 }
 0x449   : > { %v14052_v31 = vpop.permute.xlu1 %4425 }
 0x44a   : > { %19727 = vst [vmem:[#allocation171_spill] sm:$0xff] %v14052_v31  ;;  %3602 = vrot.lane.b32.xlu1 %v14022_v49, %s11605_s19 }
 0x44b   : > { %v14058_v47 = vpop.permute.xlu0 %2556 }
 0x44c   : > { %19728 = vst [vmem:[#allocation172_spill] sm:$0xff] %v14058_v47  ;;  %3869 = vrot.lane.b32.xlu0 %v14016_v16, %s11606_s20  ;;  %v14578_v47 = vld [vmem:[#allocation2 + $0x130] sm:$0xff] }
 0x44d   : > { %v14060_v15 = vpop.permute.xlu1 %2558 }
 0x44e   : > { %19729 = vst [vmem:[#allocation173_spill] sm:$0xff] %v14060_v15  ;;  %3871 = vrot.lane.b32.xlu1 %v14022_v49, %s11606_s20 }
 0x44f   : > { %v14066_v48 = vpop.permute.xlu0 %2560 }
 0x450   : > { %19730 = vst [vmem:[#allocation174_spill] sm:$0xff] %v14066_v48  ;;  %4138 = vrot.lane.b32.xlu0 %v14016_v16, %s11607_s21  ;;  %v14084_v48 = vld [vmem:[#allocation2 + $0xf0] sm:$0xff] }
 0x451   : > { %v14068_v36 = vpop.permute.xlu1 %2562 }
 0x452   : > { %19731 = vst [vmem:[#allocation175_spill] sm:$0xff] %v14068_v36  ;;  %4140 = vrot.lane.b32.xlu1 %v14022_v49, %s11607_s21 }
 0x453   : > { %v14074_v31 = vpop.permute.xlu0 %2825 }
 0x454   : > { %19732 = vst [vmem:[#allocation176_spill] sm:$0xff] %v14074_v31  ;;  %4407 = vrot.lane.b32.xlu0 %v14016_v16, %s11608_s22 }
 0x455   : > { %v14076_v30 = vpop.permute.xlu1 %2827 }
 0x456   : > { %19733 = vst [vmem:[#allocation177_spill] sm:$0xff] %v14076_v30  ;;  %4409 = vrot.lane.b32.xlu1 %v14022_v49, %s11608_s22 }
 0x457   : > { %v14082_v15 = vpop.permute.xlu0 %2829 }
 0x458   : > { %19734 = vst [vmem:[#allocation178_spill] sm:$0xff] %v14082_v15  ;;  %2544 = vrot.lane.b32.xlu0 %v14084_v48, %s11601_s12 }
 0x459   : > { %v14086_v36 = vpop.permute.xlu1 %2831 }
 0x45a   : > { %19735 = vst [vmem:[#allocation179_spill] sm:$0xff] %v14086_v36  ;;  %2546 = vrot.lane.b32.xlu1 %v14090_v21, %s11601_s12 }
 0x45b   : > { %v14094_v30 = vpop.permute.xlu0 %3094 }
 0x45c   : > { %19736 = vst [vmem:[#allocation180_spill] sm:$0xff] %v14094_v30  ;;  %2813 = vrot.lane.b32.xlu0 %v14084_v48, %s11602_s16 }
 0x45d   : > { %v14096_v58 = vpop.permute.xlu1 %3096 }
 0x45e   : > { %19737 = vst [vmem:[#allocation181_spill] sm:$0xff] %v14096_v58  ;;  %2815 = vrot.lane.b32.xlu1 %v14090_v21, %s11602_s16 }
 0x45f   : > { %v14102_v15 = vpop.permute.xlu0 %3098 }
 0x460   : > { %19738 = vst [vmem:[#allocation182_spill] sm:$0xff] %v14102_v15  ;;  %3082 = vrot.lane.b32.xlu0 %v14084_v48, %s11603_s17 }
 0x461   : > { %v14104_v36 = vpop.permute.xlu1 %3100 }
 0x462   : > { %19739 = vst [vmem:[#allocation183_spill] sm:$0xff] %v14104_v36  ;;  %3084 = vrot.lane.b32.xlu1 %v14090_v21, %s11603_s17 }
 0x463   : > { %v14110_v63 = vpop.permute.xlu0 %3363 }
 0x464   : > { %19740 = vst [vmem:[#allocation184_spill] sm:$0xff] %v14110_v63  ;;  %3351 = vrot.lane.b32.xlu0 %v14084_v48, %s11604_s18 }
 0x465   : > { %v14112_v57 = vpop.permute.xlu1 %3365 }
 0x466   : > { %19741 = vst [vmem:[#allocation185_spill] sm:$0xff] %v14112_v57  ;;  %3353 = vrot.lane.b32.xlu1 %v14090_v21, %s11604_s18 }
 0x467   : > { %v14118_v58 = vpop.permute.xlu0 %3367 }
 0x468   : > { %19742 = vst [vmem:[#allocation186_spill] sm:$0xff] %v14118_v58  ;;  %3620 = vrot.lane.b32.xlu0 %v14084_v48, %s11605_s19 }
 0x469   : > { %v14120_v15 = vpop.permute.xlu1 %3369 }
 0x46a   : > { %19743 = vst [vmem:[#allocation187_spill] sm:$0xff] %v14120_v15  ;;  %3622 = vrot.lane.b32.xlu1 %v14090_v21, %s11605_s19 }
 0x46b   : > { %v14126_v36 = vpop.permute.xlu0 %3632 }
 0x46c   : > { %19744 = vst [vmem:[#allocation188_spill] sm:$0xff] %v14126_v36  ;;  %3889 = vrot.lane.b32.xlu0 %v14084_v48, %s11606_s20  ;;  %v14234_v36 = vld [vmem:[#allocation2 + $0x18] sm:$0xff] }
 0x46d   : > { %v14128_v63 = vpop.permute.xlu1 %3634 }
 0x46e   : > { %19745 = vst [vmem:[#allocation189_spill] sm:$0xff] %v14128_v63  ;;  %3891 = vrot.lane.b32.xlu1 %v14090_v21, %s11606_s20 }
 0x46f   : > { %v14134_v57 = vpop.permute.xlu0 %3636 }
 0x470   : > { %19746 = vst [vmem:[#allocation190_spill] sm:$0xff] %v14134_v57  ;;  %4158 = vrot.lane.b32.xlu0 %v14084_v48, %s11607_s21  ;;  %v14152_v57 = vld [vmem:[#allocation2 + $0x148] sm:$0xff] }
 0x471   : > { %v14136_v58 = vpop.permute.xlu1 %3638 }
 0x472   : > { %19747 = vst [vmem:[#allocation191_spill] sm:$0xff] %v14136_v58  ;;  %4160 = vrot.lane.b32.xlu1 %v14090_v21, %s11607_s21 }
 0x473   : > { %v14142_v15 = vpop.permute.xlu0 %3901 }
 0x474   : > { %19748 = vst [vmem:[#allocation192_spill] sm:$0xff] %v14142_v15  ;;  %4427 = vrot.lane.b32.xlu0 %v14084_v48, %s11608_s22 }
 0x475   : > { %v14144_v17 = vpop.permute.xlu1 %3903 }
 0x476   : > { %19749 = vst [vmem:[#allocation193_spill] sm:$0xff] %v14144_v17  ;;  %4429 = vrot.lane.b32.xlu1 %v14090_v21, %s11608_s22 }
 0x477   : > { %v14150_v63 = vpop.permute.xlu0 %3905 }
 0x478   : > { %19750 = vst [vmem:[#allocation194_spill] sm:$0xff] %v14150_v63  ;;  %2564 = vrot.lane.b32.xlu0 %v14152_v57, %s11601_s12 }
 0x479   : > { %v14154_v58 = vpop.permute.xlu1 %3907 }
 0x47a   : > { %19751 = vst [vmem:[#allocation195_spill] sm:$0xff] %v14154_v58  ;;  %2566 = vrot.lane.b32.xlu1 %v14158_v14, %s11601_s12  ;;  %s11617_s12 = smov 16  }
 0x47b   : > { %v14162_v17 = vpop.permute.xlu0 %4170 }
 0x47c   : > { %19752 = vst [vmem:[#allocation196_spill] sm:$0xff] %v14162_v17  ;;  %2833 = vrot.lane.b32.xlu0 %v14152_v57, %s11602_s16 }
 0x47d   : > { %v14164_v12 = vpop.permute.xlu1 %4172 }
 0x47e   : > { %19753 = vst [vmem:[#allocation197_spill] sm:$0xff] %v14164_v12  ;;  %2835 = vrot.lane.b32.xlu1 %v14158_v14, %s11602_s16  ;;  %s11618_s16 = smov 17  }
 0x47f   : > { %v14170_v63 = vpop.permute.xlu0 %4174 }
 0x480   : > { %19754 = vst [vmem:[#allocation198_spill] sm:$0xff] %v14170_v63  ;;  %3102 = vrot.lane.b32.xlu0 %v14152_v57, %s11603_s17 }
 0x481   : > { %v14172_v58 = vpop.permute.xlu1 %4176 }
 0x482   : > { %19755 = vst [vmem:[#allocation199_spill] sm:$0xff] %v14172_v58  ;;  %3104 = vrot.lane.b32.xlu1 %v14158_v14, %s11603_s17  ;;  %s11619_s17 = smov 18  }
 0x483   : > { %v14178_v50 = vpop.permute.xlu0 %4439 }
 0x484   : > { %19756 = vst [vmem:[#allocation200_spill] sm:$0xff] %v14178_v50  ;;  %3371 = vrot.lane.b32.xlu0 %v14152_v57, %s11604_s18 }
 0x485   : > { %v14180_v33 = vpop.permute.xlu1 %4441 }
 0x486   : > { %19757 = vst [vmem:[#allocation201_spill] sm:$0xff] %v14180_v33  ;;  %3373 = vrot.lane.b32.xlu1 %v14158_v14, %s11604_s18 }
 0x487   : > { %v14186_v12 = vpop.permute.xlu0 %4443 }
 0x488   : > { %19758 = vst [vmem:[#allocation202_spill] sm:$0xff] %v14186_v12  ;;  %3640 = vrot.lane.b32.xlu0 %v14152_v57, %s11605_s19 }
 0x489   : > { %v14188_v63 = vpop.permute.xlu1 %4445 }
 0x48a   : > { %19759 = vst [vmem:[#allocation203_spill] sm:$0xff] %v14188_v63  ;;  %3642 = vrot.lane.b32.xlu1 %v14158_v14, %s11605_s19 }
 0x48b   : > { %v14194_v58 = vpop.permute.xlu0 %2504 }
 0x48c   : > { %19760 = vst [vmem:[#allocation204_spill] sm:$0xff] %v14194_v58  ;;  %3909 = vrot.lane.b32.xlu0 %v14152_v57, %s11606_s20 }
 0x48d   : > { %v14196_v50 = vpop.permute.xlu1 %2506 }
 0x48e   : > { %19761 = vst [vmem:[#allocation205_spill] sm:$0xff] %v14196_v50  ;;  %3911 = vrot.lane.b32.xlu1 %v14158_v14, %s11606_s20  ;;  %s11620_s20 = smov 108  }
 0x48f   : > { %v14202_v33 = vpop.permute.xlu0 %2773 }
 0x490   : > { %19762 = vst [vmem:[#allocation206_spill] sm:$0xff] %v14202_v33  ;;  %4178 = vrot.lane.b32.xlu0 %v14152_v57, %s11607_s21 }
 0x491   : > { %v14204_v12 = vpop.permute.xlu1 %2775 }
 0x492   : > { %19763 = vst [vmem:[#allocation207_spill] sm:$0xff] %v14204_v12  ;;  %4180 = vrot.lane.b32.xlu1 %v14158_v14, %s11607_s21  ;;  %s11621_s21 = smov 109  }
 0x493   : > { %v14210_v63 = vpop.permute.xlu0 %3042 }
 0x494   : > { %19764 = vst [vmem:[#allocation208_spill] sm:$0xff] %v14210_v63  ;;  %4447 = vrot.lane.b32.xlu0 %v14152_v57, %s11608_s22 }
 0x495   : > { %v14212_v58 = vpop.permute.xlu1 %3044 }
 0x496   : > { %19765 = vst [vmem:[#allocation209_spill] sm:$0xff] %v14212_v58  ;;  %4449 = vrot.lane.b32.xlu1 %v14158_v14, %s11608_s22  ;;  %v14228_v58 = vld [vmem:[#allocation2 + $0x10] sm:$0xff]  ;;  %s11622_s22 = smov 110  }
 0x497   : > { %v14218_v50 = vpop.permute.xlu0 %3311 }
 0x498   : > { %19766 = vst [vmem:[#allocation210_spill] sm:$0xff] %v14218_v50  ;;  %4640 = vrot.lane.b32.xlu0 %v13569_v25, %s11609_s25  ;;  %v14240_v25 = vld [vmem:[#allocation2 + $0x20] sm:$0xff] }
 0x499   : > { %v14220_v33 = vpop.permute.xlu1 %3313 }
 0x49a   : > { %19767 = vst [vmem:[#allocation211_spill] sm:$0xff] %v14220_v33  ;;  %4642 = vrot.lane.b32.xlu1 %v13562_v6, %s11609_s25  ;;  %v14246_v6 = vld [vmem:[#allocation2 + $0x28] sm:$0xff] }
 0x49b   : > { %v14226_v12 = vpop.permute.xlu0 %3580 }
 0x49c   : > { %19768 = vst [vmem:[#allocation212_spill] sm:$0xff] %v14226_v12  ;;  %4644 = vrot.lane.b32.xlu0 %v14228_v58, %s11609_s25  ;;  %v14252_v12 = vld [vmem:[#allocation2 + $0x30] sm:$0xff] }
 0x49d   : > { %v14230_v63 = vpop.permute.xlu1 %3582 }
 0x49e   : > { %19769 = vst [vmem:[#allocation213_spill] sm:$0xff] %v14230_v63  ;;  %4646 = vrot.lane.b32.xlu1 %v14234_v36, %s11609_s25 }
 0x49f   : > { %v14238_v33 = vpop.permute.xlu0 %3849 }
 0x4a0   : > { %19770 = vst [vmem:[#allocation214_spill] sm:$0xff] %v14238_v33  ;;  %4648 = vrot.lane.b32.xlu0 %v14240_v25, %s11609_s25  ;;  %v14258_v33 = vld [vmem:[#allocation2 + $0x38] sm:$0xff] }
 0x4a1   : > { %v14242_v50 = vpop.permute.xlu1 %3851 }
 0x4a2   : > { %19771 = vst [vmem:[#allocation215_spill] sm:$0xff] %v14242_v50  ;;  %4650 = vrot.lane.b32.xlu1 %v14246_v6, %s11609_s25 }
 0x4a3   : > { %v14250_v63 = vpop.permute.xlu0 %4118 }
 0x4a4   : > { %19772 = vst [vmem:[#allocation216_spill] sm:$0xff] %v14250_v63  ;;  %4652 = vrot.lane.b32.xlu0 %v14252_v12, %s11609_s25 }
 0x4a5   : > { %v14254_v32 = vpop.permute.xlu1 %4120 }
 0x4a6   : > { %19773 = vst [vmem:[#allocation217_spill] sm:$0xff] %v14254_v32  ;;  %4654 = vrot.lane.b32.xlu1 %v14258_v33, %s11609_s25 }
 0x4a7   : > { %v14262_v50 = vpop.permute.xlu0 %4387 }
 0x4a8   : > { %19774 = vst [vmem:[#allocation218_spill] sm:$0xff] %v14262_v50  ;;  %4656 = vrot.lane.b32.xlu0 %v13948_v54, %s11609_s25  ;;  %v14280_v50 = vld [vmem:[#allocation2 + $0x68] sm:$0xff] }
 0x4a9   : > { %v14264_v27 = vpop.permute.xlu1 %4389 }
 0x4aa   : > { %19775 = vst [vmem:[#allocation219_spill] sm:$0xff] %v14264_v27  ;;  %4658 = vrot.lane.b32.xlu1 %v13954_v19, %s11609_s25 }
 0x4ab   : > { %v14270_v63 = vpop.permute.xlu0 %2524 }
 0x4ac   : > { %19776 = vst [vmem:[#allocation220_spill] sm:$0xff] %v14270_v63  ;;  %4660 = vrot.lane.b32.xlu0 %v13559_v0, %s11609_s25  ;;  %v14292_v0 = vld [vmem:[#allocation2 + $0x78] sm:$0xff] }
 0x4ad   : > { %v14272_v32 = vpop.permute.xlu1 %2526 }
 0x4ae   : > { %19777 = vst [vmem:[#allocation221_spill] sm:$0xff] %v14272_v32  ;;  %4662 = vrot.lane.b32.xlu1 %v13552_v62, %s11609_s25  ;;  %v14298_v62 = vld [vmem:[#allocation2 + $0x80] sm:$0xff] }
 0x4af   : > { %v14278_v28 = vpop.permute.xlu0 %2793 }
 0x4b0   : > { %19778 = vst [vmem:[#allocation222_spill] sm:$0xff] %v14278_v28  ;;  %4664 = vrot.lane.b32.xlu0 %v14280_v50, %s11609_s25  ;;  %v14304_v28 = vld [vmem:[#allocation2 + $0x88] sm:$0xff] }
 0x4b1   : > { %v14282_v27 = vpop.permute.xlu1 %2795 }
 0x4b2   : > { %19779 = vst [vmem:[#allocation223_spill] sm:$0xff] %v14282_v27  ;;  %4666 = vrot.lane.b32.xlu1 %v14286_v39, %s11609_s25 }
 0x4b3   : > { %v14290_v32 = vpop.permute.xlu0 %3062 }
 0x4b4   : > { %19780 = vst [vmem:[#allocation224_spill] sm:$0xff] %v14290_v32  ;;  %4668 = vrot.lane.b32.xlu0 %v14292_v0, %s11609_s25  ;;  %v14310_v32 = vld [vmem:[#allocation2 + $0x90] sm:$0xff] }
 0x4b5   : > { %v14294_v63 = vpop.permute.xlu1 %3064 }
 0x4b6   : > { %19781 = vst [vmem:[#allocation225_spill] sm:$0xff] %v14294_v63  ;;  %4670 = vrot.lane.b32.xlu1 %v14298_v62, %s11609_s25 }
 0x4b7   : > { %v14302_v27 = vpop.permute.xlu0 %3331 }
 0x4b8   : > { %19782 = vst [vmem:[#allocation226_spill] sm:$0xff] %v14302_v27  ;;  %4672 = vrot.lane.b32.xlu0 %v14304_v28, %s11609_s25 }
 0x4b9   : > { %v14306_v38 = vpop.permute.xlu1 %3333 }
 0x4ba   : > { %19783 = vst [vmem:[#allocation227_spill] sm:$0xff] %v14306_v38  ;;  %4674 = vrot.lane.b32.xlu1 %v14310_v32, %s11609_s25  ;;  %v14324_v38 = vld [vmem:[#allocation2 + $0xb0] sm:$0xff] }
 0x4bb   : > { %v14314_v63 = vpop.permute.xlu0 %3600 }
 0x4bc   : > { %19784 = vst [vmem:[#allocation228_spill] sm:$0xff] %v14314_v63  ;;  %4676 = vrot.lane.b32.xlu0 %v14016_v16, %s11609_s25  ;;  %v14336_v63 = vld [vmem:[#allocation2 + $0xc0] sm:$0xff] }
 0x4bd   : > { %v14316_v20 = vpop.permute.xlu1 %3602 }
 0x4be   : > { %19785 = vst [vmem:[#allocation229_spill] sm:$0xff] %v14316_v20  ;;  %4678 = vrot.lane.b32.xlu1 %v14022_v49, %s11609_s25 }
 0x4bf   : > { %v14322_v27 = vpop.permute.xlu0 %3869 }
 0x4c0   : > { %19786 = vst [vmem:[#allocation230_spill] sm:$0xff] %v14322_v27  ;;  %4680 = vrot.lane.b32.xlu0 %v14324_v38, %s11609_s25  ;;  %v14342_v27 = vld [vmem:[#allocation2 + $0xc8] sm:$0xff] }
 0x4c1   : > { %v14326_v55 = vpop.permute.xlu1 %3871 }
 0x4c2   : > { %19787 = vst [vmem:[#allocation231_spill] sm:$0xff] %v14326_v55  ;;  %4682 = vrot.lane.b32.xlu1 %v14330_v56, %s11609_s25 }
 0x4c3   : > { %v14334_v20 = vpop.permute.xlu0 %4138 }
 0x4c4   : > { %19788 = vst [vmem:[#allocation232_spill] sm:$0xff] %v14334_v20  ;;  %4684 = vrot.lane.b32.xlu0 %v14336_v63, %s11609_s25  ;;  %v14354_v20 = vld [vmem:[#allocation2 + $0xd8] sm:$0xff] }
 0x4c5   : > { %v14338_v15 = vpop.permute.xlu1 %4140 }
 0x4c6   : > { %19789 = vst [vmem:[#allocation233_spill] sm:$0xff] %v14338_v15  ;;  %4686 = vrot.lane.b32.xlu1 %v14342_v27, %s11609_s25 }
 0x4c7   : > { %v14346_v55 = vpop.permute.xlu0 %4407 }
 0x4c8   : > { %19790 = vst [vmem:[#allocation234_spill] sm:$0xff] %v14346_v55  ;;  %4688 = vrot.lane.b32.xlu0 %v14348_v29, %s11609_s25  ;;  %v14366_v55 = vld [vmem:[#allocation2 + $0xe8] sm:$0xff] }
 0x4c9   : > { %v14350_v59 = vpop.permute.xlu1 %4409 }
 0x4ca   : > { %19791 = vst [vmem:[#allocation235_spill] sm:$0xff] %v14350_v59  ;;  %4690 = vrot.lane.b32.xlu1 %v14354_v20, %s11609_s25 }
 0x4cb   : > { %v14358_v15 = vpop.permute.xlu0 %2544 }
 0x4cc   : > { %19792 = vst [vmem:[#allocation236_spill] sm:$0xff] %v14358_v15  ;;  %4692 = vrot.lane.b32.xlu0 %v14360_v46, %s11609_s25 }
 0x4cd   : > { %v14362_v35 = vpop.permute.xlu1 %2546 }
 0x4ce   : > { %19793 = vst [vmem:[#allocation237_spill] sm:$0xff] %v14362_v35  ;;  %4694 = vrot.lane.b32.xlu1 %v14366_v55, %s11609_s25  ;;  %v14380_v35 = vld [vmem:[#allocation2 + $0x108] sm:$0xff] }
 0x4cf   : > { %v14370_v59 = vpop.permute.xlu0 %2813 }
 0x4d0   : > { %19794 = vst [vmem:[#allocation238_spill] sm:$0xff] %v14370_v59  ;;  %4696 = vrot.lane.b32.xlu0 %v14084_v48, %s11609_s25  ;;  %v14392_v59 = vld [vmem:[#allocation2 + $0x118] sm:$0xff] }
 0x4d1   : > { %v14372_v1 = vpop.permute.xlu1 %2815 }
 0x4d2   : > { %19795 = vst [vmem:[#allocation239_spill] sm:$0xff] %v14372_v1  ;;  %4698 = vrot.lane.b32.xlu1 %v14090_v21, %s11609_s25 }
 0x4d3   : > { %v14378_v15 = vpop.permute.xlu0 %3082 }
 0x4d4   : > { %19796 = vst [vmem:[#allocation240_spill] sm:$0xff] %v14378_v15  ;;  %4700 = vrot.lane.b32.xlu0 %v14380_v35, %s11609_s25  ;;  %v14398_v15 = vld [vmem:[#allocation2 + $0x120] sm:$0xff] }
 0x4d5   : > { %v14382_v60 = vpop.permute.xlu1 %3084 }
 0x4d6   : > { %19797 = vst [vmem:[#allocation241_spill] sm:$0xff] %v14382_v60  ;;  %4702 = vrot.lane.b32.xlu1 %v14386_v4, %s11609_s25 }
 0x4d7   : > { %v14390_v1 = vpop.permute.xlu0 %3351 }
 0x4d8   : > { %19798 = vst [vmem:[#allocation242_spill] sm:$0xff] %v14390_v1  ;;  %4704 = vrot.lane.b32.xlu0 %v14392_v59, %s11609_s25 }
 0x4d9   : > { %v14394_v61 = vpop.permute.xlu1 %3353 }
 0x4da   : > { %19799 = vst [vmem:[#allocation243_spill] sm:$0xff] %v14394_v61  ;;  %4706 = vrot.lane.b32.xlu1 %v14398_v15, %s11609_s25 }
 0x4db   : > { %v14402_v60 = vpop.permute.xlu0 %3620 }
 0x4dc   : > { %19800 = vst [vmem:[#allocation244_spill] sm:$0xff] %v14402_v60  ;;  %4708 = vrot.lane.b32.xlu0 %v13812_v23, %s11609_s25 }
 0x4dd   : > { %v14404_v17 = vpop.permute.xlu1 %3622 }
 0x4de   : > { %19801 = vst [vmem:[#allocation245_spill] sm:$0xff] %v14404_v17  ;;  %4710 = vrot.lane.b32.xlu1 %v13818_v7, %s11609_s25  ;;  %v14428_v7 = vld [vmem:[#allocation2] sm:$0xff] }
 0x4df   : > { %v14410_v1 = vpop.permute.xlu0 %3889 }
 0x4e0   : > { %19802 = vst [vmem:[#allocation246_spill] sm:$0xff] %v14410_v1  ;;  %4712 = vrot.lane.b32.xlu0 %v13824_v8, %s11609_s25  ;;  %v14434_v8 = vld [vmem:[#allocation2 + $0x8] sm:$0xff] }
 0x4e1   : > { %v14412_v61 = vpop.permute.xlu1 %3891 }
 0x4e2   : > { %19803 = vst [vmem:[#allocation247_spill] sm:$0xff] %v14412_v61  ;;  %4714 = vrot.lane.b32.xlu1 %v13830_v26, %s11609_s25 }
 0x4e3   : > { %v14418_v53 = vpop.permute.xlu0 %4158 }
 0x4e4   : > { %19804 = vst [vmem:[#allocation248_spill] sm:$0xff] %v14418_v53  ;;  %4716 = vrot.lane.b32.xlu0 %v14152_v57, %s11609_s25 }
 0x4e5   : > { %v14420_v60 = vpop.permute.xlu1 %4160 }
 0x4e6   : > { %19805 = vst [vmem:[#allocation249_spill] sm:$0xff] %v14420_v60  ;;  %4718 = vrot.lane.b32.xlu1 %v14158_v14, %s11609_s25 }
 0x4e7   : > { %v14426_v23 = vpop.permute.xlu0 %4427 }
 0x4e8   : > { %19806 = vst [vmem:[#allocation250_spill] sm:$0xff] %v14426_v23  ;;  %4909 = vrot.lane.b32.xlu0 %v14428_v7, %s11610_s26 }
 0x4e9   : > { %v14430_v17 = vpop.permute.xlu1 %4429 }
 0x4ea   : > { %19807 = vst [vmem:[#allocation251_spill] sm:$0xff] %v14430_v17  ;;  %4911 = vrot.lane.b32.xlu1 %v14434_v8, %s11610_s26 }
 0x4eb   : > { %v14438_v26 = vpop.permute.xlu0 %2564 }
 0x4ec   : > { %19808 = vst [vmem:[#allocation252_spill] sm:$0xff] %v14438_v26  ;;  %4913 = vrot.lane.b32.xlu0 %v14228_v58, %s11610_s26  ;;  %v14472_v26 = vld [vmem:[#allocation2 + $0x58] sm:$0xff] }
 0x4ed   : > { %v14440_v61 = vpop.permute.xlu1 %2566 }
 0x4ee   : > { %19809 = vst [vmem:[#allocation253_spill] sm:$0xff] %v14440_v61  ;;  %4915 = vrot.lane.b32.xlu1 %v14234_v36, %s11610_s26 }
 0x4ef   : > { %v14446_v17 = vpop.permute.xlu0 %2833 }
 0x4f0   : > { %19810 = vst [vmem:[#allocation254_spill] sm:$0xff] %v14446_v17  ;;  %4917 = vrot.lane.b32.xlu0 %v14240_v25, %s11610_s26  ;;  %v14478_v17 = vld [vmem:[#allocation2 + $0x60] sm:$0xff] }
 0x4f1   : > { %v14448_v60 = vpop.permute.xlu1 %2835 }
 0x4f2   : > { %19811 = vst [vmem:[#allocation255_spill] sm:$0xff] %v14448_v60  ;;  %4919 = vrot.lane.b32.xlu1 %v14246_v6, %s11610_s26 }
 0x4f3   : > { %v14454_v23 = vpop.permute.xlu0 %3102 }
 0x4f4   : > { %19812 = vst [vmem:[#allocation256_spill] sm:$0xff] %v14454_v23  ;;  %4921 = vrot.lane.b32.xlu0 %v14252_v12, %s11610_s26 }
 0x4f5   : > { %v14456_v1 = vpop.permute.xlu1 %3104 }
 0x4f6   : > { %19813 = vst [vmem:[#allocation257_spill] sm:$0xff] %v14456_v1  ;;  %4923 = vrot.lane.b32.xlu1 %v14258_v33, %s11610_s26 }
 0x4f7   : > { %v14462_v61 = vpop.permute.xlu0 %3371 }
 0x4f8   : > { %19814 = vst [vmem:[#allocation258_spill] sm:$0xff] %v14462_v61  ;;  %4925 = vrot.lane.b32.xlu0 %v13948_v54, %s11610_s26 }
 0x4f9   : > { %v14464_v53 = vpop.permute.xlu1 %3373 }
 0x4fa   : > { %19815 = vst [vmem:[#allocation259_spill] sm:$0xff] %v14464_v53  ;;  %4927 = vrot.lane.b32.xlu1 %v13954_v19, %s11610_s26 }
 0x4fb   : > { %v14470_v60 = vpop.permute.xlu0 %3640 }
 0x4fc   : > { %19816 = vst [vmem:[#allocation260_spill] sm:$0xff] %v14470_v60  ;;  %4929 = vrot.lane.b32.xlu0 %v14472_v26, %s11610_s26 }
 0x4fd   : > { %v14474_v1 = vpop.permute.xlu1 %3642 }
 0x4fe   : > { %19817 = vst [vmem:[#allocation261_spill] sm:$0xff] %v14474_v1  ;;  %4931 = vrot.lane.b32.xlu1 %v14478_v17, %s11610_s26 }
 0x4ff   : > { %v14482_v53 = vpop.permute.xlu0 %3909 }
 0x500   : > { %19818 = vst [vmem:[#allocation262_spill] sm:$0xff] %v14482_v53  ;;  %4933 = vrot.lane.b32.xlu0 %v14280_v50, %s11610_s26 }
 0x501   : > { %v14484_v61 = vpop.permute.xlu1 %3911 }
 0x502   : > { %19819 = vst [vmem:[#allocation263_spill] sm:$0xff] %v14484_v61  ;;  %4935 = vrot.lane.b32.xlu1 %v14286_v39, %s11610_s26 }
 0x503   : > { %v14490_v60 = vpop.permute.xlu0 %4178 }
 0x504   : > { %19820 = vst [vmem:[#allocation264_spill] sm:$0xff] %v14490_v60  ;;  %4937 = vrot.lane.b32.xlu0 %v14292_v0, %s11610_s26 }
 0x505   : > { %v14492_v1 = vpop.permute.xlu1 %4180 }
 0x506   : > { %19821 = vst [vmem:[#allocation265_spill] sm:$0xff] %v14492_v1  ;;  %4939 = vrot.lane.b32.xlu1 %v14298_v62, %s11610_s26 }
 0x507   : > { %v14498_v23 = vpop.permute.xlu0 %4447 }
 0x508   : > { %19822 = vst [vmem:[#allocation266_spill] sm:$0xff] %v14498_v23  ;;  %4941 = vrot.lane.b32.xlu0 %v14304_v28, %s11610_s26 }
 0x509   : > { %v14500_v53 = vpop.permute.xlu1 %4449 }
 0x50a   : > { %19823 = vst [vmem:[#allocation267_spill] sm:$0xff] %v14500_v53  ;;  %4943 = vrot.lane.b32.xlu1 %v14310_v32, %s11610_s26 }
 0x50b   : > { %v14506_v61 = vpop.permute.xlu0 %4640 }
 0x50c   : > { %4945 = vrot.lane.b32.xlu0 %v14016_v16, %s11610_s26 }
 0x50d   : > { %v14508_v60 = vpop.permute.xlu1 %4642 }
 0x50e   : > { %4947 = vrot.lane.b32.xlu1 %v14022_v49, %s11610_s26 }
 0x50f   : > { %v14514_v1 = vpop.permute.xlu0 %4644 }
 0x510   : > { %19824 = vst [vmem:[#allocation268_spill] sm:$0xff] %v14514_v1  ;;  %4949 = vrot.lane.b32.xlu0 %v14324_v38, %s11610_s26 }
 0x511   : > { %v14516_v23 = vpop.permute.xlu1 %4646 }
 0x512   : > { %19825 = vst [vmem:[#allocation269_spill] sm:$0xff] %v14516_v23  ;;  %4951 = vrot.lane.b32.xlu1 %v14330_v56, %s11610_s26 }
 0x513   : > { %v14522_v53 = vpop.permute.xlu0 %4648 }
 0x514   : > { %19826 = vst [vmem:[#allocation270_spill] sm:$0xff] %v14522_v53  ;;  %4953 = vrot.lane.b32.xlu0 %v14336_v63, %s11610_s26 }
 0x515   : > { %v14524_v42 = vpop.permute.xlu1 %4650 }
 0x516   : > { %19827 = vst [vmem:[#allocation271_spill] sm:$0xff] %v14524_v42  ;;  %4955 = vrot.lane.b32.xlu1 %v14342_v27, %s11610_s26 }
 0x517   : > { %v14530_v45 = vpop.permute.xlu0 %4652 }
 0x518   : > { %19828 = vst [vmem:[#allocation272_spill] sm:$0xff] %v14530_v45  ;;  %4957 = vrot.lane.b32.xlu0 %v14348_v29, %s11610_s26 }
 0x519   : > { %v14532_v9 = vpop.permute.xlu1 %4654 }
 0x51a   : > { %19829 = vst [vmem:[#allocation273_spill] sm:$0xff] %v14532_v9  ;;  %4959 = vrot.lane.b32.xlu1 %v14354_v20, %s11610_s26 }
 0x51b   : > { %v14538_v23 = vpop.permute.xlu0 %4656 }
 0x51c   : > { %19830 = vst [vmem:[#allocation274_spill] sm:$0xff] %v14538_v23  ;;  %4961 = vrot.lane.b32.xlu0 %v14360_v46, %s11610_s26 }
 0x51d   : > { %v14540_v53 = vpop.permute.xlu1 %4658 }
 0x51e   : > { %19831 = vst [vmem:[#allocation275_spill] sm:$0xff] %v14540_v53  ;;  %4963 = vrot.lane.b32.xlu1 %v14366_v55, %s11610_s26 }
 0x51f   : > { %v14546_v42 = vpop.permute.xlu0 %4660 }
 0x520   : > { %4965 = vrot.lane.b32.xlu0 %v14084_v48, %s11610_s26 }
 0x521   : > { %v14548_v45 = vpop.permute.xlu1 %4662 }
 0x522   : > { %4967 = vrot.lane.b32.xlu1 %v14090_v21, %s11610_s26 }
 0x523   : > { %v14554_v9 = vpop.permute.xlu0 %4664 }
 0x524   : > { %19832 = vst [vmem:[#allocation276_spill] sm:$0xff] %v14554_v9  ;;  %4969 = vrot.lane.b32.xlu0 %v14380_v35, %s11610_s26 }
 0x525   : > { %v14556_v23 = vpop.permute.xlu1 %4666 }
 0x526   : > { %19833 = vst [vmem:[#allocation277_spill] sm:$0xff] %v14556_v23  ;;  %4971 = vrot.lane.b32.xlu1 %v14386_v4, %s11610_s26 }
 0x527   : > { %v14562_v53 = vpop.permute.xlu0 %4668 }
 0x528   : > { %19834 = vst [vmem:[#allocation278_spill] sm:$0xff] %v14562_v53  ;;  %4973 = vrot.lane.b32.xlu0 %v14392_v59, %s11610_s26  ;;  %v14584_v53 = vld [vmem:[#allocation2 + $0x138] sm:$0xff] }
 0x529   : > { %v14564_v18 = vpop.permute.xlu1 %4670 }
 0x52a   : > { %19835 = vst [vmem:[#allocation279_spill] sm:$0xff] %v14564_v18  ;;  %4975 = vrot.lane.b32.xlu1 %v14398_v15, %s11610_s26 }
 0x52b   : > { %v14570_v13 = vpop.permute.xlu0 %4672 }
 0x52c   : > { %19836 = vst [vmem:[#allocation280_spill] sm:$0xff] %v14570_v13  ;;  %4977 = vrot.lane.b32.xlu0 %v14572_v41, %s11610_s26  ;;  %v14590_v13 = vld [vmem:[#allocation2 + $0x140] sm:$0xff] }
 0x52d   : > { %v14574_v23 = vpop.permute.xlu1 %4674 }
 0x52e   : > { %19837 = vst [vmem:[#allocation281_spill] sm:$0xff] %v14574_v23  ;;  %4979 = vrot.lane.b32.xlu1 %v14578_v47, %s11610_s26 }
 0x52f   : > { %v14582_v18 = vpop.permute.xlu0 %4676 }
 0x530   : > { %19838 = vst [vmem:[#allocation282_spill] sm:$0xff] %v14582_v18  ;;  %4981 = vrot.lane.b32.xlu0 %v14584_v53, %s11610_s26 }
 0x531   : > { %v14586_v52 = vpop.permute.xlu1 %4678 }
 0x532   : > { %19839 = vst [vmem:[#allocation283_spill] sm:$0xff] %v14586_v52  ;;  %4983 = vrot.lane.b32.xlu1 %v14590_v13, %s11610_s26 }
 0x533   : > { %v14594_v23 = vpop.permute.xlu0 %4680 }
 0x534   : > { %4985 = vrot.lane.b32.xlu0 %v14152_v57, %s11610_s26 }
 0x535   : > { %v14596_v24 = vpop.permute.xlu1 %4682 }
 0x536   : > { %4987 = vrot.lane.b32.xlu1 %v14158_v14, %s11610_s26 }
 0x537   : > { %v14602_v18 = vpop.permute.xlu0 %4684 }
 0x538   : > { %19840 = vst [vmem:[#allocation284_spill] sm:$0xff] %v14602_v18  ;;  %5178 = vrot.lane.b32.xlu0 %v14428_v7, %s11611_s29 }
 0x539   : > { %v14604_v52 = vpop.permute.xlu1 %4686 }
 0x53a   : > { %19841 = vst [vmem:[#allocation285_spill] sm:$0xff] %v14604_v52  ;;  %5180 = vrot.lane.b32.xlu1 %v14434_v8, %s11611_s29 }
 0x53b   : > { %v14610_v44 = vpop.permute.xlu0 %4688 }
 0x53c   : > { %19842 = vst [vmem:[#allocation286_spill] sm:$0xff] %v14610_v44  ;;  %5182 = vrot.lane.b32.xlu0 %v14228_v58, %s11611_s29 }
 0x53d   : > { %v14612_v22 = vpop.permute.xlu1 %4690 }
 0x53e   : > { %19843 = vst [vmem:[#allocation287_spill] sm:$0xff] %v14612_v22  ;;  %5184 = vrot.lane.b32.xlu1 %v14234_v36, %s11611_s29 }
 0x53f   : > { %v14618_v40 = vpop.permute.xlu0 %4692 }
 0x540   : > { %19844 = vst [vmem:[#allocation288_spill] sm:$0xff] %v14618_v40  ;;  %5186 = vrot.lane.b32.xlu0 %v14240_v25, %s11611_s29 }
 0x541   : > { %v14620_v52 = vpop.permute.xlu1 %4694 }
 0x542   : > { %19845 = vst [vmem:[#allocation289_spill] sm:$0xff] %v14620_v52  ;;  %5188 = vrot.lane.b32.xlu1 %v14246_v6, %s11611_s29 }
 0x543   : > { %v14626_v10 = vpop.permute.xlu0 %4696 }
 0x544   : > { %19846 = vst [vmem:[#allocation290_spill] sm:$0xff] %v14626_v10  ;;  %5190 = vrot.lane.b32.xlu0 %v14252_v12, %s11611_s29 }
 0x545   : > { %v14628_v44 = vpop.permute.xlu1 %4698 }
 0x546   : > { %19847 = vst [vmem:[#allocation291_spill] sm:$0xff] %v14628_v44  ;;  %5192 = vrot.lane.b32.xlu1 %v14258_v33, %s11611_s29 }
 0x547   : > { %v14634_v22 = vpop.permute.xlu0 %4700 }
 0x548   : > { %5194 = vrot.lane.b32.xlu0 %v13948_v54, %s11611_s29 }
 0x549   : > { %v14636_v40 = vpop.permute.xlu1 %4702 }
 0x54a   : > { %5196 = vrot.lane.b32.xlu1 %v13954_v19, %s11611_s29 }
 0x54b   : > { %v14642_v52 = vpop.permute.xlu0 %4704 }
 0x54c   : > { %19848 = vst [vmem:[#allocation292_spill] sm:$0xff] %v14642_v52  ;;  %5198 = vrot.lane.b32.xlu0 %v14472_v26, %s11611_s29 }
 0x54d   : > { %v14644_v10 = vpop.permute.xlu1 %4706 }
 0x54e   : > { %19849 = vst [vmem:[#allocation293_spill] sm:$0xff] %v14644_v10  ;;  %5200 = vrot.lane.b32.xlu1 %v14478_v17, %s11611_s29 }
 0x54f   : > { %v14650_v44 = vpop.permute.xlu0 %4708 }
 0x550   : > { %19850 = vst [vmem:[#allocation294_spill] sm:$0xff] %v14650_v44  ;;  %5202 = vrot.lane.b32.xlu0 %v14280_v50, %s11611_s29 }
 0x551   : > { %v14652_v5 = vpop.permute.xlu1 %4710 }
 0x552   : > { %19851 = vst [vmem:[#allocation295_spill] sm:$0xff] %v14652_v5  ;;  %5204 = vrot.lane.b32.xlu1 %v14286_v39, %s11611_s29 }
 0x553   : > { %v14658_v54 = vpop.permute.xlu0 %4712 }
 0x554   : > { %19852 = vst [vmem:[#allocation296_spill] sm:$0xff] %v14658_v54  ;;  %5206 = vrot.lane.b32.xlu0 %v14292_v0, %s11611_s29 }
 0x555   : > { %v14660_v19 = vpop.permute.xlu1 %4714 }
 0x556   : > { %19853 = vst [vmem:[#allocation297_spill] sm:$0xff] %v14660_v19  ;;  %5208 = vrot.lane.b32.xlu1 %v14298_v62, %s11611_s29 }
 0x557   : > { %v14666_v10 = vpop.permute.xlu0 %4716 }
 0x558   : > { %19854 = vst [vmem:[#allocation298_spill] sm:$0xff] %v14666_v10  ;;  %5210 = vrot.lane.b32.xlu0 %v14304_v28, %s11611_s29 }
 0x559   : > { %v14668_v44 = vpop.permute.xlu1 %4718 }
 0x55a   : > { %19855 = vst [vmem:[#allocation299_spill] sm:$0xff] %v14668_v44  ;;  %5212 = vrot.lane.b32.xlu1 %v14310_v32, %s11611_s29 }
 0x55b   : > { %v14674_v5 = vpop.permute.xlu0 %4909 }
 0x55c   : > { %5214 = vrot.lane.b32.xlu0 %v14016_v16, %s11611_s29 }
 0x55d   : > { %v14676_v54 = vpop.permute.xlu1 %4911 }
 0x55e   : > { %5216 = vrot.lane.b32.xlu1 %v14022_v49, %s11611_s29 }
 0x55f   : > { %v14682_v19 = vpop.permute.xlu0 %4913 }
 0x560   : > { %19856 = vst [vmem:[#allocation300_spill] sm:$0xff] %v14682_v19  ;;  %5218 = vrot.lane.b32.xlu0 %v14324_v38, %s11611_s29 }
 0x561   : > { %v14684_v10 = vpop.permute.xlu1 %4915 }
 0x562   : > { %19857 = vst [vmem:[#allocation301_spill] sm:$0xff] %v14684_v10  ;;  %5220 = vrot.lane.b32.xlu1 %v14330_v56, %s11611_s29 }
 0x563   : > { %v14690_v44 = vpop.permute.xlu0 %4917 }
 0x564   : > { %19858 = vst [vmem:[#allocation302_spill] sm:$0xff] %v14690_v44  ;;  %5222 = vrot.lane.b32.xlu0 %v14336_v63, %s11611_s29 }
 0x565   : > { %v14692_v31 = vpop.permute.xlu1 %4919 }
 0x566   : > { %19859 = vst [vmem:[#allocation303_spill] sm:$0xff] %v14692_v31  ;;  %5224 = vrot.lane.b32.xlu1 %v14342_v27, %s11611_s29 }
 0x567   : > { %v14698_v16 = vpop.permute.xlu0 %4921 }
 0x568   : > { %19860 = vst [vmem:[#allocation304_spill] sm:$0xff] %v14698_v16  ;;  %5226 = vrot.lane.b32.xlu0 %v14348_v29, %s11611_s29 }
 0x569   : > { %v14700_v49 = vpop.permute.xlu1 %4923 }
 0x56a   : > { %19861 = vst [vmem:[#allocation305_spill] sm:$0xff] %v14700_v49  ;;  %5228 = vrot.lane.b32.xlu1 %v14354_v20, %s11611_s29 }
 0x56b   : > { %v14706_v10 = vpop.permute.xlu0 %4925 }
 0x56c   : > { %19862 = vst [vmem:[#allocation306_spill] sm:$0xff] %v14706_v10  ;;  %5230 = vrot.lane.b32.xlu0 %v14360_v46, %s11611_s29 }
 0x56d   : > { %v14708_v44 = vpop.permute.xlu1 %4927 }
 0x56e   : > { %19863 = vst [vmem:[#allocation307_spill] sm:$0xff] %v14708_v44  ;;  %5232 = vrot.lane.b32.xlu1 %v14366_v55, %s11611_s29 }
 0x56f   : > { %v14714_v31 = vpop.permute.xlu0 %4929 }
 0x570   : > { %5234 = vrot.lane.b32.xlu0 %v14084_v48, %s11611_s29 }
 0x571   : > { %v14716_v16 = vpop.permute.xlu1 %4931 }
 0x572   : > { %5236 = vrot.lane.b32.xlu1 %v14090_v21, %s11611_s29 }
 0x573   : > { %v14722_v49 = vpop.permute.xlu0 %4933 }
 0x574   : > { %19864 = vst [vmem:[#allocation308_spill] sm:$0xff] %v14722_v49  ;;  %5238 = vrot.lane.b32.xlu0 %v14380_v35, %s11611_s29 }
 0x575   : > { %v14724_v10 = vpop.permute.xlu1 %4935 }
 0x576   : > { %19865 = vst [vmem:[#allocation309_spill] sm:$0xff] %v14724_v10  ;;  %5240 = vrot.lane.b32.xlu1 %v14386_v4, %s11611_s29 }
 0x577   : > { %v14730_v44 = vpop.permute.xlu0 %4937 }
 0x578   : > { %19866 = vst [vmem:[#allocation310_spill] sm:$0xff] %v14730_v44  ;;  %5242 = vrot.lane.b32.xlu0 %v14392_v59, %s11611_s29 }
 0x579   : > { %v14732_v2 = vpop.permute.xlu1 %4939 }
 0x57a   : > { %19867 = vst [vmem:[#allocation311_spill] sm:$0xff] %v14732_v2  ;;  %5244 = vrot.lane.b32.xlu1 %v14398_v15, %s11611_s29 }
 0x57b   : > { %v14738_v21 = vpop.permute.xlu0 %4941 }
 0x57c   : > { %19868 = vst [vmem:[#allocation312_spill] sm:$0xff] %v14738_v21  ;;  %5246 = vrot.lane.b32.xlu0 %v14572_v41, %s11611_s29 }
 0x57d   : > { %v14740_v48 = vpop.permute.xlu1 %4943 }
 0x57e   : > { %19869 = vst [vmem:[#allocation313_spill] sm:$0xff] %v14740_v48  ;;  %5248 = vrot.lane.b32.xlu1 %v14578_v47, %s11611_s29 }
 0x57f   : > { %v14746_v10 = vpop.permute.xlu0 %4945 }
 0x580   : > { %19870 = vst [vmem:[#allocation314_spill] sm:$0xff] %v14746_v10  ;;  %5250 = vrot.lane.b32.xlu0 %v14584_v53, %s11611_s29 }
 0x581   : > { %v14748_v44 = vpop.permute.xlu1 %4947 }
 0x582   : > { %19871 = vst [vmem:[#allocation315_spill] sm:$0xff] %v14748_v44  ;;  %5252 = vrot.lane.b32.xlu1 %v14590_v13, %s11611_s29 }
 0x583   : > { %v14754_v2 = vpop.permute.xlu0 %4949 }
 0x584   : > { %5254 = vrot.lane.b32.xlu0 %v14152_v57, %s11611_s29 }
 0x585   : > { %v14756_v21 = vpop.permute.xlu1 %4951 }
 0x586   : > { %5256 = vrot.lane.b32.xlu1 %v14158_v14, %s11611_s29 }
 0x587   : > { %v14762_v48 = vpop.permute.xlu0 %4953 }
 0x588   : > { %19872 = vst [vmem:[#allocation316_spill] sm:$0xff] %v14762_v48  ;;  %5447 = vrot.lane.b32.xlu0 %v14428_v7, %s11612_s30 }
 0x589   : > { %v14764_v10 = vpop.permute.xlu1 %4955 }
 0x58a   : > { %19873 = vst [vmem:[#allocation317_spill] sm:$0xff] %v14764_v10  ;;  %5449 = vrot.lane.b32.xlu1 %v14434_v8, %s11612_s30 }
 0x58b   : > { %v14770_v44 = vpop.permute.xlu0 %4957 }
 0x58c   : > { %19874 = vst [vmem:[#allocation318_spill] sm:$0xff] %v14770_v44  ;;  %5451 = vrot.lane.b32.xlu0 %v14228_v58, %s11612_s30 }
 0x58d   : > { %v14772_v43 = vpop.permute.xlu1 %4959 }
 0x58e   : > { %19875 = vst [vmem:[#allocation319_spill] sm:$0xff] %v14772_v43  ;;  %5453 = vrot.lane.b32.xlu1 %v14234_v36, %s11612_s30 }
 0x58f   : > { %v14778_v14 = vpop.permute.xlu0 %4961 }
 0x590   : > { %19876 = vst [vmem:[#allocation320_spill] sm:$0xff] %v14778_v14  ;;  %5455 = vrot.lane.b32.xlu0 %v14240_v25, %s11612_s30  ;;  %v14796_v14 = vld [vmem:[#allocation2 + $0x40] sm:$0xff] }
 0x591   : > { %v14780_v57 = vpop.permute.xlu1 %4963 }
 0x592   : > { %19877 = vst [vmem:[#allocation321_spill] sm:$0xff] %v14780_v57  ;;  %5457 = vrot.lane.b32.xlu1 %v14246_v6, %s11612_s30 }
 0x593   : > { %v14786_v10 = vpop.permute.xlu0 %4965 }
 0x594   : > { %19878 = vst [vmem:[#allocation322_spill] sm:$0xff] %v14786_v10  ;;  %5459 = vrot.lane.b32.xlu0 %v14252_v12, %s11612_s30 }
 0x595   : > { %v14788_v44 = vpop.permute.xlu1 %4967 }
 0x596   : > { %19879 = vst [vmem:[#allocation323_spill] sm:$0xff] %v14788_v44  ;;  %5461 = vrot.lane.b32.xlu1 %v14258_v33, %s11612_s30 }
 0x597   : > { %v14794_v43 = vpop.permute.xlu0 %4969 }
 0x598   : > { %5463 = vrot.lane.b32.xlu0 %v14796_v14, %s11612_s30 }
 0x599   : > { %v14798_v57 = vpop.permute.xlu1 %4971 }
 0x59a   : > { %5465 = vrot.lane.b32.xlu1 %v14802_v34, %s11612_s30 }
 0x59b   : > { %v14806_v44 = vpop.permute.xlu0 %4973 }
 0x59c   : > { %19880 = vst [vmem:[#allocation324_spill] sm:$0xff] %v14806_v44  ;;  %5467 = vrot.lane.b32.xlu0 %v14472_v26, %s11612_s30 }
 0x59d   : > { %v14808_v10 = vpop.permute.xlu1 %4975 }
 0x59e   : > { %19881 = vst [vmem:[#allocation325_spill] sm:$0xff] %v14808_v10  ;;  %5469 = vrot.lane.b32.xlu1 %v14478_v17, %s11612_s30 }
 0x59f   : > { %v14814_v37 = vpop.permute.xlu0 %4977 }
 0x5a0   : > { %19882 = vst [vmem:[#allocation326_spill] sm:$0xff] %v14814_v37  ;;  %5471 = vrot.lane.b32.xlu0 %v14280_v50, %s11612_s30 }
 0x5a1   : > { %v14816_v51 = vpop.permute.xlu1 %4979 }
 0x5a2   : > { %19883 = vst [vmem:[#allocation327_spill] sm:$0xff] %v14816_v51  ;;  %5473 = vrot.lane.b32.xlu1 %v14286_v39, %s11612_s30  ;;  %v14840_v39 = vld [vmem:[#allocation2 + $0x98] sm:$0xff] }
 0x5a3   : > { %v14822_v11 = vpop.permute.xlu0 %4981 }
 0x5a4   : > { %19884 = vst [vmem:[#allocation328_spill] sm:$0xff] %v14822_v11  ;;  %5475 = vrot.lane.b32.xlu0 %v14292_v0, %s11612_s30  ;;  %v14846_v0 = vld [vmem:[#allocation2 + $0xa0] sm:$0xff] }
 0x5a5   : > { %v14824_v30 = vpop.permute.xlu1 %4983 }
 0x5a6   : > { %19885 = vst [vmem:[#allocation329_spill] sm:$0xff] %v14824_v30  ;;  %5477 = vrot.lane.b32.xlu1 %v14298_v62, %s11612_s30 }
 0x5a7   : > { %v14830_v10 = vpop.permute.xlu0 %4985 }
 0x5a8   : > { %19886 = vst [vmem:[#allocation330_spill] sm:$0xff] %v14830_v10  ;;  %5479 = vrot.lane.b32.xlu0 %v14304_v28, %s11612_s30 }
 0x5a9   : > { %v14832_v37 = vpop.permute.xlu1 %4987 }
 0x5aa   : > { %19887 = vst [vmem:[#allocation331_spill] sm:$0xff] %v14832_v37  ;;  %5481 = vrot.lane.b32.xlu1 %v14310_v32, %s11612_s30 }
 0x5ab   : > { %v14838_v50 = vpop.permute.xlu0 %5178 }
 0x5ac   : > { %5483 = vrot.lane.b32.xlu0 %v14840_v39, %s11612_s30 }
 0x5ad   : > { %v14842_v30 = vpop.permute.xlu1 %5180 }
 0x5ae   : > { %5485 = vrot.lane.b32.xlu1 %v14846_v0, %s11612_s30 }
 0x5af   : > { %v14850_v62 = vpop.permute.xlu0 %5182 }
 0x5b0   : > { %19888 = vst [vmem:[#allocation332_spill] sm:$0xff] %v14850_v62  ;;  %5487 = vrot.lane.b32.xlu0 %v14324_v38, %s11612_s30 }
 0x5b1   : > { %v14852_v28 = vpop.permute.xlu1 %5184 }
 0x5b2   : > { %19889 = vst [vmem:[#allocation333_spill] sm:$0xff] %v14852_v28  ;;  %5489 = vrot.lane.b32.xlu1 %v14330_v56, %s11612_s30 }
 0x5b3   : > { %v14858_v32 = vpop.permute.xlu0 %5186 }
 0x5b4   : > { %19890 = vst [vmem:[#allocation334_spill] sm:$0xff] %v14858_v32  ;;  %5491 = vrot.lane.b32.xlu0 %v14336_v63, %s11612_s30 }
 0x5b5   : > { %v14860_v37 = vpop.permute.xlu1 %5188 }
 0x5b6   : > { %19891 = vst [vmem:[#allocation335_spill] sm:$0xff] %v14860_v37  ;;  %5493 = vrot.lane.b32.xlu1 %v14342_v27, %s11612_s30  ;;  %v14884_v27 = vld [vmem:[#allocation2 + $0xf0] sm:$0xff] }
 0x5b7   : > { %v14866_v10 = vpop.permute.xlu0 %5190  ;;  %v14930_v37 = vld [vmem:[#allocation2 + $0x150] sm:$0xff] }
 0x5b8   : > { %19892 = vst [vmem:[#allocation336_spill] sm:$0xff] %v14866_v10  ;;  %5495 = vrot.lane.b32.xlu0 %v14348_v29, %s11612_s30  ;;  %v14890_v29 = vld [vmem:[#allocation2 + $0xf8] sm:$0xff] }
 0x5b9   : > { %v14868_v51 = vpop.permute.xlu1 %5192 }
 0x5ba   : > { %19893 = vst [vmem:[#allocation337_spill] sm:$0xff] %v14868_v51  ;;  %5497 = vrot.lane.b32.xlu1 %v14354_v20, %s11612_s30 }
 0x5bb   : > { %v14874_v38 = vpop.permute.xlu0 %5194 }
 0x5bc   : > { %19894 = vst [vmem:[#allocation338_spill] sm:$0xff] %v14874_v38  ;;  %5499 = vrot.lane.b32.xlu0 %v14360_v46, %s11612_s30 }
 0x5bd   : > { %v14876_v56 = vpop.permute.xlu1 %5196 }
 0x5be   : > { %19895 = vst [vmem:[#allocation339_spill] sm:$0xff] %v14876_v56  ;;  %5501 = vrot.lane.b32.xlu1 %v14366_v55, %s11612_s30 }
 0x5bf   : > { %v14882_v63 = vpop.permute.xlu0 %5198 }
 0x5c0   : > { %5503 = vrot.lane.b32.xlu0 %v14884_v27, %s11612_s30 }
 0x5c1   : > { %v14886_v51 = vpop.permute.xlu1 %5200 }
 0x5c2   : > { %5505 = vrot.lane.b32.xlu1 %v14890_v29, %s11612_s30 }
 0x5c3   : > { %v14894_v20 = vpop.permute.xlu0 %5202 }
 0x5c4   : > { %19896 = vst [vmem:[#allocation340_spill] sm:$0xff] %v14894_v20  ;;  %5507 = vrot.lane.b32.xlu0 %v14380_v35, %s11612_s30 }
 0x5c5   : > { %v14896_v46 = vpop.permute.xlu1 %5204 }
 0x5c6   : > { %19897 = vst [vmem:[#allocation341_spill] sm:$0xff] %v14896_v46  ;;  %5509 = vrot.lane.b32.xlu1 %v14386_v4, %s11612_s30 }
 0x5c7   : > { %v14902_v55 = vpop.permute.xlu0 %5206 }
 0x5c8   : > { %19898 = vst [vmem:[#allocation342_spill] sm:$0xff] %v14902_v55  ;;  %5511 = vrot.lane.b32.xlu0 %v14392_v59, %s11612_s30  ;;  %v14926_v59 = vld [vmem:[#allocation2 + $0x148] sm:$0xff] }
 0x5c9   : > { %v14904_v56 = vpop.permute.xlu1 %5208 }
 0x5ca   : > { %19899 = vst [vmem:[#allocation343_spill] sm:$0xff] %v14904_v56  ;;  %5513 = vrot.lane.b32.xlu1 %v14398_v15, %s11612_s30 }
 0x5cb   : > { %v14910_v38 = vpop.permute.xlu0 %5210 }
 0x5cc   : > { %19900 = vst [vmem:[#allocation344_spill] sm:$0xff] %v14910_v38  ;;  %5515 = vrot.lane.b32.xlu0 %v14572_v41, %s11612_s30 }
 0x5cd   : > { %v14912_v11 = vpop.permute.xlu1 %5212 }
 0x5ce   : > { %19901 = vst [vmem:[#allocation345_spill] sm:$0xff] %v14912_v11  ;;  %5517 = vrot.lane.b32.xlu1 %v14578_v47, %s11612_s30 }
 0x5cf   : > { %v14918_v4 = vpop.permute.xlu0 %5214 }
 0x5d0   : > { %19902 = vst [vmem:[#allocation346_spill] sm:$0xff] %v14918_v4  ;;  %5519 = vrot.lane.b32.xlu0 %v14584_v53, %s11612_s30 }
 0x5d1   : > { %v14920_v35 = vpop.permute.xlu1 %5216 }
 0x5d2   : > { %19903 = vst [vmem:[#allocation347_spill] sm:$0xff] %v14920_v35  ;;  %5521 = vrot.lane.b32.xlu1 %v14590_v13, %s11612_s30 }
 0x5d3   : > { %v5219_v15 = vpop.permute.xlu0 %5218 }
 0x5d4   : > { %5523 = vrot.lane.b32.xlu0 %v14926_v59, %s11612_s30 }
 0x5d5   : > { %v5221_v11 = vpop.permute.xlu1 %5220 }
 0x5d6   : > { %5525 = vrot.lane.b32.xlu1 %v14930_v37, %s11612_s30 }
 0x5d7   : > { %v14934_v4 = vpop.permute.xlu0 %5222 }
 0x5d8   : > { %19904 = vst [vmem:[#allocation348_spill] sm:$0xff] %v14934_v4  ;;  %5716 = vrot.lane.b32.xlu0 %v14428_v7, %s11613_s9 }
 0x5d9   : > { %v14936_v35 = vpop.permute.xlu1 %5224 }
 0x5da   : > { %19905 = vst [vmem:[#allocation349_spill] sm:$0xff] %v14936_v35  ;;  %5718 = vrot.lane.b32.xlu1 %v14434_v8, %s11613_s9  ;;  %v15380_v35 = vld [vmem:[#allocation2 + $0x130] sm:$0xff] }
 0x5db   : > { %v14942_v10 = vpop.permute.xlu0 %5226 }
 0x5dc   : > { %19906 = vst [vmem:[#allocation350_spill] sm:$0xff] %v14942_v10  ;;  %5720 = vrot.lane.b32.xlu0 %v14228_v58, %s11613_s9 }
 0x5dd   : > { %v14944_v56 = vpop.permute.xlu1 %5228 }
 0x5de   : > { %19907 = vst [vmem:[#allocation351_spill] sm:$0xff] %v14944_v56  ;;  %5722 = vrot.lane.b32.xlu1 %v14234_v36, %s11613_s9  ;;  %v14986_v56 = vld [vmem:[#allocation2 + $0x68] sm:$0xff] }
 0x5df   : > { %v14950_v38 = vpop.permute.xlu0 %5230 }
 0x5e0   : > { %19908 = vst [vmem:[#allocation352_spill] sm:$0xff] %v14950_v38  ;;  %5724 = vrot.lane.b32.xlu0 %v14240_v25, %s11613_s9  ;;  %v15182_v38 = vld [vmem:[#allocation2 + $0x118] sm:$0xff] }
 0x5e1   : > { %v14952_v28 = vpop.permute.xlu1 %5232 }
 0x5e2   : > { %19909 = vst [vmem:[#allocation353_spill] sm:$0xff] %v14952_v28  ;;  %5726 = vrot.lane.b32.xlu1 %v14246_v6, %s11613_s9 }
 0x5e3   : > { %v14958_v7 = vpop.permute.xlu0 %5234 }
 0x5e4   : > { %19910 = vst [vmem:[#allocation354_spill] sm:$0xff] %v14958_v7  ;;  %5728 = vrot.lane.b32.xlu0 %v14252_v12, %s11613_s9  ;;  %v5278_v12 = vsel %vm5258_vm12, %v5221_v11, %v14934_v4  ;;  %v5277_v7 = vsel %vm5258_vm12, %v5219_v15, %v5221_v11  ;;  %v5260_v11 = vsel %vm5258_vm12, %v14842_v30, %v14850_v62  ;;  %v15374_v4 = vld [vmem:[#allocation2 + $0x128] sm:$0xff] }
 0x5e5   : > { %v14960_v8 = vpop.permute.xlu1 %5236 }
 0x5e6   : > { %19911 = vst [vmem:[#allocation355_spill] sm:$0xff] %v14960_v8  ;;  %5730 = vrot.lane.b32.xlu1 %v14258_v33, %s11613_s9 }
 0x5e7   : > { %v5239_v36 = vpop.permute.xlu0 %5238 }
 0x5e8   : > { %5732 = vrot.lane.b32.xlu0 %v14796_v14, %s11613_s9 }
 0x5e9   : > { %v5241_v58 = vpop.permute.xlu1 %5240 }
 0x5ea   : > { %5734 = vrot.lane.b32.xlu1 %v14802_v34, %s11613_s9  ;;  %v5286_v33 = vsel %vm5258_vm12, %v5239_v36, %v5241_v58 }
 0x5eb   : > { %v14970_v25 = vpop.permute.xlu0 %5242 }
 0x5ec   : > { %19912 = vst [vmem:[#allocation356_spill] sm:$0xff] %v14970_v25  ;;  %v5287_v6 = vsel %vm5258_vm12, %v5241_v58, %v14970_v25  ;;  %5736 = vrot.lane.b32.xlu0 %v14472_v26, %s11613_s9  ;;  %v5269_v26 = vsel %vm5258_vm12, %v14886_v51, %v14894_v20  ;;  %v14998_v58 = vld [vmem:[#allocation2 + $0x70] sm:$0xff] }
 0x5ed   : > { %v14974_v8 = vpop.permute.xlu1 %5244  ;;  %9856 = vmatprep.subr.mxu1 %v5287_v6 }
 0x5ee   : > { %19913 = vst [vmem:[#allocation357_spill] sm:$0xff] %v14974_v8  ;;  %9857 = vmatpush1.msra.mxu1 %v5286_v33  ;;  %5738 = vrot.lane.b32.xlu1 %v14478_v17, %s11613_s9  ;;  %v5268_v17 = vsel %vm5258_vm12, %v14882_v63, %v14886_v51  ;;  %v15010_v51 = vld [vmem:[#allocation2 + $0x78] sm:$0xff]  ;;  %v5018_v63 = vsel %vm19465_vm13, %v14798_v57, %v14806_v44 }
 0x5ef   : > { %9858 = vmatprep.subr.mxu1 %v5278_v12  ;;  %v14983_v28 = vpop.permute.xlu0 %5246  ;;  %v5017_v33 = vsel %vm19465_vm13, %v14794_v43, %v14798_v57  ;;  %v15022_v12 = vld [vmem:[#allocation2 + $0x80] sm:$0xff]  ;;  %v5000_v43 = vsel %vm19465_vm13, %v14716_v16, %v14722_v49 }
 0x5f0   : > { %19914 = vst [vmem:[#allocation358_spill] sm:$0xff] %v14983_v28  ;;  %9859 = vmatpush1.msra.mxu1 %v5277_v7  ;;  %5740 = vrot.lane.b32.xlu0 %v14986_v56, %s11613_s9  ;;  %v5259_v7 = vsel %vm5258_vm12, %v14838_v50, %v14842_v30  ;;  %v5009_v30 = vsel %vm19465_vm13, %v14756_v21, %v14762_v48 }
 0x5f1   : > { %v14991_v36 = vpop.permute.xlu1 %5248  ;;  %9860 = vmatprep.subr.mxu1 %v5269_v26  ;;  %v5008_v26 = vsel %vm19465_vm13, %v14754_v2, %v14756_v21  ;;  %v4991_v2 = vsel %vm19465_vm13, %v14676_v54, %v14682_v19 }
 0x5f2   : > { %19915 = vst [vmem:[#allocation359_spill] sm:$0xff] %v14991_v36  ;;  %9861 = vmatpush1.msra.mxu1 %v5268_v17  ;;  %5742 = vrot.lane.b32.xlu1 %v14998_v58, %s11613_s9  ;;  %v15034_v17 = vld [vmem:[#allocation2 + $0x88] sm:$0xff] }
 0x5f3   : > { %9862 = vmatprep.subr.mxu1 %v5260_v11  ;;  %v15005_v15 = vpop.permute.xlu0 %5250  ;;  %v4999_v11 = vsel %vm19465_vm13, %v14714_v31, %v14716_v16  ;;  %v4749_v31 = vsel %vm19464_vm14, %v14636_v40, %v14642_v52  ;;  %v15280_v52 = vld [vmem:[#allocation2 + $0x60] sm:$0xff] }
 0x5f4   : > { %19916 = vst [vmem:[#allocation360_spill] sm:$0xff] %v15005_v15  ;;  %9863 = vmatpush1.msra.mxu1 %v5259_v7  ;;  %5744 = vrot.lane.b32.xlu0 %v15010_v51, %s11613_s9  ;;  %v15046_v7 = vld [vmem:[#allocation2 + $0x90] sm:$0xff]  ;;  %v15188_v15 = vld [vmem:[#allocation2 + $0x120] sm:$0xff] }
 0x5f5   : > { %v15015_v6 = vpop.permute.xlu1 %5252  ;;  %9864 = vmatprep.subr.mxu1 %v5018_v63  ;;  %v4990_v63 = vsel %vm19465_vm13, %v14674_v5, %v14676_v54  ;;  %v4740_v5 = vsel %vm19464_vm14, %v14596_v24, %v14602_v18 }
 0x5f6   : > { %19917 = vst [vmem:[#allocation361_spill] sm:$0xff] %v15015_v6  ;;  %9865 = vmatpush1.msra.mxu1 %v5017_v33  ;;  %5746 = vrot.lane.b32.xlu1 %v15022_v12, %s11613_s9  ;;  %v4748_v33 = vsel %vm19464_vm14, %v14634_v22, %v14636_v40  ;;  %v4731_v40 = vsel %vm19464_vm14, %v14548_v45, %v14554_v9 }
 0x5f7   : > { %9866 = vmatprep.subr.mxu1 %v5009_v30  ;;  %v15029_v50 = vpop.permute.xlu0 %5254  ;;  %v4739_v30 = vsel %vm19464_vm14, %v14594_v23, %v14596_v24  ;;  %v4722_v24 = vsel %vm19464_vm14, %v14508_v60, %v14514_v1 }
 0x5f8   : > { %19918 = vst [vmem:[#allocation362_spill] sm:$0xff] %v15029_v50  ;;  %9867 = vmatpush1.msra.mxu1 %v5008_v26  ;;  %5748 = vrot.lane.b32.xlu0 %v15034_v17, %s11613_s9  ;;  %v15078_v26 = vld [vmem:[#allocation2 + $0xb0] sm:$0xff]  ;;  %v15138_v50 = vld [vmem:[#allocation2 + $0xd8] sm:$0xff] }
 0x5f9   : > { %v15039_v57 = vpop.permute.xlu1 %5256  ;;  %9868 = vmatprep.subr.mxu1 %v5000_v43  ;;  %v4730_v43 = vsel %vm19464_vm14, %v14546_v42, %v14548_v45  ;;  %v15102_v45 = vld [vmem:[#allocation2 + $0xc0] sm:$0xff]  ;;  %v19925_v42 = vld [vmem:[#allocation29_spill] sm:$0xff] }
 0x5fa   : > { %19919 = vst [vmem:[#allocation363_spill] sm:$0xff] %v15039_v57  ;;  %9869 = vmatpush1.msra.mxu1 %v4999_v11  ;;  %5750 = vrot.lane.b32.xlu1 %v15046_v7, %s11613_s9  ;;  %v15090_v11 = vld [vmem:[#allocation2 + $0xb8] sm:$0xff] }
 0x5fb   : > { %9870 = vmatprep.subr.mxu1 %v4991_v2  ;;  %v15053_v21 = vpop.permute.xlu0 %5447  ;;  %v4721_v2 = vsel %vm19464_vm14, %v14506_v61, %v14508_v60  ;;  %v19928_v61 = vld [vmem:[#allocation76_spill] sm:$0xff]  ;;  %v19929_v60 = vld [vmem:[#allocation23_spill] sm:$0xff] }
 0x5fc   : > { %19920 = vst [vmem:[#allocation364_spill] sm:$0xff] %v15053_v21  ;;  %9871 = vmatpush1.msra.mxu1 %v4990_v63  ;;  %5752 = vrot.lane.b32.xlu0 %v14840_v39, %s11613_s9  ;;  %v4480_v63 = vsel %vm19466_vm15, %v19925_v42, %v13519_v3  ;;  %v15254_v3 = vld [vmem:[#allocation2 + $0x30] sm:$0xff] }
 0x5fd   : > { %v15061_v16 = vpop.permute.xlu1 %5449  ;;  %9872 = vmatprep.subr.mxu1 %v4749_v31 }
 0x5fe   : > { %19921 = vst [vmem:[#allocation365_spill] sm:$0xff] %v15061_v16  ;;  %9873 = vmatpush1.msra.mxu1 %v4748_v33  ;;  %5754 = vrot.lane.b32.xlu1 %v14846_v0, %s11613_s9  ;;  %v19927_v33 = vld [vmem:[#allocation28_spill] sm:$0xff] }
 0x5ff   : > { %9874 = vmatprep.subr.mxu1 %v4740_v5  ;;  %v15073_v54 = vpop.permute.xlu0 %5451  ;;  %v4479_v5 = vsel %vm19466_vm15, %v19927_v33, %v19925_v42  ;;  %v19932_v42 = vld [vmem:[#allocation60_spill] sm:$0xff]  ;;  %v19933_v33 = vld [vmem:[#allocation17_spill] sm:$0xff] }
 0x600   : > { %19922 = vst [vmem:[#allocation366_spill] sm:$0xff] %v15073_v54  ;;  %9875 = vmatpush1.msra.mxu1 %v4739_v30  ;;  %5756 = vrot.lane.b32.xlu0 %v15078_v26, %s11613_s9  ;;  %v15114_v30 = vld [vmem:[#allocation2 + $0xc8] sm:$0xff] }
 0x601   : > { %v15083_v22 = vpop.permute.xlu1 %5453  ;;  %9876 = vmatprep.subr.mxu1 %v4731_v40  ;;  %v4471_v40 = vsel %vm19466_vm15, %v19929_v60, %v19928_v61 }
 0x602   : > { %19923 = vst [vmem:[#allocation367_spill] sm:$0xff] %v15083_v22  ;;  %9877 = vmatpush1.msra.mxu1 %v4730_v43  ;;  %5758 = vrot.lane.b32.xlu1 %v15090_v11, %s11613_s9 }
 0x603   : > { %9878 = vmatprep.subr.mxu1 %v4722_v24  ;;  %v15097_v23 = vpop.permute.xlu0 %5455  ;;  %v19931_v24 = vld [vmem:[#allocation22_spill] sm:$0xff] }
 0x604   : > { %19924 = vst [vmem:[#allocation368_spill] sm:$0xff] %v15097_v23  ;;  %9879 = vmatpush1.msra.mxu1 %v4721_v2  ;;  %5760 = vrot.lane.b32.xlu0 %v15102_v45, %s11613_s9  ;;  %v4470_v2 = vsel %vm19466_vm15, %v19931_v24, %v19929_v60  ;;  %v19936_v60 = vld [vmem:[#allocation44_spill] sm:$0xff]  ;;  %v19937_v24 = vld [vmem:[#allocation11_spill] sm:$0xff] }
 0x605   : > { %v15107_v31 = vpop.permute.xlu1 %5457  ;;  %9880 = vmatprep.subr.mxu1 %v4480_v63  ;;  %v15126_v63 = vld [vmem:[#allocation2 + $0xd0] sm:$0xff] }
 0x606   : > { %19926 = vst [vmem:[#allocation29_spill] sm:$0xff] %v15107_v31  ;;  %9881 = vmatpush1.msra.mxu1 %v4479_v5  ;;  %5762 = vrot.lane.b32.xlu1 %v15114_v30, %s11613_s9  ;;  %v4462_v5 = vsel %vm19466_vm15, %v19933_v33, %v19932_v42  ;;  %v19939_v31 = vld [vmem:[#allocation10_spill] sm:$0xff]  ;;  %v15242_v42 = vld [vmem:[#allocation2 + $0x20] sm:$0xff] }
 0x607   : > { %9882 = vmatprep.subr.mxu1 %v4471_v40  ;;  %v15121_v43 = vpop.permute.xlu0 %5459  ;;  %v19935_v40 = vld [vmem:[#allocation16_spill] sm:$0xff] }
 0x608   : > { %19930 = vst [vmem:[#allocation28_spill] sm:$0xff] %v15121_v43  ;;  %9883 = vmatpush1.msra.mxu1 %v4470_v2  ;;  %5764 = vrot.lane.b32.xlu0 %v15126_v63, %s11613_s9  ;;  %v4461_v6 = vsel %vm19466_vm15, %v19935_v40, %v19933_v33  ;;  %v4453_v2 = vsel %vm19466_vm15, %v19937_v24, %v19936_v60  ;;  %v15150_v43 = vld [vmem:[#allocation2 + $0xe0] sm:$0xff]  ;;  %v15156_v33 = vld [vmem:[#allocation2 + $0xe8] sm:$0xff]  ;;  %v15236_v60 = vld [vmem:[#allocation2 + $0x18] sm:$0xff] }
 0x609   : > { %v15131_v57 = vpop.permute.xlu1 %5461  ;;  %9884 = vmatprep.subr.mxu1 %v4462_v5  ;;  %v4452_v5 = vsel %vm19466_vm15, %v19939_v31, %v19937_v24  ;;  %v15170_v24 = vld [vmem:[#allocation2 + $0x108] sm:$0xff] }
 0x60a   : > { %19934 = vst [vmem:[#allocation23_spill] sm:$0xff] %v15131_v57  ;;  %9885 = vmatpush1.msra.mxu1 %v4461_v6  ;;  %5766 = vrot.lane.b32.xlu1 %v15138_v50, %s11613_s9 }
 0x60b   : > { %9886 = vmatprep.subr.mxu1 %v4453_v2  ;;  %v15145_v57 = vpop.permute.xlu0 %5463 }
 0x60c   : > { %19938 = vst [vmem:[#allocation22_spill] sm:$0xff] %v15145_v57  ;;  %9887 = vmatpush1.msra.mxu1 %v4452_v5  ;;  %5768 = vrot.lane.b32.xlu0 %v15150_v43, %s11613_s9 }
 0x60d   : > { %v15152_v6 = vpop.permute.xlu1 %5465 }
 0x60e   : > { %19940 = vst [vmem:[#allocation17_spill] sm:$0xff] %v15152_v6  ;;  %5770 = vrot.lane.b32.xlu1 %v15156_v33, %s11613_s9  ;;  %v15176_v6 = vld [vmem:[#allocation2 + $0x110] sm:$0xff] }
 0x60f   : > { %v15160_v40 = vpop.permute.xlu0 %5467 }
 0x610   : > { %19941 = vst [vmem:[#allocation16_spill] sm:$0xff] %v15160_v40  ;;  %5772 = vrot.lane.b32.xlu0 %v14884_v27, %s11613_s9 }
 0x611   : > { %v15162_v2 = vpop.permute.xlu1 %5469 }
 0x612   : > { %19942 = vst [vmem:[#allocation11_spill] sm:$0xff] %v15162_v2  ;;  %5774 = vrot.lane.b32.xlu1 %v14890_v29, %s11613_s9 }
 0x613   : > { %v15168_v31 = vpop.permute.xlu0 %5471 }
 0x614   : > { %19943 = vst [vmem:[#allocation10_spill] sm:$0xff] %v15168_v31  ;;  %5776 = vrot.lane.b32.xlu0 %v15170_v24, %s11613_s9 }
 0x615   : > { %v15172_v5 = vpop.permute.xlu1 %5473 }
 0x616   : > { %19944 = vst [vmem:[#allocation369_spill] sm:$0xff] %v15172_v5  ;;  %5778 = vrot.lane.b32.xlu1 %v15176_v6, %s11613_s9 }
 0x617   : > { %v15180_v57 = vpop.permute.xlu0 %5475 }
 0x618   : > { %19945 = vst [vmem:[#allocation370_spill] sm:$0xff] %v15180_v57  ;;  %5780 = vrot.lane.b32.xlu0 %v15182_v38, %s11613_s9 }
 0x619   : > { %v15184_v36 = vpop.permute.xlu1 %5477 }
 0x61a   : > { %19946 = vst [vmem:[#allocation371_spill] sm:$0xff] %v15184_v36  ;;  %5782 = vrot.lane.b32.xlu1 %v15188_v15, %s11613_s9 }
 0x61b   : > { %v15192_v22 = vpop.permute.xlu0 %5479 }
 0x61c   : > { %19947 = vst [vmem:[#allocation372_spill] sm:$0xff] %v15192_v22  ;;  %5784 = vrot.lane.b32.xlu0 %v14572_v41, %s11613_s9 }
 0x61d   : > { %v15194_v23 = vpop.permute.xlu1 %5481 }
 0x61e   : > { %19948 = vst [vmem:[#allocation373_spill] sm:$0xff] %v15194_v23  ;;  %5786 = vrot.lane.b32.xlu1 %v14578_v47, %s11613_s9  ;;  %v15218_v47 = vld [vmem:[#allocation2] sm:$0xff]  ;;  %v15230_v23 = vld [vmem:[#allocation2 + $0x10] sm:$0xff] }
 0x61f   : > { %v15200_v5 = vpop.permute.xlu0 %5483 }
 0x620   : > { %19949 = vst [vmem:[#allocation374_spill] sm:$0xff] %v15200_v5  ;;  %5788 = vrot.lane.b32.xlu0 %v14584_v53, %s11613_s9  ;;  %v15224_v53 = vld [vmem:[#allocation2 + $0x8] sm:$0xff] }
 0x621   : > { %v15202_v36 = vpop.permute.xlu1 %5485 }
 0x622   : > { %19950 = vst [vmem:[#allocation375_spill] sm:$0xff] %v15202_v36  ;;  %5790 = vrot.lane.b32.xlu1 %v14590_v13, %s11613_s9 }
 0x623   : > { %v15208_v57 = vpop.permute.xlu0 %5487 }
 0x624   : > { %5792 = vrot.lane.b32.xlu0 %v14926_v59, %s11613_s9 }
 0x625   : > { %v15210_v22 = vpop.permute.xlu1 %5489 }
 0x626   : > { %5794 = vrot.lane.b32.xlu1 %v14930_v37, %s11613_s9 }
 0x627   : > { %v15216_v41 = vpop.permute.xlu0 %5491 }
 0x628   : > { %19951 = vst [vmem:[#allocation376_spill] sm:$0xff] %v15216_v41  ;;  %5985 = vrot.lane.b32.xlu0 %v15218_v47, %s11614_s10 }
 0x629   : > { %v15220_v36 = vpop.permute.xlu1 %5493 }
 0x62a   : > { %19952 = vst [vmem:[#allocation377_spill] sm:$0xff] %v15220_v36  ;;  %5987 = vrot.lane.b32.xlu1 %v15224_v53, %s11614_s10 }
 0x62b   : > { %v15228_v13 = vpop.permute.xlu0 %5495 }
 0x62c   : > { %19953 = vst [vmem:[#allocation378_spill] sm:$0xff] %v15228_v13  ;;  %5989 = vrot.lane.b32.xlu0 %v15230_v23, %s11614_s10  ;;  %v15248_v13 = vld [vmem:[#allocation2 + $0x28] sm:$0xff] }
 0x62d   : > { %v15232_v5 = vpop.permute.xlu1 %5497 }
 0x62e   : > { %19954 = vst [vmem:[#allocation379_spill] sm:$0xff] %v15232_v5  ;;  %5991 = vrot.lane.b32.xlu1 %v15236_v60, %s11614_s10 }
 0x62f   : > { %v15240_v36 = vpop.permute.xlu0 %5499 }
 0x630   : > { %19955 = vst [vmem:[#allocation380_spill] sm:$0xff] %v15240_v36  ;;  %5993 = vrot.lane.b32.xlu0 %v15242_v42, %s11614_s10  ;;  %v15260_v36 = vld [vmem:[#allocation2 + $0x38] sm:$0xff] }
 0x631   : > { %v15244_v61 = vpop.permute.xlu1 %5501 }
 0x632   : > { %19956 = vst [vmem:[#allocation381_spill] sm:$0xff] %v15244_v61  ;;  %5995 = vrot.lane.b32.xlu1 %v15248_v13, %s11614_s10 }
 0x633   : > { %v15252_v5 = vpop.permute.xlu0 %5503 }
 0x634   : > { %19957 = vst [vmem:[#allocation382_spill] sm:$0xff] %v15252_v5  ;;  %5997 = vrot.lane.b32.xlu0 %v15254_v3, %s11614_s10 }
 0x635   : > { %v15256_v1 = vpop.permute.xlu1 %5505 }
 0x636   : > { %19958 = vst [vmem:[#allocation383_spill] sm:$0xff] %v15256_v1  ;;  %5999 = vrot.lane.b32.xlu1 %v15260_v36, %s11614_s10  ;;  %v15274_v1 = vld [vmem:[#allocation2 + $0x58] sm:$0xff] }
 0x637   : > { %v15264_v61 = vpop.permute.xlu0 %5507 }
 0x638   : > { %6001 = vrot.lane.b32.xlu0 %v14796_v14, %s11614_s10 }
 0x639   : > { %v15266_v9 = vpop.permute.xlu1 %5509 }
 0x63a   : > { %6003 = vrot.lane.b32.xlu1 %v14802_v34, %s11614_s10 }
 0x63b   : > { %v15272_v5 = vpop.permute.xlu0 %5511 }
 0x63c   : > { %19959 = vst [vmem:[#allocation384_spill] sm:$0xff] %v15272_v5  ;;  %6005 = vrot.lane.b32.xlu0 %v15274_v1, %s11614_s10 }
 0x63d   : > { %v15276_v18 = vpop.permute.xlu1 %5513 }
 0x63e   : > { %19960 = vst [vmem:[#allocation385_spill] sm:$0xff] %v15276_v18  ;;  %6007 = vrot.lane.b32.xlu1 %v15280_v52, %s11614_s10 }
 0x63f   : > { %v15284_v19 = vpop.permute.xlu0 %5515 }
 0x640   : > { %19961 = vst [vmem:[#allocation386_spill] sm:$0xff] %v15284_v19  ;;  %6009 = vrot.lane.b32.xlu0 %v14986_v56, %s11614_s10 }
 0x641   : > { %v15286_v49 = vpop.permute.xlu1 %5517 }
 0x642   : > { %19962 = vst [vmem:[#allocation387_spill] sm:$0xff] %v15286_v49  ;;  %6011 = vrot.lane.b32.xlu1 %v14998_v58, %s11614_s10 }
 0x643   : > { %v15292_v48 = vpop.permute.xlu0 %5519 }
 0x644   : > { %19963 = vst [vmem:[#allocation388_spill] sm:$0xff] %v15292_v48  ;;  %6013 = vrot.lane.b32.xlu0 %v15010_v51, %s11614_s10 }
 0x645   : > { %v15294_v18 = vpop.permute.xlu1 %5521 }
 0x646   : > { %19964 = vst [vmem:[#allocation389_spill] sm:$0xff] %v15294_v18  ;;  %6015 = vrot.lane.b32.xlu1 %v15022_v12, %s11614_s10 }
 0x647   : > { %v15300_v44 = vpop.permute.xlu0 %5523 }
 0x648   : > { %19965 = vst [vmem:[#allocation390_spill] sm:$0xff] %v15300_v44  ;;  %6017 = vrot.lane.b32.xlu0 %v15034_v17, %s11614_s10 }
 0x649   : > { %v15302_v19 = vpop.permute.xlu1 %5525 }
 0x64a   : > { %19966 = vst [vmem:[#allocation391_spill] sm:$0xff] %v15302_v19  ;;  %6019 = vrot.lane.b32.xlu1 %v15046_v7, %s11614_s10 }
 0x64b   : > { %v15308_v49 = vpop.permute.xlu0 %5716 }
 0x64c   : > { %6021 = vrot.lane.b32.xlu0 %v14840_v39, %s11614_s10 }
 0x64d   : > { %v15310_v48 = vpop.permute.xlu1 %5718 }
 0x64e   : > { %6023 = vrot.lane.b32.xlu1 %v14846_v0, %s11614_s10 }
 0x64f   : > { %v15316_v18 = vpop.permute.xlu0 %5720 }
 0x650   : > { %6025 = vrot.lane.b32.xlu0 %v15078_v26, %s11614_s10 }
 0x651   : > { %v15318_v44 = vpop.permute.xlu1 %5722 }
 0x652   : > { %19967 = vst [vmem:[#allocation392_spill] sm:$0xff] %v15318_v44  ;;  %6027 = vrot.lane.b32.xlu1 %v15090_v11, %s11614_s10 }
 0x653   : > { %v15324_v19 = vpop.permute.xlu0 %5724 }
 0x654   : > { %19968 = vst [vmem:[#allocation393_spill] sm:$0xff] %v15324_v19  ;;  %6029 = vrot.lane.b32.xlu0 %v15102_v45, %s11614_s10 }
 0x655   : > { %v15326_v62 = vpop.permute.xlu1 %5726 }
 0x656   : > { %19969 = vst [vmem:[#allocation394_spill] sm:$0xff] %v15326_v62  ;;  %6031 = vrot.lane.b32.xlu1 %v15114_v30, %s11614_s10 }
 0x657   : > { %v15332_v32 = vpop.permute.xlu0 %5728 }
 0x658   : > { %19970 = vst [vmem:[#allocation395_spill] sm:$0xff] %v15332_v32  ;;  %6033 = vrot.lane.b32.xlu0 %v15126_v63, %s11614_s10 }
 0x659   : > { %v15334_v20 = vpop.permute.xlu1 %5730 }
 0x65a   : > { %19971 = vst [vmem:[#allocation396_spill] sm:$0xff] %v15334_v20  ;;  %6035 = vrot.lane.b32.xlu1 %v15138_v50, %s11614_s10 }
 0x65b   : > { %v15340_v44 = vpop.permute.xlu0 %5732 }
 0x65c   : > { %19972 = vst [vmem:[#allocation397_spill] sm:$0xff] %v15340_v44  ;;  %6037 = vrot.lane.b32.xlu0 %v15150_v43, %s11614_s10 }
 0x65d   : > { %v15342_v19 = vpop.permute.xlu1 %5734 }
 0x65e   : > { %19973 = vst [vmem:[#allocation398_spill] sm:$0xff] %v15342_v19  ;;  %6039 = vrot.lane.b32.xlu1 %v15156_v33, %s11614_s10 }
 0x65f   : > { %v15348_v62 = vpop.permute.xlu0 %5736 }
 0x660   : > { %6041 = vrot.lane.b32.xlu0 %v14884_v27, %s11614_s10 }
 0x661   : > { %v15350_v32 = vpop.permute.xlu1 %5738 }
 0x662   : > { %6043 = vrot.lane.b32.xlu1 %v14890_v29, %s11614_s10 }
 0x663   : > { %v15356_v20 = vpop.permute.xlu0 %5740 }
 0x664   : > { %6045 = vrot.lane.b32.xlu0 %v15170_v24, %s11614_s10 }
 0x665   : > { %v15358_v44 = vpop.permute.xlu1 %5742 }
 0x666   : > { %19974 = vst [vmem:[#allocation399_spill] sm:$0xff] %v15358_v44  ;;  %6047 = vrot.lane.b32.xlu1 %v15176_v6, %s11614_s10 }
 0x667   : > { %v15364_v19 = vpop.permute.xlu0 %5744 }
 0x668   : > { %19975 = vst [vmem:[#allocation400_spill] sm:$0xff] %v15364_v19  ;;  %6049 = vrot.lane.b32.xlu0 %v15182_v38, %s11614_s10  ;;  %v15386_v19 = vld [vmem:[#allocation2 + $0x138] sm:$0xff] }
 0x669   : > { %v15366_v46 = vpop.permute.xlu1 %5746 }
 0x66a   : > { %19976 = vst [vmem:[#allocation401_spill] sm:$0xff] %v15366_v46  ;;  %6051 = vrot.lane.b32.xlu1 %v15188_v15, %s11614_s10 }
 0x66b   : > { %v15372_v55 = vpop.permute.xlu0 %5748 }
 0x66c   : > { %19977 = vst [vmem:[#allocation402_spill] sm:$0xff] %v15372_v55  ;;  %6053 = vrot.lane.b32.xlu0 %v15374_v4, %s11614_s10  ;;  %v15392_v55 = vld [vmem:[#allocation2 + $0x140] sm:$0xff] }
 0x66d   : > { %v15376_v44 = vpop.permute.xlu1 %5750 }
 0x66e   : > { %19978 = vst [vmem:[#allocation403_spill] sm:$0xff] %v15376_v44  ;;  %6055 = vrot.lane.b32.xlu1 %v15380_v35, %s11614_s10 }
 0x66f   : > { %v15384_v46 = vpop.permute.xlu0 %5752 }
 0x670   : > { %19979 = vst [vmem:[#allocation404_spill] sm:$0xff] %v15384_v46  ;;  %6057 = vrot.lane.b32.xlu0 %v15386_v19, %s11614_s10 }
 0x671   : > { %v15388_v10 = vpop.permute.xlu1 %5754 }
 0x672   : > { %19980 = vst [vmem:[#allocation405_spill] sm:$0xff] %v15388_v10  ;;  %6059 = vrot.lane.b32.xlu1 %v15392_v55, %s11614_s10 }
 0x673   : > { %v15396_v44 = vpop.permute.xlu0 %5756 }
 0x674   : > { %6061 = vrot.lane.b32.xlu0 %v14926_v59, %s11614_s10 }
 0x675   : > { %v15398_v25 = vpop.permute.xlu1 %5758 }
 0x676   : > { %6063 = vrot.lane.b32.xlu1 %v14930_v37, %s11614_s10 }
 0x677   : > { %v15404_v46 = vpop.permute.xlu0 %5760 }
 0x678   : > { %6254 = vrot.lane.b32.xlu0 %v15218_v47, %s11615_s11 }
 0x679   : > { %v15406_v10 = vpop.permute.xlu1 %5762 }
 0x67a   : > { %19981 = vst [vmem:[#allocation406_spill] sm:$0xff] %v15406_v10  ;;  %6256 = vrot.lane.b32.xlu1 %v15224_v53, %s11615_s11 }
 0x67b   : > { %v15412_v8 = vpop.permute.xlu0 %5764 }
 0x67c   : > { %19982 = vst [vmem:[#allocation407_spill] sm:$0xff] %v15412_v8  ;;  %6258 = vrot.lane.b32.xlu0 %v15230_v23, %s11615_s11 }
 0x67d   : > { %v15414_v28 = vpop.permute.xlu1 %5766 }
 0x67e   : > { %19983 = vst [vmem:[#allocation408_spill] sm:$0xff] %v15414_v28  ;;  %6260 = vrot.lane.b32.xlu1 %v15236_v60, %s11615_s11 }
 0x67f   : > { %v15420_v21 = vpop.permute.xlu0 %5768 }
 0x680   : > { %19984 = vst [vmem:[#allocation409_spill] sm:$0xff] %v15420_v21  ;;  %6262 = vrot.lane.b32.xlu0 %v15242_v42, %s11615_s11 }
 0x681   : > { %v15422_v10 = vpop.permute.xlu1 %5770 }
 0x682   : > { %19985 = vst [vmem:[#allocation410_spill] sm:$0xff] %v15422_v10  ;;  %6264 = vrot.lane.b32.xlu1 %v15248_v13, %s11615_s11 }
 0x683   : > { %v15428_v16 = vpop.permute.xlu0 %5772 }
 0x684   : > { %19986 = vst [vmem:[#allocation411_spill] sm:$0xff] %v15428_v16  ;;  %6266 = vrot.lane.b32.xlu0 %v15254_v3, %s11615_s11 }
 0x685   : > { %v15430_v8 = vpop.permute.xlu1 %5774 }
 0x686   : > { %19987 = vst [vmem:[#allocation412_spill] sm:$0xff] %v15430_v8  ;;  %6268 = vrot.lane.b32.xlu1 %v15260_v36, %s11615_s11 }
 0x687   : > { %v15436_v28 = vpop.permute.xlu0 %5776 }
 0x688   : > { %6270 = vrot.lane.b32.xlu0 %v14796_v14, %s11615_s11 }
 0x689   : > { %v15438_v21 = vpop.permute.xlu1 %5778 }
 0x68a   : > { %6272 = vrot.lane.b32.xlu1 %v14802_v34, %s11615_s11 }
 0x68b   : > { %v15444_v10 = vpop.permute.xlu0 %5780 }
 0x68c   : > { %6274 = vrot.lane.b32.xlu0 %v15274_v1, %s11615_s11 }
 0x68d   : > { %v15446_v16 = vpop.permute.xlu1 %5782 }
 0x68e   : > { %19988 = vst [vmem:[#allocation413_spill] sm:$0xff] %v15446_v16  ;;  %6276 = vrot.lane.b32.xlu1 %v15280_v52, %s11615_s11 }
 0x68f   : > { %v15452_v8 = vpop.permute.xlu0 %5784 }
 0x690   : > { %19989 = vst [vmem:[#allocation414_spill] sm:$0xff] %v15452_v8  ;;  %6278 = vrot.lane.b32.xlu0 %v14986_v56, %s11615_s11 }
 0x691   : > { %v15454_v54 = vpop.permute.xlu1 %5786 }
 0x692   : > { %19990 = vst [vmem:[#allocation415_spill] sm:$0xff] %v15454_v54  ;;  %6280 = vrot.lane.b32.xlu1 %v14998_v58, %s11615_s11 }
 0x693   : > { %v15460_v34 = vpop.permute.xlu0 %5788 }
 0x694   : > { %19991 = vst [vmem:[#allocation416_spill] sm:$0xff] %v15460_v34  ;;  %6282 = vrot.lane.b32.xlu0 %v15010_v51, %s11615_s11 }
 0x695   : > { %v15462_v14 = vpop.permute.xlu1 %5790 }
 0x696   : > { %19992 = vst [vmem:[#allocation417_spill] sm:$0xff] %v15462_v14  ;;  %6284 = vrot.lane.b32.xlu1 %v15022_v12, %s11615_s11 }
 0x697   : > { %v15468_v16 = vpop.permute.xlu0 %5792 }
 0x698   : > { %19993 = vst [vmem:[#allocation418_spill] sm:$0xff] %v15468_v16  ;;  %6286 = vrot.lane.b32.xlu0 %v15034_v17, %s11615_s11 }
 0x699   : > { %v15470_v8 = vpop.permute.xlu1 %5794 }
 0x69a   : > { %19994 = vst [vmem:[#allocation419_spill] sm:$0xff] %v15470_v8  ;;  %6288 = vrot.lane.b32.xlu1 %v15046_v7, %s11615_s11 }
 0x69b   : > { %v15476_v54 = vpop.permute.xlu0 %5985 }
 0x69c   : > { %6290 = vrot.lane.b32.xlu0 %v14840_v39, %s11615_s11 }
 0x69d   : > { %v15478_v34 = vpop.permute.xlu1 %5987 }
 0x69e   : > { %6292 = vrot.lane.b32.xlu1 %v14846_v0, %s11615_s11 }
 0x69f   : > { %v15484_v14 = vpop.permute.xlu0 %5989 }
 0x6a0   : > { %6294 = vrot.lane.b32.xlu0 %v15078_v26, %s11615_s11 }
 0x6a1   : > { %v15486_v16 = vpop.permute.xlu1 %5991 }
 0x6a2   : > { %19995 = vst [vmem:[#allocation420_spill] sm:$0xff] %v15486_v16  ;;  %6296 = vrot.lane.b32.xlu1 %v15090_v11, %s11615_s11 }
 0x6a3   : > { %v15492_v8 = vpop.permute.xlu0 %5993 }
 0x6a4   : > { %19996 = vst [vmem:[#allocation421_spill] sm:$0xff] %v15492_v8  ;;  %6298 = vrot.lane.b32.xlu0 %v15102_v45, %s11615_s11 }
 0x6a5   : > { %v15494_v40 = vpop.permute.xlu1 %5995 }
 0x6a6   : > { %19997 = vst [vmem:[#allocation422_spill] sm:$0xff] %v15494_v40  ;;  %6300 = vrot.lane.b32.xlu1 %v15114_v30, %s11615_s11 }
 0x6a7   : > { %v15500_v39 = vpop.permute.xlu0 %5997 }
 0x6a8   : > { %19998 = vst [vmem:[#allocation423_spill] sm:$0xff] %v15500_v39  ;;  %6302 = vrot.lane.b32.xlu0 %v15126_v63, %s11615_s11 }
 0x6a9   : > { %v15502_v0 = vpop.permute.xlu1 %5999 }
 0x6aa   : > { %19999 = vst [vmem:[#allocation424_spill] sm:$0xff] %v15502_v0  ;;  %6304 = vrot.lane.b32.xlu1 %v15138_v50, %s11615_s11 }
 0x6ab   : > { %v15508_v16 = vpop.permute.xlu0 %6001 }
 0x6ac   : > { %20000 = vst [vmem:[#allocation425_spill] sm:$0xff] %v15508_v16  ;;  %6306 = vrot.lane.b32.xlu0 %v15150_v43, %s11615_s11 }
 0x6ad   : > { %v15510_v8 = vpop.permute.xlu1 %6003 }
 0x6ae   : > { %20001 = vst [vmem:[#allocation426_spill] sm:$0xff] %v15510_v8  ;;  %6308 = vrot.lane.b32.xlu1 %v15156_v33, %s11615_s11 }
 0x6af   : > { %v15516_v40 = vpop.permute.xlu0 %6005 }
 0x6b0   : > { %6310 = vrot.lane.b32.xlu0 %v14884_v27, %s11615_s11 }
 0x6b1   : > { %v15518_v39 = vpop.permute.xlu1 %6007 }
 0x6b2   : > { %6312 = vrot.lane.b32.xlu1 %v14890_v29, %s11615_s11 }
 0x6b3   : > { %v15524_v0 = vpop.permute.xlu0 %6009 }
 0x6b4   : > { %6314 = vrot.lane.b32.xlu0 %v15170_v24, %s11615_s11 }
 0x6b5   : > { %v15526_v16 = vpop.permute.xlu1 %6011 }
 0x6b6   : > { %20002 = vst [vmem:[#allocation427_spill] sm:$0xff] %v15526_v16  ;;  %6316 = vrot.lane.b32.xlu1 %v15176_v6, %s11615_s11 }
 0x6b7   : > { %v15532_v8 = vpop.permute.xlu0 %6013 }
 0x6b8   : > { %20003 = vst [vmem:[#allocation428_spill] sm:$0xff] %v15532_v8  ;;  %6318 = vrot.lane.b32.xlu0 %v15182_v38, %s11615_s11 }
 0x6b9   : > { %v15534_v2 = vpop.permute.xlu1 %6015 }
 0x6ba   : > { %20004 = vst [vmem:[#allocation429_spill] sm:$0xff] %v15534_v2  ;;  %6320 = vrot.lane.b32.xlu1 %v15188_v15, %s11615_s11 }
 0x6bb   : > { %v15540_v27 = vpop.permute.xlu0 %6017 }
 0x6bc   : > { %20005 = vst [vmem:[#allocation430_spill] sm:$0xff] %v15540_v27  ;;  %6322 = vrot.lane.b32.xlu0 %v15374_v4, %s11615_s11 }
 0x6bd   : > { %v15542_v29 = vpop.permute.xlu1 %6019 }
 0x6be   : > { %20006 = vst [vmem:[#allocation431_spill] sm:$0xff] %v15542_v29  ;;  %6324 = vrot.lane.b32.xlu1 %v15380_v35, %s11615_s11 }
 0x6bf   : > { %v15548_v16 = vpop.permute.xlu0 %6021 }
 0x6c0   : > { %20007 = vst [vmem:[#allocation432_spill] sm:$0xff] %v15548_v16  ;;  %6326 = vrot.lane.b32.xlu0 %v15386_v19, %s11615_s11  ;;  %v6450_v16 = vld [vmem:[#allocation2 + $0x40] sm:$0xff] }
 0x6c1   : > { %v15550_v8 = vpop.permute.xlu1 %6023 }
 0x6c2   : > { %20008 = vst [vmem:[#allocation433_spill] sm:$0xff] %v15550_v8  ;;  %6328 = vrot.lane.b32.xlu1 %v15392_v55, %s11615_s11 }
 0x6c3   : > { %v15556_v15 = vpop.permute.xlu0 %6025 }
 0x6c4   : > { %6330 = vrot.lane.b32.xlu0 %v14926_v59, %s11615_s11 }
 0x6c5   : > { %v15558_v2 = vpop.permute.xlu1 %6027 }
 0x6c6   : > { %6332 = vrot.lane.b32.xlu1 %v14930_v37, %s11615_s11 }
 0x6c7   : > { %v15564_v4 = vpop.permute.xlu0 %6029 }
 0x6c8   : > { %6522 = vrot.lane.b32.xlu0 %v15218_v47, %s11616_s13 }
 0x6c9   : > { %v15566_v35 = vpop.permute.xlu1 %6031 }
 0x6ca   : > { %20009 = vst [vmem:[#allocation434_spill] sm:$0xff] %v15566_v35  ;;  %6524 = vrot.lane.b32.xlu1 %v15224_v53, %s11616_s13 }
 0x6cb   : > { %v15572_v19 = vpop.permute.xlu0 %6033 }
 0x6cc   : > { %20010 = vst [vmem:[#allocation435_spill] sm:$0xff] %v15572_v19  ;;  %6526 = vrot.lane.b32.xlu0 %v15230_v23, %s11616_s13 }
 0x6cd   : > { %v15574_v55 = vpop.permute.xlu1 %6035 }
 0x6ce   : > { %20011 = vst [vmem:[#allocation436_spill] sm:$0xff] %v15574_v55  ;;  %6528 = vrot.lane.b32.xlu1 %v15236_v60, %s11616_s13  ;;  %v6460_v55 = vld [vmem:[#allocation2 + $0x98] sm:$0xff] }
 0x6cf   : > { %v15580_v37 = vpop.permute.xlu0 %6037 }
 0x6d0   : > { %20012 = vst [vmem:[#allocation437_spill] sm:$0xff] %v15580_v37  ;;  %6530 = vrot.lane.b32.xlu0 %v15242_v42, %s11616_s13  ;;  %v6451_v42 = vld [vmem:[#allocation2 + $0x48] sm:$0xff] }
 0x6d1   : > { %v15582_v59 = vpop.permute.xlu1 %6039 }
 0x6d2   : > { %20013 = vst [vmem:[#allocation438_spill] sm:$0xff] %v15582_v59  ;;  %6532 = vrot.lane.b32.xlu1 %v15248_v13, %s11616_s13 }
 0x6d3   : > { %v15588_v8 = vpop.permute.xlu0 %6041 }
 0x6d4   : > { %20014 = vst [vmem:[#allocation439_spill] sm:$0xff] %v15588_v8  ;;  %6534 = vrot.lane.b32.xlu0 %v15254_v3, %s11616_s13 }
 0x6d5   : > { %v15590_v29 = vpop.permute.xlu1 %6043 }
 0x6d6   : > { %20015 = vst [vmem:[#allocation440_spill] sm:$0xff] %v15590_v29  ;;  %6536 = vrot.lane.b32.xlu1 %v15260_v36, %s11616_s13 }
 0x6d7   : > { %v15596_v60 = vpop.permute.xlu0 %6045 }
 0x6d8   : > { %6538 = vrot.lane.b32.xlu0 %v6450_v16, %s11616_s13 }
 0x6d9   : > { %v15598_v59 = vpop.permute.xlu1 %6047 }
 0x6da   : > { %6540 = vrot.lane.b32.xlu1 %v6451_v42, %s11616_s13 }
 0x6db   : > { %v15602_v13 = vpop.permute.xlu0 %6049 }
 0x6dc   : > { %6542 = vrot.lane.b32.xlu0 %v15274_v1, %s11616_s13 }
 0x6dd   : > { %v15604_v8 = vpop.permute.xlu1 %6051 }
 0x6de   : > { %20016 = vst [vmem:[#allocation441_spill] sm:$0xff] %v15604_v8  ;;  %6544 = vrot.lane.b32.xlu1 %v15280_v52, %s11616_s13 }
 0x6df   : > { %v15610_v3 = vpop.permute.xlu0 %6053 }
 0x6e0   : > { %20017 = vst [vmem:[#allocation442_spill] sm:$0xff] %v15610_v3  ;;  %6546 = vrot.lane.b32.xlu0 %v14986_v56, %s11616_s13  ;;  %v15765_v3 = vld [vmem:[#allocation2 + $0x68] sm:$0xff] }
 0x6e1   : > { %v15612_v36 = vpop.permute.xlu1 %6055 }
 0x6e2   : > { %20018 = vst [vmem:[#allocation443_spill] sm:$0xff] %v15612_v36  ;;  %6548 = vrot.lane.b32.xlu1 %v14998_v58, %s11616_s13  ;;  %v6470_v36 = vld [vmem:[#allocation2 + $0xf0] sm:$0xff] }
 0x6e3   : > { %v15618_v16 = vpop.permute.xlu0 %6057 }
 0x6e4   : > { %20019 = vst [vmem:[#allocation444_spill] sm:$0xff] %v15618_v16  ;;  %6550 = vrot.lane.b32.xlu0 %v15010_v51, %s11616_s13  ;;  %v6461_v51 = vld [vmem:[#allocation2 + $0xa0] sm:$0xff] }
 0x6e5   : > { %v15620_v42 = vpop.permute.xlu1 %6059 }
 0x6e6   : > { %20020 = vst [vmem:[#allocation445_spill] sm:$0xff] %v15620_v42  ;;  %6552 = vrot.lane.b32.xlu1 %v15022_v12, %s11616_s13 }
 0x6e7   : > { %v15626_v29 = vpop.permute.xlu0 %6061 }
 0x6e8   : > { %20021 = vst [vmem:[#allocation446_spill] sm:$0xff] %v15626_v29  ;;  %6554 = vrot.lane.b32.xlu0 %v15034_v17, %s11616_s13 }
 0x6e9   : > { %v15628_v27 = vpop.permute.xlu1 %6063 }
 0x6ea   : > { %20022 = vst [vmem:[#allocation447_spill] sm:$0xff] %v15628_v27  ;;  %6556 = vrot.lane.b32.xlu1 %v15046_v7, %s11616_s13 }
 0x6eb   : > { %v15634_v58 = vpop.permute.xlu0 %6254 }
 0x6ec   : > { %6558 = vrot.lane.b32.xlu0 %v6460_v55, %s11616_s13 }
 0x6ed   : > { %v15636_v42 = vpop.permute.xlu1 %6256 }
 0x6ee   : > { %6560 = vrot.lane.b32.xlu1 %v6461_v51, %s11616_s13 }
 0x6ef   : > { %v15640_v12 = vpop.permute.xlu0 %6258 }
 0x6f0   : > { %6562 = vrot.lane.b32.xlu0 %v15078_v26, %s11616_s13 }
 0x6f1   : > { %v15642_v29 = vpop.permute.xlu1 %6260 }
 0x6f2   : > { %20023 = vst [vmem:[#allocation448_spill] sm:$0xff] %v15642_v29  ;;  %6564 = vrot.lane.b32.xlu1 %v15090_v11, %s11616_s13 }
 0x6f3   : > { %v15648_v17 = vpop.permute.xlu0 %6262 }
 0x6f4   : > { %6566 = vrot.lane.b32.xlu0 %v15102_v45, %s11616_s13 }
 0x6f5   : > { %v15650_v7 = vpop.permute.xlu1 %6264 }
 0x6f6   : > { %20024 = vst [vmem:[#allocation449_spill] sm:$0xff] %v15650_v7  ;;  %6568 = vrot.lane.b32.xlu1 %v15114_v30, %s11616_s13 }
 0x6f7   : > { %v15656_v55 = vpop.permute.xlu0 %6266 }
 0x6f8   : > { %20025 = vst [vmem:[#allocation450_spill] sm:$0xff] %v15656_v55  ;;  %6570 = vrot.lane.b32.xlu0 %v15126_v63, %s11616_s13  ;;  %v8862_v63 = vld [vmem:[%s18990_s5] sm:$0x77] }
 0x6f9   : > { %v15658_v51 = vpop.permute.xlu1 %6268 }
 0x6fa   : > { %20026 = vst [vmem:[#allocation451_spill] sm:$0xff] %v15658_v51  ;;  %6572 = vrot.lane.b32.xlu1 %v15138_v50, %s11616_s13  ;;  %v15680_v50 = vcombine.high %v8862_v63, %v8862_v63 }
 0x6fb   : > { %v15664_v27 = vpop.permute.xlu0 %6270 }
 0x6fc   : > { %20027 = vst [vmem:[#allocation452_spill] sm:$0xff] %v15664_v27  ;;  %6574 = vrot.lane.b32.xlu0 %v15150_v43, %s11616_s13  ;;  %20029 = vst [vmem:[#allocation454_spill] sm:$0xff] %v15680_v50  ;;  %9849 = vmatprep.mubr.f32.mxu0 %v15680_v50 }
 0x6fd   : > { %v15666_v37 = vpop.permute.xlu1 %6272  ;;  %9850 = vmatmul.mubr.f32.vlgmr.msra.gmra.mxu0 %v8862_v63 }
 0x6fe   : > { %20028 = vst [vmem:[#allocation453_spill] sm:$0xff] %v15666_v37  ;;  %6576 = vrot.lane.b32.xlu1 %v15156_v33, %s11616_s13  ;;  %v6471_v37 = vld [vmem:[#allocation2 + $0xf8] sm:$0xff] }
 0x6ff   : > { %v15672_v30 = vpop.permute.xlu0 %6274 }
 0x700   : > { %6578 = vrot.lane.b32.xlu0 %v6470_v36, %s11616_s13 }
 0x701   : > { %v15677_v51 = vpop.permute.xlu1 %6276 }
 0x702   : > { %6580 = vrot.lane.b32.xlu1 %v6471_v37, %s11616_s13 }
 0x703   : > { %v15683_v43 = vpop.permute.xlu0 %6278 }
 0x704   : > { %6582 = vrot.lane.b32.xlu0 %v15170_v24, %s11616_s13 }
 0x705   : > { %v15686_v33 = vpop.permute.xlu1 %6280 }
 0x706   : > { %6584 = vrot.lane.b32.xlu1 %v15176_v6, %s11616_s13 }
 0x707   : > { %v15692_v27 = vpop.permute.xlu0 %6282 }
 0x708   : > { %7391 = vrot.lane.b32.xlu0 %v15176_v6, %s11617_s12 }
 0x709   : > { %v15694_v36 = vpop.permute.xlu1 %6284 }
 0x70a   : > { %20030 = vst [vmem:[#allocation455_spill] sm:$0xff] %v15694_v36  ;;  %7393 = vrot.lane.b32.xlu1 %v15182_v38, %s11617_s12 }
 0x70b   : > { %v15700_v37 = vpop.permute.xlu0 %6286 }
 0x70c   : > { %20031 = vst [vmem:[#allocation456_spill] sm:$0xff] %v15700_v37  ;;  %7389 = vrot.lane.b32.xlu0 %v15170_v24, %s11617_s12 }
 0x70d   : > { %v15702_v63 = vpop.permute.xlu1 %6288 }
 0x70e   : > { %20032 = vst [vmem:[#allocation457_spill] sm:$0xff] %v15702_v63  ;;  %7371 = vrot.lane.b32.xlu1 %v15090_v11, %s11617_s12 }
 0x70f   : > { %v15708_v16 = vpop.permute.xlu0 %6290 }
 0x710   : > { %20033 = vst [vmem:[#allocation458_spill] sm:$0xff] %v15708_v16  ;;  %7373 = vrot.lane.b32.xlu0 %v15102_v45, %s11617_s12 }
 0x711   : > { %v15710_v7 = vpop.permute.xlu1 %6292 }
 0x712   : > { %20034 = vst [vmem:[#allocation459_spill] sm:$0xff] %v15710_v7  ;;  %7369 = vrot.lane.b32.xlu1 %v15078_v26, %s11617_s12 }
 0x713   : > { %v6295_v55 = vpop.permute.xlu0 %6294 }
 0x714   : > { %7351 = vrot.lane.b32.xlu0 %v15280_v52, %s11617_s12 }
 0x715   : > { %v6297_v36 = vpop.permute.xlu1 %6296 }
 0x716   : > { %7353 = vrot.lane.b32.xlu1 %v14986_v56, %s11617_s12  ;;  %v6352_v29 = vsel %vm19432_vm3, %v6295_v55, %v6297_v36  ;;  %v6335_v55 = vsel %vm19432_vm3, %v15636_v42, %v15640_v12 }
 0x717   : > { %v15720_v63 = vpop.permute.xlu0 %6298 }
 0x718   : > { %7349 = vrot.lane.b32.xlu0 %v15274_v1, %s11617_s12 }
 0x719   : > { %v15722_v37 = vpop.permute.xlu1 %6300 }
 0x71a   : > { %7331 = vrot.lane.b32.xlu1 %v15224_v53, %s11617_s12 }
 0x71b   : > { %v15728_v7 = vpop.permute.xlu0 %6302 }
 0x71c   : > { %7333 = vrot.lane.b32.xlu0 %v15230_v23, %s11617_s12 }
 0x71d   : > { %v15730_v16 = vpop.permute.xlu1 %6304 }
 0x71e   : > { %20035 = vst [vmem:[#allocation460_spill] sm:$0xff] %v15730_v16  ;;  %7329 = vrot.lane.b32.xlu1 %v15218_v47, %s11617_s12 }
 0x71f   : > { %v15736_v56 = vpop.permute.xlu0 %6306 }
 0x720   : > { %20036 = vst [vmem:[#allocation461_spill] sm:$0xff] %v15736_v56  ;;  %7122 = vrot.lane.b32.xlu0 %v15176_v6, %s11618_s16 }
 0x721   : > { %v15738_v35 = vpop.permute.xlu1 %6308 }
 0x722   : > { %20037 = vst [vmem:[#allocation462_spill] sm:$0xff] %v15738_v35  ;;  %7124 = vrot.lane.b32.xlu1 %v15182_v38, %s11618_s16 }
 0x723   : > { %v15744_v19 = vpop.permute.xlu0 %6310 }
 0x724   : > { %20038 = vst [vmem:[#allocation463_spill] sm:$0xff] %v15744_v19  ;;  %7120 = vrot.lane.b32.xlu0 %v15170_v24, %s11618_s16 }
 0x725   : > { %v15746_v16 = vpop.permute.xlu1 %6312 }
 0x726   : > { %20039 = vst [vmem:[#allocation464_spill] sm:$0xff] %v15746_v16  ;;  %7102 = vrot.lane.b32.xlu1 %v15090_v11, %s11618_s16 }
 0x727   : > { %v6315_v56 = vpop.permute.xlu0 %6314 }
 0x728   : > { %7104 = vrot.lane.b32.xlu0 %v15102_v45, %s11618_s16  ;;  %v6353_v45 = vsel %vm19432_vm3, %v6297_v36, %v15720_v63  ;;  %v6334_v36 = vsel %vm19432_vm3, %v15634_v58, %v15636_v42  ;;  %v6085_v42 = vsel %vm19430_vm0, %v15558_v2, %v15564_v4 }
 0x729   : > { %v6317_v8 = vpop.permute.xlu1 %6316 }
 0x72a   : > { %7100 = vrot.lane.b32.xlu1 %v15078_v26, %s11618_s16  ;;  %v6361_v11 = vsel %vm19432_vm3, %v6315_v56, %v6317_v8  ;;  %v6343_v56 = vsel %vm19432_vm3, %v15672_v30, %v15677_v51 }
 0x72b   : > { %v15756_v35 = vpop.permute.xlu0 %6318 }
 0x72c   : > { %v6362_v19 = vsel %vm19432_vm3, %v6317_v8, %v15756_v35  ;;  %7082 = vrot.lane.b32.xlu0 %v15280_v52, %s11618_s16 }
 0x72d   : > { %v15760_v16 = vpop.permute.xlu1 %6320  ;;  %9888 = vmatprep.subr.mxu1 %v6362_v19  ;;  %v6344_v19 = vsel %vm19432_vm3, %v15677_v51, %v15683_v43  ;;  %v6094_v51 = vsel %vm19430_vm0, %v15598_v59, %v15602_v13  ;;  %vm8484_vm3 = vcmask 891904  }
 0x72e   : > { %9889 = vmatpush2.msra.mxu1 %v6361_v11  ;;  %7084 = vrot.lane.b32.xlu1 %v15765_v3, %s11618_s16  ;;  %v6093_v11 = vsel %vm19430_vm0, %v15596_v60, %v15598_v59  ;;  %v6076_v59 = vsel %vm19430_vm0, %v15518_v39, %v15524_v0 }
 0x72f   : > { %9890 = vmatprep.subr.mxu1 %v6353_v45  ;;  %v15771_v26 = vpop.permute.xlu0 %6322  ;;  %v6084_v45 = vsel %vm19430_vm0, %v15556_v15, %v15558_v2  ;;  %v6067_v2 = vsel %vm19430_vm0, %v15478_v34, %v15484_v14 }
 0x730   : > { %9891 = vmatpush2.msra.mxu1 %v6352_v29  ;;  %7080 = vrot.lane.b32.xlu0 %v15274_v1, %s11618_s16 }
 0x731   : > { %v15777_v8 = vpop.permute.xlu1 %6324  ;;  %9892 = vmatprep.subr.mxu1 %v6344_v19  ;;  %v15844_v19 = vld [vmem:[#allocation2 + $0xb8] sm:$0xff] }
 0x732   : > { %20040 = vst [vmem:[#allocation465_spill] sm:$0xff] %v15777_v8  ;;  %9893 = vmatpush2.msra.mxu1 %v6343_v56  ;;  %7062 = vrot.lane.b32.xlu1 %v15224_v53, %s11618_s16  ;;  %v15856_v56 = vld [vmem:[#allocation2 + $0xc0] sm:$0xff] }
 0x733   : > { %9894 = vmatprep.subr.mxu1 %v6335_v55  ;;  %v15789_v29 = vpop.permute.xlu0 %6326  ;;  %v5806_v55 = vsel %vm19426_vm1, %v15348_v62, %v15350_v32  ;;  %v5556_v62 = vsel %vm19421_vm2, %v15266_v9, %v15272_v5 }
 0x734   : > { %20041 = vst [vmem:[#allocation466_spill] sm:$0xff] %v15789_v29  ;;  %9895 = vmatpush2.msra.mxu1 %v6334_v36  ;;  %7064 = vrot.lane.b32.xlu0 %v15230_v23, %s11618_s16  ;;  %v6731_v36 = vld [vmem:[#allocation2 + $0xb0] sm:$0xff] }
 0x735   : > { %v15797_v30 = vpop.permute.xlu1 %6328  ;;  %9896 = vmatprep.subr.mxu1 %v6094_v51  ;;  %v5797_v51 = vsel %vm19426_vm1, %v15308_v49, %v15310_v48  ;;  %v5547_v49 = vsel %vm19421_vm2, %v15210_v22, %v15216_v41 }
 0x736   : > { %20042 = vst [vmem:[#allocation467_spill] sm:$0xff] %v15797_v30  ;;  %9897 = vmatpush2.msra.mxu1 %v6093_v11  ;;  %7060 = vrot.lane.b32.xlu1 %v15218_v47, %s11618_s16  ;;  %v6075_v47 = vsel %vm19430_vm0, %v15516_v40, %v15518_v39  ;;  %v5825_v40 = vsel %vm19426_vm1, %v15438_v21, %v15444_v10  ;;  %v16021_v30 = vld [vmem:[#allocation2 + $0x18] sm:$0xff] }
 0x737   : > { %9898 = vmatprep.subr.mxu1 %v6085_v42  ;;  %v15809_v58 = vpop.permute.xlu0 %6330  ;;  %v5555_v11 = vsel %vm19421_vm2, %v15264_v61, %v15266_v9  ;;  %v20050_v42 = vld [vmem:[#allocation11_spill] sm:$0xff] }
 0x738   : > { %20043 = vst [vmem:[#allocation468_spill] sm:$0xff] %v15809_v58  ;;  %9899 = vmatpush2.msra.mxu1 %v6084_v45  ;;  %6853 = vrot.lane.b32.xlu0 %v15176_v6, %s11619_s17  ;;  %v6066_v6 = vsel %vm19430_vm0, %v15476_v54, %v15478_v34  ;;  %v5816_v54 = vsel %vm19426_vm1, %v15398_v25, %v15404_v46  ;;  %v20052_v45 = vld [vmem:[#allocation16_spill] sm:$0xff]  ;;  %vm19434_vm0 = vcmask 154624  }
 0x739   : > { %v15817_v60 = vpop.permute.xlu1 %6332  ;;  %9900 = vmatprep.subr.mxu1 %v6076_v59  ;;  %v5538_v9 = vsel %vm19421_vm2, %v20050_v42, %v15168_v31  ;;  %v5537_v59 = vsel %vm19421_vm2, %v20052_v45, %v20050_v42 }
 0x73a   : > { %20044 = vst [vmem:[#allocation469_spill] sm:$0xff] %v15817_v60  ;;  %9901 = vmatpush2.msra.mxu1 %v6075_v47  ;;  %6855 = vrot.lane.b32.xlu1 %v15182_v38, %s11619_s17  ;;  %v5824_v38 = vsel %vm19426_vm1, %v15436_v28, %v15438_v21  ;;  %v5807_v28 = vsel %vm19426_vm1, %v15350_v32, %v15356_v20  ;;  %v20053_v47 = vld [vmem:[#allocation366_spill] sm:$0xff] }
 0x73b   : > { %9902 = vmatprep.subr.mxu1 %v6067_v2  ;;  %v15829_v15 = vpop.permute.xlu0 %6522  ;;  %v20054_v2 = vld [vmem:[#allocation365_spill] sm:$0xff] }
 0x73c   : > { %9903 = vmatpush2.msra.mxu1 %v6066_v6  ;;  %6851 = vrot.lane.b32.xlu0 %v15170_v24, %s11619_s17  ;;  %v5815_v24 = vsel %vm19426_vm1, %v15396_v44, %v15398_v25  ;;  %v5798_v44 = vsel %vm19426_vm1, %v15310_v48, %v15316_v18  ;;  %vm19431_vm1 = vcmask 146432  }
 0x73d   : > { %v15837_v39 = vpop.permute.xlu1 %6524  ;;  %9904 = vmatprep.subr.mxu1 %v5825_v40 }
 0x73e   : > { %9905 = vmatpush2.msra.mxu1 %v5824_v38  ;;  %6833 = vrot.lane.b32.xlu1 %v15844_v19, %s11619_s17 }
 0x73f   : > { %9906 = vmatprep.subr.mxu1 %v5816_v54  ;;  %v15851_v34 = vpop.permute.xlu0 %6526 }
 0x740   : > { %20045 = vst [vmem:[#allocation470_spill] sm:$0xff] %v15851_v34  ;;  %9907 = vmatpush2.msra.mxu1 %v5815_v24  ;;  %6835 = vrot.lane.b32.xlu0 %v15856_v56, %s11619_s17  ;;  %v6711_v24 = vld [vmem:[#allocation2] sm:$0xff] }
 0x741   : > { %v15861_v21 = vpop.permute.xlu1 %6528  ;;  %9908 = vmatprep.subr.mxu1 %v5807_v28  ;;  %v20059_v28 = vmov 0.0  }
 0x742   : > { %20046 = vst [vmem:[#allocation471_spill] sm:$0xff] %v15861_v21  ;;  %9909 = vmatpush2.msra.mxu1 %v5806_v55  ;;  %6831 = vrot.lane.b32.xlu1 %v6731_v36, %s11619_s17  ;;  %v15931_v55 = vld [vmem:[#allocation2 + $0x118] sm:$0xff] }
 0x743   : > { %9910 = vmatprep.subr.mxu1 %v5798_v44  ;;  %v15872_v25 = vpop.permute.xlu0 %6530  ;;  %v15941_v44 = vld [vmem:[#allocation2 + $0x120] sm:$0xff] }
 0x744   : > { %20047 = vst [vmem:[#allocation472_spill] sm:$0xff] %v15872_v25  ;;  %9911 = vmatpush2.msra.mxu1 %v5797_v51  ;;  %6813 = vrot.lane.b32.xlu0 %v15280_v52, %s11619_s17  ;;  %v5546_v52 = vsel %vm19421_vm2, %v15208_v57, %v15210_v22  ;;  %v5529_v57 = vsel %vm19421_vm2, %v20054_v2, %v20053_v47  ;;  %v8863_v22 = vld [vmem:[%s18990_s5 + $0x8] sm:$0x77] }
 0x745   : > { %v15880_v32 = vpop.permute.xlu1 %6532  ;;  %9912 = vmatprep.subr.mxu1 %v5556_v62  ;;  %v15920_v38 = vcombine.high %v8863_v22, %v8863_v22  ;;  %v15947_v62 = vld [vmem:[#allocation2 + $0x110] sm:$0xff] }
 0x746   : > { %20048 = vst [vmem:[#allocation473_spill] sm:$0xff] %v15880_v32  ;;  %9913 = vmatpush2.msra.mxu1 %v5555_v11  ;;  %6815 = vrot.lane.b32.xlu1 %v15765_v3, %s11619_s17 }
 0x747   : > { %9914 = vmatprep.subr.mxu1 %v5547_v49  ;;  %v15892_v48 = vpop.permute.xlu0 %6534  ;;  %20057 = vst [vmem:[#allocation365_spill] sm:$0xff] %v15920_v38  ;;  %9920 = vmatprep.mubr.f32.mxu1 %v15920_v38 }
 0x748   : > { %20049 = vst [vmem:[#allocation474_spill] sm:$0xff] %v15892_v48  ;;  %9915 = vmatpush2.msra.mxu1 %v5546_v52  ;;  %6811 = vrot.lane.b32.xlu0 %v15274_v1, %s11619_s17  ;;  %v20056_v1 = vld [vmem:[#allocation364_spill] sm:$0xff] }
 0x749   : > { %v15900_v61 = vpop.permute.xlu1 %6536  ;;  %9916 = vmatprep.subr.mxu1 %v5538_v9  ;;  %v5528_v40 = vsel %vm19421_vm2, %v20056_v1, %v20054_v2  ;;  %v15965_v9 = vld [vmem:[#allocation2 + $0xc8] sm:$0xff]  ;;  %vm19467_vm2 = vcmask 138240  }
 0x74a   : > { %20051 = vst [vmem:[#allocation11_spill] sm:$0xff] %v15900_v61  ;;  %9917 = vmatpush2.msra.mxu1 %v5537_v59  ;;  %6793 = vrot.lane.b32.xlu1 %v15224_v53, %s11619_s17 }
 0x74b   : > { %9918 = vmatprep.subr.mxu1 %v5529_v57  ;;  %v15915_v6 = vpop.permute.xlu0 %6538 }
 0x74c   : > { %20055 = vst [vmem:[#allocation16_spill] sm:$0xff] %v15915_v6  ;;  %9919 = vmatpush2.msra.mxu1 %v5528_v40  ;;  %6795 = vrot.lane.b32.xlu0 %v15230_v23, %s11619_s17  ;;  %v15991_v40 = vld [vmem:[#allocation2 + $0x70] sm:$0xff] }
 0x74d   : > { %v15922_v54 = vpop.permute.xlu1 %6540  ;;  %9921 = vmatmul.mubr.f32.vlgmr.msra.gmra.mxu1 %v8863_v22 }
 0x74e   : > { %20058 = vst [vmem:[#allocation364_spill] sm:$0xff] %v15922_v54  ;;  %6791 = vrot.lane.b32.xlu1 %v6711_v24, %s11619_s17  ;;  %10062 = vmatprep.mubr.f32.mxu1 %v20059_v28 }
 0x74f   : > { %v15928_v53 = vpop.permute.xlu0 %6542 }
 0x750   : > { %6586 = vrot.lane.b32.xlu0 %v15931_v55, %s11616_s13 }
 0x751   : > { %v15933_v36 = vpop.permute.xlu1 %6544 }
 0x752   : > { %8735 = vrot.lane.b32.xlu1 %v15931_v55, %s11620_s20 }
 0x753   : > { %v15939_v23 = vpop.permute.xlu0 %6546 }
 0x754   : > { %8737 = vrot.lane.b32.xlu0 %v15941_v44, %s11620_s20 }
 0x755   : > { %v15943_v51 = vpop.permute.xlu1 %6548 }
 0x756   : > { %20060 = vst [vmem:[#allocation475_spill] sm:$0xff] %v15943_v51  ;;  %8733 = vrot.lane.b32.xlu1 %v15947_v62, %s11620_s20 }
 0x757   : > { %v15951_v11 = vpop.permute.xlu0 %6550 }
 0x758   : > { %20061 = vst [vmem:[#allocation476_spill] sm:$0xff] %v15951_v11  ;;  %8466 = vrot.lane.b32.xlu0 %v15931_v55, %s11621_s21 }
 0x759   : > { %v15953_v49 = vpop.permute.xlu1 %6552 }
 0x75a   : > { %20062 = vst [vmem:[#allocation477_spill] sm:$0xff] %v15953_v49  ;;  %8468 = vrot.lane.b32.xlu1 %v15941_v44, %s11621_s21 }
 0x75b   : > { %v15959_v52 = vpop.permute.xlu0 %6554 }
 0x75c   : > { %20063 = vst [vmem:[#allocation478_spill] sm:$0xff] %v15959_v52  ;;  %8715 = vrot.lane.b32.xlu0 %v15856_v56, %s11620_s20 }
 0x75d   : > { %v15961_v42 = vpop.permute.xlu1 %6556 }
 0x75e   : > { %20064 = vst [vmem:[#allocation479_spill] sm:$0xff] %v15961_v42  ;;  %8717 = vrot.lane.b32.xlu1 %v15965_v9, %s11620_s20  ;;  %v16015_v42 = vld [vmem:[#allocation2 + $0x10] sm:$0xff] }
 0x75f   : > { %v15969_v45 = vpop.permute.xlu0 %6558 }
 0x760   : > { %20065 = vst [vmem:[#allocation480_spill] sm:$0xff] %v15969_v45  ;;  %8464 = vrot.lane.b32.xlu0 %v15947_v62, %s11621_s21 }
 0x761   : > { %v15971_v59 = vpop.permute.xlu1 %6560 }
 0x762   : > { %20066 = vst [vmem:[#allocation481_spill] sm:$0xff] %v15971_v59  ;;  %8713 = vrot.lane.b32.xlu1 %v15844_v19, %s11620_s20  ;;  %v16001_v59 = vld [vmem:[#allocation2 + $0x60] sm:$0xff] }
 0x763   : > { %v15977_v2 = vpop.permute.xlu0 %6562 }
 0x764   : > { %8446 = vrot.lane.b32.xlu0 %v15856_v56, %s11621_s21 }
 0x765   : > { %v15979_v57 = vpop.permute.xlu1 %6564 }
 0x766   : > { %8448 = vrot.lane.b32.xlu1 %v15965_v9, %s11621_s21 }
 0x767   : > { %v15985_v22 = vpop.permute.xlu0 %6566 }
 0x768   : > { %8695 = vrot.lane.b32.xlu0 %v15765_v3, %s11620_s20 }
 0x769   : > { %v15987_v1 = vpop.permute.xlu1 %6568 }
 0x76a   : > { %8697 = vrot.lane.b32.xlu1 %v15991_v40, %s11620_s20 }
 0x76b   : > { %v15995_v24 = vpop.permute.xlu0 %6570 }
 0x76c   : > { %8444 = vrot.lane.b32.xlu0 %v15844_v19, %s11621_s21 }
 0x76d   : > { %v15997_v54 = vpop.permute.xlu1 %6572 }
 0x76e   : > { %20067 = vst [vmem:[#allocation482_spill] sm:$0xff] %v15997_v54  ;;  %8693 = vrot.lane.b32.xlu1 %v16001_v59, %s11620_s20 }
 0x76f   : > { %v16005_v60 = vpop.permute.xlu0 %6574 }
 0x770   : > { %20068 = vst [vmem:[#allocation483_spill] sm:$0xff] %v16005_v60  ;;  %8426 = vrot.lane.b32.xlu0 %v15765_v3, %s11621_s21 }
 0x771   : > { %v16007_v61 = vpop.permute.xlu1 %6576 }
 0x772   : > { %20069 = vst [vmem:[#allocation484_spill] sm:$0xff] %v16007_v61  ;;  %8428 = vrot.lane.b32.xlu1 %v15991_v40, %s11621_s21 }
 0x773   : > { %v16013_v6 = vpop.permute.xlu0 %6578 }
 0x774   : > { %20070 = vst [vmem:[#allocation485_spill] sm:$0xff] %v16013_v6  ;;  %8675 = vrot.lane.b32.xlu0 %v16015_v42, %s11620_s20  ;;  %v16031_v6 = vld [vmem:[#allocation2 + $0x8] sm:$0xff] }
 0x775   : > { %v16017_v45 = vpop.permute.xlu1 %6580 }
 0x776   : > { %20071 = vst [vmem:[#allocation486_spill] sm:$0xff] %v16017_v45  ;;  %8677 = vrot.lane.b32.xlu1 %v16021_v30, %s11620_s20 }
 0x777   : > { %v16025_v61 = vpop.permute.xlu0 %6582 }
 0x778   : > { %8424 = vrot.lane.b32.xlu0 %v16001_v59, %s11621_s21 }
 0x779   : > { %v16027_v58 = vpop.permute.xlu1 %6584 }
 0x77a   : > { %8673 = vrot.lane.b32.xlu1 %v16031_v6, %s11620_s20 }
 0x77b   : > { %v7392_v45 = vpop.permute.xlu0 %7391 }
 0x77c   : > { %8406 = vrot.lane.b32.xlu0 %v16015_v42, %s11621_s21 }
 0x77d   : > { %v16035_v32 = vpop.permute.xlu1 %7393 }
 0x77e   : > { %v7437_v48 = vsel %vm19512_vm4, %v7392_v45, %v16035_v32  ;;  %8408 = vrot.lane.b32.xlu1 %v16021_v30, %s11621_s21 }
 0x77f   : > { %v7390_v49 = vpop.permute.xlu0 %7389  ;;  %9927 = vmatprep.subr.mxu0 %v7437_v48 }
 0x780   : > { %v7436_v52 = vsel %vm19512_vm4, %v7390_v49, %v7392_v45  ;;  %8404 = vrot.lane.b32.xlu0 %v16031_v6, %s11621_s21 }
 0x781   : > { %v7372_v54 = vpop.permute.xlu1 %7371  ;;  %9928 = vmatpush1.msra.mxu0 %v7436_v52 }
 0x782   : > { %8197 = vrot.lane.b32.xlu1 %v15931_v55, %s11622_s22 }
 0x783   : > { %v16048_v60 = vpop.permute.xlu0 %7373 }
 0x784   : > { %v7428_v8 = vsel %vm19512_vm4, %v7372_v54, %v16048_v60  ;;  %8199 = vrot.lane.b32.xlu0 %v15941_v44, %s11622_s22 }
 0x785   : > { %v7370_v29 = vpop.permute.xlu1 %7369  ;;  %9929 = vmatprep.subr.mxu0 %v7428_v8 }
 0x786   : > { %v7427_v48 = vsel %vm19512_vm4, %v7370_v29, %v7372_v54  ;;  %8195 = vrot.lane.b32.xlu1 %v15947_v62, %s11622_s22 }
 0x787   : > { %v7352_v49 = vpop.permute.xlu0 %7351  ;;  %9930 = vmatpush1.msra.mxu0 %v7427_v48 }
 0x788   : > { %8177 = vrot.lane.b32.xlu0 %v15856_v56, %s11622_s22 }
 0x789   : > { %v16057_v52 = vpop.permute.xlu1 %7353 }
 0x78a   : > { %v7419_v45 = vsel %vm19512_vm4, %v7352_v49, %v16057_v52  ;;  %8179 = vrot.lane.b32.xlu1 %v15965_v9, %s11622_s22 }
 0x78b   : > { %v7350_v28 = vpop.permute.xlu0 %7349  ;;  %9931 = vmatprep.subr.mxu0 %v7419_v45 }
 0x78c   : > { %v7418_v8 = vsel %vm19512_vm4, %v7350_v28, %v7352_v49  ;;  %8175 = vrot.lane.b32.xlu0 %v15844_v19, %s11622_s22 }
 0x78d   : > { %v7332_v29 = vpop.permute.xlu1 %7331  ;;  %9932 = vmatpush1.msra.mxu0 %v7418_v8 }
 0x78e   : > { %8157 = vrot.lane.b32.xlu1 %v15765_v3, %s11622_s22 }
 0x78f   : > { %v16070_v54 = vpop.permute.xlu0 %7333 }
 0x790   : > { %v7410_v48 = vsel %vm19512_vm4, %v7332_v29, %v16070_v54  ;;  %8159 = vrot.lane.b32.xlu0 %v15991_v40, %s11622_s22 }
 0x791   : > { %v7330_v47 = vpop.permute.xlu1 %7329  ;;  %9933 = vmatprep.subr.mxu0 %v7410_v48 }
 0x792   : > { %v7409_v28 = vsel %vm19512_vm4, %v7330_v47, %v7332_v29  ;;  %8155 = vrot.lane.b32.xlu1 %v16001_v59, %s11622_s22 }
 0x793   : > { %v7123_v49 = vpop.permute.xlu0 %7122  ;;  %9934 = vmatpush1.msra.mxu0 %v7409_v28 }
 0x794   : > { %8137 = vrot.lane.b32.xlu0 %v16015_v42, %s11622_s22 }
 0x795   : > { %v16079_v45 = vpop.permute.xlu1 %7124 }
 0x796   : > { %v7169_v8 = vsel %vm19467_vm2, %v7123_v49, %v16079_v45  ;;  %8139 = vrot.lane.b32.xlu1 %v16021_v30, %s11622_s22 }
 0x797   : > { %v7121_v48 = vpop.permute.xlu0 %7120  ;;  %9935 = vmatprep.subr.mxu0 %v7169_v8 }
 0x798   : > { %v7168_v47 = vsel %vm19467_vm2, %v7121_v48, %v7123_v49  ;;  %8135 = vrot.lane.b32.xlu0 %v16031_v6, %s11622_s22 }
 0x799   : > { %v7103_v29 = vpop.permute.xlu1 %7102  ;;  %9936 = vmatpush1.msra.mxu0 %v7168_v47 }
 0x79a   : > { %7928 = vrot.lane.b32.xlu1 %v15931_v55, %s11623_s23 }
 0x79b   : > { %v16092_v28 = vpop.permute.xlu0 %7104 }
 0x79c   : > { %v7160_v31 = vsel %vm19467_vm2, %v7103_v29, %v16092_v28  ;;  %7930 = vrot.lane.b32.xlu0 %v15941_v44, %s11623_s23 }
 0x79d   : > { %v7101_v41 = vpop.permute.xlu1 %7100  ;;  %9937 = vmatprep.subr.mxu0 %v7160_v31 }
 0x79e   : > { %v7159_v49 = vsel %vm19467_vm2, %v7101_v41, %v7103_v29  ;;  %7926 = vrot.lane.b32.xlu1 %v15947_v62, %s11623_s23 }
 0x79f   : > { %v7083_v8 = vpop.permute.xlu0 %7082  ;;  %9938 = vmatpush1.msra.mxu0 %v7159_v49 }
 0x7a0   : > { %7908 = vrot.lane.b32.xlu0 %v15856_v56, %s11623_s23 }
 0x7a1   : > { %v16101_v48 = vpop.permute.xlu1 %7084 }
 0x7a2   : > { %v7151_v47 = vsel %vm19467_vm2, %v7083_v8, %v16101_v48  ;;  %7910 = vrot.lane.b32.xlu1 %v15965_v9, %s11623_s23 }
 0x7a3   : > { %v7081_v5 = vpop.permute.xlu0 %7080  ;;  %9939 = vmatprep.subr.mxu0 %v7151_v47 }
 0x7a4   : > { %v7150_v31 = vsel %vm19467_vm2, %v7081_v5, %v7083_v8  ;;  %7906 = vrot.lane.b32.xlu0 %v15844_v19, %s11623_s23 }
 0x7a5   : > { %v7063_v41 = vpop.permute.xlu1 %7062  ;;  %9940 = vmatpush1.msra.mxu0 %v7150_v31 }
 0x7a6   : > { %7888 = vrot.lane.b32.xlu1 %v15765_v3, %s11623_s23 }
 0x7a7   : > { %v16114_v29 = vpop.permute.xlu0 %7064 }
 0x7a8   : > { %v7142_v49 = vsel %vm19467_vm2, %v7063_v41, %v16114_v29  ;;  %7890 = vrot.lane.b32.xlu0 %v15991_v40, %s11623_s23 }
 0x7a9   : > { %v7061_v21 = vpop.permute.xlu1 %7060  ;;  %9941 = vmatprep.subr.mxu0 %v7142_v49 }
 0x7aa   : > { %v7141_v5 = vsel %vm19467_vm2, %v7061_v21, %v7063_v41  ;;  %7886 = vrot.lane.b32.xlu1 %v16001_v59, %s11623_s23 }
 0x7ab   : > { %v6854_v8 = vpop.permute.xlu0 %6853  ;;  %9942 = vmatpush1.msra.mxu0 %v7141_v5 }
 0x7ac   : > { %7868 = vrot.lane.b32.xlu0 %v16015_v42, %s11623_s23 }
 0x7ad   : > { %v16123_v47 = vpop.permute.xlu1 %6855 }
 0x7ae   : > { %v6900_v31 = vsel %vm19431_vm1, %v6854_v8, %v16123_v47  ;;  %7870 = vrot.lane.b32.xlu1 %v16021_v30, %s11623_s23 }
 0x7af   : > { %v6852_v49 = vpop.permute.xlu0 %6851  ;;  %9943 = vmatprep.subr.mxu0 %v6900_v31 }
 0x7b0   : > { %v6899_v21 = vsel %vm19431_vm1, %v6852_v49, %v6854_v8  ;;  %7866 = vrot.lane.b32.xlu0 %v16031_v6, %s11623_s23 }
 0x7b1   : > { %v6834_v41 = vpop.permute.xlu1 %6833  ;;  %9944 = vmatpush1.msra.mxu0 %v6899_v21 }
 0x7b2   : > { %7659 = vrot.lane.b32.xlu1 %v15931_v55, %s11624_s24 }
 0x7b3   : > { %v16136_v5 = vpop.permute.xlu0 %6835 }
 0x7b4   : > { %v6891_v25 = vsel %vm19431_vm1, %v6834_v41, %v16136_v5  ;;  %7661 = vrot.lane.b32.xlu0 %v15941_v44, %s11624_s24 }
 0x7b5   : > { %v6832_v51 = vpop.permute.xlu1 %6831  ;;  %9945 = vmatprep.subr.mxu0 %v6891_v25 }
 0x7b6   : > { %v6890_v8 = vsel %vm19431_vm1, %v6832_v51, %v6834_v41  ;;  %7657 = vrot.lane.b32.xlu1 %v15947_v62, %s11624_s24  ;;  %v16159_v62 = vld [vmem:[%s18990_s5 + $0x10] sm:$0x77] }
 0x7b7   : > { %v6814_v31 = vpop.permute.xlu0 %6813  ;;  %9946 = vmatpush1.msra.mxu0 %v6890_v8 }
 0x7b8   : > { %7639 = vrot.lane.b32.xlu0 %v15856_v56, %s11624_s24  ;;  %v16163_v56 = vcombine.high %v16159_v62, %v16159_v62 }
 0x7b9   : > { %v16145_v49 = vpop.permute.xlu1 %6815 }
 0x7ba   : > { %v6882_v21 = vsel %vm19431_vm1, %v6814_v31, %v16145_v49  ;;  %7641 = vrot.lane.b32.xlu1 %v15965_v9, %s11624_s24  ;;  %20072 = vst [vmem:[#allocation487_spill] sm:$0xff] %v16163_v56  ;;  %9991 = vmatprep.mubr.f32.mxu0 %v16163_v56 }
 0x7bb   : > { %v6812_v11 = vpop.permute.xlu0 %6811  ;;  %9947 = vmatprep.subr.mxu0 %v6882_v21 }
 0x7bc   : > { %v6881_v25 = vsel %vm19431_vm1, %v6812_v11, %v6814_v31  ;;  %7637 = vrot.lane.b32.xlu0 %v15844_v19, %s11624_s24 }
 0x7bd   : > { %v6794_v51 = vpop.permute.xlu1 %6793  ;;  %9948 = vmatpush1.msra.mxu0 %v6881_v25  ;;  %v6630_v25 = vsel %vm19434_vm0, %v16025_v61, %v16027_v58 }
 0x7be   : > { %7619 = vrot.lane.b32.xlu1 %v15765_v3, %s11624_s24 }
 0x7bf   : > { %v16167_v41 = vpop.permute.xlu0 %6795 }
 0x7c0   : > { %v6873_v11 = vsel %vm19431_vm1, %v6794_v51, %v16167_v41  ;;  %7621 = vrot.lane.b32.xlu0 %v15991_v40, %s11624_s24 }
 0x7c1   : > { %v6792_v19 = vpop.permute.xlu1 %6791  ;;  %9949 = vmatprep.subr.mxu0 %v6873_v11  ;;  %v6621_v11 = vsel %vm19434_vm0, %v15977_v2, %v15979_v57 }
 0x7c2   : > { %v6872_v8 = vsel %vm19431_vm1, %v6792_v19, %v6794_v51  ;;  %7617 = vrot.lane.b32.xlu1 %v16001_v59, %s11624_s24  ;;  %vm8753_vm1 = vcmask 883712   ;;  %v6622_v59 = vsel %vm19434_vm0, %v15979_v57, %v15985_v22  ;;  %v6604_v57 = vsel %vm19434_vm0, %v15837_v39, %v15851_v34 }
 0x7c3   : > { %v16177_v31 = vpop.permute.xlu0 %6586  ;;  %9950 = vmatpush1.msra.mxu0 %v6872_v8  ;;  %v6612_v8 = vsel %vm19434_vm0, %v15928_v53, %v15933_v36  ;;  %v16216_v53 = vld [vmem:[#allocation2 + $0x128] sm:$0xff] }
 0x7c4   : > { %v6631_v3 = vsel %vm19434_vm0, %v16027_v58, %v16177_v31  ;;  %7599 = vrot.lane.b32.xlu0 %v16015_v42, %s11624_s24  ;;  %v6613_v58 = vsel %vm19434_vm0, %v15933_v36, %v15939_v23 }
 0x7c5   : > { %v8736_v21 = vpop.permute.xlu1 %8735  ;;  %9951 = vmatprep.subr.mxu0 %v6631_v3 }
 0x7c6   : > { %9952 = vmatpush1.msra.mxu0 %v6630_v25  ;;  %7601 = vrot.lane.b32.xlu1 %v16021_v30, %s11624_s24 }
 0x7c7   : > { %v16192_v51 = vpop.permute.xlu0 %8737  ;;  %9953 = vmatprep.subr.mxu0 %v6622_v59  ;;  %v16226_v59 = vld [vmem:[#allocation2 + $0xd0] sm:$0xff] }
 0x7c8   : > { %20073 = vst [vmem:[#allocation488_spill] sm:$0xff] %v16192_v51  ;;  %9954 = vmatpush1.msra.mxu0 %v6621_v11  ;;  %v8782_v61 = vsel %vm8753_vm1, %v8736_v21, %v16192_v51  ;;  %7597 = vrot.lane.b32.xlu0 %v16031_v6, %s11624_s24  ;;  %v6603_v6 = vsel %vm19434_vm0, %v15829_v15, %v15837_v39  ;;  %vm19440_vm0 = vcmask 261120   ;;  %v20115_v51 = vld [vmem:[#allocation47_spill] sm:$0xff] }
 0x7c9   : > { %v8734_v19 = vpop.permute.xlu1 %8733  ;;  %9955 = vmatprep.subr.mxu0 %v6613_v58  ;;  %10022 = vmatprep.subr.mxu1 %v8782_v61  ;;  %v16237_v61 = vld [vmem:[#allocation2 + $0x78] sm:$0xff] }
 0x7ca   : > { %v8781_v3 = vsel %vm8753_vm1, %v8734_v19, %v8736_v21  ;;  %9956 = vmatpush1.msra.mxu0 %v6612_v8  ;;  %7395 = vrot.lane.b32.xlu1 %v15941_v44, %s11617_s12 }
 0x7cb   : > { %10023 = vmatpush1.msra.mxu1 %v8781_v3  ;;  %v8467_v2 = vpop.permute.xlu0 %8466  ;;  %9957 = vmatprep.subr.mxu0 %v6604_v57  ;;  %v16244_v57 = vld [vmem:[#allocation2 + $0x20] sm:$0xff] }
 0x7cc   : > { %9958 = vmatpush1.msra.mxu0 %v6603_v6  ;;  %7397 = vrot.lane.b32.xlu0 %v16216_v53, %s11617_s12 }
 0x7cd   : > { %v16218_v36 = vpop.permute.xlu1 %8468 }
 0x7ce   : > { %20074 = vst [vmem:[#allocation489_spill] sm:$0xff] %v16218_v36  ;;  %v8513_v21 = vsel %vm8484_vm3, %v8467_v2, %v16218_v36  ;;  %7375 = vrot.lane.b32.xlu1 %v15965_v9, %s11617_s12 }
 0x7cf   : > { %v8716_v25 = vpop.permute.xlu0 %8715  ;;  %9959 = vmatprep.subr.mxu0 %v8513_v21 }
 0x7d0   : > { %7377 = vrot.lane.b32.xlu0 %v16226_v59, %s11617_s12 }
 0x7d1   : > { %v16228_v11 = vpop.permute.xlu1 %8717 }
 0x7d2   : > { %20075 = vst [vmem:[#allocation490_spill] sm:$0xff] %v16228_v11  ;;  %v8773_v15 = vsel %vm8753_vm1, %v8716_v25, %v16228_v11  ;;  %7355 = vrot.lane.b32.xlu1 %v15991_v40, %s11617_s12 }
 0x7d3   : > { %10024 = vmatprep.subr.mxu1 %v8773_v15  ;;  %v8465_v39 = vpop.permute.xlu0 %8464 }
 0x7d4   : > { %v8512_v58 = vsel %vm8484_vm3, %v8465_v39, %v8467_v2  ;;  %7357 = vrot.lane.b32.xlu0 %v16237_v61, %s11617_s12 }
 0x7d5   : > { %v8714_v19 = vpop.permute.xlu1 %8713  ;;  %9960 = vmatpush2.msra.mxu0 %v8512_v58 }
 0x7d6   : > { %v8772_v8 = vsel %vm8753_vm1, %v8714_v19, %v8716_v25  ;;  %7335 = vrot.lane.b32.xlu1 %v16021_v30, %s11617_s12 }
 0x7d7   : > { %10025 = vmatpush1.msra.mxu1 %v8772_v8  ;;  %v8447_v3 = vpop.permute.xlu0 %8446 }
 0x7d8   : > { %7337 = vrot.lane.b32.xlu0 %v16244_v57, %s11617_s12 }
 0x7d9   : > { %v16246_v6 = vpop.permute.xlu1 %8448 }
 0x7da   : > { %20076 = vst [vmem:[#allocation491_spill] sm:$0xff] %v16246_v6  ;;  %v8504_v2 = vsel %vm8484_vm3, %v8447_v3, %v16246_v6  ;;  %7126 = vrot.lane.b32.xlu1 %v15941_v44, %s11618_s16 }
 0x7db   : > { %v8696_v21 = vpop.permute.xlu0 %8695  ;;  %9961 = vmatprep.subr.mxu0 %v8504_v2 }
 0x7dc   : > { %7128 = vrot.lane.b32.xlu0 %v16216_v53, %s11618_s16 }
 0x7dd   : > { %v16254_v25 = vpop.permute.xlu1 %8697 }
 0x7de   : > { %20077 = vst [vmem:[#allocation492_spill] sm:$0xff] %v16254_v25  ;;  %v8764_v15 = vsel %vm8753_vm1, %v8696_v21, %v16254_v25  ;;  %7106 = vrot.lane.b32.xlu1 %v15965_v9, %s11618_s16  ;;  %v20081_v25 = vld [vmem:[#allocation83_spill] sm:$0xff] }
 0x7df   : > { %10026 = vmatprep.subr.mxu1 %v8764_v15  ;;  %v8445_v39 = vpop.permute.xlu0 %8444 }
 0x7e0   : > { %v8503_v58 = vsel %vm8484_vm3, %v8445_v39, %v8447_v3  ;;  %7108 = vrot.lane.b32.xlu0 %v16226_v59, %s11618_s16 }
 0x7e1   : > { %v8694_v19 = vpop.permute.xlu1 %8693  ;;  %9962 = vmatpush2.msra.mxu0 %v8503_v58 }
 0x7e2   : > { %v8763_v8 = vsel %vm8753_vm1, %v8694_v19, %v8696_v21  ;;  %7086 = vrot.lane.b32.xlu1 %v15991_v40, %s11618_s16 }
 0x7e3   : > { %10027 = vmatpush1.msra.mxu1 %v8763_v8  ;;  %v8427_v2 = vpop.permute.xlu0 %8426 }
 0x7e4   : > { %7088 = vrot.lane.b32.xlu0 %v16237_v61, %s11618_s16 }
 0x7e5   : > { %v16268_v6 = vpop.permute.xlu1 %8428 }
 0x7e6   : > { %20078 = vst [vmem:[#allocation493_spill] sm:$0xff] %v16268_v6  ;;  %v8495_v3 = vsel %vm8484_vm3, %v8427_v2, %v16268_v6  ;;  %7066 = vrot.lane.b32.xlu1 %v16021_v30, %s11618_s16 }
 0x7e7   : > { %v8676_v15 = vpop.permute.xlu0 %8675  ;;  %9963 = vmatprep.subr.mxu0 %v8495_v3  ;;  %v8865_v3 = vld [vmem:[%s18990_s5 + $0x18] sm:$0x7] }
 0x7e8   : > { %7068 = vrot.lane.b32.xlu0 %v16244_v57, %s11618_s16 }
 0x7e9   : > { %v16276_v39 = vpop.permute.xlu1 %8677 }
 0x7ea   : > { %20079 = vst [vmem:[#allocation494_spill] sm:$0xff] %v16276_v39  ;;  %v8755_v21 = vsel %vm8753_vm1, %v8676_v15, %v16276_v39  ;;  %6857 = vrot.lane.b32.xlu1 %v15941_v44, %s11619_s17  ;;  %v20080_v39 = vld [vmem:[#allocation180_spill] sm:$0xff] }
 0x7eb   : > { %10028 = vmatprep.subr.mxu1 %v8755_v21  ;;  %v8425_v58 = vpop.permute.xlu0 %8424 }
 0x7ec   : > { %v8494_v19 = vsel %vm8484_vm3, %v8425_v58, %v8427_v2  ;;  %6859 = vrot.lane.b32.xlu0 %v16216_v53, %s11619_s17  ;;  %v3137_v2 = vsel %vm3106_vm5, %v20081_v25, %v20080_v39  ;;  %v20082_v58 = vld [vmem:[#allocation82_spill] sm:$0xff] }
 0x7ed   : > { %v8674_v8 = vpop.permute.xlu1 %8673  ;;  %9964 = vmatpush2.msra.mxu0 %v8494_v19  ;;  %v3136_v19 = vsel %vm3106_vm5, %v20082_v58, %v20081_v25  ;;  %v20086_v39 = vld [vmem:[#allocation66_spill] sm:$0xff]  ;;  %v20087_v58 = vld [vmem:[#allocation116_spill] sm:$0xff] }
 0x7ee   : > { %v8754_v6 = vsel %vm8753_vm1, %v8674_v8, %v8676_v15  ;;  %6837 = vrot.lane.b32.xlu1 %v15965_v9, %s11619_s17  ;;  %v20084_v15 = vld [vmem:[#allocation148_spill] sm:$0xff] }
 0x7ef   : > { %10029 = vmatpush1.msra.mxu1 %v8754_v6  ;;  %v8407_v21 = vpop.permute.xlu0 %8406  ;;  %v20085_v6 = vld [vmem:[#allocation67_spill] sm:$0xff] }
 0x7f0   : > { %10069 = vmatprep.subr.mxu1 %v3137_v2  ;;  %11367 = vmatmul.mubr.msk.f32.vlgmr.msra.gmra.mxu1 %vm19440_vm0, %v8865_v3  ;;  %v3128_v8 = vsel %vm3106_vm5, %v20085_v6, %v20084_v15  ;;  %v3127_v2 = vsel %vm3106_vm5, %v20086_v39, %v20085_v6  ;;  %v20089_v39 = vld [vmem:[#allocation50_spill] sm:$0xff]  ;;  %vm8215_vm0 = vcmask 900096  }
 0x7f1   : > { %v16300_v11 = vpop.permute.xlu1 %8408  ;;  %6839 = vrot.lane.b32.xlu0 %v16226_v59, %s11619_s17  ;;  %10070 = vmatpush1.msra.mxu1 %v3136_v19  ;;  %v20088_v19 = vld [vmem:[#allocation51_spill] sm:$0xff] }
 0x7f2   : > { %20083 = vst [vmem:[#allocation83_spill] sm:$0xff] %v16300_v11  ;;  %10071 = vmatprep.subr.mxu1 %v3128_v8  ;;  %v8486_v3 = vsel %vm8484_vm3, %v8407_v21, %v16300_v11  ;;  %10133 = vmatprep.mubr.f32.mxu1 %v15680_v50  ;;  %v3119_v36 = vsel %vm3106_vm5, %v20088_v19, %v20087_v58  ;;  %v20091_v50 = vld [vmem:[#allocation35_spill] sm:$0xff] }
 0x7f3   : > { %6817 = vrot.lane.b32.xlu1 %v15991_v40, %s11619_s17  ;;  %10072 = vmatpush1.msra.mxu1 %v3127_v2  ;;  %v8405_v25 = vpop.permute.xlu0 %8404  ;;  %v3118_v6 = vsel %vm3106_vm5, %v20089_v39, %v20088_v19  ;;  %v20090_v2 = vld [vmem:[#allocation102_spill] sm:$0xff] }
 0x7f4   : > { %v8485_v8 = vsel %vm8484_vm3, %v8405_v25, %v8407_v21  ;;  %9965 = vmatprep.subr.mxu0 %v8486_v3  ;;  %10073 = vmatprep.subr.mxu1 %v3119_v36  ;;  %v3110_v11 = vsel %vm3106_vm5, %v20091_v50, %v20090_v2  ;;  %v20092_v36 = vld [vmem:[#allocation34_spill] sm:$0xff]  ;;  %v20094_v25 = vld [vmem:[#allocation176_spill] sm:$0xff] }
 0x7f5   : > { %v8198_v15 = vpop.permute.xlu1 %8197  ;;  %6819 = vrot.lane.b32.xlu0 %v16237_v61, %s11619_s17  ;;  %9966 = vmatpush2.msra.mxu0 %v8485_v8  ;;  %v3109_v21 = vsel %vm3106_vm5, %v20092_v36, %v20091_v50  ;;  %v20095_v8 = vld [vmem:[#allocation81_spill] sm:$0xff]  ;;  %v20097_v36 = vld [vmem:[#allocation144_spill] sm:$0xff] }
 0x7f6   : > { %10074 = vmatpush1.msra.mxu1 %v3118_v6  ;;  %v2868_v19 = vsel %vm2837_vm6, %v20095_v8, %v20094_v25 }
 0x7f7   : > { %10075 = vmatprep.subr.mxu1 %v3110_v11  ;;  %6797 = vrot.lane.b32.xlu1 %v16021_v30, %s11619_s17  ;;  %v16332_v3 = vpop.permute.xlu0 %8199  ;;  %v20096_v11 = vld [vmem:[#allocation80_spill] sm:$0xff] }
 0x7f8   : > { %20093 = vst [vmem:[#allocation82_spill] sm:$0xff] %v16332_v3  ;;  %10076 = vmatpush1.msra.mxu1 %v3109_v21  ;;  %v8244_v39 = vsel %vm8215_vm0, %v8198_v15, %v16332_v3  ;;  %v2867_v2 = vsel %vm2837_vm6, %v20096_v11, %v20095_v8  ;;  %v20098_v21 = vld [vmem:[#allocation65_spill] sm:$0xff]  ;;  %v20100_v8 = vld [vmem:[#allocation112_spill] sm:$0xff] }
 0x7f9   : > { %10077 = vmatprep.subr.mxu1 %v2868_v19  ;;  %v8196_v6 = vpop.permute.xlu1 %8195  ;;  %6799 = vrot.lane.b32.xlu0 %v16244_v57, %s11619_s17  ;;  %v2859_v25 = vsel %vm2837_vm6, %v20098_v21, %v20097_v36  ;;  %v20099_v19 = vld [vmem:[#allocation64_spill] sm:$0xff]  ;;  %v20101_v11 = vld [vmem:[#allocation49_spill] sm:$0xff]  ;;  %v16377_v36 = vld [vmem:[#allocation2 + $0x130] sm:$0xff] }
 0x7fa   : > { %v8243_v50 = vsel %vm8215_vm0, %v8196_v6, %v8198_v15  ;;  %9967 = vmatprep.subr.mxu0 %v8244_v39  ;;  %10078 = vmatpush1.msra.mxu1 %v2867_v2  ;;  %v2858_v3 = vsel %vm2837_vm6, %v20099_v19, %v20098_v21  ;;  %v2850_v15 = vsel %vm2837_vm6, %v20101_v11, %v20100_v8  ;;  %v20104_v6 = vld [vmem:[#allocation98_spill] sm:$0xff]  ;;  %v20105_v21 = vld [vmem:[#allocation33_spill] sm:$0xff]  ;;  %v20106_v19 = vld [vmem:[#allocation32_spill] sm:$0xff] }
 0x7fb   : > { %10079 = vmatprep.subr.mxu1 %v2859_v25  ;;  %6588 = vrot.lane.b32.xlu1 %v15941_v44, %s11616_s13  ;;  %v8178_v58 = vpop.permute.xlu0 %8177  ;;  %v20103_v25 = vld [vmem:[#allocation48_spill] sm:$0xff] }
 0x7fc   : > { %10080 = vmatpush1.msra.mxu1 %v2858_v3  ;;  %9968 = vmatpush2.msra.mxu0 %v8243_v50  ;;  %v2849_v39 = vsel %vm2837_vm6, %v20103_v25, %v20101_v11  ;;  %v2841_v3 = vsel %vm2837_vm6, %v20105_v21, %v20104_v6  ;;  %v20107_v25 = vld [vmem:[#allocation172_spill] sm:$0xff] }
 0x7fd   : > { %10081 = vmatprep.subr.mxu1 %v2850_v15  ;;  %v16356_v2 = vpop.permute.xlu1 %8179  ;;  %6590 = vrot.lane.b32.xlu0 %v16216_v53, %s11616_s13  ;;  %v2840_v15 = vsel %vm2837_vm6, %v20106_v19, %v20105_v21  ;;  %v20110_v19 = vld [vmem:[#allocation140_spill] sm:$0xff] }
 0x7fe   : > { %20102 = vst [vmem:[#allocation67_spill] sm:$0xff] %v16356_v2  ;;  %10082 = vmatpush1.msra.mxu1 %v2849_v39  ;;  %v8235_v50 = vsel %vm8215_vm0, %v8178_v58, %v16356_v2  ;;  %v20108_v39 = vld [vmem:[#allocation79_spill] sm:$0xff]  ;;  %v20109_v2 = vld [vmem:[#allocation78_spill] sm:$0xff] }
 0x7ff   : > { %10083 = vmatprep.subr.mxu1 %v2841_v3  ;;  %8739 = vrot.lane.b32.xlu1 %v16216_v53, %s11620_s20  ;;  %v8176_v8 = vpop.permute.xlu0 %8175  ;;  %v2599_v6 = vsel %vm19449_vm7, %v20108_v39, %v20107_v25  ;;  %v2598_v21 = vsel %vm19449_vm7, %v20109_v2, %v20108_v39  ;;  %v20114_v25 = vld [vmem:[#allocation108_spill] sm:$0xff] }
 0x800   : > { %10084 = vmatpush1.msra.mxu1 %v2840_v15  ;;  %v8234_v11 = vsel %vm8215_vm0, %v8176_v8, %v8178_v58  ;;  %9969 = vmatprep.subr.mxu0 %v8235_v50  ;;  %v20111_v58 = vld [vmem:[#allocation63_spill] sm:$0xff]  ;;  %v2581_v2 = vsel %vm19449_vm7, %v20115_v51, %v20114_v25 }
 0x801   : > { %10085 = vmatprep.subr.mxu1 %v2599_v6  ;;  %v8158_v3 = vpop.permute.xlu1 %8157  ;;  %8741 = vrot.lane.b32.xlu0 %v16377_v36, %s11620_s20  ;;  %v2590_v8 = vsel %vm19449_vm7, %v20111_v58, %v20110_v19  ;;  %v20112_v6 = vld [vmem:[#allocation62_spill] sm:$0xff]  ;;  %v20118_v25 = vld [vmem:[#allocation31_spill] sm:$0xff] }
 0x802   : > { %9970 = vmatpush2.msra.mxu0 %v8234_v11  ;;  %10086 = vmatpush1.msra.mxu1 %v2598_v21  ;;  %v2589_v50 = vsel %vm19449_vm7, %v20112_v6, %v20111_v58  ;;  %v16397_v11 = vld [vmem:[#allocation2 + $0xd8] sm:$0xff] }
 0x803   : > { %10087 = vmatprep.subr.mxu1 %v2590_v8  ;;  %8719 = vrot.lane.b32.xlu1 %v16226_v59, %s11620_s20  ;;  %v16392_v15 = vpop.permute.xlu0 %8159  ;;  %v20116_v8 = vld [vmem:[#allocation46_spill] sm:$0xff] }
 0x804   : > { %20113 = vst [vmem:[#allocation66_spill] sm:$0xff] %v16392_v15  ;;  %10088 = vmatpush1.msra.mxu1 %v2589_v50  ;;  %v8226_v39 = vsel %vm8215_vm0, %v8158_v3, %v16392_v15  ;;  %v2580_v58 = vsel %vm19449_vm7, %v20116_v8, %v20115_v51  ;;  %v20117_v50 = vld [vmem:[#allocation94_spill] sm:$0xff]  ;;  %v16415_v51 = vld [vmem:[#allocation2 + $0x80] sm:$0xff]  ;;  %v16441_v8 = vld [vmem:[#allocation2 + $0x28] sm:$0xff] }
 0x805   : > { %10089 = vmatprep.subr.mxu1 %v2581_v2  ;;  %v8156_v21 = vpop.permute.xlu1 %8155  ;;  %8721 = vrot.lane.b32.xlu0 %v16397_v11, %s11620_s20  ;;  %v2572_v19 = vsel %vm19449_vm7, %v20118_v25, %v20117_v50  ;;  %v20119_v2 = vld [vmem:[#allocation30_spill] sm:$0xff] }
 0x806   : > { %v8225_v6 = vsel %vm8215_vm0, %v8156_v21, %v8158_v3  ;;  %9971 = vmatprep.subr.mxu0 %v8226_v39  ;;  %10090 = vmatpush1.msra.mxu1 %v2580_v58  ;;  %v2571_v15 = vsel %vm19449_vm7, %v20119_v2, %v20118_v25  ;;  %v2356_v25 = vld [vmem:[#allocation2 + $0xc0] sm:$0xff]  ;;  %vm7946_vm7 = vcmask 908288   ;;  %v20121_v21 = vld [vmem:[#allocation91_spill] sm:$0xff] }
 0x807   : > { %10091 = vmatprep.subr.mxu1 %v2572_v19  ;;  %8699 = vrot.lane.b32.xlu1 %v16237_v61, %s11620_s20  ;;  %v8138_v34 = vpop.permute.xlu0 %8137 }
 0x808   : > { %10092 = vmatpush1.msra.mxu1 %v2571_v15  ;;  %9972 = vmatpush2.msra.mxu0 %v8225_v6 }
 0x809   : > { %10093 = vmatprep.subr.mxu1 %v15941_v44  ;;  %v16418_v3 = vpop.permute.xlu1 %8139  ;;  %8701 = vrot.lane.b32.xlu0 %v16415_v51, %s11620_s20 }
 0x80a   : > { %10094 = vmatpush1.msra.mxu1 %v15931_v55  ;;  %v8217_v19 = vsel %vm8215_vm0, %v8138_v34, %v16418_v3  ;;  %v2347_v55 = vld [vmem:[#allocation2 + $0x68] sm:$0xff] }
 0x80b   : > { %10095 = vmatprep.subr.mxu1 %v15965_v9  ;;  %8470 = vrot.lane.b32.xlu1 %v16216_v53, %s11621_s21  ;;  %v8136_v15 = vpop.permute.xlu0 %8135 }
 0x80c   : > { %10096 = vmatpush1.msra.mxu1 %v2356_v25  ;;  %v8216_v44 = vsel %vm8215_vm0, %v8136_v15, %v8138_v34  ;;  %9973 = vmatprep.subr.mxu0 %v8217_v19  ;;  %v20120_v34 = vld [vmem:[#allocation196_spill] sm:$0xff]  ;;  %v20124_v25 = vld [vmem:[#allocation75_spill] sm:$0xff] }
 0x80d   : > { %10097 = vmatprep.subr.mxu1 %v15991_v40  ;;  %v7929_v39 = vpop.permute.xlu1 %7928  ;;  %8472 = vrot.lane.b32.xlu0 %v16377_v36, %s11621_s21  ;;  %v4213_v40 = vsel %vm4182_vm8, %v20121_v21, %v20120_v34  ;;  %v20123_v19 = vld [vmem:[#allocation164_spill] sm:$0xff] }
 0x80e   : > { %9974 = vmatpush2.msra.mxu0 %v8216_v44  ;;  %10098 = vmatpush1.msra.mxu1 %v2347_v55  ;;  %v4204_v15 = vsel %vm4182_vm8, %v20124_v25, %v20123_v19  ;;  %v20125_v44 = vld [vmem:[#allocation74_spill] sm:$0xff] }
 0x80f   : > { %10099 = vmatprep.subr.mxu1 %v16021_v30  ;;  %8679 = vrot.lane.b32.xlu1 %v16244_v57, %s11620_s20  ;;  %v16435_v9 = vpop.permute.xlu0 %7930  ;;  %v20122_v30 = vld [vmem:[#allocation90_spill] sm:$0xff]  ;;  %v4203_v55 = vsel %vm4182_vm8, %v20125_v44, %v20124_v25  ;;  %v20131_v25 = vld [vmem:[#allocation43_spill] sm:$0xff] }
 0x810   : > { %10100 = vmatpush1.msra.mxu1 %v16015_v42  ;;  %v7975_v58 = vsel %vm7946_vm7, %v7929_v39, %v16435_v9  ;;  %v4212_v2 = vsel %vm4182_vm8, %v20122_v30, %v20121_v21  ;;  %v20126_v21 = vld [vmem:[#allocation132_spill] sm:$0xff]  ;;  %v20127_v30 = vld [vmem:[#allocation59_spill] sm:$0xff] }
 0x811   : > { %10101 = vmatprep.subr.mxu1 %v4213_v40  ;;  %v7927_v6 = vpop.permute.xlu1 %7926  ;;  %8681 = vrot.lane.b32.xlu0 %v16441_v8, %s11620_s20 }
 0x812   : > { %v7974_v42 = vsel %vm7946_vm7, %v7927_v6, %v7929_v39  ;;  %9975 = vmatprep.subr.mxu0 %v7975_v58  ;;  %10102 = vmatpush2.msra.mxu1 %v4212_v2  ;;  %v4195_v39 = vsel %vm4182_vm8, %v20127_v30, %v20126_v21  ;;  %v20129_v6 = vld [vmem:[#allocation58_spill] sm:$0xff] }
 0x813   : > { %10103 = vmatprep.subr.mxu1 %v4204_v15  ;;  %8450 = vrot.lane.b32.xlu1 %v16226_v59, %s11621_s21  ;;  %v7909_v40 = vpop.permute.xlu0 %7908  ;;  %v4194_v2 = vsel %vm4182_vm8, %v20129_v6, %v20127_v30  ;;  %v20130_v15 = vld [vmem:[#allocation19_spill] sm:$0xff]  ;;  %v20133_v6 = vld [vmem:[#allocation192_spill] sm:$0xff] }
 0x814   : > { %10104 = vmatpush2.msra.mxu1 %v4203_v55  ;;  %9976 = vmatpush2.msra.mxu0 %v7974_v42  ;;  %v4186_v44 = vsel %vm4182_vm8, %v20131_v25, %v20130_v15  ;;  %v20132_v55 = vld [vmem:[#allocation42_spill] sm:$0xff] }
 0x815   : > { %10105 = vmatprep.subr.mxu1 %v4195_v39  ;;  %v16462_v58 = vpop.permute.xlu1 %7910  ;;  %8452 = vrot.lane.b32.xlu0 %v16397_v11, %s11621_s21  ;;  %v4185_v39 = vsel %vm4182_vm8, %v20132_v55, %v20131_v25  ;;  %v20136_v25 = vld [vmem:[#allocation160_spill] sm:$0xff]  ;;  %v20137_v55 = vld [vmem:[#allocation73_spill] sm:$0xff] }
 0x816   : > { %20128 = vst [vmem:[#allocation51_spill] sm:$0xff] %v16462_v58  ;;  %10106 = vmatpush2.msra.mxu1 %v4194_v2  ;;  %v7966_v42 = vsel %vm7946_vm7, %v7909_v40, %v16462_v58  ;;  %v20134_v2 = vld [vmem:[#allocation89_spill] sm:$0xff] }
 0x817   : > { %10107 = vmatprep.subr.mxu1 %v4186_v44  ;;  %8430 = vrot.lane.b32.xlu1 %v16237_v61, %s11621_s21  ;;  %v7907_v21 = vpop.permute.xlu0 %7906  ;;  %v3944_v15 = vsel %vm19453_vm9, %v20134_v2, %v20133_v6  ;;  %v20135_v44 = vld [vmem:[#allocation88_spill] sm:$0xff]  ;;  %v20141_v6 = vld [vmem:[#allocation57_spill] sm:$0xff] }
 0x818   : > { %10108 = vmatpush2.msra.mxu1 %v4185_v39  ;;  %v7965_v30 = vsel %vm7946_vm7, %v7907_v21, %v7909_v40  ;;  %9977 = vmatprep.subr.mxu0 %v7966_v42  ;;  %v3943_v58 = vsel %vm19453_vm9, %v20135_v44, %v20134_v2  ;;  %v3935_v40 = vsel %vm19453_vm9, %v20137_v55, %v20136_v25  ;;  %v20138_v21 = vld [vmem:[#allocation72_spill] sm:$0xff] }
 0x819   : > { %10109 = vmatprep.subr.mxu1 %v3944_v15  ;;  %v7889_v19 = vpop.permute.xlu1 %7888  ;;  %8432 = vrot.lane.b32.xlu0 %v16415_v51, %s11621_s21  ;;  %v3934_v15 = vsel %vm19453_vm9, %v20138_v21, %v20137_v55  ;;  %v20140_v39 = vld [vmem:[#allocation128_spill] sm:$0xff]  ;;  %v20143_v21 = vld [vmem:[#allocation7_spill] sm:$0xff] }
 0x81a   : > { %9978 = vmatpush2.msra.mxu0 %v7965_v30  ;;  %10110 = vmatpush2.msra.mxu1 %v3943_v58  ;;  %v3926_v30 = vsel %vm19453_vm9, %v20141_v6, %v20140_v39  ;;  %v20142_v44 = vld [vmem:[#allocation56_spill] sm:$0xff] }
 0x81b   : > { %10111 = vmatprep.subr.mxu1 %v3935_v40  ;;  %8410 = vrot.lane.b32.xlu1 %v16244_v57, %s11621_s21  ;;  %v16496_v42 = vpop.permute.xlu0 %7890  ;;  %v3925_v40 = vsel %vm19453_vm9, %v20142_v44, %v20141_v6  ;;  %v20146_v6 = vld [vmem:[#allocation188_spill] sm:$0xff]  ;;  %v20147_v44 = vld [vmem:[#allocation87_spill] sm:$0xff] }
 0x81c   : > { %20139 = vst [vmem:[#allocation50_spill] sm:$0xff] %v16496_v42  ;;  %10112 = vmatpush2.msra.mxu1 %v3934_v15  ;;  %v7957_v58 = vsel %vm7946_vm7, %v7889_v19, %v16496_v42  ;;  %v20144_v15 = vld [vmem:[#allocation41_spill] sm:$0xff] }
 0x81d   : > { %10113 = vmatprep.subr.mxu1 %v3926_v30  ;;  %v7887_v2 = vpop.permute.xlu1 %7886  ;;  %8412 = vrot.lane.b32.xlu0 %v16441_v8, %s11621_s21  ;;  %v3917_v39 = vsel %vm19453_vm9, %v20144_v15, %v20143_v21  ;;  %v20145_v30 = vld [vmem:[#allocation40_spill] sm:$0xff] }
 0x81e   : > { %v7956_v55 = vsel %vm7946_vm7, %v7887_v2, %v7889_v19  ;;  %9979 = vmatprep.subr.mxu0 %v7957_v58  ;;  %10114 = vmatpush2.msra.mxu1 %v3925_v40  ;;  %v3916_v25 = vsel %vm19453_vm9, %v20145_v30, %v20144_v15  ;;  %v3675_v19 = vsel %vm3644_vm10, %v20147_v44, %v20146_v6  ;;  %v20150_v40 = vld [vmem:[#allocation156_spill] sm:$0xff]  ;;  %v20151_v15 = vld [vmem:[#allocation71_spill] sm:$0xff]  ;;  %v20152_v30 = vld [vmem:[#allocation70_spill] sm:$0xff]  ;;  %vm7677_vm9 = vcmask 916480  }
 0x81f   : > { %10115 = vmatprep.subr.mxu1 %v3917_v39  ;;  %8201 = vrot.lane.b32.xlu1 %v16216_v53, %s11622_s22  ;;  %v7869_v42 = vpop.permute.xlu0 %7868  ;;  %v20149_v39 = vld [vmem:[#allocation86_spill] sm:$0xff] }
 0x820   : > { %10116 = vmatpush2.msra.mxu1 %v3916_v25  ;;  %9980 = vmatpush2.msra.mxu0 %v7956_v55  ;;  %v3674_v2 = vsel %vm3644_vm10, %v20149_v39, %v20147_v44  ;;  %v3666_v25 = vsel %vm3644_vm10, %v20151_v15, %v20150_v40  ;;  %v20153_v39 = vld [vmem:[#allocation124_spill] sm:$0xff] }
 0x821   : > { %10117 = vmatprep.subr.mxu1 %v3675_v19  ;;  %v16520_v58 = vpop.permute.xlu1 %7870  ;;  %8203 = vrot.lane.b32.xlu0 %v16377_v36, %s11622_s22  ;;  %v3665_v19 = vsel %vm3644_vm10, %v20152_v30, %v20151_v15  ;;  %v20156_v15 = vld [vmem:[#allocation21_spill] sm:$0xff]  ;;  %v20157_v30 = vld [vmem:[#allocation39_spill] sm:$0xff] }
 0x822   : > { %20148 = vst [vmem:[#allocation35_spill] sm:$0xff] %v16520_v58  ;;  %10118 = vmatpush2.msra.mxu1 %v3674_v2  ;;  %v7948_v55 = vsel %vm7946_vm7, %v7869_v42, %v16520_v58  ;;  %v20154_v2 = vld [vmem:[#allocation55_spill] sm:$0xff] }
 0x823   : > { %10119 = vmatprep.subr.mxu1 %v3666_v25  ;;  %8181 = vrot.lane.b32.xlu1 %v16226_v59, %s11622_s22  ;;  %v7867_v6 = vpop.permute.xlu0 %7866  ;;  %v3657_v40 = vsel %vm3644_vm10, %v20154_v2, %v20153_v39  ;;  %v20155_v25 = vld [vmem:[#allocation54_spill] sm:$0xff] }
 0x824   : > { %10120 = vmatpush2.msra.mxu1 %v3665_v19  ;;  %v7947_v44 = vsel %vm7946_vm7, %v7867_v6, %v7869_v42  ;;  %9981 = vmatprep.subr.mxu0 %v7948_v55  ;;  %v3656_v58 = vsel %vm3644_vm10, %v20155_v25, %v20154_v2  ;;  %v3648_v42 = vsel %vm3644_vm10, %v20157_v30, %v20156_v15  ;;  %v20158_v6 = vld [vmem:[#allocation38_spill] sm:$0xff]  ;;  %v20160_v19 = vld [vmem:[#allocation184_spill] sm:$0xff]  ;;  %v20161_v2 = vld [vmem:[#allocation85_spill] sm:$0xff] }
 0x825   : > { %10121 = vmatprep.subr.mxu1 %v3657_v40  ;;  %v7660_v21 = vpop.permute.xlu1 %7659  ;;  %8183 = vrot.lane.b32.xlu0 %v16397_v11, %s11622_s22  ;;  %v3647_v40 = vsel %vm3644_vm10, %v20158_v6, %v20157_v30  ;;  %v20163_v6 = vld [vmem:[#allocation152_spill] sm:$0xff] }
 0x826   : > { %9982 = vmatpush2.msra.mxu0 %v7947_v44  ;;  %10122 = vmatpush2.msra.mxu1 %v3656_v58  ;;  %v3406_v44 = vsel %vm3375_vm11, %v20161_v2, %v20160_v19 }
 0x827   : > { %10123 = vmatprep.subr.mxu1 %v3648_v42  ;;  %8161 = vrot.lane.b32.xlu1 %v16237_v61, %s11622_s22  ;;  %v16554_v55 = vpop.permute.xlu0 %7661  ;;  %v20162_v42 = vld [vmem:[#allocation84_spill] sm:$0xff] }
 0x828   : > { %20159 = vst [vmem:[#allocation34_spill] sm:$0xff] %v16554_v55  ;;  %10124 = vmatpush2.msra.mxu1 %v3647_v40  ;;  %v7706_v58 = vsel %vm7677_vm9, %v7660_v21, %v16554_v55  ;;  %v3405_v15 = vsel %vm3375_vm11, %v20162_v42, %v20161_v2  ;;  %v20164_v40 = vld [vmem:[#allocation69_spill] sm:$0xff]  ;;  %v20166_v2 = vld [vmem:[#allocation120_spill] sm:$0xff] }
 0x829   : > { %10125 = vmatprep.subr.mxu1 %v3406_v44  ;;  %v7658_v25 = vpop.permute.xlu1 %7657  ;;  %8163 = vrot.lane.b32.xlu0 %v16415_v51, %s11622_s22  ;;  %v3397_v19 = vsel %vm3375_vm11, %v20164_v40, %v20163_v6  ;;  %v20165_v44 = vld [vmem:[#allocation68_spill] sm:$0xff]  ;;  %v20167_v42 = vld [vmem:[#allocation53_spill] sm:$0xff] }
 0x82a   : > { %v7705_v30 = vsel %vm7677_vm9, %v7658_v25, %v7660_v21  ;;  %9983 = vmatprep.subr.mxu0 %v7706_v58  ;;  %10126 = vmatpush2.msra.mxu1 %v3405_v15  ;;  %v3396_v39 = vsel %vm3375_vm11, %v20165_v44, %v20164_v40  ;;  %v3388_v21 = vsel %vm3375_vm11, %v20167_v42, %v20166_v2  ;;  %v20169_v25 = vld [vmem:[#allocation9_spill] sm:$0xff]  ;;  %v20171_v44 = vld [vmem:[#allocation36_spill] sm:$0xff] }
 0x82b   : > { %10127 = vmatprep.subr.mxu1 %v3397_v19  ;;  %8141 = vrot.lane.b32.xlu1 %v16244_v57, %s11622_s22  ;;  %v7640_v55 = vpop.permute.xlu0 %7639  ;;  %v20168_v19 = vld [vmem:[#allocation52_spill] sm:$0xff]  ;;  %v20170_v40 = vld [vmem:[#allocation37_spill] sm:$0xff] }
 0x82c   : > { %10128 = vmatpush2.msra.mxu1 %v3396_v39  ;;  %9984 = vmatpush2.msra.mxu0 %v7705_v30  ;;  %v3387_v58 = vsel %vm3375_vm11, %v20168_v19, %v20167_v42  ;;  %v3379_v39 = vsel %vm3375_vm11, %v20170_v40, %v20169_v25 }
 0x82d   : > { %10129 = vmatprep.subr.mxu1 %v3388_v21  ;;  %v16578_v15 = vpop.permute.xlu1 %7641  ;;  %8143 = vrot.lane.b32.xlu0 %v16441_v8, %s11622_s22  ;;  %v3378_v21 = vsel %vm3375_vm11, %v20171_v44, %v20170_v40 }
 0x82e   : > { %10130 = vmatpush2.msra.mxu1 %v3387_v58  ;;  %v7697_v30 = vsel %vm7677_vm9, %v7640_v55, %v16578_v15  ;;  %v11579_v58 = vld [vmem:[%s18990_s5] sm:$0x77] }
 0x82f   : > { %10131 = vmatprep.subr.mxu1 %v3379_v39  ;;  %7932 = vrot.lane.b32.xlu1 %v16216_v53, %s11623_s23  ;;  %v7638_v2 = vpop.permute.xlu0 %7637 }
 0x830   : > { %10132 = vmatpush2.msra.mxu1 %v3378_v21  ;;  %v7696_v42 = vsel %vm7677_vm9, %v7638_v2, %v7640_v55  ;;  %9985 = vmatprep.subr.mxu0 %v7697_v30 }
 0x831   : > { %v7620_v19 = vpop.permute.xlu1 %7619  ;;  %7934 = vrot.lane.b32.xlu0 %v16377_v36, %s11623_s23  ;;  %9986 = vmatpush2.msra.mxu0 %v7696_v42 }
 0x832   : > { %10134 = vmatmul.mubr.f32.vlgmr.msra.gmra.mxu1 %v11579_v58 }
 0x833   : > { %7912 = vrot.lane.b32.xlu1 %v16226_v59, %s11623_s23  ;;  %v16603_v39 = vpop.permute.xlu0 %7621  ;;  %10275 = vmatprep.mubr.f32.mxu1 %v16163_v56  ;;  %v20174_v56 = vld [vmem:[#allocation356_spill] sm:$0xff] }
 0x834   : > { %v7688_v55 = vsel %vm7677_vm9, %v7620_v19, %v16603_v39 }
 0x835   : > { %v7618_v2 = vpop.permute.xlu1 %7617  ;;  %7914 = vrot.lane.b32.xlu0 %v16397_v11, %s11623_s23  ;;  %9987 = vmatprep.subr.mxu0 %v7688_v55  ;;  %v20172_v55 = vld [vmem:[#allocation358_spill] sm:$0xff] }
 0x836   : > { %v7687_v40 = vsel %vm7677_vm9, %v7618_v2, %v7620_v19  ;;  %v20173_v2 = vld [vmem:[#allocation357_spill] sm:$0xff] }
 0x837   : > { %7892 = vrot.lane.b32.xlu1 %v16237_v61, %s11623_s23  ;;  %v7600_v30 = vpop.permute.xlu0 %7599  ;;  %9988 = vmatpush2.msra.mxu0 %v7687_v40  ;;  %v5289_v40 = vsel %vm5258_vm12, %v20173_v2, %v20172_v55  ;;  %v5288_v25 = vsel %vm5258_vm12, %v20174_v56, %v20173_v2  ;;  %v20178_v55 = vld [vmem:[#allocation348_spill] sm:$0xff] }
 0x839   : > { %v16613_v44 = vpop.permute.xlu1 %7601  ;;  %7894 = vrot.lane.b32.xlu0 %v16415_v51, %s11623_s23 }
 0x83a   : > { %v7679_v21 = vsel %vm7677_vm9, %v7600_v30, %v16613_v44 }
 0x83b   : > { %7872 = vrot.lane.b32.xlu1 %v16244_v57, %s11623_s23  ;;  %v7598_v42 = vpop.permute.xlu0 %7597  ;;  %9989 = vmatprep.subr.mxu0 %v7679_v21  ;;  %v20176_v21 = vld [vmem:[#allocation350_spill] sm:$0xff] }
 0x83c   : > { %v7678_v19 = vsel %vm7677_vm9, %v7598_v42, %v7600_v30  ;;  %v20177_v42 = vld [vmem:[#allocation349_spill] sm:$0xff] }
 0x83d   : > { %v7396_v58 = vpop.permute.xlu1 %7395  ;;  %7874 = vrot.lane.b32.xlu0 %v16441_v8, %s11623_s23  ;;  %9990 = vmatpush2.msra.mxu0 %v7678_v19  ;;  %v5280_v19 = vsel %vm5258_vm12, %v20177_v42, %v20176_v21 }
 0x83e   : > { %10140 = vmatprep.subr.mxu0 %v5289_v40  ;;  %9992 = vmatmul.mubr.f32.vlgmr.msra.gmra.mxu0 %v16159_v62  ;;  %v5279_v40 = vsel %vm5258_vm12, %v20178_v55, %v20177_v42  ;;  %v20182_v42 = vld [vmem:[#allocation340_spill] sm:$0xff] }
 0x83f   : > { %7663 = vrot.lane.b32.xlu1 %v16216_v53, %s11624_s24  ;;  %v16633_v30 = vpop.permute.xlu0 %7397  ;;  %10141 = vmatpush1.msra.mxu0 %v5288_v25  ;;  %v20179_v53 = vld [vmem:[#allocation342_spill] sm:$0xff]  ;;  %v20180_v25 = vld [vmem:[#allocation341_spill] sm:$0xff] }
 0x840   : > { %20175 = vst [vmem:[#allocation81_spill] sm:$0xff] %v16633_v30  ;;  %10142 = vmatprep.subr.mxu0 %v5280_v19  ;;  %v7439_v62 = vsel %vm19512_vm4, %v7396_v58, %v16633_v30  ;;  %10204 = vmatprep.mubr.f32.mxu0 %v15920_v38  ;;  %v5271_v2 = vsel %vm5258_vm12, %v20180_v25, %v20179_v53  ;;  %v20184_v30 = vld [vmem:[#allocation333_spill] sm:$0xff] }
 0x841   : > { %v7376_v56 = vpop.permute.xlu1 %7375  ;;  %7665 = vrot.lane.b32.xlu0 %v16377_v36, %s11624_s24  ;;  %10143 = vmatpush1.msra.mxu0 %v5279_v40  ;;  %v7438_v19 = vsel %vm19512_vm4, %v16035_v32, %v7396_v58  ;;  %v5270_v38 = vsel %vm5258_vm12, %v20182_v42, %v20180_v25  ;;  %v20183_v40 = vld [vmem:[#allocation334_spill] sm:$0xff]  ;;  %v20188_v42 = vld [vmem:[#allocation324_spill] sm:$0xff] }
 0x842   : > { %10211 = vmatprep.subr.mxu1 %v7439_v62  ;;  %10144 = vmatprep.subr.mxu0 %v5271_v2  ;;  %v5262_v53 = vsel %vm5258_vm12, %v20184_v30, %v20183_v40  ;;  %v20186_v25 = vld [vmem:[#allocation326_spill] sm:$0xff] }
 0x843   : > { %10212 = vmatpush1.msra.mxu1 %v7438_v19  ;;  %7643 = vrot.lane.b32.xlu1 %v16226_v59, %s11624_s24  ;;  %v16653_v55 = vpop.permute.xlu0 %7377  ;;  %v20185_v59 = vld [vmem:[#allocation332_spill] sm:$0xff]  ;;  %v7429_v19 = vsel %vm19512_vm4, %v16048_v60, %v7376_v56 }
 0x844   : > { %20181 = vst [vmem:[#allocation80_spill] sm:$0xff] %v16653_v55  ;;  %10145 = vmatpush1.msra.mxu0 %v5270_v38  ;;  %v7430_v62 = vsel %vm19512_vm4, %v7376_v56, %v16653_v55  ;;  %v5261_v58 = vsel %vm5258_vm12, %v20185_v59, %v20184_v30  ;;  %v20187_v38 = vld [vmem:[#allocation325_spill] sm:$0xff]  ;;  %v20189_v30 = vld [vmem:[#allocation318_spill] sm:$0xff]  ;;  %v20191_v56 = vld [vmem:[#allocation316_spill] sm:$0xff] }
 0x845   : > { %10146 = vmatprep.subr.mxu0 %v5262_v53  ;;  %v7356_v32 = vpop.permute.xlu1 %7355  ;;  %7645 = vrot.lane.b32.xlu0 %v16397_v11, %s11624_s24  ;;  %v5020_v2 = vsel %vm19465_vm13, %v20187_v38, %v20186_v25  ;;  %v5019_v55 = vsel %vm19465_vm13, %v20188_v42, %v20187_v38 }
 0x846   : > { %10147 = vmatpush1.msra.mxu0 %v5261_v58  ;;  %10213 = vmatprep.subr.mxu1 %v7430_v62  ;;  %v20190_v62 = vld [vmem:[#allocation317_spill] sm:$0xff] }
 0x847   : > { %10148 = vmatprep.subr.mxu0 %v5020_v2  ;;  %10214 = vmatpush1.msra.mxu1 %v7429_v19  ;;  %v16673_v53 = vpop.permute.xlu0 %7357  ;;  %v5011_v59 = vsel %vm19465_vm13, %v20190_v62, %v20189_v30  ;;  %v5010_v38 = vsel %vm19465_vm13, %v20191_v56, %v20190_v62  ;;  %v7420_v19 = vsel %vm19512_vm4, %v16057_v52, %v7356_v32  ;;  %v20195_v62 = vld [vmem:[#allocation302_spill] sm:$0xff] }
 0x848   : > { %7623 = vrot.lane.b32.xlu1 %v16237_v61, %s11624_s24  ;;  %10149 = vmatpush1.msra.mxu0 %v5019_v55  ;;  %v7421_v58 = vsel %vm19512_vm4, %v7356_v32, %v16673_v53  ;;  %v20192_v61 = vld [vmem:[#allocation310_spill] sm:$0xff]  ;;  %v20193_v55 = vld [vmem:[#allocation309_spill] sm:$0xff]  ;;  %v20197_v32 = vld [vmem:[#allocation300_spill] sm:$0xff] }
 0x849   : > { %10150 = vmatprep.subr.mxu0 %v5011_v59  ;;  %v7336_v60 = vpop.permute.xlu1 %7335  ;;  %7625 = vrot.lane.b32.xlu0 %v16415_v51, %s11624_s24  ;;  %v5002_v2 = vsel %vm19465_vm13, %v20193_v55, %v20192_v61  ;;  %v20194_v59 = vld [vmem:[#allocation308_spill] sm:$0xff] }
 0x84a   : > { %10151 = vmatpush1.msra.mxu0 %v5010_v38  ;;  %10215 = vmatprep.subr.mxu1 %v7421_v58  ;;  %v5001_v30 = vsel %vm19465_vm13, %v20194_v59, %v20193_v55  ;;  %v20196_v58 = vld [vmem:[#allocation301_spill] sm:$0xff] }
 0x84b   : > { %10152 = vmatprep.subr.mxu0 %v5002_v2  ;;  %10216 = vmatpush1.msra.mxu1 %v7420_v19  ;;  %v16695_v42 = vpop.permute.xlu0 %7337  ;;  %v4993_v56 = vsel %vm19465_vm13, %v20196_v58, %v20195_v62  ;;  %v4992_v55 = vsel %vm19465_vm13, %v20197_v32, %v20196_v58  ;;  %v7411_v19 = vsel %vm19512_vm4, %v16070_v54, %v7336_v60  ;;  %v20202_v58 = vld [vmem:[#allocation286_spill] sm:$0xff] }
 0x84c   : > { %7603 = vrot.lane.b32.xlu1 %v16244_v57, %s11624_s24  ;;  %10153 = vmatpush1.msra.mxu0 %v5001_v30  ;;  %v7412_v38 = vsel %vm19512_vm4, %v7336_v60, %v16695_v42  ;;  %v20198_v57 = vld [vmem:[#allocation294_spill] sm:$0xff]  ;;  %v20199_v30 = vld [vmem:[#allocation293_spill] sm:$0xff] }
 0x84d   : > { %10154 = vmatprep.subr.mxu0 %v4993_v56  ;;  %v7127_v52 = vpop.permute.xlu1 %7126  ;;  %7605 = vrot.lane.b32.xlu0 %v16441_v8, %s11624_s24  ;;  %v4751_v2 = vsel %vm19464_vm14, %v20199_v30, %v20198_v57  ;;  %v20201_v56 = vld [vmem:[#allocation292_spill] sm:$0xff] }
 0x84e   : > { %10155 = vmatpush1.msra.mxu0 %v4992_v55  ;;  %10217 = vmatprep.subr.mxu1 %v7412_v38  ;;  %v4750_v62 = vsel %vm19464_vm14, %v20201_v56, %v20199_v30  ;;  %v20203_v38 = vld [vmem:[#allocation285_spill] sm:$0xff]  ;;  %v16727_v55 = vld [vmem:[#allocation2 + $0x138] sm:$0xff]  ;;  %v20204_v30 = vld [vmem:[#allocation284_spill] sm:$0xff] }
 0x84f   : > { %10156 = vmatprep.subr.mxu0 %v4751_v2  ;;  %10218 = vmatpush1.msra.mxu1 %v7411_v19  ;;  %v16717_v59 = vpop.permute.xlu0 %7128  ;;  %v4742_v32 = vsel %vm19464_vm14, %v20203_v38, %v20202_v58  ;;  %v4741_v2 = vsel %vm19464_vm14, %v20204_v30, %v20203_v38  ;;  %v20206_v19 = vld [vmem:[#allocation277_spill] sm:$0xff]  ;;  %v7170_v58 = vsel %vm19467_vm2, %v16079_v45, %v7127_v52  ;;  %v20209_v38 = vld [vmem:[#allocation270_spill] sm:$0xff] }
 0x850   : > { %20200 = vst [vmem:[#allocation65_spill] sm:$0xff] %v16717_v59  ;;  %7399 = vrot.lane.b32.xlu1 %v16377_v36, %s11617_s12  ;;  %10157 = vmatpush1.msra.mxu0 %v4750_v62  ;;  %v7171_v54 = vsel %vm19467_vm2, %v7127_v52, %v16717_v59  ;;  %v20205_v62 = vld [vmem:[#allocation278_spill] sm:$0xff]  ;;  %v20208_v59 = vld [vmem:[#allocation276_spill] sm:$0xff] }
 0x851   : > { %10158 = vmatprep.subr.mxu0 %v4742_v32  ;;  %v7107_v60 = vpop.permute.xlu1 %7106  ;;  %7401 = vrot.lane.b32.xlu0 %v16727_v55, %s11617_s12  ;;  %v4733_v56 = vsel %vm19464_vm14, %v20206_v19, %v20205_v62  ;;  %v4732_v57 = vsel %vm19464_vm14, %v20208_v59, %v20206_v19  ;;  %v20211_v59 = vld [vmem:[#allocation268_spill] sm:$0xff]  ;;  %v20213_v19 = vld [vmem:[#allocation93_spill] sm:$0xff] }
 0x852   : > { %10159 = vmatpush1.msra.mxu0 %v4741_v2  ;;  %10219 = vmatprep.subr.mxu1 %v7171_v54  ;;  %v20210_v54 = vld [vmem:[#allocation269_spill] sm:$0xff]  ;;  %v16751_v2 = vld [vmem:[#allocation2 + $0xe0] sm:$0xff] }
 0x853   : > { %10160 = vmatprep.subr.mxu0 %v4733_v56  ;;  %10220 = vmatpush1.msra.mxu1 %v7170_v58  ;;  %v16741_v32 = vpop.permute.xlu0 %7108  ;;  %v4724_v30 = vsel %vm19464_vm14, %v20210_v54, %v20209_v38  ;;  %v4723_v58 = vsel %vm19464_vm14, %v20211_v59, %v20210_v54  ;;  %v7161_v38 = vsel %vm19467_vm2, %v16092_v28, %v7107_v60  ;;  %v20216_v54 = vld [vmem:[#allocation168_spill] sm:$0xff]  ;;  %vm20225_vm14 = vcmask 162816  }
 0x854   : > { %20207 = vst [vmem:[#allocation64_spill] sm:$0xff] %v16741_v32  ;;  %7379 = vrot.lane.b32.xlu1 %v16397_v11, %s11617_s12  ;;  %10161 = vmatpush1.msra.mxu0 %v4732_v57  ;;  %v7162_v45 = vsel %vm19467_vm2, %v7107_v60, %v16741_v32  ;;  %v20212_v57 = vld [vmem:[#allocation200_spill] sm:$0xff]  ;;  %vm20226_vm13 = vmmov %vm20225_vm14 }
 0x855   : > { %10162 = vmatprep.subr.mxu0 %v4724_v30  ;;  %v7087_v52 = vpop.permute.xlu1 %7086  ;;  %7381 = vrot.lane.b32.xlu0 %v16751_v2, %s11617_s12  ;;  %v4482_v56 = vsel %vm19466_vm15, %v20213_v19, %v20212_v57  ;;  %v20215_v32 = vld [vmem:[#allocation92_spill] sm:$0xff] }
 0x856   : > { %10163 = vmatpush1.msra.mxu0 %v4723_v58  ;;  %10221 = vmatprep.subr.mxu1 %v7162_v45  ;;  %v4481_v62 = vsel %vm19466_vm15, %v20215_v32, %v20213_v19  ;;  %v20217_v45 = vld [vmem:[#allocation77_spill] sm:$0xff]  ;;  %v20218_v32 = vld [vmem:[#allocation76_spill] sm:$0xff] }
 0x857   : > { %10164 = vmatprep.subr.mxu0 %v4482_v56  ;;  %10222 = vmatpush1.msra.mxu1 %v7161_v38  ;;  %v16765_v30 = vpop.permute.xlu0 %7088  ;;  %v4473_v59 = vsel %vm19466_vm15, %v20217_v45, %v20216_v54  ;;  %v16775_v58 = vld [vmem:[#allocation2 + $0x88] sm:$0xff]  ;;  %v4472_v38 = vsel %vm19466_vm15, %v20218_v32, %v20217_v45  ;;  %v7152_v54 = vsel %vm19467_vm2, %v16101_v48, %v7087_v52 }
 0x858   : > { %20214 = vst [vmem:[#allocation49_spill] sm:$0xff] %v16765_v30  ;;  %7359 = vrot.lane.b32.xlu1 %v16415_v51, %s11617_s12  ;;  %10165 = vmatpush1.msra.mxu0 %v4481_v62  ;;  %v7153_v28 = vsel %vm19467_vm2, %v7087_v52, %v16765_v30  ;;  %v20219_v62 = vld [vmem:[#allocation136_spill] sm:$0xff]  ;;  %v20220_v19 = vld [vmem:[#allocation61_spill] sm:$0xff] }
 0x859   : > { %10166 = vmatprep.subr.mxu0 %v4473_v59  ;;  %v7067_v60 = vpop.permute.xlu1 %7066  ;;  %7361 = vrot.lane.b32.xlu0 %v16775_v58, %s11617_s12  ;;  %v4464_v56 = vsel %vm19466_vm15, %v20220_v19, %v20219_v62  ;;  %v20221_v30 = vld [vmem:[#allocation60_spill] sm:$0xff]  ;;  %v20222_v45 = vld [vmem:[#allocation5_spill] sm:$0xff] }
 0x85a   : > { %10167 = vmatpush1.msra.mxu0 %v4472_v38  ;;  %10223 = vmatprep.subr.mxu1 %v7153_v28  ;;  %v4463_v57 = vsel %vm19466_vm15, %v20221_v30, %v20220_v19  ;;  %v20223_v28 = vld [vmem:[#allocation45_spill] sm:$0xff]  ;;  %v16799_v38 = vld [vmem:[#allocation2 + $0x30] sm:$0xff]  ;;  %v20224_v30 = vld [vmem:[#allocation44_spill] sm:$0xff]  ;;  %v7143_v19 = vsel %vm19467_vm2, %v16114_v29, %v7067_v60 }
 0x85b   : > { %10168 = vmatprep.subr.mxu0 %v4464_v56  ;;  %10224 = vmatpush1.msra.mxu1 %v7152_v54  ;;  %v16789_v59 = vpop.permute.xlu0 %7068  ;;  %v4455_v32 = vsel %vm19466_vm15, %v20223_v28, %v20222_v45  ;;  %v4454_v54 = vsel %vm19466_vm15, %v20224_v30, %v20223_v28  ;;  %vm20227_vm15 = vmmov %vm20226_vm13 }
 0x85c   : > { %7339 = vrot.lane.b32.xlu1 %v16441_v8, %s11617_s12  ;;  %10169 = vmatpush1.msra.mxu0 %v4463_v57  ;;  %v7144_v48 = vsel %vm19467_vm2, %v7067_v60, %v16789_v59  ;;  %v6364_v57 = vsel %vm20225_vm14, %v15760_v16, %v15771_v26  ;;  %v6355_v28 = vsel %vm20227_vm15, %v15722_v37, %v15728_v7  ;;  %vm20228_vm14 = vcmask 146432   ;;  %vm20229_vm2 = vmmov %vm20226_vm13 }
 0x85d   : > { %10170 = vmatprep.subr.mxu0 %v4455_v32  ;;  %v6858_v52 = vpop.permute.xlu1 %6857  ;;  %7341 = vrot.lane.b32.xlu0 %v16799_v38, %s11617_s12  ;;  %v6363_v32 = vsel %vm20226_vm13, %v15756_v35, %v15760_v16  ;;  %v6354_v35 = vsel %vm20229_vm2, %v15720_v63, %v15722_v37  ;;  %vm20230_vm13 = vmmov %vm20229_vm2  ;;  %v20233_v37 = vld [vmem:[#allocation448_spill] sm:$0xff] }
 0x85e   : > { %10171 = vmatpush1.msra.mxu0 %v4454_v54  ;;  %10225 = vmatprep.subr.mxu1 %v7144_v48  ;;  %v6346_v16 = vsel %vm20230_vm13, %v15686_v33, %v15692_v27  ;;  %vm20231_vm15 = vmmov %vm20228_vm14  ;;  %v6337_v63 = vsel %vm20229_vm2, %v20233_v37, %v15648_v17 }
 0x85f   : > { %10172 = vmatprep.subr.mxu0 %v6364_v57  ;;  %10226 = vmatpush1.msra.mxu1 %v7143_v19  ;;  %v16813_v56 = vpop.permute.xlu0 %6859  ;;  %v6901_v60 = vsel %vm20231_vm15, %v16123_v47, %v6858_v52  ;;  %vm20234_vm13 = vmmov %vm20231_vm15 }
 0x860   : > { %7130 = vrot.lane.b32.xlu1 %v16377_v36, %s11618_s16  ;;  %10173 = vmatpush2.msra.mxu0 %v6363_v32  ;;  %v6902_v48 = vsel %vm20228_vm14, %v6858_v52, %v16813_v56  ;;  %vm20232_vm14 = vmmov %vm20229_vm2  ;;  %v20237_v52 = vld [vmem:[#allocation441_spill] sm:$0xff] }
 0x861   : > { %10174 = vmatprep.subr.mxu0 %v6355_v28  ;;  %v6838_v29 = vpop.permute.xlu1 %6837  ;;  %7132 = vrot.lane.b32.xlu0 %v16727_v55, %s11618_s16  ;;  %v6345_v54 = vsel %vm20232_vm14, %v15683_v43, %v15686_v33  ;;  %vm20235_vm15 = vmmov %vm20229_vm2  ;;  %v20236_v33 = vld [vmem:[#allocation442_spill] sm:$0xff]  ;;  %vm20238_vm14 = vcmask 424960  }
 0x862   : > { %10175 = vmatpush2.msra.mxu0 %v6354_v35  ;;  %10227 = vmatprep.subr.mxu1 %v6902_v48  ;;  %v6336_v43 = vsel %vm20235_vm15, %v15640_v12, %v20233_v37  ;;  %v6096_v19 = vsel %vm20238_vm14, %v20237_v52, %v20236_v33  ;;  %vm20239_vm2 = vmmov %vm20234_vm13  ;;  %v20241_v12 = vld [vmem:[#allocation435_spill] sm:$0xff]  ;;  %v20242_v35 = vld [vmem:[#allocation434_spill] sm:$0xff] }
 0x863   : > { %10176 = vmatprep.subr.mxu0 %v6346_v16  ;;  %10228 = vmatpush1.msra.mxu1 %v6901_v60  ;;  %v16835_v30 = vpop.permute.xlu0 %6839  ;;  %v6892_v32 = vsel %vm20239_vm2, %v16136_v5, %v6838_v29 }
 0x864   : > { %7110 = vrot.lane.b32.xlu1 %v16397_v11, %s11618_s16  ;;  %10177 = vmatpush2.msra.mxu0 %v6345_v54  ;;  %v6893_v57 = vsel %vm20234_vm13, %v6838_v29, %v16835_v30  ;;  %vm20240_vm13 = vmmov %vm20238_vm14  ;;  %v20246_v29 = vld [vmem:[#allocation428_spill] sm:$0xff]  ;;  %v20247_v54 = vld [vmem:[#allocation427_spill] sm:$0xff] }
 0x865   : > { %10178 = vmatprep.subr.mxu0 %v6337_v63  ;;  %v6818_v47 = vpop.permute.xlu1 %6817  ;;  %7112 = vrot.lane.b32.xlu0 %v16751_v2, %s11618_s16  ;;  %v6095_v48 = vsel %vm20240_vm13, %v15602_v13, %v20237_v52  ;;  %vm20243_vm15 = vmmov %vm20240_vm13  ;;  %v20252_v52 = vld [vmem:[#allocation420_spill] sm:$0xff] }
 0x866   : > { %10179 = vmatpush2.msra.mxu0 %v6336_v43  ;;  %10229 = vmatprep.subr.mxu1 %v6893_v57  ;;  %v6087_v16 = vsel %vm20243_vm15, %v20242_v35, %v20241_v12  ;;  %vm20244_vm14 = vmmov %vm20239_vm2 }
 0x867   : > { %10180 = vmatprep.subr.mxu0 %v6096_v19  ;;  %10230 = vmatpush1.msra.mxu1 %v6892_v32  ;;  %v16857_v28 = vpop.permute.xlu0 %6819  ;;  %vm20245_vm2 = vmmov %vm20240_vm13 }
 0x868   : > { %7090 = vrot.lane.b32.xlu1 %v16415_v51, %s11618_s16  ;;  %10181 = vmatpush2.msra.mxu0 %v6095_v48  ;;  %v6884_v60 = vsel %vm20244_vm14, %v6818_v47, %v16857_v28  ;;  %v6086_v13 = vsel %vm20245_vm2, %v15564_v4, %v20242_v35  ;;  %vm20248_vm13 = vmmov %vm20245_vm2  ;;  %v20251_v4 = vld [vmem:[#allocation421_spill] sm:$0xff] }
 0x869   : > { %10182 = vmatprep.subr.mxu0 %v6087_v16  ;;  %v6798_v5 = vpop.permute.xlu1 %6797  ;;  %7092 = vrot.lane.b32.xlu0 %v16775_v58, %s11618_s16  ;;  %v6078_v37 = vsel %vm20248_vm13, %v20247_v54, %v20246_v29  ;;  %vm20249_vm15 = vmmov %vm20244_vm14  ;;  %v6069_v19 = vsel %vm20245_vm2, %v20252_v52, %v20251_v4  ;;  %v20256_v48 = vld [vmem:[#allocation413_spill] sm:$0xff] }
 0x86a   : > { %10183 = vmatpush2.msra.mxu0 %v6086_v13  ;;  %10231 = vmatprep.subr.mxu1 %v6884_v60  ;;  %v6883_v63 = vsel %vm20249_vm15, %v16145_v49, %v6818_v47  ;;  %vm20250_vm14 = vmmov %vm20245_vm2  ;;  %v20255_v47 = vld [vmem:[#allocation414_spill] sm:$0xff] }
 0x86b   : > { %10184 = vmatprep.subr.mxu0 %v6078_v37  ;;  %10232 = vmatpush1.msra.mxu1 %v6883_v63  ;;  %v16879_v57 = vpop.permute.xlu0 %6799  ;;  %v6077_v43 = vsel %vm20250_vm14, %v15524_v0, %v20247_v54  ;;  %vm20253_vm13 = vmmov %vm20249_vm15  ;;  %vm20257_vm14 = vcmask 433152   ;;  %v20261_v54 = vld [vmem:[#allocation406_spill] sm:$0xff] }
 0x86c   : > { %7070 = vrot.lane.b32.xlu1 %v16441_v8, %s11618_s16  ;;  %10185 = vmatpush2.msra.mxu0 %v6077_v43  ;;  %v6875_v32 = vsel %vm20253_vm13, %v6798_v5, %v16879_v57  ;;  %vm20254_vm15 = vmmov %vm20245_vm2  ;;  %v5827_v35 = vsel %vm20257_vm14, %v20256_v48, %v20255_v47 }
 0x86d   : > { %10186 = vmatprep.subr.mxu0 %v6069_v19  ;;  %v6589_v49 = vpop.permute.xlu1 %6588  ;;  %7072 = vrot.lane.b32.xlu0 %v16799_v38, %s11618_s16  ;;  %v6068_v0 = vsel %vm20254_vm15, %v15484_v14, %v20252_v52  ;;  %vm20258_vm2 = vmmov %vm20253_vm13  ;;  %v20260_v14 = vld [vmem:[#allocation407_spill] sm:$0xff] }
 0x86e   : > { %10187 = vmatpush2.msra.mxu0 %v6068_v0  ;;  %10233 = vmatprep.subr.mxu1 %v6875_v32  ;;  %v6874_v16 = vsel %vm20258_vm2, %v16167_v41, %v6798_v5  ;;  %vm20259_vm13 = vmmov %vm20257_vm14  ;;  %vm20263_vm14 = vcmask 154624   ;;  %v20266_v5 = vld [vmem:[#allocation399_spill] sm:$0xff]  ;;  %v20272_v0 = vld [vmem:[#allocation392_spill] sm:$0xff] }
 0x86f   : > { %10188 = vmatprep.subr.mxu0 %v5827_v35  ;;  %10234 = vmatpush1.msra.mxu1 %v6874_v16  ;;  %v16901_v60 = vpop.permute.xlu0 %6590  ;;  %v5826_v13 = vsel %vm20259_vm13, %v15444_v10, %v20256_v48  ;;  %vm20262_vm15 = vmmov %vm20259_vm13  ;;  %v6624_v19 = vsel %vm20263_vm14, %v15987_v1, %v15995_v24  ;;  %v20276_v16 = vld [vmem:[#allocation475_spill] sm:$0xff] }
 0x870   : > { %6861 = vrot.lane.b32.xlu1 %v16377_v36, %s11619_s17  ;;  %10189 = vmatpush2.msra.mxu0 %v5826_v13  ;;  %v5818_v37 = vsel %vm20262_vm15, %v20261_v54, %v20260_v14  ;;  %v6633_v63 = vsel %vm20263_vm14, %v6589_v49, %v16901_v60  ;;  %vm20264_vm2 = vmmov %vm20259_vm13  ;;  %v20265_v36 = vld [vmem:[#allocation400_spill] sm:$0xff] }
 0x871   : > { %10190 = vmatprep.subr.mxu0 %v5818_v37  ;;  %v16913_v41 = vpop.permute.xlu1 %8739  ;;  %6863 = vrot.lane.b32.xlu0 %v16727_v55, %s11619_s17  ;;  %v5817_v10 = vsel %vm20264_vm2, %v15404_v46, %v20261_v54  ;;  %vm20267_vm13 = vmmov %vm20264_vm2  ;;  %v5808_v46 = vsel %vm20264_vm2, %v15356_v20, %v20266_v5  ;;  %v20275_v20 = vld [vmem:[#allocation476_spill] sm:$0xff] }
 0x872   : > { %10191 = vmatpush2.msra.mxu0 %v5817_v10  ;;  %10235 = vmatprep.subr.mxu1 %v6633_v63  ;;  %v5809_v43 = vsel %vm20267_vm13, %v20266_v5, %v20265_v36  ;;  %vm20268_vm15 = vmmov %vm20263_vm14  ;;  %v20283_v10 = vld [vmem:[#allocation472_spill] sm:$0xff] }
 0x873   : > { %v6632_v52 = vsel %vm20268_vm15, %v16177_v31, %v6589_v49  ;;  %10192 = vmatprep.subr.mxu0 %v5809_v43  ;;  %v16928_v32 = vpop.permute.xlu0 %8741  ;;  %vm20270_vm13 = vmmov %vm20263_vm14  ;;  %v20271_v49 = vld [vmem:[#allocation393_spill] sm:$0xff]  ;;  %v20286_v43 = vld [vmem:[#allocation384_spill] sm:$0xff] }
 0x874   : > { %10236 = vmatpush1.msra.mxu1 %v6632_v52  ;;  %20269 = vst [vmem:[#allocation48_spill] sm:$0xff] %v16928_v32  ;;  %6841 = vrot.lane.b32.xlu1 %v16397_v11, %s11619_s17  ;;  %v6623_v31 = vsel %vm20270_vm13, %v15985_v22, %v15987_v1  ;;  %vm20273_vm15 = vmmov %vm20264_vm2  ;;  %v20278_v22 = vld [vmem:[#allocation386_spill] sm:$0xff]  ;;  %v20279_v1 = vld [vmem:[#allocation385_spill] sm:$0xff] }
 0x875   : > { %10237 = vmatprep.subr.mxu1 %v6624_v19  ;;  %10193 = vmatpush2.msra.mxu0 %v5808_v46  ;;  %v5800_v48 = vsel %vm20273_vm15, %v20272_v0, %v20271_v49  ;;  %v8720_v35 = vpop.permute.xlu1 %8719  ;;  %vm20274_vm14 = vmmov %vm20264_vm2  ;;  %v20288_v19 = vld [vmem:[#allocation470_spill] sm:$0xff] }
 0x876   : > { %10238 = vmatpush1.msra.mxu1 %v6623_v31  ;;  %10194 = vmatprep.subr.mxu0 %v5800_v48  ;;  %v5799_v11 = vsel %vm20274_vm14, %v15316_v18, %v20272_v0  ;;  %vm20277_vm2 = vmmov %vm20270_vm13  ;;  %vm20280_vm13 = vcmask 441344   ;;  %v20284_v18 = vld [vmem:[#allocation471_spill] sm:$0xff]  ;;  %v20290_v31 = vld [vmem:[#allocation378_spill] sm:$0xff] }
 0x877   : > { %6843 = vrot.lane.b32.xlu0 %v16751_v2, %s11619_s17  ;;  %v6615_v13 = vsel %vm20277_vm2, %v20276_v16, %v20275_v20  ;;  %10195 = vmatpush2.msra.mxu0 %v5799_v11  ;;  %v5558_v54 = vsel %vm20280_vm13, %v20279_v1, %v20278_v22  ;;  %vm20281_vm15 = vmmov %vm20277_vm2  ;;  %v16955_v63 = vpop.permute.xlu0 %8721  ;;  %v20291_v0 = vld [vmem:[#allocation377_spill] sm:$0xff] }
 0x878   : > { %10239 = vmatprep.subr.mxu1 %v6615_v13  ;;  %v6614_v37 = vsel %vm20281_vm15, %v15939_v23, %v20276_v16  ;;  %20282 = vst [vmem:[#allocation33_spill] sm:$0xff] %v16955_v63  ;;  %10196 = vmatprep.subr.mxu0 %v5558_v54  ;;  %vm20285_vm14 = vmmov %vm20277_vm2  ;;  %v20296_v13 = vld [vmem:[#allocation370_spill] sm:$0xff] }
 0x879   : > { %10240 = vmatpush1.msra.mxu1 %v6614_v37  ;;  %v6606_v5 = vsel %vm20285_vm14, %v20284_v18, %v20283_v10  ;;  %6821 = vrot.lane.b32.xlu1 %v16415_v51, %s11619_s17  ;;  %vm20287_vm2 = vmmov %vm20280_vm13  ;;  %v8700_v46 = vpop.permute.xlu1 %8699  ;;  %v20293_v51 = vld [vmem:[#allocation376_spill] sm:$0xff]  ;;  %v20298_v37 = vld [vmem:[#allocation10_spill] sm:$0xff] }
 0x87a   : > { %10241 = vmatprep.subr.mxu1 %v6606_v5  ;;  %v5557_v52 = vsel %vm20287_vm2, %v20286_v43, %v20279_v1  ;;  %vm20289_vm13 = vmmov %vm20285_vm14  ;;  %v20297_v1 = vld [vmem:[#allocation369_spill] sm:$0xff]  ;;  %v20300_v43 = vld [vmem:[#allocation368_spill] sm:$0xff] }
 0x87b   : > { %v6605_v23 = vsel %vm20289_vm13, %v20288_v19, %v20284_v18  ;;  %10197 = vmatpush2.msra.mxu0 %v5557_v52  ;;  %vm20292_vm15 = vmmov %vm20287_vm2  ;;  %6823 = vrot.lane.b32.xlu0 %v16775_v58, %s11619_s17  ;;  %v16976_v16 = vpop.permute.xlu0 %8701  ;;  %v5540_v54 = vsel %vm20287_vm2, %v20297_v1, %v20296_v13  ;;  %v20301_v52 = vld [vmem:[#allocation367_spill] sm:$0xff] }
 0x87c   : > { %v5549_v48 = vsel %vm20292_vm15, %v20291_v0, %v20290_v31  ;;  %10242 = vmatpush1.msra.mxu1 %v6605_v23  ;;  %vm20294_vm14 = vmmov %vm20287_vm2  ;;  %20295 = vst [vmem:[#allocation32_spill] sm:$0xff] %v16976_v16  ;;  %v20303_v23 = vld [vmem:[#allocation366_spill] sm:$0xff] }
 0x87d   : > { %10198 = vmatprep.subr.mxu0 %v5549_v48  ;;  %v5548_v11 = vsel %vm20294_vm14, %v20293_v51, %v20291_v0  ;;  %6801 = vrot.lane.b32.xlu1 %v16441_v8, %s11619_s17  ;;  %vm20299_vm13 = vmmov %vm20287_vm2  ;;  %v8471_v5 = vpop.permute.xlu1 %8470  ;;  %v8784_v8 = vsel %vm8753_vm1, %v16913_v41, %v16928_v32  ;;  %v16999_v51 = vld [vmem:[#allocation2 + $0x130] sm:$0xff] }
 0x87e   : > { %10199 = vmatpush2.msra.mxu0 %v5548_v11  ;;  %v5539_v18 = vsel %vm20299_vm13, %v20298_v37, %v20297_v1  ;;  %vm20302_vm15 = vmmov %vm20287_vm2  ;;  %v20305_v37 = vld [vmem:[#allocation488_spill] sm:$0xff]  ;;  %vm20348_vm13 = vcmask 1039360  }
 0x87f   : > { %10200 = vmatprep.subr.mxu0 %v5540_v54  ;;  %v5531_v19 = vsel %vm20302_vm15, %v20301_v52, %v20300_v43  ;;  %6803 = vrot.lane.b32.xlu0 %v16799_v38, %s11619_s17  ;;  %vm20304_vm14 = vmmov %vm20287_vm2  ;;  %v16994_v48 = vpop.permute.xlu0 %8472  ;;  %v11580_v54 = vld [vmem:[%s18990_s5 + $0x8] sm:$0x77]  ;;  %vm20315_vm2 = vcmask 261120  }
 0x880   : > { %10201 = vmatpush2.msra.mxu0 %v5539_v18  ;;  %v5530_v0 = vsel %vm20304_vm14, %v20303_v23, %v20301_v52  ;;  %v8515_v11 = vsel %vm8484_vm3, %v8471_v5, %v16994_v48  ;;  %v8783_v18 = vsel %vm8753_vm1, %v20305_v37, %v16913_v41  ;;  %v8775_v52 = vsel %vm8753_vm1, %v8720_v35, %v16955_v63  ;;  %vm20350_vm15 = vmmov %vm20348_vm13 }
 0x881   : > { %10202 = vmatprep.subr.mxu0 %v5531_v19  ;;  %6592 = vrot.lane.b32.xlu1 %v16999_v51, %s11616_s13  ;;  %v8680_v1 = vpop.permute.xlu1 %8679  ;;  %v20306_v19 = vld [vmem:[#allocation489_spill] sm:$0xff]  ;;  %v8766_v41 = vsel %vm8753_vm1, %v8700_v46, %v16976_v16  ;;  %vm20353_vm14 = vmmov %vm20348_vm13 }
 0x882   : > { %10203 = vmatpush2.msra.mxu0 %v5530_v0  ;;  %10243 = vmatprep.subr.mxu1 %v8515_v11  ;;  %v8514_v23 = vsel %vm8484_vm3, %v20306_v19, %v8471_v5  ;;  %v20309_v5 = vld [vmem:[#allocation492_spill] sm:$0xff]  ;;  %v20310_v19 = vmov 0.0  }
 0x883   : > { %10306 = vmatprep.subr.mxu0 %v8784_v8  ;;  %10205 = vmatmul.mubr.f32.vlgmr.msra.gmra.mxu0 %v11580_v54  ;;  %v17017_v0 = vpop.permute.xlu0 %8681  ;;  %v20308_v8 = vld [vmem:[#allocation490_spill] sm:$0xff] }
 0x884   : > { %10307 = vmatpush1.msra.mxu0 %v8783_v18  ;;  %6594 = vrot.lane.b32.xlu0 %v16727_v55, %s11616_s13  ;;  %20307 = vst [vmem:[#allocation79_spill] sm:$0xff] %v17017_v0  ;;  %v8774_v54 = vsel %vm8753_vm1, %v20308_v8, %v8720_v35  ;;  %v8757_v37 = vsel %vm8753_vm1, %v8680_v1, %v17017_v0 }
 0x885   : > { %10308 = vmatprep.subr.mxu0 %v8775_v52  ;;  %10244 = vmatpush2.msra.mxu1 %v8514_v23  ;;  %v8451_v11 = vpop.permute.xlu1 %8450  ;;  %v8765_v18 = vsel %vm8753_vm1, %v20309_v5, %v8700_v46  ;;  %v17029_v52 = vld [vmem:[#allocation2 + $0x140] sm:$0xff]  ;;  %v20312_v23 = vld [vmem:[#allocation494_spill] sm:$0xff]  ;;  %v20314_v46 = vld [vmem:[#allocation181_spill] sm:$0xff] }
 0x886   : > { %10309 = vmatpush1.msra.mxu0 %v8774_v54  ;;  %8743 = vrot.lane.b32.xlu1 %v16727_v55, %s11620_s20  ;;  %v8756_v8 = vsel %vm8753_vm1, %v20312_v23, %v8680_v1  ;;  %v20313_v54 = vld [vmem:[#allocation182_spill] sm:$0xff]  ;;  %v20316_v1 = vld [vmem:[#allocation180_spill] sm:$0xff] }
 0x887   : > { %10310 = vmatprep.subr.mxu0 %v8766_v41  ;;  %10346 = vmatprep.mubr.f32.mxu0 %v20310_v19  ;;  %v17034_v35 = vpop.permute.xlu0 %8452  ;;  %v3139_v41 = vsel %vm3106_vm5, %v20314_v46, %v20313_v54  ;;  %v3138_v23 = vsel %vm3106_vm5, %v20316_v1, %v20314_v46  ;;  %v20318_v54 = vld [vmem:[#allocation149_spill] sm:$0xff]  ;;  %v20322_v46 = vld [vmem:[#allocation118_spill] sm:$0xff] }
 0x888   : > { %10311 = vmatpush1.msra.mxu0 %v8765_v18  ;;  %8745 = vrot.lane.b32.xlu0 %v17029_v52, %s11620_s20  ;;  %20311 = vst [vmem:[#allocation78_spill] sm:$0xff] %v17034_v35  ;;  %v8506_v18 = vsel %vm8484_vm3, %v8451_v11, %v17034_v35  ;;  %v20323_v1 = vld [vmem:[#allocation117_spill] sm:$0xff] }
 0x889   : > { %10312 = vmatprep.subr.mxu0 %v8757_v37  ;;  %v8431_v5 = vpop.permute.xlu1 %8430  ;;  %v11581_v37 = vld [vmem:[%s18990_s5 + $0x18] sm:$0x7]  ;;  %10245 = vmatprep.subr.mxu1 %v8506_v18  ;;  %v17074_v18 = vld [vmem:[#allocation2 + $0xe8] sm:$0xff] }
 0x88a   : > { %10313 = vmatpush1.msra.mxu0 %v8756_v8  ;;  %8474 = vrot.lane.b32.xlu1 %v16727_v55, %s11621_s21  ;;  %v20317_v8 = vld [vmem:[#allocation150_spill] sm:$0xff] }
 0x88b   : > { %10353 = vmatprep.subr.mxu0 %v3139_v41  ;;  %11368 = vmatmul.mubr.msk.f32.vlgmr.msra.gmra.mxu0 %vm20315_vm2, %v11581_v37  ;;  %v3130_v0 = vsel %vm3106_vm5, %v20318_v54, %v20317_v8  ;;  %v17057_v19 = vpop.permute.xlu0 %8432  ;;  %v20320_v41 = vld [vmem:[#allocation491_spill] sm:$0xff]  ;;  %v20321_v37 = vld [vmem:[#allocation148_spill] sm:$0xff]  ;;  %vm20356_vm2 = vmmov %vm20348_vm13 }
 0x88c   : > { %10354 = vmatpush1.msra.mxu0 %v3138_v23  ;;  %8476 = vrot.lane.b32.xlu0 %v17029_v52, %s11621_s21  ;;  %20319 = vst [vmem:[#allocation63_spill] sm:$0xff] %v17057_v19  ;;  %v8505_v16 = vsel %vm8484_vm3, %v20320_v41, %v8451_v11  ;;  %v3129_v63 = vsel %vm3106_vm5, %v20321_v37, %v20318_v54  ;;  %v20328_v37 = vld [vmem:[#allocation493_spill] sm:$0xff] }
 0x88d   : > { %10355 = vmatprep.subr.mxu0 %v3130_v0  ;;  %10246 = vmatpush2.msra.mxu1 %v8505_v16  ;;  %v3121_v23 = vsel %vm3106_vm5, %v20323_v1, %v20322_v46  ;;  %v8411_v35 = vpop.permute.xlu1 %8410  ;;  %v8497_v8 = vsel %vm8484_vm3, %v8431_v5, %v17057_v19  ;;  %v20324_v0 = vld [vmem:[#allocation116_spill] sm:$0xff]  ;;  %v20326_v16 = vld [vmem:[#allocation103_spill] sm:$0xff]  ;;  %v20329_v46 = vld [vmem:[#allocation102_spill] sm:$0xff] }
 0x88e   : > { %10356 = vmatpush1.msra.mxu0 %v3129_v63  ;;  %8723 = vrot.lane.b32.xlu1 %v16751_v2, %s11620_s20  ;;  %v3120_v11 = vsel %vm3106_vm5, %v20324_v0, %v20323_v1  ;;  %v20325_v63 = vld [vmem:[#allocation104_spill] sm:$0xff]  ;;  %v3111_v1 = vsel %vm3106_vm5, %v20329_v46, %v20326_v16  ;;  %v20330_v0 = vld [vmem:[#allocation178_spill] sm:$0xff] }
 0x88f   : > { %10357 = vmatprep.subr.mxu0 %v3121_v23  ;;  %v3112_v54 = vsel %vm3106_vm5, %v20326_v16, %v20325_v63  ;;  %v17081_v41 = vpop.permute.xlu0 %8412  ;;  %10247 = vmatprep.subr.mxu1 %v8497_v8  ;;  %v8496_v23 = vsel %vm8484_vm3, %v20328_v37, %v8431_v5  ;;  %v20332_v5 = vld [vmem:[#allocation176_spill] sm:$0xff]  ;;  %v20333_v46 = vld [vmem:[#allocation146_spill] sm:$0xff]  ;;  %v20334_v16 = vld [vmem:[#allocation145_spill] sm:$0xff] }
 0x890   : > { %10358 = vmatpush1.msra.mxu0 %v3120_v11  ;;  %8725 = vrot.lane.b32.xlu0 %v17074_v18, %s11620_s20  ;;  %20327 = vst [vmem:[#allocation62_spill] sm:$0xff] %v17081_v41  ;;  %v20331_v11 = vld [vmem:[#allocation177_spill] sm:$0xff]  ;;  %v8488_v63 = vsel %vm8484_vm3, %v8411_v35, %v17081_v41 }
 0x891   : > { %10359 = vmatprep.subr.mxu0 %v3112_v54  ;;  %10248 = vmatpush2.msra.mxu1 %v8496_v23  ;;  %v2870_v19 = vsel %vm2837_vm6, %v20331_v11, %v20330_v0  ;;  %v8202_v32 = vpop.permute.xlu1 %8201  ;;  %v2869_v8 = vsel %vm2837_vm6, %v20332_v5, %v20331_v11  ;;  %v2861_v54 = vsel %vm2837_vm6, %v20334_v16, %v20333_v46  ;;  %v20336_v23 = vld [vmem:[#allocation83_spill] sm:$0xff]  ;;  %v20338_v11 = vld [vmem:[#allocation114_spill] sm:$0xff]  ;;  %v20339_v5 = vld [vmem:[#allocation113_spill] sm:$0xff] }
 0x892   : > { %10360 = vmatpush1.msra.mxu0 %v3111_v1  ;;  %8454 = vrot.lane.b32.xlu1 %v16751_v2, %s11621_s21  ;;  %v8487_v1 = vsel %vm8484_vm3, %v20336_v23, %v8411_v35  ;;  %v20340_v35 = vld [vmem:[#allocation112_spill] sm:$0xff] }
 0x893   : > { %10361 = vmatprep.subr.mxu0 %v2870_v19  ;;  %v17103_v37 = vpop.permute.xlu0 %8203  ;;  %10249 = vmatprep.subr.mxu1 %v8488_v63  ;;  %v20337_v19 = vld [vmem:[#allocation144_spill] sm:$0xff]  ;;  %v2851_v63 = vsel %vm2837_vm6, %v20340_v35, %v20339_v5  ;;  %v20346_v35 = vld [vmem:[#allocation174_spill] sm:$0xff] }
 0x894   : > { %10362 = vmatpush1.msra.mxu0 %v2869_v8  ;;  %8456 = vrot.lane.b32.xlu0 %v17074_v18, %s11621_s21  ;;  %20335 = vst [vmem:[#allocation47_spill] sm:$0xff] %v17103_v37  ;;  %v2860_v0 = vsel %vm2837_vm6, %v20337_v19, %v20334_v16  ;;  %v2852_v8 = vsel %vm2837_vm6, %v20339_v5, %v20338_v11  ;;  %v20342_v16 = vld [vmem:[#allocation99_spill] sm:$0xff]  ;;  %v20344_v19 = vld [vmem:[#allocation82_spill] sm:$0xff] }
 0x895   : > { %10363 = vmatprep.subr.mxu0 %v2861_v54  ;;  %10250 = vmatpush2.msra.mxu1 %v8487_v1  ;;  %v8182_v41 = vpop.permute.xlu1 %8181  ;;  %v8246_v46 = vsel %vm8215_vm0, %v8202_v32, %v17103_v37  ;;  %v17120_v54 = vld [vmem:[#allocation2 + $0x90] sm:$0xff] }
 0x896   : > { %10364 = vmatpush1.msra.mxu0 %v2860_v0  ;;  %8703 = vrot.lane.b32.xlu1 %v16775_v58, %s11620_s20  ;;  %v20341_v0 = vld [vmem:[#allocation100_spill] sm:$0xff]  ;;  %v20345_v11 = vld [vmem:[#allocation98_spill] sm:$0xff] }
 0x897   : > { %10365 = vmatprep.subr.mxu0 %v2852_v8  ;;  %v2843_v23 = vsel %vm2837_vm6, %v20342_v16, %v20341_v0  ;;  %v17127_v1 = vpop.permute.xlu0 %8183  ;;  %10251 = vmatprep.subr.mxu1 %v8246_v46  ;;  %v8245_v8 = vsel %vm8215_vm0, %v20344_v19, %v8202_v32  ;;  %v2842_v5 = vsel %vm2837_vm6, %v20345_v11, %v20342_v16  ;;  %v20349_v32 = vld [vmem:[#allocation172_spill] sm:$0xff]  ;;  %v20351_v11 = vld [vmem:[#allocation142_spill] sm:$0xff]  ;;  %v20352_v16 = vld [vmem:[#allocation141_spill] sm:$0xff] }
 0x898   : > { %10366 = vmatpush1.msra.mxu0 %v2851_v63  ;;  %8705 = vrot.lane.b32.xlu0 %v17120_v54, %s11620_s20  ;;  %20343 = vst [vmem:[#allocation46_spill] sm:$0xff] %v17127_v1  ;;  %v20347_v63 = vld [vmem:[#allocation173_spill] sm:$0xff]  ;;  %v8237_v0 = vsel %vm8215_vm0, %v8182_v41, %v17127_v1 }
 0x899   : > { %10367 = vmatprep.subr.mxu0 %v2843_v23  ;;  %10252 = vmatpush2.msra.mxu1 %v8245_v8  ;;  %v2601_v37 = vsel %vm20348_vm13, %v20347_v63, %v20346_v35  ;;  %v8162_v43 = vpop.permute.xlu1 %8161  ;;  %v2600_v46 = vsel %vm20350_vm15, %v20349_v32, %v20347_v63  ;;  %v2592_v23 = vsel %vm20353_vm14, %v20352_v16, %v20351_v11  ;;  %v20354_v8 = vld [vmem:[#allocation67_spill] sm:$0xff]  ;;  %v20357_v63 = vld [vmem:[#allocation110_spill] sm:$0xff]  ;;  %v20358_v32 = vld [vmem:[#allocation109_spill] sm:$0xff] }
 0x89a   : > { %10368 = vmatpush1.msra.mxu0 %v2842_v5  ;;  %8434 = vrot.lane.b32.xlu1 %v16775_v58, %s11621_s21  ;;  %v8236_v5 = vsel %vm8215_vm0, %v20354_v8, %v8182_v41  ;;  %vm20359_vm13 = vmmov %vm20356_vm2  ;;  %v20360_v41 = vld [vmem:[#allocation108_spill] sm:$0xff] }
 0x89b   : > { %10369 = vmatprep.subr.mxu0 %v2601_v37  ;;  %v17149_v19 = vpop.permute.xlu0 %8163  ;;  %10253 = vmatprep.subr.mxu1 %v8237_v0  ;;  %v20355_v37 = vld [vmem:[#allocation140_spill] sm:$0xff]  ;;  %vm20361_vm15 = vmmov %vm20356_vm2 }
 0x89c   : > { %10370 = vmatpush1.msra.mxu0 %v2600_v46  ;;  %8436 = vrot.lane.b32.xlu0 %v17120_v54, %s11621_s21  ;;  %v2591_v35 = vsel %vm20356_vm2, %v20355_v37, %v20352_v16  ;;  %v2583_v46 = vsel %vm20359_vm13, %v20358_v32, %v20357_v63  ;;  %v8228_v11 = vsel %vm8215_vm0, %v8162_v43, %v17149_v19  ;;  %v20363_v16 = vld [vmem:[#allocation95_spill] sm:$0xff]  ;;  %vm20364_vm14 = vmmov %vm20356_vm2  ;;  %v20365_v37 = vld [vmem:[#allocation66_spill] sm:$0xff]  ;;  %vm20384_vm13 = vcmask 744448  }
 0x89d   : > { %10371 = vmatprep.subr.mxu0 %v2592_v23  ;;  %10254 = vmatpush2.msra.mxu1 %v8236_v5  ;;  %v8142_v1 = vpop.permute.xlu1 %8141  ;;  %v2582_v0 = vsel %vm20361_vm15, %v20360_v41, %v20358_v32  ;;  %v17166_v23 = vld [vmem:[#allocation2 + $0x38] sm:$0xff]  ;;  %v2573_v32 = vsel %vm20356_vm2, %v20117_v50, %v20363_v16  ;;  %vm20386_vm15 = vmmov %vm20384_vm13 }
 0x89e   : > { %10372 = vmatpush1.msra.mxu0 %v2591_v35  ;;  %8683 = vrot.lane.b32.xlu1 %v16799_v38, %s11620_s20  ;;  %v20362_v35 = vld [vmem:[#allocation96_spill] sm:$0xff]  ;;  %v8218_v50 = vsel %vm8215_vm0, %v16418_v3, %v8142_v1  ;;  %vm20392_vm2 = vmmov %vm20384_vm13 }
 0x89f   : > { %10373 = vmatprep.subr.mxu0 %v2583_v46  ;;  %v2574_v8 = vsel %vm20364_vm14, %v20363_v16, %v20362_v35  ;;  %v17173_v5 = vpop.permute.xlu0 %8143  ;;  %10255 = vmatprep.subr.mxu1 %v8228_v11  ;;  %v8227_v46 = vsel %vm8215_vm0, %v20365_v37, %v8162_v43  ;;  %v2367_v11 = vld [vmem:[#allocation2 + $0x128] sm:$0xff]  ;;  %v2359_v43 = vld [vmem:[#allocation2 + $0xd8] sm:$0xff]  ;;  %v2358_v16 = vld [vmem:[#allocation2 + $0xd0] sm:$0xff] }
 0x8a0   : > { %10374 = vmatpush1.msra.mxu0 %v2582_v0  ;;  %8685 = vrot.lane.b32.xlu0 %v17166_v23, %s11620_s20  ;;  %v8219_v0 = vsel %vm8215_vm0, %v8142_v1, %v17173_v5  ;;  %v2350_v37 = vld [vmem:[#allocation2 + $0x80] sm:$0xff]  ;;  %vm20389_vm14 = vmmov %vm20384_vm13 }
 0x8a1   : > { %10375 = vmatprep.subr.mxu0 %v2574_v8  ;;  %10256 = vmatpush2.msra.mxu1 %v8227_v46  ;;  %v7933_v41 = vpop.permute.xlu1 %7932  ;;  %v2340_v1 = vld [vmem:[#allocation2 + $0x20] sm:$0xff] }
 0x8a2   : > { %10376 = vmatpush1.msra.mxu0 %v2573_v32  ;;  %8414 = vrot.lane.b32.xlu1 %v16799_v38, %s11621_s21  ;;  %v2349_v32 = vld [vmem:[#allocation2 + $0x78] sm:$0xff]  ;;  %v7976_v3 = vsel %vm7946_vm7, %v16435_v9, %v7933_v41  ;;  %v20369_v9 = vld [vmem:[#allocation166_spill] sm:$0xff] }
 0x8a3   : > { %10377 = vmatprep.subr.mxu0 %v16999_v51  ;;  %v17187_v8 = vpop.permute.xlu0 %7934  ;;  %10257 = vmatprep.subr.mxu1 %v8219_v0  ;;  %v2341_v0 = vld [vmem:[#allocation2 + $0x28] sm:$0xff] }
 0x8a4   : > { %10378 = vmatpush1.msra.mxu0 %v2367_v11  ;;  %8416 = vrot.lane.b32.xlu0 %v17166_v23, %s11621_s21  ;;  %v7977_v51 = vsel %vm7946_vm7, %v7933_v41, %v17187_v8  ;;  %v20370_v41 = vld [vmem:[#allocation165_spill] sm:$0xff] }
 0x8a5   : > { %10379 = vmatprep.subr.mxu0 %v2359_v43  ;;  %10258 = vmatpush2.msra.mxu1 %v8218_v50  ;;  %v7913_v46 = vpop.permute.xlu1 %7912  ;;  %v20367_v43 = vld [vmem:[#allocation198_spill] sm:$0xff]  ;;  %v20368_v50 = vld [vmem:[#allocation197_spill] sm:$0xff] }
 0x8a6   : > { %10380 = vmatpush1.msra.mxu0 %v2358_v16  ;;  %8205 = vrot.lane.b32.xlu1 %v16727_v55, %s11622_s22  ;;  %v4215_v16 = vsel %vm4182_vm8, %v20368_v50, %v20367_v43 }
 0x8a7   : > { %10381 = vmatprep.subr.mxu0 %v2350_v37  ;;  %v17197_v11 = vpop.permute.xlu0 %7914  ;;  %10259 = vmatprep.subr.mxu1 %v7977_v51  ;;  %v4214_v51 = vsel %vm4182_vm8, %v20120_v34, %v20368_v50  ;;  %v20374_v34 = vld [vmem:[#allocation134_spill] sm:$0xff]  ;;  %v20375_v50 = vld [vmem:[#allocation133_spill] sm:$0xff] }
 0x8a8   : > { %10382 = vmatpush1.msra.mxu0 %v2349_v32  ;;  %8207 = vrot.lane.b32.xlu0 %v17029_v52, %s11622_s22  ;;  %20366 = vst [vmem:[#allocation94_spill] sm:$0xff] %v17197_v11  ;;  %v7968_v32 = vsel %vm7946_vm7, %v7913_v46, %v17197_v11 }
 0x8a9   : > { %10383 = vmatprep.subr.mxu0 %v2341_v0  ;;  %10260 = vmatpush2.msra.mxu1 %v7976_v3  ;;  %v7893_v37 = vpop.permute.xlu1 %7892  ;;  %v4206_v0 = vsel %vm4182_vm8, %v20370_v41, %v20369_v9 }
 0x8aa   : > { %10384 = vmatpush1.msra.mxu0 %v2340_v1  ;;  %8185 = vrot.lane.b32.xlu1 %v16751_v2, %s11622_s22  ;;  %v20372_v1 = vld [vmem:[#allocation51_spill] sm:$0xff] }
 0x8ab   : > { %10385 = vmatprep.subr.mxu0 %v4215_v16  ;;  %v17216_v3 = vpop.permute.xlu0 %7894  ;;  %10261 = vmatprep.subr.mxu1 %v7968_v32  ;;  %v7967_v43 = vsel %vm7946_vm7, %v20372_v1, %v7913_v46  ;;  %v20373_v16 = vld [vmem:[#allocation164_spill] sm:$0xff]  ;;  %v20380_v1 = vld [vmem:[#allocation50_spill] sm:$0xff] }
 0x8ac   : > { %10386 = vmatpush2.msra.mxu0 %v4214_v51  ;;  %8187 = vrot.lane.b32.xlu0 %v17074_v18, %s11622_s22  ;;  %20371 = vst [vmem:[#allocation31_spill] sm:$0xff] %v17216_v3  ;;  %v4205_v11 = vsel %vm4182_vm8, %v20373_v16, %v20370_v41  ;;  %v4197_v51 = vsel %vm4182_vm8, %v20375_v50, %v20374_v34  ;;  %v20376_v46 = vld [vmem:[#allocation132_spill] sm:$0xff] }
 0x8ad   : > { %10387 = vmatprep.subr.mxu0 %v4206_v0  ;;  %10262 = vmatpush2.msra.mxu1 %v7967_v43  ;;  %v7873_v35 = vpop.permute.xlu1 %7872  ;;  %v7959_v9 = vsel %vm7946_vm7, %v7893_v37, %v17216_v3  ;;  %v4196_v32 = vsel %vm4182_vm8, %v20376_v46, %v20375_v50  ;;  %v20378_v43 = vld [vmem:[#allocation18_spill] sm:$0xff]  ;;  %v7958_v16 = vsel %vm7946_vm7, %v20380_v1, %v7893_v37  ;;  %v20383_v46 = vld [vmem:[#allocation193_spill] sm:$0xff]  ;;  %v20385_v37 = vld [vmem:[#allocation192_spill] sm:$0xff] }
 0x8ae   : > { %10388 = vmatpush2.msra.mxu0 %v4205_v11  ;;  %8165 = vrot.lane.b32.xlu1 %v16775_v58, %s11622_s22  ;;  %v20377_v11 = vld [vmem:[#allocation13_spill] sm:$0xff]  ;;  %v20382_v50 = vld [vmem:[#allocation194_spill] sm:$0xff] }
 0x8af   : > { %10389 = vmatprep.subr.mxu0 %v4197_v51  ;;  %v4188_v41 = vsel %vm4182_vm8, %v20378_v43, %v20377_v11  ;;  %v17238_v0 = vpop.permute.xlu0 %7874  ;;  %10263 = vmatprep.subr.mxu1 %v7959_v9  ;;  %v20381_v51 = vld [vmem:[#allocation19_spill] sm:$0xff]  ;;  %v3945_v9 = vsel %vm20386_vm15, %v20385_v37, %v20383_v46  ;;  %v20394_v37 = vld [vmem:[#allocation129_spill] sm:$0xff]  ;;  %vm20397_vm15 = vmmov %vm20392_vm2 }
 0x8b0   : > { %10390 = vmatpush2.msra.mxu0 %v4196_v32  ;;  %8167 = vrot.lane.b32.xlu0 %v17120_v54, %s11622_s22  ;;  %20379 = vst [vmem:[#allocation30_spill] sm:$0xff] %v17238_v0  ;;  %v4187_v34 = vsel %vm4182_vm8, %v20381_v51, %v20378_v43  ;;  %v3946_v32 = vsel %vm20384_vm13, %v20383_v46, %v20382_v50  ;;  %v20388_v43 = vld [vmem:[#allocation161_spill] sm:$0xff]  ;;  %v20393_v46 = vld [vmem:[#allocation130_spill] sm:$0xff]  ;;  %vm20395_vm13 = vmmov %vm20392_vm2 }
 0x8b1   : > { %10391 = vmatprep.subr.mxu0 %v4188_v41  ;;  %10264 = vmatpush2.msra.mxu1 %v7958_v16  ;;  %v7664_v3 = vpop.permute.xlu1 %7663  ;;  %v7950_v11 = vsel %vm7946_vm7, %v7873_v35, %v17238_v0  ;;  %v20390_v16 = vld [vmem:[#allocation35_spill] sm:$0xff] }
 0x8b2   : > { %10392 = vmatpush2.msra.mxu0 %v4187_v34  ;;  %8145 = vrot.lane.b32.xlu1 %v16799_v38, %s11622_s22  ;;  %v20387_v34 = vld [vmem:[#allocation162_spill] sm:$0xff]  ;;  %v7949_v51 = vsel %vm7946_vm7, %v20390_v16, %v7873_v35  ;;  %v20396_v35 = vld [vmem:[#allocation128_spill] sm:$0xff] }
 0x8b3   : > { %10393 = vmatprep.subr.mxu0 %v3946_v32  ;;  %v3937_v41 = vsel %vm20389_vm14, %v20388_v43, %v20387_v34  ;;  %v17260_v1 = vpop.permute.xlu0 %7665  ;;  %10265 = vmatprep.subr.mxu1 %v7950_v11  ;;  %v20391_v32 = vld [vmem:[#allocation160_spill] sm:$0xff]  ;;  %v3927_v11 = vsel %vm20397_vm15, %v20396_v35, %v20394_v37  ;;  %vm20400_vm14 = vmmov %vm20392_vm2  ;;  %v20404_v35 = vld [vmem:[#allocation189_spill] sm:$0xff] }
 0x8b4   : > { %10394 = vmatpush2.msra.mxu0 %v3945_v9  ;;  %8147 = vrot.lane.b32.xlu0 %v17166_v23, %s11622_s22  ;;  %v3936_v50 = vsel %vm20392_vm2, %v20391_v32, %v20388_v43  ;;  %v3928_v9 = vsel %vm20395_vm13, %v20394_v37, %v20393_v46  ;;  %v7708_v34 = vsel %vm7677_vm9, %v7664_v3, %v17260_v1  ;;  %v20399_v43 = vld [vmem:[#allocation6_spill] sm:$0xff]  ;;  %vm20445_vm13 = vcmask 457728  }
 0x8b5   : > { %10395 = vmatprep.subr.mxu0 %v3937_v41  ;;  %10266 = vmatpush2.msra.mxu1 %v7949_v51  ;;  %v7644_v0 = vpop.permute.xlu1 %7643  ;;  %v20401_v51 = vld [vmem:[#allocation34_spill] sm:$0xff]  ;;  %vm20446_vm15 = vmmov %vm20445_vm13 }
 0x8b6   : > { %10396 = vmatpush2.msra.mxu0 %v3936_v50  ;;  %7936 = vrot.lane.b32.xlu1 %v16727_v55, %s11623_s23  ;;  %v20398_v50 = vld [vmem:[#allocation25_spill] sm:$0xff]  ;;  %v7707_v32 = vsel %vm7677_vm9, %v20401_v51, %v7664_v3  ;;  %v20403_v37 = vld [vmem:[#allocation190_spill] sm:$0xff] }
 0x8b7   : > { %10397 = vmatprep.subr.mxu0 %v3928_v9  ;;  %v3919_v41 = vsel %vm20400_vm14, %v20399_v43, %v20398_v50  ;;  %v17282_v16 = vpop.permute.xlu0 %7645  ;;  %10267 = vmatprep.subr.mxu1 %v7708_v34  ;;  %v20402_v9 = vld [vmem:[#allocation7_spill] sm:$0xff]  ;;  %v20405_v34 = vld [vmem:[#allocation188_spill] sm:$0xff]  ;;  %vm20449_vm14 = vmmov %vm20445_vm13 }
 0x8b8   : > { %10398 = vmatpush2.msra.mxu0 %v3927_v11  ;;  %7938 = vrot.lane.b32.xlu0 %v17029_v52, %s11623_s23  ;;  %v3918_v46 = vsel %vm20392_vm2, %v20402_v9, %v20399_v43  ;;  %v3677_v11 = vsel %vm3644_vm10, %v20404_v35, %v20403_v37  ;;  %v7699_v50 = vsel %vm7677_vm9, %v7644_v0, %v17282_v16  ;;  %v20407_v43 = vld [vmem:[#allocation157_spill] sm:$0xff]  ;;  %v20408_v9 = vld [vmem:[#allocation156_spill] sm:$0xff]  ;;  %vm20452_vm2 = vmmov %vm20445_vm13 }
 0x8b9   : > { %10399 = vmatprep.subr.mxu0 %v3919_v41  ;;  %10268 = vmatpush2.msra.mxu1 %v7707_v32  ;;  %v3676_v3 = vsel %vm3644_vm10, %v20405_v34, %v20404_v35  ;;  %v3667_v35 = vsel %vm3644_vm10, %v20408_v9, %v20407_v43  ;;  %v20410_v34 = vld [vmem:[#allocation125_spill] sm:$0xff] }
 0x8ba   : > { %10400 = vmatpush2.msra.mxu0 %v3918_v46  ;;  %7916 = vrot.lane.b32.xlu1 %v16751_v2, %s11623_s23  ;;  %v7624_v41 = vpop.permute.xlu1 %7623  ;;  %v20406_v46 = vld [vmem:[#allocation158_spill] sm:$0xff]  ;;  %v7698_v2 = vsel %vm7677_vm9, %v16578_v15, %v7644_v0 }
 0x8bb   : > { %10401 = vmatprep.subr.mxu0 %v3677_v11  ;;  %v3668_v51 = vsel %vm3644_vm10, %v20407_v43, %v20406_v46  ;;  %v17304_v32 = vpop.permute.xlu0 %7625  ;;  %10269 = vmatprep.subr.mxu1 %v7699_v50  ;;  %v20409_v11 = vld [vmem:[#allocation126_spill] sm:$0xff]  ;;  %v20411_v50 = vld [vmem:[#allocation124_spill] sm:$0xff]  ;;  %v20412_v43 = vld [vmem:[#allocation15_spill] sm:$0xff] }
 0x8bc   : > { %10402 = vmatpush2.msra.mxu0 %v3676_v3  ;;  %7918 = vrot.lane.b32.xlu0 %v17074_v18, %s11623_s23  ;;  %v3659_v3 = vsel %vm3644_vm10, %v20410_v34, %v20409_v11  ;;  %v7690_v46 = vsel %vm7677_vm9, %v7624_v41, %v17304_v32  ;;  %v3658_v15 = vsel %vm3644_vm10, %v20411_v50, %v20410_v34  ;;  %v20416_v50 = vld [vmem:[#allocation185_spill] sm:$0xff] }
 0x8bd   : > { %10403 = vmatprep.subr.mxu0 %v3668_v51  ;;  %10270 = vmatpush2.msra.mxu1 %v7698_v2  ;;  %v20413_v51 = vld [vmem:[#allocation20_spill] sm:$0xff] }
 0x8be   : > { %10404 = vmatpush2.msra.mxu0 %v3667_v35  ;;  %7896 = vrot.lane.b32.xlu1 %v16775_v58, %s11623_s23  ;;  %v7604_v0 = vpop.permute.xlu1 %7603  ;;  %v3650_v2 = vsel %vm3644_vm10, %v20413_v51, %v20412_v43  ;;  %v7689_v58 = vsel %vm7677_vm9, %v16603_v39, %v7624_v41  ;;  %v20414_v35 = vld [vmem:[#allocation21_spill] sm:$0xff] }
 0x8bf   : > { %10405 = vmatprep.subr.mxu0 %v3659_v3  ;;  %v17326_v9 = vpop.permute.xlu0 %7605  ;;  %10271 = vmatprep.subr.mxu1 %v7690_v46  ;;  %v3649_v34 = vsel %vm3644_vm10, %v20414_v35, %v20413_v51  ;;  %v20415_v3 = vld [vmem:[#allocation186_spill] sm:$0xff]  ;;  %v20417_v46 = vld [vmem:[#allocation184_spill] sm:$0xff] }
 0x8c0   : > { %10406 = vmatpush2.msra.mxu0 %v3658_v15  ;;  %7898 = vrot.lane.b32.xlu0 %v17120_v54, %s11623_s23  ;;  %v3408_v15 = vsel %vm3375_vm11, %v20416_v50, %v20415_v3  ;;  %v7681_v43 = vsel %vm7677_vm9, %v7604_v0, %v17326_v9  ;;  %v3407_v39 = vsel %vm3375_vm11, %v20417_v46, %v20416_v50  ;;  %v20418_v51 = vld [vmem:[#allocation154_spill] sm:$0xff]  ;;  %v20421_v50 = vld [vmem:[#allocation360_spill] sm:$0xff] }
 0x8c1   : > { %10407 = vmatprep.subr.mxu0 %v3650_v2  ;;  %10272 = vmatpush2.msra.mxu1 %v7689_v58  ;;  %v20419_v2 = vld [vmem:[#allocation153_spill] sm:$0xff] }
 0x8c2   : > { %10408 = vmatpush2.msra.mxu0 %v3649_v34  ;;  %7876 = vrot.lane.b32.xlu1 %v16799_v38, %s11623_s23  ;;  %v7400_v41 = vpop.permute.xlu1 %7399  ;;  %v3399_v58 = vsel %vm3375_vm11, %v20419_v2, %v20418_v51  ;;  %v7680_v38 = vsel %vm7677_vm9, %v16613_v44, %v7604_v0  ;;  %v3398_v34 = vsel %vm3375_vm11, %v20163_v6, %v20419_v2  ;;  %v11582_v6 = vld [vmem:[%s18990_s5 + $0x10] sm:$0x77]  ;;  %v20425_v44 = vld [vmem:[#allocation120_spill] sm:$0xff] }
 0x8c3   : > { %10409 = vmatprep.subr.mxu0 %v3408_v15  ;;  %v17348_v35 = vpop.permute.xlu0 %7401  ;;  %10273 = vmatprep.subr.mxu1 %v7681_v43  ;;  %v20422_v15 = vld [vmem:[#allocation359_spill] sm:$0xff]  ;;  %v20424_v43 = vld [vmem:[#allocation121_spill] sm:$0xff]  ;;  %v20426_v2 = vld [vmem:[#allocation358_spill] sm:$0xff] }
 0x8c4   : > { %10410 = vmatpush2.msra.mxu0 %v3407_v39  ;;  %7878 = vrot.lane.b32.xlu0 %v17166_v23, %s11623_s23  ;;  %20420 = vst [vmem:[#allocation196_spill] sm:$0xff] %v17348_v35  ;;  %v5291_v46 = vsel %vm5258_vm12, %v20422_v15, %v20421_v50  ;;  %v20423_v39 = vld [vmem:[#allocation122_spill] sm:$0xff]  ;;  %v3389_v0 = vsel %vm3375_vm11, %v20425_v44, %v20424_v43  ;;  %v20432_v44 = vld [vmem:[#allocation9_spill] sm:$0xff] }
 0x8c5   : > { %10411 = vmatprep.subr.mxu0 %v3399_v58  ;;  %10274 = vmatpush2.msra.mxu1 %v7680_v38  ;;  %v3390_v58 = vsel %vm3375_vm11, %v20424_v43, %v20423_v39  ;;  %v20431_v39 = vld [vmem:[#allocation351_spill] sm:$0xff] }
 0x8c6   : > { %10412 = vmatpush2.msra.mxu0 %v3398_v34  ;;  %7667 = vrot.lane.b32.xlu1 %v16727_v55, %s11624_s24  ;;  %v7380_v51 = vpop.permute.xlu1 %7379  ;;  %v5290_v55 = vsel %vm5258_vm12, %v20426_v2, %v20422_v15  ;;  %v20428_v34 = vld [vmem:[#allocation27_spill] sm:$0xff]  ;;  %v17388_v2 = vld [vmem:[#allocation2 + $0xe0] sm:$0xff] }
 0x8c7   : > { %10424 = vmatprep.subr.mxu1 %v5291_v46  ;;  %10413 = vmatprep.subr.mxu0 %v3390_v58  ;;  %v17372_v38 = vpop.permute.xlu0 %7381  ;;  %v20429_v46 = vld [vmem:[#allocation8_spill] sm:$0xff] }
 0x8c8   : > { %10276 = vmatmul.mubr.f32.vlgmr.msra.gmra.mxu1 %v11582_v6  ;;  %20427 = vst [vmem:[#allocation91_spill] sm:$0xff] %v17372_v38  ;;  %10414 = vmatpush2.msra.mxu0 %v3389_v0  ;;  %v3381_v58 = vsel %vm3375_vm11, %v20429_v46, %v20428_v34  ;;  %v20430_v6 = vld [vmem:[#allocation352_spill] sm:$0xff]  ;;  %v3380_v15 = vsel %vm3375_vm11, %v20432_v44, %v20429_v46  ;;  %v20434_v34 = vld [vmem:[#allocation343_spill] sm:$0xff]  ;;  %v20436_v46 = vld [vmem:[#allocation454_spill] sm:$0xff] }
 0x8c9   : > { %10425 = vmatpush1.msra.mxu1 %v5290_v55  ;;  %7669 = vrot.lane.b32.xlu0 %v17029_v52, %s11624_s24  ;;  %v5282_v43 = vsel %vm5258_vm12, %v20431_v39, %v20430_v6  ;;  %v5281_v0 = vsel %vm5258_vm12, %v20176_v21, %v20431_v39  ;;  %v11583_v21 = vld [vmem:[%s18990_s5] sm:$0x77]  ;;  %v20437_v39 = vld [vmem:[#allocation342_spill] sm:$0xff] }
 0x8ca   : > { %10415 = vmatprep.subr.mxu0 %v3381_v58  ;;  %10426 = vmatprep.subr.mxu1 %v5282_v43  ;;  %v7360_v55 = vpop.permute.xlu1 %7359  ;;  %v20433_v58 = vld [vmem:[#allocation344_spill] sm:$0xff]  ;;  %v7441_v43 = vsel %vm19512_vm4, %v7400_v41, %v17348_v35  ;;  %v5272_v44 = vsel %vm5258_vm12, %v20437_v39, %v20434_v34  ;;  %v20440_v35 = vld [vmem:[#allocation335_spill] sm:$0xff] }
 0x8cb   : > { %10416 = vmatpush2.msra.mxu0 %v3380_v15  ;;  %10427 = vmatpush1.msra.mxu1 %v5281_v0  ;;  %v5273_v3 = vsel %vm5258_vm12, %v20434_v34, %v20433_v58  ;;  %v17395_v6 = vpop.permute.xlu0 %7361  ;;  %v20438_v15 = vld [vmem:[#allocation81_spill] sm:$0xff]  ;;  %v20439_v58 = vld [vmem:[#allocation336_spill] sm:$0xff]  ;;  %v5263_v34 = vsel %vm5258_vm12, %v20183_v40, %v20440_v35 }
 0x8cc   : > { %7647 = vrot.lane.b32.xlu1 %v17388_v2, %s11624_s24  ;;  %20435 = vst [vmem:[#allocation90_spill] sm:$0xff] %v17395_v6  ;;  %10428 = vmatprep.subr.mxu1 %v5273_v3  ;;  %v7440_v0 = vsel %vm19512_vm4, %v20438_v15, %v7400_v41  ;;  %v7432_v3 = vsel %vm19512_vm4, %v7380_v51, %v17372_v38  ;;  %v20442_v39 = vld [vmem:[#allocation80_spill] sm:$0xff]  ;;  %v17424_v15 = vld [vmem:[#allocation2 + $0x88] sm:$0xff]  ;;  %v20454_v38 = vld [vmem:[#allocation311_spill] sm:$0xff] }
 0x8cd   : > { %10417 = vmatprep.mubr.f32.mxu0 %v20436_v46  ;;  %10495 = vmatprep.subr.mxu0 %v7441_v43  ;;  %v5264_v43 = vsel %vm5258_vm12, %v20440_v35, %v20439_v58  ;;  %v7423_v41 = vsel %vm19512_vm4, %v7360_v55, %v17395_v6 }
 0x8ce   : > { %10418 = vmatmul.mubr.f32.vlgmr.msra.gmra.mxu0 %v11583_v21  ;;  %10429 = vmatpush1.msra.mxu1 %v5272_v44  ;;  %v7340_v50 = vpop.permute.xlu1 %7339  ;;  %v7431_v44 = vsel %vm19512_vm4, %v20442_v39, %v7380_v51  ;;  %v20447_v51 = vld [vmem:[#allocation320_spill] sm:$0xff] }
 0x8cf   : > { %10496 = vmatpush1.msra.mxu0 %v7440_v0  ;;  %7649 = vrot.lane.b32.xlu0 %v17074_v18, %s11624_s24  ;;  %v17420_v21 = vpop.permute.xlu0 %7341  ;;  %v20443_v0 = vld [vmem:[#allocation328_spill] sm:$0xff] }
 0x8d0   : > { %10430 = vmatprep.subr.mxu1 %v5264_v43  ;;  %20441 = vst [vmem:[#allocation75_spill] sm:$0xff] %v17420_v21  ;;  %10497 = vmatprep.subr.mxu0 %v7432_v3  ;;  %v20444_v43 = vld [vmem:[#allocation327_spill] sm:$0xff] }
 0x8d1   : > { %10431 = vmatpush1.msra.mxu1 %v5263_v34  ;;  %10498 = vmatpush1.msra.mxu0 %v7431_v44  ;;  %v5022_v40 = vsel %vm20445_vm13, %v20444_v43, %v20443_v0  ;;  %v5021_v35 = vsel %vm20446_vm15, %v20186_v25, %v20444_v43  ;;  %v20448_v34 = vld [vmem:[#allocation319_spill] sm:$0xff]  ;;  %v7422_v44 = vsel %vm19512_vm4, %v16673_v53, %v7360_v55  ;;  %v20451_v25 = vld [vmem:[#allocation318_spill] sm:$0xff]  ;;  %vm20455_vm13 = vmmov %vm20452_vm2 }
 0x8d2   : > { %7627 = vrot.lane.b32.xlu1 %v17424_v15, %s11624_s24  ;;  %10432 = vmatprep.subr.mxu1 %v5022_v40  ;;  %v7131_v3 = vpop.permute.xlu1 %7130  ;;  %v5013_v39 = vsel %vm20449_vm14, %v20448_v34, %v20447_v51  ;;  %v7414_v40 = vsel %vm19512_vm4, %v7340_v50, %v17420_v21  ;;  %v17448_v43 = vld [vmem:[#allocation2 + $0x30] sm:$0xff]  ;;  %vm20456_vm15 = vmmov %vm20452_vm2 }
 0x8d3   : > { %10499 = vmatprep.subr.mxu0 %v7423_v41  ;;  %10433 = vmatpush1.msra.mxu1 %v5021_v35  ;;  %v17443_v6 = vpop.permute.xlu0 %7132  ;;  %v5012_v41 = vsel %vm20452_vm2, %v20451_v25, %v20448_v34  ;;  %v20453_v35 = vld [vmem:[#allocation312_spill] sm:$0xff]  ;;  %v5003_v55 = vsel %vm20456_vm15, %v20192_v61, %v20454_v38  ;;  %vm20459_vm14 = vmmov %vm20452_vm2  ;;  %vm20460_vm2 = vcmask 138240   ;;  %v20462_v61 = vld [vmem:[#allocation302_spill] sm:$0xff]  ;;  %vm20465_vm15 = vcmask 719872  }
 0x8d4   : > { %7629 = vrot.lane.b32.xlu0 %v17120_v54, %s11624_s24  ;;  %20450 = vst [vmem:[#allocation74_spill] sm:$0xff] %v17443_v6  ;;  %10434 = vmatprep.subr.mxu1 %v5013_v39  ;;  %v5004_v53 = vsel %vm20455_vm13, %v20454_v38, %v20453_v35  ;;  %v20457_v34 = vld [vmem:[#allocation304_spill] sm:$0xff] }
 0x8d5   : > { %10500 = vmatpush1.msra.mxu0 %v7422_v44  ;;  %10435 = vmatpush1.msra.mxu1 %v5012_v41  ;;  %v20458_v44 = vld [vmem:[#allocation303_spill] sm:$0xff]  ;;  %v7413_v41 = vsel %vm19512_vm4, %v16695_v42, %v7340_v50  ;;  %v20466_v42 = vld [vmem:[#allocation294_spill] sm:$0xff] }
 0x8d6   : > { %7607 = vrot.lane.b32.xlu1 %v17448_v43, %s11624_s24  ;;  %10436 = vmatprep.subr.mxu1 %v5004_v53  ;;  %v7111_v39 = vpop.permute.xlu1 %7110  ;;  %v4995_v25 = vsel %vm20459_vm14, %v20458_v44, %v20457_v34  ;;  %v7173_v53 = vsel %vm20460_vm2, %v7131_v3, %v17443_v6  ;;  %v4994_v38 = vsel %vm20455_vm13, %v20462_v61, %v20458_v44  ;;  %vm20467_vm14 = vmmov %vm20465_vm15  ;;  %v17480_v6 = vld [vmem:[#allocation2 + $0x148] sm:$0xff]  ;;  %v20468_v44 = vld [vmem:[#allocation288_spill] sm:$0xff]  ;;  %vm20472_vm13 = vcmask 138240  }
 0x8d7   : > { %10501 = vmatprep.subr.mxu0 %v7414_v40  ;;  %10437 = vmatpush1.msra.mxu1 %v5003_v55  ;;  %v17467_v21 = vpop.permute.xlu0 %7112  ;;  %v20463_v40 = vld [vmem:[#allocation296_spill] sm:$0xff]  ;;  %v20464_v55 = vld [vmem:[#allocation295_spill] sm:$0xff]  ;;  %vm20470_vm2 = vmmov %vm20467_vm14 }
 0x8d8   : > { %7609 = vrot.lane.b32.xlu0 %v17166_v23, %s11624_s24  ;;  %20461 = vst [vmem:[#allocation59_spill] sm:$0xff] %v17467_v21  ;;  %10438 = vmatprep.subr.mxu1 %v4995_v25  ;;  %v4753_v34 = vsel %vm20465_vm15, %v20464_v55, %v20463_v40  ;;  %v4752_v50 = vsel %vm20467_vm14, %v20466_v42, %v20464_v55  ;;  %vm20473_vm15 = vmmov %vm20472_vm13  ;;  %v20477_v42 = vld [vmem:[#allocation280_spill] sm:$0xff] }
 0x8d9   : > { %10502 = vmatpush1.msra.mxu0 %v7413_v41  ;;  %10439 = vmatpush1.msra.mxu1 %v4994_v38  ;;  %v20469_v41 = vld [vmem:[#allocation287_spill] sm:$0xff]  ;;  %v20471_v38 = vld [vmem:[#allocation65_spill] sm:$0xff]  ;;  %vm20476_vm14 = vmmov %vm20470_vm2 }
 0x8da   : > { %7403 = vrot.lane.b32.xlu1 %v17029_v52, %s11617_s12  ;;  %10440 = vmatprep.subr.mxu1 %v4753_v34  ;;  %v7091_v25 = vpop.permute.xlu1 %7090  ;;  %v4744_v61 = vsel %vm20470_vm2, %v20469_v41, %v20468_v44  ;;  %v7172_v40 = vsel %vm20472_vm13, %v20471_v38, %v7131_v3  ;;  %v7164_v34 = vsel %vm20473_vm15, %v7111_v39, %v17467_v21  ;;  %v20479_v3 = vld [vmem:[#allocation278_spill] sm:$0xff]  ;;  %vm20480_vm13 = vmmov %vm20470_vm2 }
 0x8db   : > { %10503 = vmatprep.subr.mxu0 %v7173_v53  ;;  %10441 = vmatpush1.msra.mxu1 %v4752_v50  ;;  %v17491_v35 = vpop.permute.xlu0 %7092  ;;  %v20475_v53 = vld [vmem:[#allocation286_spill] sm:$0xff]  ;;  %v20478_v50 = vld [vmem:[#allocation279_spill] sm:$0xff]  ;;  %vm20483_vm15 = vmmov %vm20470_vm2 }
 0x8dc   : > { %7405 = vrot.lane.b32.xlu0 %v17480_v6, %s11617_s12  ;;  %20474 = vst [vmem:[#allocation58_spill] sm:$0xff] %v17491_v35  ;;  %10442 = vmatprep.subr.mxu1 %v4744_v61  ;;  %v4743_v55 = vsel %vm20476_vm14, %v20475_v53, %v20469_v41  ;;  %v4735_v44 = vsel %vm20470_vm2, %v20478_v50, %v20477_v42  ;;  %v17504_v21 = vld [vmem:[#allocation2 + $0xf0] sm:$0xff]  ;;  %v20482_v41 = vld [vmem:[#allocation271_spill] sm:$0xff]  ;;  %vm20485_vm14 = vcmask 138240  }
 0x8dd   : > { %10504 = vmatpush1.msra.mxu0 %v7172_v40  ;;  %10443 = vmatpush1.msra.mxu1 %v4743_v55  ;;  %v4734_v38 = vsel %vm20480_vm13, %v20479_v3, %v20478_v50  ;;  %v20481_v40 = vld [vmem:[#allocation272_spill] sm:$0xff]  ;;  %vm20486_vm2 = vmmov %vm20485_vm14  ;;  %v20488_v3 = vld [vmem:[#allocation202_spill] sm:$0xff] }
 0x8de   : > { %7383 = vrot.lane.b32.xlu1 %v17074_v18, %s11617_s12  ;;  %10444 = vmatprep.subr.mxu1 %v4735_v44  ;;  %v7071_v61 = vpop.permute.xlu1 %7070  ;;  %v4726_v53 = vsel %vm20483_vm15, %v20482_v41, %v20481_v40  ;;  %v20484_v55 = vld [vmem:[#allocation64_spill] sm:$0xff]  ;;  %v7155_v44 = vsel %vm20486_vm2, %v7091_v25, %v17491_v35  ;;  %vm20490_vm15 = vcmask 728064   ;;  %v17528_v35 = vld [vmem:[#allocation2 + $0x98] sm:$0xff] }
 0x8df   : > { %10505 = vmatprep.subr.mxu0 %v7164_v34  ;;  %10445 = vmatpush1.msra.mxu1 %v4734_v38  ;;  %v7163_v42 = vsel %vm20485_vm14, %v20484_v55, %v7111_v39  ;;  %v17515_v51 = vpop.permute.xlu0 %7072  ;;  %v20487_v34 = vld [vmem:[#allocation270_spill] sm:$0xff]  ;;  %v20489_v38 = vld [vmem:[#allocation201_spill] sm:$0xff]  ;;  %v20491_v39 = vld [vmem:[#allocation200_spill] sm:$0xff] }
 0x8e0   : > { %7385 = vrot.lane.b32.xlu0 %v17504_v21, %s11617_s12  ;;  %10446 = vmatprep.subr.mxu1 %v4726_v53  ;;  %v4725_v50 = vsel %vm20480_vm13, %v20487_v34, %v20482_v41  ;;  %v4484_v40 = vsel %vm20490_vm15, %v20489_v38, %v20488_v3  ;;  %vm20492_vm14 = vmmov %vm20490_vm15  ;;  %v20494_v41 = vld [vmem:[#allocation169_spill] sm:$0xff]  ;;  %vm20497_vm13 = vcmask 138240  }
 0x8e1   : > { %10506 = vmatpush1.msra.mxu0 %v7163_v42  ;;  %10447 = vmatpush1.msra.mxu1 %v4725_v50  ;;  %v4483_v55 = vsel %vm20492_vm14, %v20491_v39, %v20489_v38  ;;  %v20493_v42 = vld [vmem:[#allocation170_spill] sm:$0xff]  ;;  %vm20495_vm2 = vmmov %vm20492_vm14  ;;  %v20496_v50 = vld [vmem:[#allocation49_spill] sm:$0xff] }
 0x8e2   : > { %7363 = vrot.lane.b32.xlu1 %v17120_v54, %s11617_s12  ;;  %10448 = vmatprep.subr.mxu1 %v4484_v40  ;;  %v6862_v53 = vpop.permute.xlu1 %6861  ;;  %v4475_v34 = vsel %vm20495_vm2, %v20494_v41, %v20493_v42  ;;  %v7154_v3 = vsel %vm20497_vm13, %v20496_v50, %v7091_v25  ;;  %vm20498_vm15 = vmmov %vm20497_vm13  ;;  %v20501_v39 = vld [vmem:[#allocation138_spill] sm:$0xff]  ;;  %v17552_v50 = vld [vmem:[#allocation2 + $0x40] sm:$0xff] }
 0x8e3   : > { %10507 = vmatprep.subr.mxu0 %v7155_v44  ;;  %10449 = vmatpush1.msra.mxu1 %v4483_v55  ;;  %v7146_v40 = vsel %vm20498_vm15, %v7071_v61, %v17515_v51  ;;  %v17539_v0 = vpop.permute.xlu0 %6863  ;;  %v20499_v44 = vld [vmem:[#allocation168_spill] sm:$0xff]  ;;  %vm20500_vm14 = vmmov %vm20495_vm2  ;;  %v20502_v55 = vld [vmem:[#allocation137_spill] sm:$0xff] }
 0x8e4   : > { %7365 = vrot.lane.b32.xlu0 %v17528_v35, %s11617_s12  ;;  %10450 = vmatprep.subr.mxu1 %v4475_v34  ;;  %v4474_v38 = vsel %vm20500_vm14, %v20499_v44, %v20494_v41  ;;  %v4466_v42 = vsel %vm20495_vm2, %v20502_v55, %v20501_v39  ;;  %vm20503_vm13 = vmmov %vm20495_vm2  ;;  %v20505_v41 = vld [vmem:[#allocation4_spill] sm:$0xff]  ;;  %vm20507_vm14 = vcmask 138240  }
 0x8e5   : > { %10508 = vmatpush1.msra.mxu0 %v7154_v3  ;;  %10451 = vmatpush1.msra.mxu1 %v4474_v38  ;;  %v4465_v25 = vsel %vm20503_vm13, %v20219_v62, %v20502_v55  ;;  %v20504_v3 = vld [vmem:[#allocation106_spill] sm:$0xff]  ;;  %vm20506_vm15 = vmmov %vm20495_vm2  ;;  %v7145_v38 = vsel %vm20507_vm14, %v16789_v59, %v7071_v61  ;;  %vm20508_vm2 = vcmask 146432   ;;  %v4456_v62 = vsel %vm20503_vm13, %v20222_v45, %v20505_v41  ;;  %v20513_v45 = vld [vmem:[#allocation461_spill] sm:$0xff] }
 0x8e6   : > { %7343 = vrot.lane.b32.xlu1 %v17166_v23, %s11617_s12  ;;  %10452 = vmatprep.subr.mxu1 %v4466_v42  ;;  %v6842_v34 = vpop.permute.xlu1 %6841  ;;  %v4457_v44 = vsel %vm20506_vm15, %v20505_v41, %v20504_v3  ;;  %v6904_v42 = vsel %vm20508_vm2, %v6862_v53, %v17539_v0  ;;  %v20509_v55 = vld [vmem:[#allocation466_spill] sm:$0xff]  ;;  %vm20511_vm15 = vcmask 162816   ;;  %v20514_v61 = vld [vmem:[#allocation460_spill] sm:$0xff]  ;;  %vm20516_vm13 = vcmask 146432  }
 0x8e7   : > { %10509 = vmatprep.subr.mxu0 %v7146_v40  ;;  %10453 = vmatpush1.msra.mxu1 %v4465_v25  ;;  %v20510_v25 = vld [vmem:[#allocation465_spill] sm:$0xff]  ;;  %vm20512_vm14 = vmmov %vm20511_vm15 }
 0x8e8   : > { %7345 = vrot.lane.b32.xlu0 %v17552_v50, %s11617_s12  ;;  %10454 = vmatprep.subr.mxu1 %v4457_v44  ;;  %v6366_v3 = vsel %vm20511_vm15, %v20510_v25, %v20509_v55  ;;  %v6365_v59 = vsel %vm20512_vm14, %v15771_v26, %v20510_v25  ;;  %vm20515_vm2 = vmmov %vm20512_vm14  ;;  %v6903_v44 = vsel %vm20516_vm13, %v16813_v56, %v6862_v53  ;;  %v20523_v53 = vld [vmem:[#allocation449_spill] sm:$0xff] }
 0x8e9   : > { %10510 = vmatpush1.msra.mxu0 %v7145_v38  ;;  %v17566_v40 = vpop.permute.xlu0 %6843  ;;  %10455 = vmatpush1.msra.mxu1 %v4456_v62  ;;  %v6357_v41 = vsel %vm20515_vm2, %v20514_v61, %v20513_v45  ;;  %vm20517_vm15 = vmmov %vm20516_vm13  ;;  %v20520_v62 = vld [vmem:[#allocation455_spill] sm:$0xff] }
 0x8ea   : > { %7134 = vrot.lane.b32.xlu1 %v17029_v52, %s11618_s16  ;;  %10456 = vmatprep.subr.mxu1 %v6366_v3  ;;  %v6895_v3 = vsel %vm20517_vm15, %v6842_v34, %v17566_v40  ;;  %vm20518_vm14 = vmmov %vm20515_vm2 }
 0x8eb   : > { %10511 = vmatprep.subr.mxu0 %v6904_v42  ;;  %10457 = vmatpush2.msra.mxu1 %v6365_v59  ;;  %v6822_v38 = vpop.permute.xlu1 %6821  ;;  %v6356_v26 = vsel %vm20518_vm14, %v15728_v7, %v20514_v61  ;;  %v20519_v42 = vld [vmem:[#allocation456_spill] sm:$0xff]  ;;  %vm20521_vm13 = vmmov %vm20515_vm2  ;;  %v20522_v7 = vld [vmem:[#allocation450_spill] sm:$0xff]  ;;  %vm20525_vm14 = vcmask 146432  }
 0x8ec   : > { %7136 = vrot.lane.b32.xlu0 %v17480_v6, %s11618_s16  ;;  %10458 = vmatprep.subr.mxu1 %v6357_v41  ;;  %v6348_v25 = vsel %vm20515_vm2, %v20520_v62, %v20519_v42  ;;  %v6347_v56 = vsel %vm20521_vm13, %v15692_v27, %v20520_v62  ;;  %vm20524_vm15 = vmmov %vm20515_vm2  ;;  %v6894_v41 = vsel %vm20525_vm14, %v16835_v30, %v6842_v34  ;;  %v20528_v62 = vld [vmem:[#allocation443_spill] sm:$0xff]  ;;  %v20532_v34 = vld [vmem:[#allocation436_spill] sm:$0xff] }
 0x8ed   : > { %10512 = vmatpush1.msra.mxu0 %v6903_v44  ;;  %10459 = vmatpush2.msra.mxu1 %v6356_v26  ;;  %v17593_v59 = vpop.permute.xlu0 %6823  ;;  %v6339_v61 = vsel %vm20524_vm15, %v20523_v53, %v20522_v7  ;;  %vm20526_vm2 = vmmov %vm20525_vm14  ;;  %v6338_v27 = vsel %vm20521_vm13, %v15648_v17, %v20523_v53  ;;  %vm20529_vm15 = vcmask 424960   ;;  %v20531_v17 = vld [vmem:[#allocation437_spill] sm:$0xff]  ;;  %vm20534_vm13 = vcmask 146432  }
 0x8ee   : > { %7114 = vrot.lane.b32.xlu1 %v17074_v18, %s11618_s16  ;;  %10460 = vmatprep.subr.mxu1 %v6348_v25  ;;  %v6886_v26 = vsel %vm20526_vm2, %v6822_v38, %v17593_v59  ;;  %vm20530_vm14 = vmmov %vm20529_vm15 }
 0x8ef   : > { %10513 = vmatprep.subr.mxu0 %v6895_v3  ;;  %10461 = vmatpush2.msra.mxu1 %v6347_v56  ;;  %v6802_v44 = vpop.permute.xlu1 %6801  ;;  %v20527_v3 = vld [vmem:[#allocation444_spill] sm:$0xff]  ;;  %v6097_v30 = vsel %vm20530_vm14, %v20236_v33, %v20528_v62  ;;  %vm20533_vm2 = vmmov %vm20530_vm14 }
 0x8f0   : > { %7116 = vrot.lane.b32.xlu0 %v17504_v21, %s11618_s16  ;;  %10462 = vmatprep.subr.mxu1 %v6339_v61  ;;  %v6098_v25 = vsel %vm20529_vm15, %v20528_v62, %v20527_v3  ;;  %v6089_v53 = vsel %vm20533_vm2, %v20532_v34, %v20531_v17  ;;  %v6885_v61 = vsel %vm20534_vm13, %v16857_v28, %v6822_v38  ;;  %vm20535_vm15 = vmmov %vm20534_vm13  ;;  %v20538_v62 = vld [vmem:[#allocation429_spill] sm:$0xff]  ;;  %v20541_v38 = vld [vmem:[#allocation422_spill] sm:$0xff] }
 0x8f1   : > { %10514 = vmatpush1.msra.mxu0 %v6894_v41  ;;  %10463 = vmatpush2.msra.mxu1 %v6338_v27  ;;  %v17615_v56 = vpop.permute.xlu0 %6803  ;;  %vm20536_vm14 = vmmov %vm20533_vm2 }
 0x8f2   : > { %7094 = vrot.lane.b32.xlu1 %v17120_v54, %s11618_s16  ;;  %10464 = vmatprep.subr.mxu1 %v6098_v25  ;;  %v6877_v27 = vsel %vm20535_vm15, %v6802_v44, %v17615_v56  ;;  %v6088_v33 = vsel %vm20536_vm14, %v20241_v12, %v20532_v34  ;;  %vm20539_vm13 = vmmov %vm20533_vm2  ;;  %v20540_v12 = vld [vmem:[#allocation423_spill] sm:$0xff]  ;;  %vm20543_vm14 = vcmask 146432  }
 0x8f3   : > { %10515 = vmatprep.subr.mxu0 %v6886_v26  ;;  %10465 = vmatpush2.msra.mxu1 %v6097_v30  ;;  %v6593_v41 = vpop.permute.xlu1 %6592  ;;  %v20537_v26 = vld [vmem:[#allocation430_spill] sm:$0xff]  ;;  %v6079_v28 = vsel %vm20539_vm13, %v20246_v29, %v20538_v62  ;;  %vm20542_vm15 = vmmov %vm20533_vm2  ;;  %v6070_v29 = vsel %vm20539_vm13, %v20251_v4, %v20541_v38  ;;  %v20549_v4 = vld [vmem:[#allocation409_spill] sm:$0xff]  ;;  %vm20552_vm13 = vcmask 154624  }
 0x8f4   : > { %7096 = vrot.lane.b32.xlu0 %v17528_v35, %s11618_s16  ;;  %10466 = vmatprep.subr.mxu1 %v6089_v53  ;;  %v6080_v25 = vsel %vm20533_vm2, %v20538_v62, %v20537_v26  ;;  %v6071_v34 = vsel %vm20542_vm15, %v20541_v38, %v20540_v12  ;;  %v6876_v53 = vsel %vm20543_vm14, %v16879_v57, %v6802_v44  ;;  %vm20544_vm2 = vcmask 154624   ;;  %v20546_v62 = vld [vmem:[#allocation415_spill] sm:$0xff] }
 0x8f5   : > { %10516 = vmatpush1.msra.mxu0 %v6885_v61  ;;  %10467 = vmatpush2.msra.mxu1 %v6088_v33  ;;  %vm20547_vm15 = vcmask 433152   ;;  %v6634_v38 = vsel %vm20552_vm13, %v16901_v60, %v6593_v41 }
 0x8f6   : > { %7074 = vrot.lane.b32.xlu1 %v17166_v23, %s11618_s16  ;;  %v17637_v30 = vpop.permute.xlu0 %6594  ;;  %10468 = vmatprep.subr.mxu1 %v6080_v25  ;;  %vm20548_vm14 = vmmov %vm20547_vm15 }
 0x8f7   : > { %10517 = vmatprep.subr.mxu0 %v6877_v27  ;;  %10469 = vmatpush2.msra.mxu1 %v6079_v28  ;;  %v6635_v33 = vsel %vm20544_vm2, %v6593_v41, %v17637_v30  ;;  %v20545_v27 = vld [vmem:[#allocation416_spill] sm:$0xff]  ;;  %v5828_v44 = vsel %vm20548_vm14, %v20255_v47, %v20546_v62  ;;  %vm20551_vm2 = vmmov %vm20548_vm14  ;;  %v20554_v47 = vld [vmem:[#allocation402_spill] sm:$0xff] }
 0x8f8   : > { %7076 = vrot.lane.b32.xlu0 %v17552_v50, %s11618_s16  ;;  %v17649_v61 = vpop.permute.xlu1 %8743  ;;  %10470 = vmatprep.subr.mxu1 %v6071_v34  ;;  %v5829_v25 = vsel %vm20547_vm15, %v20546_v62, %v20545_v27  ;;  %v20550_v28 = vld [vmem:[#allocation408_spill] sm:$0xff]  ;;  %vm20553_vm15 = vmmov %vm20551_vm2  ;;  %v20557_v62 = vld [vmem:[#allocation483_spill] sm:$0xff] }
 0x8f9   : > { %10518 = vmatpush1.msra.mxu0 %v6876_v53  ;;  %10471 = vmatpush2.msra.mxu1 %v6070_v29  ;;  %v5819_v53 = vsel %vm20553_vm15, %v20260_v14, %v20550_v28  ;;  %vm20556_vm14 = vmmov %vm20551_vm2  ;;  %v20562_v41 = vld [vmem:[#allocation395_spill] sm:$0xff] }
 0x8fa   : > { %6865 = vrot.lane.b32.xlu1 %v17029_v52, %s11619_s17  ;;  %v17661_v57 = vpop.permute.xlu0 %8745  ;;  %10472 = vmatprep.subr.mxu1 %v5829_v25  ;;  %v5820_v52 = vsel %vm20551_vm2, %v20550_v28, %v20549_v4  ;;  %v20558_v25 = vld [vmem:[#allocation482_spill] sm:$0xff]  ;;  %vm20559_vm2 = vmmov %vm20552_vm13 }
 0x8fb   : > { %10519 = vmatprep.subr.mxu0 %v6635_v33  ;;  %10473 = vmatpush2.msra.mxu1 %v5828_v44  ;;  %v20555_v33 = vld [vmem:[#allocation401_spill] sm:$0xff]  ;;  %v6626_v44 = vsel %vm20559_vm2, %v20558_v25, %v20557_v62  ;;  %vm20560_vm13 = vmmov %vm20556_vm14  ;;  %v20563_v28 = vld [vmem:[#allocation394_spill] sm:$0xff] }
 0x8fc   : > { %6867 = vrot.lane.b32.xlu0 %v17480_v6, %s11619_s17  ;;  %v8475_v34 = vpop.permute.xlu1 %8474  ;;  %10474 = vmatprep.subr.mxu1 %v5820_v52  ;;  %v5811_v29 = vsel %vm20556_vm14, %v20555_v33, %v20554_v47  ;;  %v5810_v14 = vsel %vm20560_vm13, %v20265_v36, %v20555_v33  ;;  %vm20561_vm15 = vmmov %vm20559_vm2  ;;  %v5801_v36 = vsel %vm20560_vm13, %v20271_v49, %v20563_v28 }
 0x8fd   : > { %10520 = vmatpush1.msra.mxu0 %v6634_v38  ;;  %10475 = vmatpush2.msra.mxu1 %v5819_v53  ;;  %vm20564_vm14 = vmmov %vm20560_vm13  ;;  %v20565_v38 = vld [vmem:[#allocation478_spill] sm:$0xff]  ;;  %v20566_v53 = vld [vmem:[#allocation477_spill] sm:$0xff] }
 0x8fe   : > { %6845 = vrot.lane.b32.xlu1 %v17074_v18, %s11619_s17  ;;  %v17684_v60 = vpop.permute.xlu0 %8476  ;;  %10476 = vmatprep.subr.mxu1 %v5811_v29  ;;  %v6625_v18 = vsel %vm20561_vm15, %v15995_v24, %v20558_v25  ;;  %v5802_v52 = vsel %vm20564_vm14, %v20563_v28, %v20562_v41  ;;  %v6617_v29 = vsel %vm20559_vm2, %v20566_v53, %v20565_v38  ;;  %vm20567_vm15 = vmmov %vm20559_vm2  ;;  %vm20571_vm14 = vcmask 441344   ;;  %v20573_v38 = vld [vmem:[#allocation473_spill] sm:$0xff] }
 0x8ff   : > { %10521 = vmatprep.subr.mxu0 %v6626_v44  ;;  %10477 = vmatpush2.msra.mxu1 %v5810_v14  ;;  %v6616_v24 = vsel %vm20567_vm15, %v20275_v20, %v20566_v53  ;;  %v20569_v44 = vld [vmem:[#allocation388_spill] sm:$0xff]  ;;  %v20570_v14 = vld [vmem:[#allocation387_spill] sm:$0xff]  ;;  %vm20574_vm13 = vmmov %vm20571_vm14 }
 0x900   : > { %10522 = vmatpush1.msra.mxu0 %v6625_v18  ;;  %6847 = vrot.lane.b32.xlu0 %v17504_v21, %s11619_s17  ;;  %v8724_v33 = vpop.permute.xlu1 %8723  ;;  %v5560_v18 = vsel %vm20571_vm14, %v20570_v14, %v20569_v44  ;;  %v5559_v20 = vsel %vm20574_vm13, %v20278_v22, %v20570_v14  ;;  %vm20575_vm15 = vmmov %vm20559_vm2  ;;  %v20576_v53 = vld [vmem:[#allocation380_spill] sm:$0xff] }
 0x901   : > { %10478 = vmatprep.subr.mxu1 %v5802_v52  ;;  %10523 = vmatprep.subr.mxu0 %v6617_v29  ;;  %v20572_v52 = vld [vmem:[#allocation474_spill] sm:$0xff]  ;;  %v6607_v28 = vsel %vm20575_vm15, %v20283_v10, %v20573_v38  ;;  %v20577_v29 = vld [vmem:[#allocation379_spill] sm:$0xff]  ;;  %vm20578_vm14 = vmmov %vm20574_vm13  ;;  %v8516_v10 = vsel %vm8484_vm3, %v16994_v48, %v8475_v34 }
 0x902   : > { %10479 = vmatpush2.msra.mxu1 %v5801_v36  ;;  %v17706_v25 = vpop.permute.xlu0 %8725  ;;  %10524 = vmatpush1.msra.mxu0 %v6616_v24  ;;  %v6608_v49 = vsel %vm20559_vm2, %v20573_v38, %v20572_v52  ;;  %v5551_v36 = vsel %vm20578_vm14, %v20577_v29, %v20576_v53  ;;  %vm20579_vm2 = vmmov %vm20574_vm13  ;;  %v20581_v38 = vld [vmem:[#allocation372_spill] sm:$0xff] }
 0x903   : > { %20568 = vst [vmem:[#allocation43_spill] sm:$0xff] %v17706_v25  ;;  %6825 = vrot.lane.b32.xlu1 %v17120_v54, %s11619_s17  ;;  %10480 = vmatprep.subr.mxu1 %v5560_v18  ;;  %v8517_v54 = vsel %vm8484_vm3, %v8475_v34, %v17684_v60  ;;  %v5550_v22 = vsel %vm20579_vm2, %v20290_v31, %v20577_v29  ;;  %v20582_v18 = vld [vmem:[#allocation371_spill] sm:$0xff]  ;;  %vm20583_vm13 = vmmov %vm20579_vm2  ;;  %v20586_v48 = vld [vmem:[#allocation28_spill] sm:$0xff] }
 0x904   : > { %10525 = vmatprep.subr.mxu0 %v6608_v49  ;;  %10481 = vmatpush2.msra.mxu1 %v5559_v20  ;;  %v8455_v24 = vpop.permute.xlu1 %8454  ;;  %v5542_v49 = vsel %vm20583_vm13, %v20582_v18, %v20581_v38  ;;  %vm20584_vm15 = vmmov %vm20579_vm2  ;;  %vm20604_vm13 = vcmask 261120  }
 0x905   : > { %10526 = vmatpush1.msra.mxu0 %v6607_v28  ;;  %6827 = vrot.lane.b32.xlu0 %v17528_v35, %s11619_s17  ;;  %v5541_v31 = vsel %vm20584_vm15, %v20296_v13, %v20582_v18  ;;  %v20585_v28 = vld [vmem:[#allocation365_spill] sm:$0xff]  ;;  %vm20588_vm14 = vmmov %vm20579_vm2  ;;  %v8786_v13 = vsel %vm8753_vm1, %v17649_v61, %v17661_v57  ;;  %vm20636_vm15 = vcmask 1039360  }
 0x906   : > { %10482 = vmatprep.subr.mxu1 %v5551_v36  ;;  %v17732_v14 = vpop.permute.xlu0 %8456  ;;  %10527 = vmatprep.subr.mxu0 %v8517_v54  ;;  %v20590_v36 = vld [vmem:[#allocation368_spill] sm:$0xff]  ;;  %v11584_v18 = vld [vmem:[%s18990_s5 + $0x8] sm:$0x77] }
 0x907   : > { %20580 = vst [vmem:[#allocation42_spill] sm:$0xff] %v17732_v14  ;;  %10483 = vmatpush2.msra.mxu1 %v5550_v22  ;;  %10528 = vmatpush2.msra.mxu0 %v8516_v10  ;;  %v8508_v20 = vsel %vm8484_vm3, %v8455_v24, %v17732_v14  ;;  %v17757_v10 = vld [vmem:[#allocation2 + $0x140] sm:$0xff] }
 0x908   : > { %6805 = vrot.lane.b32.xlu1 %v17166_v23, %s11619_s17  ;;  %10484 = vmatprep.subr.mxu1 %v5542_v49  ;;  %v8704_v54 = vpop.permute.xlu1 %8703  ;;  %v20587_v23 = vld [vmem:[#allocation29_spill] sm:$0xff]  ;;  %v20591_v49 = vld [vmem:[#allocation48_spill] sm:$0xff] }
 0x909   : > { %10488 = vmatprep.mubr.f32.mxu1 %v20585_v28  ;;  %10485 = vmatpush2.msra.mxu1 %v5541_v31  ;;  %v5533_v34 = vsel %vm20588_vm14, %v20587_v23, %v20586_v48  ;;  %v5532_v22 = vsel %vm20579_vm2, %v20590_v36, %v20587_v23  ;;  %v8785_v31 = vsel %vm8753_vm1, %v20591_v49, %v17649_v61  ;;  %vm20638_vm14 = vmmov %vm20636_vm15 }
 0x90a   : > { %6807 = vrot.lane.b32.xlu0 %v17552_v50, %s11619_s17  ;;  %v17752_v29 = vpop.permute.xlu0 %8705  ;;  %10486 = vmatprep.subr.mxu1 %v5533_v34  ;;  %v20592_v34 = vld [vmem:[#allocation78_spill] sm:$0xff]  ;;  %vm20641_vm2 = vmmov %vm20638_vm14 }
 0x90b   : > { %20589 = vst [vmem:[#allocation89_spill] sm:$0xff] %v17752_v29  ;;  %10529 = vmatprep.subr.mxu0 %v8508_v20  ;;  %10487 = vmatpush2.msra.mxu1 %v5532_v22  ;;  %v8777_v20 = vsel %vm8753_vm1, %v8724_v33, %v17706_v25  ;;  %v8507_v36 = vsel %vm8484_vm3, %v20592_v34, %v8455_v24  ;;  %v20595_v24 = vld [vmem:[#allocation32_spill] sm:$0xff] }
 0x90c   : > { %6596 = vrot.lane.b32.xlu1 %v17757_v10, %s11616_s13  ;;  %10590 = vmatprep.subr.mxu1 %v8786_v13  ;;  %v8435_v23 = vpop.permute.xlu1 %8434  ;;  %v8768_v22 = vsel %vm8753_vm1, %v8704_v54, %v17752_v29  ;;  %v8767_v34 = vsel %vm8753_vm1, %v20595_v24, %v8704_v54  ;;  %v20599_v54 = vld [vmem:[#allocation79_spill] sm:$0xff] }
 0x90d   : > { %10489 = vmatmul.mubr.f32.vlgmr.msra.gmra.mxu1 %v11584_v18  ;;  %10530 = vmatpush2.msra.mxu0 %v8507_v36  ;;  %v20594_v18 = vld [vmem:[#allocation33_spill] sm:$0xff] }
 0x90e   : > { %10591 = vmatpush1.msra.mxu1 %v8785_v31  ;;  %6598 = vrot.lane.b32.xlu0 %v17480_v6, %s11616_s13  ;;  %v17778_v13 = vpop.permute.xlu0 %8436  ;;  %v8776_v61 = vsel %vm8753_vm1, %v20594_v18, %v8724_v33  ;;  %v17786_v31 = vld [vmem:[#allocation2 + $0x150] sm:$0xff]  ;;  %v20596_v33 = vld [vmem:[#allocation63_spill] sm:$0xff] }
 0x90f   : > { %20593 = vst [vmem:[#allocation88_spill] sm:$0xff] %v17778_v13  ;;  %10592 = vmatprep.subr.mxu1 %v8777_v20  ;;  %v8499_v49 = vsel %vm8484_vm3, %v8435_v23, %v17778_v13  ;;  %v8498_v20 = vsel %vm8484_vm3, %v20596_v33, %v8435_v23  ;;  %v20600_v23 = vld [vmem:[#allocation256_spill] sm:$0xff] }
 0x910   : > { %10593 = vmatpush1.msra.mxu1 %v8776_v61  ;;  %8747 = vrot.lane.b32.xlu1 %v17480_v6, %s11620_s20  ;;  %v8684_v14 = vpop.permute.xlu1 %8683  ;;  %v20598_v61 = vmov 0.0  }
 0x911   : > { %10594 = vmatprep.subr.mxu1 %v8768_v22  ;;  %10531 = vmatprep.subr.mxu0 %v8499_v49  ;;  %v8758_v22 = vsel %vm8753_vm1, %v20599_v54, %v8684_v14  ;;  %v17803_v49 = vld [vmem:[#allocation2 + $0xf8] sm:$0xff] }
 0x912   : > { %8749 = vrot.lane.b32.xlu0 %v17786_v31, %s11620_s20  ;;  %10595 = vmatpush1.msra.mxu1 %v8767_v34  ;;  %v17794_v36 = vpop.permute.xlu0 %8685  ;;  %v20601_v34 = vld [vmem:[#allocation183_spill] sm:$0xff] }
 0x913   : > { %20597 = vst [vmem:[#allocation73_spill] sm:$0xff] %v17794_v36  ;;  %10532 = vmatpush2.msra.mxu0 %v8498_v20  ;;  %v8759_v18 = vsel %vm8753_vm1, %v8684_v14, %v17794_v36  ;;  %10630 = vmatprep.mubr.f32.mxu1 %v20598_v61  ;;  %v3141_v33 = vsel %vm3106_vm5, %v20601_v34, %v20600_v23  ;;  %v20602_v20 = vld [vmem:[#allocation487_spill] sm:$0xff]  ;;  %v17827_v36 = vld [vmem:[#allocation2 + $0xa0] sm:$0xff] }
 0x914   : > { %8727 = vrot.lane.b32.xlu1 %v17504_v21, %s11620_s20  ;;  %10596 = vmatprep.subr.mxu1 %v8759_v18  ;;  %v8415_v24 = vpop.permute.xlu1 %8414  ;;  %v11585_v14 = vld [vmem:[%s18990_s5 + $0x18] sm:$0x7]  ;;  %v20605_v18 = vld [vmem:[#allocation182_spill] sm:$0xff] }
 0x915   : > { %10597 = vmatpush1.msra.mxu1 %v8758_v22  ;;  %10559 = vmatprep.mubr.f32.mxu0 %v20602_v20  ;;  %v3140_v54 = vsel %vm3106_vm5, %v20605_v18, %v20601_v34  ;;  %v20607_v20 = vld [vmem:[#allocation151_spill] sm:$0xff]  ;;  %v20609_v34 = vld [vmem:[#allocation150_spill] sm:$0xff] }
 0x916   : > { %8729 = vrot.lane.b32.xlu0 %v17803_v49, %s11620_s20  ;;  %10637 = vmatprep.subr.mxu1 %v3141_v33  ;;  %v17811_v13 = vpop.permute.xlu0 %8416  ;;  %v20606_v33 = vld [vmem:[#allocation240_spill] sm:$0xff]  ;;  %v3131_v18 = vsel %vm3106_vm5, %v20609_v34, %v20607_v20 }
 0x917   : > { %20603 = vst [vmem:[#allocation72_spill] sm:$0xff] %v17811_v13  ;;  %11369 = vmatmul.mubr.msk.f32.vlgmr.msra.gmra.mxu1 %vm20604_vm13, %v11585_v14  ;;  %v8490_v22 = vsel %vm8484_vm3, %v8415_v24, %v17811_v13  ;;  %v3132_v23 = vsel %vm3106_vm5, %v20607_v20, %v20606_v33  ;;  %v20608_v14 = vld [vmem:[#allocation62_spill] sm:$0xff]  ;;  %v20611_v13 = vld [vmem:[#allocation224_spill] sm:$0xff]  ;;  %v20612_v33 = vld [vmem:[#allocation119_spill] sm:$0xff] }
 0x918   : > { %8707 = vrot.lane.b32.xlu1 %v17528_v35, %s11620_s20  ;;  %10638 = vmatpush1.msra.mxu1 %v3140_v54  ;;  %v8206_v61 = vpop.permute.xlu1 %8205  ;;  %v8489_v29 = vsel %vm8484_vm3, %v20608_v14, %v8415_v24  ;;  %v3123_v25 = vsel %vm3106_vm5, %v20612_v33, %v20611_v13  ;;  %v20615_v14 = vld [vmem:[#allocation105_spill] sm:$0xff]  ;;  %vm20643_vm13 = vmmov %vm20641_vm2 }
 0x919   : > { %10533 = vmatprep.subr.mxu0 %v8490_v22  ;;  %10639 = vmatprep.subr.mxu1 %v3132_v23  ;;  %v20614_v22 = vld [vmem:[#allocation208_spill] sm:$0xff] }
 0x91a   : > { %8709 = vrot.lane.b32.xlu0 %v17827_v36, %s11620_s20  ;;  %10534 = vmatpush2.msra.mxu0 %v8489_v29  ;;  %v17836_v54 = vpop.permute.xlu0 %8207  ;;  %v20613_v29 = vld [vmem:[#allocation118_spill] sm:$0xff]  ;;  %v3114_v34 = vsel %vm3106_vm5, %v20615_v14, %v20614_v22 }
 0x91b   : > { %20610 = vst [vmem:[#allocation57_spill] sm:$0xff] %v17836_v54  ;;  %10640 = vmatpush1.msra.mxu1 %v3131_v18  ;;  %v8248_v23 = vsel %vm8215_vm0, %v8206_v61, %v17836_v54  ;;  %10701 = vmatprep.mubr.f32.mxu1 %v20436_v46  ;;  %v3122_v24 = vsel %vm3106_vm5, %v20613_v29, %v20612_v33  ;;  %v20616_v18 = vld [vmem:[#allocation47_spill] sm:$0xff]  ;;  %v20619_v33 = vld [vmem:[#allocation254_spill] sm:$0xff] }
 0x91c   : > { %8478 = vrot.lane.b32.xlu1 %v17480_v6, %s11621_s21  ;;  %10641 = vmatprep.subr.mxu1 %v3123_v25  ;;  %v8186_v20 = vpop.permute.xlu1 %8185  ;;  %v8247_v46 = vsel %vm8215_vm0, %v20616_v18, %v8206_v61  ;;  %v20617_v25 = vld [vmem:[#allocation104_spill] sm:$0xff]  ;;  %v20621_v61 = vld [vmem:[#allocation178_spill] sm:$0xff]  ;;  %v20623_v18 = vld [vmem:[#allocation147_spill] sm:$0xff] }
 0x91d   : > { %10642 = vmatpush1.msra.mxu1 %v3122_v24  ;;  %10535 = vmatprep.subr.mxu0 %v8248_v23  ;;  %v3113_v54 = vsel %vm3106_vm5, %v20617_v25, %v20615_v14  ;;  %v20620_v23 = vld [vmem:[#allocation179_spill] sm:$0xff]  ;;  %v17871_v14 = vld [vmem:[#allocation2 + $0x48] sm:$0xff] }
 0x91e   : > { %8480 = vrot.lane.b32.xlu0 %v17786_v31, %s11621_s21  ;;  %10643 = vmatprep.subr.mxu1 %v3114_v34  ;;  %v17859_v13 = vpop.permute.xlu0 %8187  ;;  %v2872_v29 = vsel %vm2837_vm6, %v20620_v23, %v20619_v33  ;;  %v2871_v34 = vsel %vm2837_vm6, %v20621_v61, %v20620_v23  ;;  %v20625_v33 = vld [vmem:[#allocation146_spill] sm:$0xff] }
 0x91f   : > { %20618 = vst [vmem:[#allocation56_spill] sm:$0xff] %v17859_v13  ;;  %10536 = vmatpush2.msra.mxu0 %v8247_v46  ;;  %10644 = vmatpush1.msra.mxu1 %v3113_v54  ;;  %v8239_v24 = vsel %vm8215_vm0, %v8186_v20, %v17859_v13  ;;  %v20622_v54 = vld [vmem:[#allocation238_spill] sm:$0xff]  ;;  %v2862_v23 = vsel %vm2837_vm6, %v20625_v33, %v20623_v18 }
 0x920   : > { %8687 = vrot.lane.b32.xlu1 %v17552_v50, %s11620_s20  ;;  %10645 = vmatprep.subr.mxu1 %v2872_v29  ;;  %v8166_v46 = vpop.permute.xlu1 %8165  ;;  %v2863_v25 = vsel %vm2837_vm6, %v20623_v18, %v20622_v54  ;;  %v20624_v13 = vld [vmem:[#allocation46_spill] sm:$0xff] }
 0x921   : > { %10646 = vmatpush1.msra.mxu1 %v2871_v34  ;;  %10537 = vmatprep.subr.mxu0 %v8239_v24  ;;  %v8238_v29 = vsel %vm8215_vm0, %v20624_v13, %v8186_v20  ;;  %v20627_v24 = vld [vmem:[#allocation222_spill] sm:$0xff]  ;;  %v20628_v34 = vld [vmem:[#allocation115_spill] sm:$0xff] }
 0x922   : > { %8689 = vrot.lane.b32.xlu0 %v17871_v14, %s11620_s20  ;;  %10647 = vmatprep.subr.mxu1 %v2863_v25  ;;  %v17883_v61 = vpop.permute.xlu0 %8167  ;;  %v2854_v22 = vsel %vm2837_vm6, %v20628_v34, %v20627_v24  ;;  %v20629_v13 = vld [vmem:[#allocation114_spill] sm:$0xff]  ;;  %v20631_v25 = vld [vmem:[#allocation101_spill] sm:$0xff] }
 0x923   : > { %20626 = vst [vmem:[#allocation41_spill] sm:$0xff] %v17883_v61  ;;  %10538 = vmatpush2.msra.mxu0 %v8238_v29  ;;  %10648 = vmatpush1.msra.mxu1 %v2862_v23  ;;  %v8230_v54 = vsel %vm8215_vm0, %v8166_v46, %v17883_v61  ;;  %v2853_v20 = vsel %vm2837_vm6, %v20629_v13, %v20628_v34  ;;  %v20630_v18 = vld [vmem:[#allocation206_spill] sm:$0xff]  ;;  %v20635_v34 = vld [vmem:[#allocation175_spill] sm:$0xff] }
 0x924   : > { %8458 = vrot.lane.b32.xlu1 %v17504_v21, %s11621_s21  ;;  %10649 = vmatprep.subr.mxu1 %v2854_v22  ;;  %v8146_v33 = vpop.permute.xlu1 %8145  ;;  %v2845_v29 = vsel %vm2837_vm6, %v20631_v25, %v20630_v18  ;;  %v8229_v23 = vsel %vm8215_vm0, %v17149_v19, %v8166_v46  ;;  %v20632_v22 = vld [vmem:[#allocation100_spill] sm:$0xff]  ;;  %v20637_v19 = vld [vmem:[#allocation174_spill] sm:$0xff] }
 0x925   : > { %10650 = vmatpush1.msra.mxu1 %v2853_v20  ;;  %10539 = vmatprep.subr.mxu0 %v8230_v54  ;;  %v2844_v61 = vsel %vm2837_vm6, %v20632_v22, %v20631_v25  ;;  %v20634_v54 = vld [vmem:[#allocation252_spill] sm:$0xff]  ;;  %v2602_v46 = vsel %vm20638_vm14, %v20637_v19, %v20635_v34  ;;  %v8220_v22 = vsel %vm8215_vm0, %v17173_v5, %v8146_v33  ;;  %vm20648_vm14 = vmmov %vm20641_vm2 }
 0x926   : > { %8460 = vrot.lane.b32.xlu0 %v17803_v49, %s11621_s21  ;;  %10651 = vmatprep.subr.mxu1 %v2845_v29  ;;  %v17905_v24 = vpop.permute.xlu0 %8147  ;;  %v2603_v13 = vsel %vm20636_vm15, %v20635_v34, %v20634_v54  ;;  %v20639_v29 = vld [vmem:[#allocation236_spill] sm:$0xff]  ;;  %vm20647_vm15 = vmmov %vm20641_vm2 }
 0x927   : > { %20633 = vst [vmem:[#allocation40_spill] sm:$0xff] %v17905_v24  ;;  %10540 = vmatpush2.msra.mxu0 %v8229_v23  ;;  %10652 = vmatpush1.msra.mxu1 %v2844_v61  ;;  %v8221_v20 = vsel %vm8215_vm0, %v8146_v33, %v17905_v24  ;;  %v20640_v61 = vld [vmem:[#allocation143_spill] sm:$0xff]  ;;  %v20645_v34 = vld [vmem:[#allocation220_spill] sm:$0xff] }
 0x928   : > { %8438 = vrot.lane.b32.xlu1 %v17528_v35, %s11621_s21  ;;  %10653 = vmatprep.subr.mxu1 %v2603_v13  ;;  %v7937_v25 = vpop.permute.xlu1 %7936  ;;  %v2594_v23 = vsel %vm20641_vm2, %v20640_v61, %v20639_v29  ;;  %v20642_v13 = vld [vmem:[#allocation142_spill] sm:$0xff]  ;;  %v20751_v29 = vld [vmem:[#allocation305_spill] sm:$0xff] }
 0x929   : > { %10654 = vmatpush1.msra.mxu1 %v2602_v46  ;;  %10541 = vmatprep.subr.mxu0 %v8221_v20  ;;  %v2593_v24 = vsel %vm20643_vm13, %v20642_v13, %v20640_v61  ;;  %v20646_v20 = vld [vmem:[#allocation111_spill] sm:$0xff]  ;;  %v20649_v61 = vld [vmem:[#allocation204_spill] sm:$0xff]  ;;  %vm20652_vm13 = vmmov %vm20641_vm2 }
 0x92a   : > { %8440 = vrot.lane.b32.xlu0 %v17827_v36, %s11621_s21  ;;  %10655 = vmatprep.subr.mxu1 %v2594_v23  ;;  %v17927_v54 = vpop.permute.xlu0 %7938  ;;  %v2585_v19 = vsel %vm20647_vm15, %v20646_v20, %v20645_v34  ;;  %v2584_v5 = vsel %vm20648_vm14, %v20357_v63, %v20646_v20  ;;  %v20651_v13 = vld [vmem:[#allocation96_spill] sm:$0xff]  ;;  %v2369_v20 = vld [vmem:[#allocation2 + $0x138] sm:$0xff]  ;;  %vm20674_vm15 = vcmask 744448  }
 0x92b   : > { %20644 = vst [vmem:[#allocation87_spill] sm:$0xff] %v17927_v54  ;;  %10542 = vmatpush2.msra.mxu0 %v8220_v22  ;;  %10656 = vmatpush1.msra.mxu1 %v2593_v24  ;;  %v7979_v46 = vsel %vm7946_vm7, %v7937_v25, %v17927_v54  ;;  %v20650_v24 = vld [vmem:[#allocation97_spill] sm:$0xff]  ;;  %v7978_v22 = vsel %vm7946_vm7, %v17187_v8, %v7937_v25  ;;  %v20654_v25 = vld [vmem:[#allocation94_spill] sm:$0xff]  ;;  %vm20676_vm14 = vmmov %vm20674_vm15 }
 0x92c   : > { %8418 = vrot.lane.b32.xlu1 %v17552_v50, %s11621_s21  ;;  %10657 = vmatprep.subr.mxu1 %v2585_v19  ;;  %v7917_v33 = vpop.permute.xlu1 %7916  ;;  %v2576_v23 = vsel %vm20641_vm2, %v20650_v24, %v20649_v61  ;;  %v2575_v19 = vsel %vm20652_vm13, %v20651_v13, %v20650_v24  ;;  %v2361_v8 = vld [vmem:[#allocation2 + $0xe8] sm:$0xff]  ;;  %v2343_v13 = vld [vmem:[#allocation2 + $0x38] sm:$0xff]  ;;  %vm20680_vm2 = vmmov %vm20676_vm14 }
 0x92d   : > { %10658 = vmatpush1.msra.mxu1 %v2584_v5  ;;  %10543 = vmatprep.subr.mxu0 %v7979_v46  ;;  %v7969_v5 = vsel %vm7946_vm7, %v20654_v25, %v7917_v33  ;;  %v20660_v25 = vld [vmem:[#allocation198_spill] sm:$0xff]  ;;  %vm20682_vm13 = vmmov %vm20680_vm2 }
 0x92e   : > { %8420 = vrot.lane.b32.xlu0 %v17871_v14, %s11621_s21  ;;  %10659 = vmatprep.subr.mxu1 %v2576_v23  ;;  %v17949_v54 = vpop.permute.xlu0 %7918  ;;  %v2352_v23 = vld [vmem:[#allocation2 + $0x90] sm:$0xff] }
 0x92f   : > { %20653 = vst [vmem:[#allocation86_spill] sm:$0xff] %v17949_v54  ;;  %10544 = vmatpush2.msra.mxu0 %v7978_v22  ;;  %10660 = vmatpush1.msra.mxu1 %v2575_v19  ;;  %v7970_v63 = vsel %vm7946_vm7, %v7917_v33, %v17949_v54  ;;  %v20656_v33 = vld [vmem:[#allocation31_spill] sm:$0xff] }
 0x930   : > { %8209 = vrot.lane.b32.xlu1 %v17480_v6, %s11622_s22  ;;  %10661 = vmatprep.subr.mxu1 %v17757_v10  ;;  %v7897_v46 = vpop.permute.xlu1 %7896 }
 0x931   : > { %10662 = vmatpush1.msra.mxu1 %v2369_v20  ;;  %10545 = vmatprep.subr.mxu0 %v7970_v63  ;;  %v20658_v63 = vld [vmem:[#allocation264_spill] sm:$0xff]  ;;  %v20659_v20 = vld [vmem:[#allocation199_spill] sm:$0xff] }
 0x932   : > { %8211 = vrot.lane.b32.xlu0 %v17786_v31, %s11622_s22  ;;  %10663 = vmatprep.subr.mxu1 %v2361_v8  ;;  %v17960_v24 = vpop.permute.xlu0 %7898  ;;  %v4217_v8 = vsel %vm4182_vm8, %v20659_v20, %v20658_v63 }
 0x933   : > { %20655 = vst [vmem:[#allocation71_spill] sm:$0xff] %v17960_v24  ;;  %10546 = vmatpush2.msra.mxu0 %v7969_v5  ;;  %10664 = vmatpush1.msra.mxu1 %v17388_v2  ;;  %v7961_v10 = vsel %vm7946_vm7, %v7897_v46, %v17960_v24  ;;  %v7960_v2 = vsel %vm7946_vm7, %v20656_v33, %v7897_v46 }
 0x934   : > { %8189 = vrot.lane.b32.xlu1 %v17504_v21, %s11622_s22  ;;  %10665 = vmatprep.subr.mxu1 %v2352_v23  ;;  %v7877_v22 = vpop.permute.xlu1 %7876  ;;  %v4216_v46 = vsel %vm4182_vm8, %v20660_v25, %v20659_v20  ;;  %v20661_v23 = vld [vmem:[#allocation248_spill] sm:$0xff]  ;;  %v20666_v25 = vld [vmem:[#allocation135_spill] sm:$0xff] }
 0x935   : > { %10666 = vmatpush1.msra.mxu1 %v17424_v15  ;;  %10547 = vmatprep.subr.mxu0 %v7961_v10  ;;  %v20665_v20 = vld [vmem:[#allocation232_spill] sm:$0xff] }
 0x936   : > { %8191 = vrot.lane.b32.xlu0 %v17803_v49, %s11622_s22  ;;  %10667 = vmatprep.subr.mxu1 %v2343_v13  ;;  %v17972_v19 = vpop.permute.xlu0 %7878  ;;  %v20663_v13 = vld [vmem:[#allocation30_spill] sm:$0xff] }
 0x937   : > { %20657 = vst [vmem:[#allocation70_spill] sm:$0xff] %v17972_v19  ;;  %10548 = vmatpush2.msra.mxu0 %v7960_v2  ;;  %10668 = vmatpush1.msra.mxu1 %v17448_v43  ;;  %v7952_v15 = vsel %vm7946_vm7, %v7877_v22, %v17972_v19  ;;  %v20662_v43 = vld [vmem:[#allocation167_spill] sm:$0xff]  ;;  %v7951_v33 = vsel %vm7946_vm7, %v20663_v13, %v7877_v22  ;;  %v20664_v2 = vld [vmem:[#allocation166_spill] sm:$0xff] }
 0x938   : > { %8169 = vrot.lane.b32.xlu1 %v17528_v35, %s11622_s22  ;;  %10669 = vmatprep.subr.mxu1 %v4217_v8  ;;  %v7668_v5 = vpop.permute.xlu1 %7667  ;;  %v4208_v10 = vsel %vm4182_vm8, %v20662_v43, %v20661_v23  ;;  %v4207_v8 = vsel %vm4182_vm8, %v20664_v2, %v20662_v43  ;;  %v20670_v2 = vld [vmem:[#allocation12_spill] sm:$0xff]  ;;  %v20675_v19 = vld [vmem:[#allocation194_spill] sm:$0xff] }
 0x939   : > { %10670 = vmatpush2.msra.mxu1 %v4216_v46  ;;  %10549 = vmatprep.subr.mxu0 %v7952_v15  ;;  %v4199_v15 = vsel %vm4182_vm8, %v20666_v25, %v20665_v20 }
 0x93a   : > { %8171 = vrot.lane.b32.xlu0 %v17827_v36, %s11622_s22  ;;  %10671 = vmatprep.subr.mxu1 %v4208_v10  ;;  %v20668_v10 = vld [vmem:[#allocation134_spill] sm:$0xff] }
 0x93b   : > { %10550 = vmatpush2.msra.mxu0 %v7951_v33  ;;  %10672 = vmatpush2.msra.mxu1 %v4207_v8  ;;  %v18000_v46 = vpop.permute.xlu0 %7669  ;;  %v4198_v22 = vsel %vm4182_vm8, %v20668_v10, %v20666_v25  ;;  %v20669_v33 = vld [vmem:[#allocation216_spill] sm:$0xff]  ;;  %v20671_v25 = vld [vmem:[#allocation13_spill] sm:$0xff] }
 0x93c   : > { %8149 = vrot.lane.b32.xlu1 %v17552_v50, %s11622_s22  ;;  %10673 = vmatprep.subr.mxu1 %v4199_v15  ;;  %20667 = vst [vmem:[#allocation55_spill] sm:$0xff] %v18000_v46  ;;  %v7710_v43 = vsel %vm7677_vm9, %v7668_v5, %v18000_v46  ;;  %v4190_v8 = vsel %vm4182_vm8, %v20670_v2, %v20669_v33  ;;  %v20673_v46 = vld [vmem:[#allocation195_spill] sm:$0xff] }
 0x93d   : > { %10674 = vmatpush2.msra.mxu1 %v4198_v22  ;;  %10551 = vmatprep.subr.mxu0 %v7710_v43  ;;  %v7709_v15 = vsel %vm7677_vm9, %v17260_v1, %v7668_v5  ;;  %v4189_v10 = vsel %vm4182_vm8, %v20671_v25, %v20670_v2  ;;  %v20672_v22 = vld [vmem:[#allocation262_spill] sm:$0xff]  ;;  %v3947_v24 = vsel %vm20676_vm14, %v20675_v19, %v20673_v46  ;;  %v20679_v2 = vld [vmem:[#allocation163_spill] sm:$0xff]  ;;  %vm20688_vm14 = vmmov %vm20680_vm2 }
 0x93e   : > { %8151 = vrot.lane.b32.xlu0 %v17871_v14, %s11622_s22  ;;  %v7648_v13 = vpop.permute.xlu1 %7647  ;;  %10675 = vmatprep.subr.mxu1 %v4190_v8  ;;  %v3948_v43 = vsel %vm20674_vm15, %v20673_v46, %v20672_v22  ;;  %v20678_v5 = vld [vmem:[#allocation246_spill] sm:$0xff]  ;;  %vm20685_vm15 = vmmov %vm20680_vm2 }
 0x93f   : > { %10552 = vmatpush2.msra.mxu0 %v7709_v15  ;;  %10676 = vmatpush2.msra.mxu1 %v4189_v10  ;;  %v3939_v8 = vsel %vm20680_vm2, %v20679_v2, %v20678_v5  ;;  %v7700_v19 = vsel %vm7677_vm9, %v17282_v16, %v7648_v13  ;;  %v20681_v46 = vld [vmem:[#allocation162_spill] sm:$0xff] }
 0x940   : > { %7940 = vrot.lane.b32.xlu1 %v17480_v6, %s11623_s23  ;;  %10677 = vmatprep.subr.mxu1 %v3948_v43  ;;  %v20683_v10 = vld [vmem:[#allocation230_spill] sm:$0xff]  ;;  %v20684_v43 = vld [vmem:[#allocation131_spill] sm:$0xff] }
 0x941   : > { %v18027_v1 = vpop.permute.xlu0 %7649  ;;  %10678 = vmatpush2.msra.mxu1 %v3947_v24  ;;  %v3938_v24 = vsel %vm20682_vm13, %v20681_v46, %v20679_v2  ;;  %v3930_v54 = vsel %vm20685_vm15, %v20684_v43, %v20683_v10  ;;  %v20690_v46 = vld [vmem:[#allocation24_spill] sm:$0xff]  ;;  %vm20692_vm13 = vmmov %vm20680_vm2  ;;  %vm20729_vm15 = vcmask 457728  }
 0x942   : > { %7942 = vrot.lane.b32.xlu0 %v17786_v31, %s11623_s23  ;;  %20677 = vst [vmem:[#allocation54_spill] sm:$0xff] %v18027_v1  ;;  %v7701_v15 = vsel %vm7677_vm9, %v7648_v13, %v18027_v1  ;;  %10679 = vmatprep.subr.mxu1 %v3939_v8 }
 0x943   : > { %10553 = vmatprep.subr.mxu0 %v7701_v15  ;;  %10680 = vmatpush2.msra.mxu1 %v3938_v24  ;;  %v20687_v15 = vld [vmem:[#allocation130_spill] sm:$0xff] }
 0x944   : > { %7920 = vrot.lane.b32.xlu1 %v17504_v21, %s11623_s23  ;;  %v7628_v25 = vpop.permute.xlu1 %7627  ;;  %10554 = vmatpush2.msra.mxu0 %v7700_v19  ;;  %v3929_v16 = vsel %vm20688_vm14, %v20687_v15, %v20684_v43  ;;  %v20689_v19 = vld [vmem:[#allocation214_spill] sm:$0xff]  ;;  %v20691_v43 = vld [vmem:[#allocation25_spill] sm:$0xff]  ;;  %vm20732_vm14 = vmmov %vm20729_vm15 }
 0x945   : > { %10681 = vmatprep.subr.mxu1 %v3930_v54  ;;  %v3921_v24 = vsel %vm20680_vm2, %v20690_v46, %v20689_v19  ;;  %v7691_v54 = vsel %vm7677_vm9, %v17304_v32, %v7628_v25  ;;  %v3920_v15 = vsel %vm20692_vm13, %v20691_v43, %v20690_v46  ;;  %vm20737_vm2 = vmmov %vm20732_vm14 }
 0x946   : > { %7922 = vrot.lane.b32.xlu0 %v17803_v49, %s11623_s23  ;;  %v18046_v8 = vpop.permute.xlu0 %7629  ;;  %10682 = vmatpush2.msra.mxu1 %v3929_v16  ;;  %v20693_v16 = vld [vmem:[#allocation260_spill] sm:$0xff]  ;;  %vm20740_vm13 = vmmov %vm20737_vm2 }
 0x947   : > { %20686 = vst [vmem:[#allocation39_spill] sm:$0xff] %v18046_v8  ;;  %v7692_v13 = vsel %vm7677_vm9, %v7628_v25, %v18046_v8  ;;  %10683 = vmatprep.subr.mxu1 %v3921_v24  ;;  %v20694_v8 = vld [vmem:[#allocation191_spill] sm:$0xff]  ;;  %v20696_v24 = vld [vmem:[#allocation244_spill] sm:$0xff] }
 0x948   : > { %7900 = vrot.lane.b32.xlu1 %v17528_v35, %s11623_s23  ;;  %v7608_v2 = vpop.permute.xlu1 %7607  ;;  %10555 = vmatprep.subr.mxu0 %v7692_v13  ;;  %v3679_v13 = vsel %vm3644_vm10, %v20694_v8, %v20693_v16  ;;  %v3678_v32 = vsel %vm3644_vm10, %v20403_v37, %v20694_v8  ;;  %v20698_v37 = vld [vmem:[#allocation158_spill] sm:$0xff] }
 0x949   : > { %10556 = vmatpush2.msra.mxu0 %v7691_v54  ;;  %10684 = vmatpush2.msra.mxu1 %v3920_v15  ;;  %v20697_v54 = vld [vmem:[#allocation159_spill] sm:$0xff]  ;;  %v7682_v15 = vsel %vm7677_vm9, %v17326_v9, %v7608_v2 }
 0x94a   : > { %7902 = vrot.lane.b32.xlu0 %v17827_v36, %s11623_s23  ;;  %v18068_v1 = vpop.permute.xlu0 %7609  ;;  %10685 = vmatprep.subr.mxu1 %v3679_v13  ;;  %v3670_v43 = vsel %vm3644_vm10, %v20697_v54, %v20696_v24  ;;  %v20700_v13 = vld [vmem:[#allocation362_spill] sm:$0xff] }
 0x94b   : > { %20695 = vst [vmem:[#allocation38_spill] sm:$0xff] %v18068_v1  ;;  %v7683_v25 = vsel %vm7677_vm9, %v7608_v2, %v18068_v1  ;;  %10686 = vmatpush2.msra.mxu1 %v3678_v32  ;;  %v20701_v32 = vld [vmem:[#allocation361_spill] sm:$0xff] }
 0x94c   : > { %7880 = vrot.lane.b32.xlu1 %v17552_v50, %s11623_s23  ;;  %v18077_v46 = vpop.permute.xlu1 %7403  ;;  %10557 = vmatprep.subr.mxu0 %v7683_v25  ;;  %v3669_v50 = vsel %vm3644_vm10, %v20698_v37, %v20697_v54  ;;  %v5293_v1 = vsel %vm5258_vm12, %v20701_v32, %v20700_v13  ;;  %v20702_v25 = vld [vmem:[#allocation228_spill] sm:$0xff]  ;;  %v18107_v54 = vld [vmem:[%s18990_s5 + $0x10] sm:$0x77] }
 0x94d   : > { %10687 = vmatprep.subr.mxu1 %v3670_v43  ;;  %10558 = vmatpush2.msra.mxu0 %v7682_v15  ;;  %v20703_v43 = vld [vmem:[#allocation127_spill] sm:$0xff]  ;;  %20704 = vst [vmem:[#allocation84_spill] sm:$0xff] %v18107_v54  ;;  %v20708_v37 = vld [vmem:[#allocation354_spill] sm:$0xff] }
 0x94e   : > { %7882 = vrot.lane.b32.xlu0 %v17871_v14, %s11623_s23  ;;  %v18089_v8 = vpop.permute.xlu0 %7405  ;;  %10688 = vmatpush2.msra.mxu1 %v3669_v50  ;;  %v3661_v61 = vsel %vm3644_vm10, %v20703_v43, %v20702_v25  ;;  %v3660_v9 = vsel %vm3644_vm10, %v20409_v11, %v20703_v43  ;;  %v20707_v11 = vld [vmem:[#allocation14_spill] sm:$0xff]  ;;  %v20709_v50 = vld [vmem:[#allocation353_spill] sm:$0xff] }
 0x94f   : > { %20699 = vst [vmem:[#allocation85_spill] sm:$0xff] %v18089_v8  ;;  %10708 = vmatprep.subr.mxu0 %v5293_v1  ;;  %10689 = vmatprep.subr.mxu1 %v3661_v61  ;;  %v20705_v1 = vld [vmem:[#allocation360_spill] sm:$0xff]  ;;  %v5284_v43 = vsel %vm5258_vm12, %v20709_v50, %v20708_v37  ;;  %v20722_v37 = vld [vmem:[#allocation338_spill] sm:$0xff] }
 0x950   : > { %7671 = vrot.lane.b32.xlu1 %v17480_v6, %s11624_s24  ;;  %v18102_v2 = vpop.permute.xlu1 %7383  ;;  %10560 = vmatmul.mubr.f32.vlgmr.msra.gmra.mxu0 %v18107_v54  ;;  %v5292_v15 = vsel %vm5258_vm12, %v20705_v1, %v20701_v32  ;;  %v20706_v6 = vld [vmem:[#allocation212_spill] sm:$0xff]  ;;  %v20713_v54 = vld [vmem:[#allocation258_spill] sm:$0xff] }
 0x951   : > { %10690 = vmatpush2.msra.mxu1 %v3660_v9  ;;  %10709 = vmatpush1.msra.mxu0 %v5292_v15  ;;  %v3652_v61 = vsel %vm3644_vm10, %v20707_v11, %v20706_v6  ;;  %v20711_v9 = vld [vmem:[#allocation15_spill] sm:$0xff]  ;;  %v20712_v1 = vld [vmem:[#allocation352_spill] sm:$0xff] }
 0x952   : > { %7673 = vrot.lane.b32.xlu0 %v17786_v31, %s11624_s24  ;;  %v18121_v13 = vpop.permute.xlu0 %7385  ;;  %10691 = vmatprep.subr.mxu1 %v3652_v61  ;;  %v3651_v32 = vsel %vm3644_vm10, %v20711_v9, %v20707_v11  ;;  %v5283_v15 = vsel %vm5258_vm12, %v20712_v1, %v20709_v50  ;;  %v20714_v6 = vld [vmem:[#allocation187_spill] sm:$0xff]  ;;  %v20715_v61 = vld [vmem:[#allocation346_spill] sm:$0xff] }
 0x953   : > { %20710 = vst [vmem:[#allocation152_spill] sm:$0xff] %v18121_v13  ;;  %10710 = vmatprep.subr.mxu0 %v5284_v43  ;;  %10692 = vmatpush2.msra.mxu1 %v3651_v32  ;;  %v3410_v34 = vsel %vm3375_vm11, %v20714_v6, %v20713_v54  ;;  %v20716_v43 = vld [vmem:[#allocation345_spill] sm:$0xff]  ;;  %v20717_v9 = vld [vmem:[#allocation186_spill] sm:$0xff]  ;;  %v20718_v32 = vld [vmem:[#allocation344_spill] sm:$0xff] }
 0x954   : > { %10711 = vmatpush1.msra.mxu0 %v5283_v15  ;;  %v18132_v25 = vpop.permute.xlu1 %7363  ;;  %7651 = vrot.lane.b32.xlu1 %v17504_v21, %s11624_s24  ;;  %v5275_v11 = vsel %vm5258_vm12, %v20716_v43, %v20715_v61  ;;  %v3409_v50 = vsel %vm3375_vm11, %v20717_v9, %v20714_v6  ;;  %v5274_v1 = vsel %vm5258_vm12, %v20718_v32, %v20716_v43  ;;  %v20720_v21 = vld [vmem:[#allocation242_spill] sm:$0xff]  ;;  %v20723_v54 = vld [vmem:[#allocation337_spill] sm:$0xff] }
 0x955   : > { %10693 = vmatprep.subr.mxu1 %v3410_v34  ;;  %10712 = vmatprep.subr.mxu0 %v5275_v11  ;;  %v20721_v34 = vld [vmem:[#allocation155_spill] sm:$0xff]  ;;  %v5266_v6 = vsel %vm5258_vm12, %v20723_v54, %v20722_v37  ;;  %v20724_v11 = vld [vmem:[#allocation154_spill] sm:$0xff]  ;;  %v5265_v9 = vsel %vm5258_vm12, %v20439_v58, %v20723_v54 }
 0x956   : > { %10694 = vmatpush2.msra.mxu1 %v3409_v50  ;;  %v18145_v15 = vpop.permute.xlu0 %7365  ;;  %10713 = vmatpush1.msra.mxu0 %v5274_v1  ;;  %v3401_v61 = vsel %vm3375_vm11, %v20721_v34, %v20720_v21  ;;  %v3400_v43 = vsel %vm3375_vm11, %v20724_v11, %v20721_v34  ;;  %v20725_v32 = vld [vmem:[#allocation226_spill] sm:$0xff]  ;;  %v20726_v1 = vld [vmem:[#allocation123_spill] sm:$0xff] }
 0x957   : > { %20719 = vst [vmem:[#allocation69_spill] sm:$0xff] %v18145_v15  ;;  %7653 = vrot.lane.b32.xlu0 %v17803_v49, %s11624_s24  ;;  %10695 = vmatprep.subr.mxu1 %v3401_v61  ;;  %v3392_v21 = vsel %vm3375_vm11, %v20726_v1, %v20725_v32  ;;  %v20727_v61 = vld [vmem:[#allocation330_spill] sm:$0xff]  ;;  %v20736_v32 = vld [vmem:[#allocation321_spill] sm:$0xff] }
 0x958   : > { %10714 = vmatprep.subr.mxu0 %v5266_v6  ;;  %v18161_v50 = vpop.permute.xlu1 %7343  ;;  %10696 = vmatpush2.msra.mxu1 %v3400_v43  ;;  %v20728_v6 = vld [vmem:[#allocation329_spill] sm:$0xff]  ;;  %v20730_v11 = vld [vmem:[#allocation122_spill] sm:$0xff]  ;;  %v20731_v43 = vld [vmem:[#allocation328_spill] sm:$0xff] }
 0x959   : > { %10715 = vmatpush1.msra.mxu0 %v5265_v9  ;;  %7631 = vrot.lane.b32.xlu1 %v17528_v35, %s11624_s24  ;;  %v5024_v34 = vsel %vm20729_vm15, %v20728_v6, %v20727_v61  ;;  %v3391_v58 = vsel %vm3375_vm11, %v20730_v11, %v20726_v1  ;;  %v5023_v9 = vsel %vm20732_vm14, %v20731_v43, %v20728_v6  ;;  %v20733_v35 = vld [vmem:[#allocation210_spill] sm:$0xff]  ;;  %v20739_v6 = vld [vmem:[#allocation320_spill] sm:$0xff]  ;;  %vm20746_vm15 = vmmov %vm20737_vm2 }
 0x95a   : > { %10697 = vmatprep.subr.mxu1 %v3392_v21  ;;  %v18174_v54 = vpop.permute.xlu0 %7345  ;;  %10716 = vmatprep.subr.mxu0 %v5024_v34  ;;  %v20734_v21 = vld [vmem:[#allocation26_spill] sm:$0xff]  ;;  %v20738_v34 = vld [vmem:[#allocation27_spill] sm:$0xff]  ;;  %v5014_v43 = vsel %vm20740_vm13, %v20739_v6, %v20736_v32  ;;  %vm20748_vm14 = vmmov %vm20737_vm2 }
 0x95b   : > { %10698 = vmatpush2.msra.mxu1 %v3391_v58  ;;  %10717 = vmatpush1.msra.mxu0 %v5023_v9  ;;  %v3383_v61 = vsel %vm3375_vm11, %v20734_v21, %v20733_v35  ;;  %v20735_v37 = vld [vmem:[#allocation322_spill] sm:$0xff]  ;;  %v3382_v58 = vsel %vm3375_vm11, %v20738_v34, %v20734_v21  ;;  %v18193_v9 = vld [vmem:[#allocation2 + $0x40] sm:$0xff]  ;;  %vm20753_vm13 = vmmov %vm20737_vm2 }
 0x95c   : > { %7633 = vrot.lane.b32.xlu0 %v17827_v36, %s11624_s24  ;;  %v5015_v1 = vsel %vm20737_vm2, %v20736_v32, %v20735_v37  ;;  %v7135_v11 = vpop.permute.xlu1 %7134  ;;  %10699 = vmatprep.subr.mxu1 %v3383_v61  ;;  %20741 = vst [vmem:[#allocation68_spill] sm:$0xff] %v18193_v9  ;;  %v18202_v61 = vld [vmem:[%s18990_s5] sm:$0x77]  ;;  %v7443_v32 = vsel %vm19512_vm4, %v18077_v46, %v18089_v8  ;;  %v20744_v21 = vld [vmem:[#allocation314_spill] sm:$0xff] }
 0x95d   : > { %10718 = vmatprep.subr.mxu0 %v5015_v1  ;;  %10700 = vmatpush2.msra.mxu1 %v3382_v58  ;;  %20743 = vst [vmem:[#allocation52_spill] sm:$0xff] %v18202_v61  ;;  %v20745_v1 = vld [vmem:[#allocation313_spill] sm:$0xff]  ;;  %v20747_v58 = vld [vmem:[#allocation312_spill] sm:$0xff] }
 0x95e   : > { %10719 = vmatpush1.msra.mxu0 %v5014_v43  ;;  %v18195_v35 = vpop.permute.xlu0 %7136  ;;  %7611 = vrot.lane.b32.xlu1 %v18193_v9, %s11624_s24  ;;  %v5006_v34 = vsel %vm20746_vm15, %v20745_v1, %v20744_v21  ;;  %v5005_v6 = vsel %vm20748_vm14, %v20747_v58, %v20745_v1  ;;  %v20749_v43 = vld [vmem:[#allocation196_spill] sm:$0xff]  ;;  %vm20758_vm15 = vcmask 719872   ;;  %v20759_v21 = vld [vmem:[#allocation90_spill] sm:$0xff] }
 0x95f   : > { %20742 = vst [vmem:[#allocation53_spill] sm:$0xff] %v18195_v35  ;;  %10702 = vmatmul.mubr.f32.vlgmr.msra.gmra.mxu1 %v18202_v61  ;;  %10779 = vmatprep.subr.mxu1 %v7443_v32  ;;  %v7442_v37 = vsel %vm19512_vm4, %v20749_v43, %v18077_v46  ;;  %v20750_v61 = vld [vmem:[#allocation306_spill] sm:$0xff]  ;;  %v7434_v32 = vsel %vm19512_vm4, %v18102_v2, %v18121_v13  ;;  %v20752_v1 = vld [vmem:[#allocation304_spill] sm:$0xff]  ;;  %vm20761_vm14 = vmmov %vm20758_vm15 }
 0x960   : > { %10720 = vmatprep.subr.mxu0 %v5006_v34  ;;  %v7115_v9 = vpop.permute.xlu1 %7114  ;;  %10780 = vmatpush1.msra.mxu1 %v7442_v37  ;;  %v4997_v8 = vsel %vm20737_vm2, %v20751_v29, %v20750_v61  ;;  %v4996_v34 = vsel %vm20753_vm13, %v20752_v1, %v20751_v29  ;;  %v20755_v37 = vld [vmem:[#allocation91_spill] sm:$0xff]  ;;  %v20756_v43 = vld [vmem:[#allocation298_spill] sm:$0xff]  ;;  %v20757_v29 = vld [vmem:[#allocation297_spill] sm:$0xff] }
 0x961   : > { %10721 = vmatpush1.msra.mxu0 %v5005_v6  ;;  %7613 = vrot.lane.b32.xlu0 %v17871_v14, %s11624_s24  ;;  %v7433_v58 = vsel %vm19512_vm4, %v20755_v37, %v18102_v2  ;;  %v18233_v6 = vld [vmem:[#allocation2 + $0x158] sm:$0xff]  ;;  %v4755_v1 = vsel %vm20758_vm15, %v20757_v29, %v20756_v43  ;;  %v7424_v2 = vsel %vm19512_vm4, %v20759_v21, %v18132_v25  ;;  %v20762_v37 = vld [vmem:[#allocation290_spill] sm:$0xff]  ;;  %vm20764_vm2 = vmmov %vm20761_vm14  ;;  %vm20769_vm15 = vcmask 138240  }
 0x962   : > { %10722 = vmatprep.subr.mxu0 %v4997_v8  ;;  %v18228_v46 = vpop.permute.xlu0 %7116  ;;  %10781 = vmatprep.subr.mxu1 %v7434_v32  ;;  %v7425_v8 = vsel %vm19512_vm4, %v18132_v25, %v18145_v15  ;;  %v20760_v32 = vld [vmem:[#allocation296_spill] sm:$0xff]  ;;  %v7416_v25 = vsel %vm19512_vm4, %v18161_v50, %v18174_v54  ;;  %vm20767_vm13 = vmmov %vm20764_vm2 }
 0x963   : > { %20754 = vst [vmem:[#allocation37_spill] sm:$0xff] %v18228_v46  ;;  %10723 = vmatpush1.msra.mxu0 %v4996_v34  ;;  %10782 = vmatpush1.msra.mxu1 %v7433_v58  ;;  %v4754_v34 = vsel %vm20761_vm14, %v20760_v32, %v20757_v29  ;;  %v20763_v58 = vld [vmem:[#allocation289_spill] sm:$0xff]  ;;  %v20766_v21 = vld [vmem:[#allocation288_spill] sm:$0xff]  ;;  %v20768_v29 = vld [vmem:[#allocation75_spill] sm:$0xff] }
 0x964   : > { %8482 = vrot.lane.b32.xlu1 %v18233_v6, %s11621_s21  ;;  %v7095_v61 = vpop.permute.xlu1 %7094  ;;  %10783 = vmatprep.subr.mxu1 %v7425_v8  ;;  %v4746_v15 = vsel %vm20764_vm2, %v20763_v58, %v20762_v37  ;;  %v4745_v8 = vsel %vm20767_vm13, %v20766_v21, %v20763_v58  ;;  %v20771_v37 = vld [vmem:[#allocation281_spill] sm:$0xff]  ;;  %vm20772_vm14 = vmmov %vm20764_vm2  ;;  %v20773_v21 = vld [vmem:[#allocation74_spill] sm:$0xff] }
 0x965   : > { %10724 = vmatprep.subr.mxu0 %v4755_v1  ;;  %10784 = vmatpush1.msra.mxu1 %v7424_v2  ;;  %v7415_v1 = vsel %vm19512_vm4, %v20768_v29, %v18161_v50  ;;  %v18265_v2 = vld [vmem:[#allocation2 + $0x100] sm:$0xff]  ;;  %vm20774_vm2 = vmmov %vm20769_vm15 }
 0x966   : > { %10725 = vmatpush1.msra.mxu0 %v4754_v34  ;;  %v18252_v13 = vpop.permute.xlu0 %7096  ;;  %7407 = vrot.lane.b32.xlu0 %v17786_v31, %s11617_s12  ;;  %v20770_v34 = vld [vmem:[#allocation282_spill] sm:$0xff]  ;;  %v7174_v43 = vsel %vm20774_vm2, %v20773_v21, %v7135_v11  ;;  %v20775_v50 = vld [vmem:[#allocation280_spill] sm:$0xff]  ;;  %vm20776_vm4 = vmmov %vm20774_vm2 }
 0x967   : > { %20765 = vst [vmem:[#allocation36_spill] sm:$0xff] %v18252_v13  ;;  %10726 = vmatprep.subr.mxu0 %v4746_v15  ;;  %10785 = vmatprep.subr.mxu1 %v7416_v25  ;;  %v7175_v15 = vsel %vm20769_vm15, %v7135_v11, %v18195_v35  ;;  %v4737_v58 = vsel %vm20772_vm14, %v20771_v37, %v20770_v34  ;;  %v20778_v35 = vld [vmem:[#allocation273_spill] sm:$0xff]  ;;  %vm20779_vm15 = vmmov %vm20767_vm13  ;;  %v20780_v11 = vld [vmem:[#allocation272_spill] sm:$0xff] }
 0x968   : > { %10727 = vmatpush1.msra.mxu0 %v4745_v8  ;;  %v7075_v32 = vpop.permute.xlu1 %7074  ;;  %10786 = vmatpush1.msra.mxu1 %v7415_v1  ;;  %v4736_v25 = vsel %vm20767_vm13, %v20775_v50, %v20771_v37  ;;  %v7166_v8 = vsel %vm20776_vm4, %v7115_v9, %v18228_v46  ;;  %v20777_v1 = vld [vmem:[#allocation274_spill] sm:$0xff]  ;;  %vm20781_vm14 = vmmov %vm20767_vm13  ;;  %v7157_v37 = vsel %vm20774_vm2, %v7095_v61, %v18252_v13  ;;  %v20782_v21 = vld [vmem:[#allocation59_spill] sm:$0xff]  ;;  %vm20786_vm13 = vcmask 728064  }
 0x969   : > { %8462 = vrot.lane.b32.xlu1 %v18265_v2, %s11621_s21  ;;  %10787 = vmatprep.subr.mxu1 %v7175_v15  ;;  %v4728_v34 = vsel %vm20779_vm15, %v20778_v35, %v20777_v1  ;;  %v4727_v15 = vsel %vm20781_vm14, %v20780_v11, %v20778_v35  ;;  %vm20783_vm4 = vmmov %vm20774_vm2  ;;  %v20788_v11 = vld [vmem:[#allocation202_spill] sm:$0xff] }
 0x96a   : > { %10728 = vmatprep.subr.mxu0 %v4737_v58  ;;  %v18281_v29 = vpop.permute.xlu0 %7076  ;;  %10788 = vmatpush1.msra.mxu1 %v7174_v43  ;;  %v7165_v50 = vsel %vm20783_vm4, %v20782_v21, %v7115_v9  ;;  %v18295_v43 = vld [vmem:[#allocation2 + $0xa8] sm:$0xff]  ;;  %vm20789_vm15 = vmmov %vm20786_vm13  ;;  %v20790_v9 = vld [vmem:[#allocation58_spill] sm:$0xff] }
 0x96b   : > { %10729 = vmatpush1.msra.mxu0 %v4736_v25  ;;  %7387 = vrot.lane.b32.xlu0 %v17803_v49, %s11617_s12  ;;  %v20785_v25 = vld [vmem:[#allocation203_spill] sm:$0xff]  ;;  %vm20791_vm14 = vmmov %vm20774_vm2  ;;  %v20795_v1 = vld [vmem:[#allocation170_spill] sm:$0xff] }
 0x96c   : > { %10730 = vmatprep.subr.mxu0 %v4728_v34  ;;  %v6866_v58 = vpop.permute.xlu1 %6865  ;;  %10789 = vmatprep.subr.mxu1 %v7166_v8  ;;  %v20784_v34 = vld [vmem:[#allocation266_spill] sm:$0xff]  ;;  %v4485_v13 = vsel %vm20789_vm15, %v20788_v11, %v20785_v25  ;;  %v7156_v8 = vsel %vm20791_vm14, %v20790_v9, %v7095_v61  ;;  %v20793_v21 = vld [vmem:[#allocation171_spill] sm:$0xff]  ;;  %vm20794_vm2 = vmmov %vm20786_vm13 }
 0x96d   : > { %10731 = vmatpush1.msra.mxu0 %v4727_v15  ;;  %10790 = vmatpush1.msra.mxu1 %v7165_v50  ;;  %v4486_v46 = vsel %vm20786_vm13, %v20785_v25, %v20784_v34  ;;  %v20792_v15 = vld [vmem:[#allocation250_spill] sm:$0xff]  ;;  %v7148_v34 = vsel %vm20783_vm4, %v7075_v32, %v18281_v29  ;;  %vm20796_vm13 = vmmov %vm20794_vm2  ;;  %v20798_v61 = vld [vmem:[#allocation139_spill] sm:$0xff] }
 0x96e   : > { %8442 = vrot.lane.b32.xlu1 %v18295_v43, %s11621_s21  ;;  %v18302_v35 = vpop.permute.xlu0 %6867  ;;  %10732 = vmatprep.subr.mxu0 %v4486_v46  ;;  %v4477_v50 = vsel %vm20794_vm2, %v20793_v21, %v20792_v15  ;;  %v18319_v25 = vld [vmem:[#allocation2 + $0x50] sm:$0xff]  ;;  %vm20799_vm15 = vmmov %vm20794_vm2 }
 0x96f   : > { %20787 = vst [vmem:[#allocation357_spill] sm:$0xff] %v18302_v35  ;;  %10791 = vmatprep.subr.mxu1 %v7157_v37  ;;  %10733 = vmatpush1.msra.mxu0 %v4485_v13  ;;  %v4476_v37 = vsel %vm20796_vm13, %v20795_v1, %v20793_v21  ;;  %v20797_v13 = vld [vmem:[#allocation234_spill] sm:$0xff]  ;;  %vm20800_vm14 = vmmov %vm20794_vm2  ;;  %v20803_v21 = vld [vmem:[#allocation107_spill] sm:$0xff] }
 0x970   : > { %7367 = vrot.lane.b32.xlu0 %v17827_v36, %s11617_s12  ;;  %v6846_v46 = vpop.permute.xlu1 %6845  ;;  %10734 = vmatprep.subr.mxu0 %v4477_v50  ;;  %v4468_v11 = vsel %vm20799_vm15, %v20798_v61, %v20797_v13  ;;  %v4467_v9 = vsel %vm20800_vm14, %v20501_v39, %v20798_v61  ;;  %vm20801_vm2 = vmmov %vm20783_vm4  ;;  %v20806_v39 = vld [vmem:[#allocation106_spill] sm:$0xff]  ;;  %vm20810_vm14 = vcmask 162816  }
 0x971   : > { %10792 = vmatpush1.msra.mxu1 %v7156_v8  ;;  %10735 = vmatpush1.msra.mxu0 %v4476_v37  ;;  %v7147_v1 = vsel %vm20801_vm2, %v17515_v51, %v7075_v32  ;;  %v20802_v8 = vld [vmem:[#allocation218_spill] sm:$0xff]  ;;  %vm20804_vm4 = vmmov %vm20796_vm13  ;;  %vm20805_vm13 = vcmask 146432   ;;  %v20808_v51 = vld [vmem:[#allocation468_spill] sm:$0xff] }
 0x972   : > { %8422 = vrot.lane.b32.xlu1 %v18319_v25, %s11621_s21  ;;  %10736 = vmatprep.subr.mxu0 %v4468_v11  ;;  %v18329_v50 = vpop.permute.xlu0 %6847  ;;  %v4459_v37 = vsel %vm20804_vm4, %v20803_v21, %v20802_v8  ;;  %v6906_v11 = vsel %vm20805_vm13, %v6866_v58, %v18302_v35  ;;  %vm20807_vm15 = vmmov %vm20804_vm4  ;;  %v20809_v32 = vld [vmem:[#allocation467_spill] sm:$0xff] }
 0x973   : > { %10793 = vmatprep.subr.mxu1 %v7148_v34  ;;  %10737 = vmatpush1.msra.mxu0 %v4467_v9  ;;  %v4458_v34 = vsel %vm20807_vm15, %v20806_v39, %v20803_v21  ;;  %v6368_v9 = vsel %vm20810_vm14, %v20809_v32, %v20808_v51  ;;  %vm20811_vm2 = vmmov %vm20810_vm14  ;;  %v20814_v21 = vld [vmem:[#allocation462_spill] sm:$0xff] }
 0x974   : > { %7347 = vrot.lane.b32.xlu0 %v17871_v14, %s11617_s12  ;;  %10738 = vmatprep.subr.mxu0 %v4459_v37  ;;  %v6367_v35 = vsel %vm20811_vm2, %v20509_v55, %v20809_v32  ;;  %vm20812_vm4 = vmmov %vm20805_vm13 }
 0x975   : > { %10794 = vmatpush1.msra.mxu1 %v7147_v1  ;;  %v6826_v61 = vpop.permute.xlu1 %6825  ;;  %10739 = vmatpush1.msra.mxu0 %v4458_v34  ;;  %v6905_v37 = vsel %vm20812_vm4, %v17539_v0, %v6866_v58  ;;  %v20813_v1 = vld [vmem:[#allocation463_spill] sm:$0xff]  ;;  %vm20815_vm13 = vmmov %vm20811_vm2  ;;  %v20818_v0 = vld [vmem:[#allocation458_spill] sm:$0xff] }
 0x976   : > { %8213 = vrot.lane.b32.xlu1 %v18233_v6, %s11622_s22  ;;  %10740 = vmatprep.subr.mxu0 %v6368_v9  ;;  %v6359_v39 = vsel %vm20815_vm13, %v20814_v21, %v20813_v1  ;;  %vm20816_vm15 = vmmov %vm20812_vm4 }
 0x977   : > { %10795 = vmatprep.subr.mxu1 %v6906_v11  ;;  %10741 = vmatpush2.msra.mxu0 %v6367_v35  ;;  %v6897_v34 = vsel %vm20816_vm15, %v6846_v46, %v18329_v50  ;;  %v18360_v9 = vpop.permute.xlu0 %6827  ;;  %vm20817_vm14 = vmmov %vm20811_vm2 }
 0x978   : > { %7138 = vrot.lane.b32.xlu0 %v17786_v31, %s11618_s16  ;;  %10742 = vmatprep.subr.mxu0 %v6359_v39  ;;  %v6358_v55 = vsel %vm20817_vm14, %v20513_v45, %v20814_v21  ;;  %v20819_v31 = vld [vmem:[#allocation457_spill] sm:$0xff]  ;;  %vm20820_vm4 = vmmov %vm20811_vm2  ;;  %v20822_v45 = vld [vmem:[#allocation452_spill] sm:$0xff] }
 0x979   : > { %10796 = vmatpush1.msra.mxu1 %v6905_v37  ;;  %10743 = vmatpush2.msra.mxu0 %v6358_v55  ;;  %v6350_v58 = vsel %vm20811_vm2, %v20819_v31, %v20818_v0  ;;  %v6349_v11 = vsel %vm20820_vm4, %v20519_v42, %v20819_v31  ;;  %vm20821_vm13 = vmmov %vm20816_vm15  ;;  %v20823_v37 = vld [vmem:[#allocation451_spill] sm:$0xff]  ;;  %vm20828_vm4 = vcmask 424960  }
 0x97a   : > { %8193 = vrot.lane.b32.xlu1 %v18265_v2, %s11622_s22  ;;  %v6806_v35 = vpop.permute.xlu1 %6805  ;;  %10744 = vmatprep.subr.mxu0 %v6350_v58  ;;  %v6896_v32 = vsel %vm20821_vm13, %v17566_v40, %v6846_v46  ;;  %vm20824_vm15 = vmmov %vm20811_vm2  ;;  %v6340_v42 = vsel %vm20811_vm2, %v20522_v7, %v20823_v37  ;;  %v20826_v40 = vld [vmem:[#allocation446_spill] sm:$0xff]  ;;  %v20831_v7 = vld [vmem:[#allocation439_spill] sm:$0xff] }
 0x97b   : > { %10797 = vmatprep.subr.mxu1 %v6897_v34  ;;  %10745 = vmatpush2.msra.mxu0 %v6349_v11  ;;  %v6341_v21 = vsel %vm20824_vm15, %v20823_v37, %v20822_v45  ;;  %vm20825_vm14 = vmmov %vm20821_vm13  ;;  %v20832_v11 = vld [vmem:[#allocation438_spill] sm:$0xff] }
 0x97c   : > { %7118 = vrot.lane.b32.xlu0 %v17803_v49, %s11618_s16  ;;  %v6888_v39 = vsel %vm20825_vm14, %v6826_v61, %v18360_v9  ;;  %v18382_v55 = vpop.permute.xlu0 %6807  ;;  %10746 = vmatprep.subr.mxu0 %v6341_v21  ;;  %v20827_v49 = vld [vmem:[#allocation445_spill] sm:$0xff]  ;;  %vm20829_vm13 = vmmov %vm20828_vm4 }
 0x97d   : > { %10798 = vmatpush1.msra.mxu1 %v6896_v32  ;;  %10747 = vmatpush2.msra.mxu0 %v6340_v42  ;;  %v6100_v46 = vsel %vm20828_vm4, %v20827_v49, %v20826_v40  ;;  %v6099_v31 = vsel %vm20829_vm13, %v20527_v3, %v20827_v49  ;;  %vm20830_vm15 = vmmov %vm20825_vm14  ;;  %v6090_v3 = vsel %vm20828_vm4, %v20531_v17, %v20832_v11  ;;  %v20841_v49 = vld [vmem:[#allocation425_spill] sm:$0xff] }
 0x97e   : > { %8173 = vrot.lane.b32.xlu1 %v18295_v43, %s11622_s22  ;;  %v6597_v34 = vpop.permute.xlu1 %6596  ;;  %10748 = vmatprep.subr.mxu0 %v6100_v46  ;;  %v6887_v58 = vsel %vm20830_vm15, %v17593_v59, %v6826_v61  ;;  %vm20833_vm14 = vmmov %vm20828_vm4  ;;  %v20836_v59 = vld [vmem:[#allocation432_spill] sm:$0xff] }
 0x97f   : > { %10799 = vmatprep.subr.mxu1 %v6888_v39  ;;  %10749 = vmatpush2.msra.mxu0 %v6099_v31  ;;  %v6091_v32 = vsel %vm20833_vm14, %v20832_v11, %v20831_v7  ;;  %vm20834_vm2 = vmmov %vm20830_vm15  ;;  %v20842_v46 = vld [vmem:[#allocation424_spill] sm:$0xff] }
 0x980   : > { %7098 = vrot.lane.b32.xlu0 %v17827_v36, %s11618_s16  ;;  %v6879_v37 = vsel %vm20834_vm2, %v6806_v35, %v18382_v55  ;;  %v18404_v21 = vpop.permute.xlu0 %6598  ;;  %10750 = vmatprep.subr.mxu0 %v6091_v32  ;;  %v20837_v36 = vld [vmem:[#allocation431_spill] sm:$0xff]  ;;  %vm20838_vm13 = vmmov %vm20828_vm4 }
 0x981   : > { %20835 = vst [vmem:[#allocation356_spill] sm:$0xff] %v18404_v21  ;;  %10800 = vmatpush1.msra.mxu1 %v6887_v58  ;;  %10751 = vmatpush2.msra.mxu0 %v6090_v3  ;;  %v6082_v61 = vsel %vm20838_vm13, %v20837_v36, %v20836_v59  ;;  %vm20839_vm15 = vmmov %vm20828_vm4  ;;  %v18443_v3 = vld [vmem:[#allocation2 + $0x150] sm:$0xff] }
 0x982   : > { %8153 = vrot.lane.b32.xlu1 %v18319_v25, %s11622_s22  ;;  %v18414_v39 = vpop.permute.xlu1 %8747  ;;  %10752 = vmatprep.subr.mxu0 %v6082_v61  ;;  %v6081_v42 = vsel %vm20839_vm15, %v20537_v26, %v20837_v36  ;;  %vm20840_vm14 = vmmov %vm20834_vm2  ;;  %vm20848_vm15 = vcmask 433152   ;;  %v20851_v36 = vld [vmem:[#allocation411_spill] sm:$0xff]  ;;  %v20852_v61 = vld [vmem:[#allocation410_spill] sm:$0xff] }
 0x983   : > { %10801 = vmatprep.subr.mxu1 %v6879_v37  ;;  %v6878_v17 = vsel %vm20840_vm14, %v17615_v56, %v6806_v35  ;;  %10753 = vmatpush2.msra.mxu0 %v6081_v42  ;;  %vm20843_vm2 = vmmov %vm20828_vm4  ;;  %vm20844_vm4 = vcmask 154624   ;;  %v20846_v56 = vld [vmem:[#allocation418_spill] sm:$0xff] }
 0x984   : > { %7078 = vrot.lane.b32.xlu0 %v17871_v14, %s11618_s16  ;;  %v6073_v31 = vsel %vm20843_vm2, %v20842_v46, %v20841_v49  ;;  %v6637_v58 = vsel %vm20844_vm4, %v6597_v34, %v18404_v21  ;;  %v18428_v11 = vpop.permute.xlu0 %8749  ;;  %vm20845_vm13 = vmmov %vm20843_vm2  ;;  %10802 = vmatpush1.msra.mxu1 %v6878_v17  ;;  %v20847_v14 = vld [vmem:[#allocation417_spill] sm:$0xff] }
 0x985   : > { %10754 = vmatprep.subr.mxu0 %v6073_v31  ;;  %v6072_v26 = vsel %vm20845_vm13, %v20540_v12, %v20842_v46  ;;  %v5831_v35 = vsel %vm20848_vm15, %v20847_v14, %v20846_v56  ;;  %vm20849_vm14 = vmmov %vm20848_vm15  ;;  %10803 = vmatprep.subr.mxu1 %v6637_v58  ;;  %v20858_v31 = vld [vmem:[#allocation404_spill] sm:$0xff]  ;;  %v20859_v58 = vld [vmem:[#allocation403_spill] sm:$0xff] }
 0x986   : > { %10755 = vmatpush2.msra.mxu0 %v6072_v26  ;;  %7944 = vrot.lane.b32.xlu1 %v18233_v6, %s11623_s23  ;;  %v18438_v32 = vpop.permute.xlu1 %8727  ;;  %v5830_v37 = vsel %vm20849_vm14, %v20545_v27, %v20847_v14  ;;  %vm20850_vm2 = vmmov %vm20844_vm4 }
 0x987   : > { %10756 = vmatprep.subr.mxu0 %v5831_v35  ;;  %v6636_v12 = vsel %vm20850_vm2, %v17637_v30, %v6597_v34  ;;  %vm20853_vm4 = vmmov %vm20849_vm14  ;;  %v20855_v30 = vld [vmem:[#allocation485_spill] sm:$0xff]  ;;  %v20856_v34 = vld [vmem:[#allocation484_spill] sm:$0xff]  ;;  %10772 = vmatprep.mubr.f32.mxu0 %v20585_v28 }
 0x988   : > { %10757 = vmatpush2.msra.mxu0 %v5830_v37  ;;  %6869 = vrot.lane.b32.xlu0 %v18443_v3, %s11619_s17  ;;  %v5822_v42 = vsel %vm20853_vm4, %v20852_v61, %v20851_v36  ;;  %v18452_v17 = vpop.permute.xlu0 %8729  ;;  %vm20854_vm13 = vmmov %vm20853_vm4  ;;  %v6740_v37 = vld [vmem:[#allocation2 + $0xf8] sm:$0xff] }
 0x989   : > { %10758 = vmatprep.subr.mxu0 %v5822_v42  ;;  %v5821_v27 = vsel %vm20854_vm13, %v20549_v4, %v20852_v61  ;;  %10804 = vmatpush1.msra.mxu1 %v6636_v12  ;;  %vm20857_vm15 = vmmov %vm20850_vm2  ;;  %v20863_v12 = vld [vmem:[#allocation397_spill] sm:$0xff]  ;;  %v20864_v61 = vld [vmem:[#allocation396_spill] sm:$0xff] }
 0x98a   : > { %10759 = vmatpush2.msra.mxu0 %v5821_v27  ;;  %7924 = vrot.lane.b32.xlu1 %v18265_v2, %s11623_s23  ;;  %v6628_v46 = vsel %vm20857_vm15, %v20856_v34, %v20855_v30  ;;  %vm20860_vm14 = vmmov %vm20853_vm4  ;;  %v18465_v14 = vpop.permute.xlu1 %8707  ;;  %v20876_v30 = vld [vmem:[#allocation389_spill] sm:$0xff] }
 0x98b   : > { %v5813_v26 = vsel %vm20860_vm14, %v20859_v58, %v20858_v31  ;;  %10805 = vmatprep.subr.mxu1 %v6628_v46  ;;  %vm20861_vm2 = vmmov %vm20853_vm4  ;;  %v20866_v46 = vld [vmem:[#allocation480_spill] sm:$0xff] }
 0x98c   : > { %10760 = vmatprep.subr.mxu0 %v5813_v26  ;;  %v5812_v4 = vsel %vm20861_vm2, %v20554_v47, %v20859_v58  ;;  %vm20862_vm4 = vmmov %vm20857_vm15  ;;  %v18476_v27 = vpop.permute.xlu0 %8709  ;;  %6849 = vrot.lane.b32.xlu0 %v6740_v37, %s11619_s17  ;;  %v20867_v26 = vld [vmem:[#allocation479_spill] sm:$0xff] }
 0x98d   : > { %v6627_v35 = vsel %vm20862_vm4, %v20557_v62, %v20856_v34  ;;  %10761 = vmatpush2.msra.mxu0 %v5812_v4  ;;  %vm20865_vm13 = vmmov %vm20861_vm2  ;;  %v20870_v34 = vld [vmem:[#allocation478_spill] sm:$0xff]  ;;  %v20873_v37 = vld [vmem:[#allocation11_spill] sm:$0xff] }
 0x98e   : > { %10806 = vmatpush1.msra.mxu1 %v6627_v35  ;;  %v5804_v42 = vsel %vm20865_vm13, %v20864_v61, %v20863_v12  ;;  %vm20868_vm15 = vmmov %vm20862_vm4  ;;  %v8479_v4 = vpop.permute.xlu1 %8478  ;;  %7904 = vrot.lane.b32.xlu1 %v18295_v43, %s11623_s23  ;;  %v20872_v35 = vld [vmem:[#allocation16_spill] sm:$0xff]  ;;  %vm20877_vm13 = vcmask 441344  }
 0x98f   : > { %10762 = vmatprep.subr.mxu0 %v5804_v42  ;;  %v6619_v47 = vsel %vm20868_vm15, %v20867_v26, %v20866_v46  ;;  %vm20869_vm14 = vmmov %vm20861_vm2  ;;  %v20875_v46 = vld [vmem:[#allocation390_spill] sm:$0xff] }
 0x990   : > { %v5803_v62 = vsel %vm20869_vm14, %v20562_v41, %v20864_v61  ;;  %10807 = vmatprep.subr.mxu1 %v6619_v47  ;;  %vm20871_vm2 = vmmov %vm20862_vm4  ;;  %v5562_v21 = vsel %vm20877_vm13, %v20876_v30, %v20875_v46  ;;  %v6730_v47 = vld [vmem:[#allocation2 + $0xa0] sm:$0xff] }
 0x991   : > { %10763 = vmatpush2.msra.mxu0 %v5803_v62  ;;  %v6618_v58 = vsel %vm20871_vm2, %v20870_v34, %v20867_v26  ;;  %vm20874_vm4 = vmmov %vm20871_vm2  ;;  %v18502_v26 = vpop.permute.xlu0 %8480  ;;  %v20880_v62 = vld [vmem:[#allocation382_spill] sm:$0xff]  ;;  %v20881_v34 = vld [vmem:[#allocation381_spill] sm:$0xff]  ;;  %6829 = vrot.lane.b32.xlu0 %v6730_v47, %s11619_s17 }
 0x992   : > { %10808 = vmatpush1.msra.mxu1 %v6618_v58  ;;  %v6610_v42 = vsel %vm20874_vm4, %v20873_v37, %v20872_v35  ;;  %10764 = vmatprep.subr.mxu0 %v5562_v21  ;;  %vm20878_vm15 = vmmov %vm20877_vm13  ;;  %v8688_v21 = vpop.permute.xlu1 %8687  ;;  %v20888_v47 = vld [vmem:[#allocation22_spill] sm:$0xff] }
 0x993   : > { %10809 = vmatprep.subr.mxu1 %v6610_v42  ;;  %v5561_v41 = vsel %vm20878_vm15, %v20569_v44, %v20876_v30  ;;  %vm20879_vm14 = vmmov %vm20871_vm2  ;;  %7884 = vrot.lane.b32.xlu1 %v18319_v25, %s11623_s23  ;;  %v20884_v30 = vld [vmem:[#allocation374_spill] sm:$0xff] }
 0x994   : > { %v6609_v61 = vsel %vm20879_vm14, %v20572_v52, %v20873_v37  ;;  %10765 = vmatpush2.msra.mxu0 %v5561_v41  ;;  %vm20882_vm2 = vmmov %vm20877_vm13  ;;  %v8519_v52 = vsel %vm8484_vm3, %v8479_v4, %v18502_v26  ;;  %v20885_v37 = vld [vmem:[#allocation373_spill] sm:$0xff] }
 0x995   : > { %10810 = vmatpush1.msra.mxu1 %v6609_v61  ;;  %v5553_v58 = vsel %vm20882_vm2, %v20881_v34, %v20880_v62  ;;  %vm20883_vm4 = vmmov %vm20882_vm2  ;;  %v6720_v61 = vld [vmem:[#allocation2 + $0x48] sm:$0xff] }
 0x996   : > { %10766 = vmatprep.subr.mxu0 %v5553_v58  ;;  %v5552_v44 = vsel %vm20883_vm4, %v20576_v53, %v20881_v34  ;;  %vm20886_vm13 = vmmov %vm20882_vm2  ;;  %v18522_v53 = vpop.permute.xlu0 %8689  ;;  %v20889_v34 = vld [vmem:[#allocation23_spill] sm:$0xff]  ;;  %10811 = vmatprep.subr.mxu1 %v8519_v52  ;;  %v8787_v52 = vsel %vm8753_vm1, %v17661_v57, %v18414_v39  ;;  %vm20899_vm4 = vcmask 261120  }
 0x997   : > { %10767 = vmatpush2.msra.mxu0 %v5552_v44  ;;  %v5544_v42 = vsel %vm20886_vm13, %v20885_v37, %v20884_v30  ;;  %vm20887_vm15 = vmmov %vm20882_vm2  ;;  %6809 = vrot.lane.b32.xlu0 %v6720_v61, %s11619_s17  ;;  %v5534_v44 = vsel %vm20882_vm2, %v20586_v48, %v20889_v34  ;;  %v18544_v48 = vld [vmem:[%s18990_s5 + $0x8] sm:$0x77]  ;;  %v8779_v61 = vsel %vm8753_vm1, %v18438_v32, %v18452_v17  ;;  %v20891_v57 = vld [vmem:[#allocation43_spill] sm:$0xff] }
 0x998   : > { %10768 = vmatprep.subr.mxu0 %v5544_v42  ;;  %v5543_v41 = vsel %vm20887_vm15, %v20581_v38, %v20885_v37  ;;  %vm20890_vm14 = vmmov %vm20882_vm2  ;;  %v8459_v42 = vpop.permute.xlu1 %8458  ;;  %7675 = vrot.lane.b32.xlu1 %v18233_v6, %s11624_s24  ;;  %v8788_v38 = vsel %vm8753_vm1, %v18414_v39, %v18428_v11  ;;  %v8518_v37 = vsel %vm8484_vm3, %v17684_v60, %v8479_v4 }
 0x999   : > { %10769 = vmatpush2.msra.mxu0 %v5543_v41  ;;  %v5535_v58 = vsel %vm20890_vm14, %v20889_v34, %v20888_v47  ;;  %10812 = vmatpush2.msra.mxu1 %v8518_v37  ;;  %v8778_v60 = vsel %vm8753_vm1, %v20891_v57, %v18438_v32  ;;  %v8770_v34 = vsel %vm8753_vm1, %v18465_v14, %v18476_v27  ;;  %v20892_v32 = vld [vmem:[#allocation89_spill] sm:$0xff]  ;;  %vm20932_vm14 = vcmask 1039360  }
 0x99a   : > { %10770 = vmatprep.subr.mxu0 %v5535_v58  ;;  %v18547_v41 = vpop.permute.xlu0 %8460  ;;  %v8761_v58 = vsel %vm8753_vm1, %v8688_v21, %v18522_v53 }
 0x99b   : > { %10771 = vmatpush2.msra.mxu0 %v5534_v44  ;;  %6600 = vrot.lane.b32.xlu0 %v18443_v3, %s11616_s13  ;;  %v8510_v4 = vsel %vm8484_vm3, %v8459_v42, %v18547_v41  ;;  %v8769_v3 = vsel %vm8753_vm1, %v20892_v32, %v18465_v14  ;;  %v20893_v44 = vmov 0.0   ;;  %v20895_v14 = vld [vmem:[#allocation265_spill] sm:$0xff]  ;;  %v20898_v32 = vld [vmem:[#allocation42_spill] sm:$0xff] }
 0x99c   : > { %10773 = vmatmul.mubr.f32.vlgmr.msra.gmra.mxu0 %v18544_v48  ;;  %10874 = vmatprep.subr.mxu0 %v8788_v38  ;;  %v8439_v39 = vpop.permute.xlu1 %8438  ;;  %v4218_v57 = vsel %vm4182_vm8, %v20658_v63, %v20895_v14  ;;  %v20900_v63 = vld [vmem:[#allocation249_spill] sm:$0xff]  ;;  %v20902_v14 = vld [vmem:[#allocation240_spill] sm:$0xff] }
 0x99d   : > { %10875 = vmatpush1.msra.mxu0 %v8787_v52  ;;  %7655 = vrot.lane.b32.xlu1 %v18265_v2, %s11624_s24  ;;  %v20894_v52 = vld [vmem:[#allocation73_spill] sm:$0xff] }
 0x99e   : > { %10876 = vmatprep.subr.mxu0 %v8779_v61  ;;  %10914 = vmatprep.mubr.f32.mxu0 %v20893_v44  ;;  %v18570_v38 = vpop.permute.xlu0 %8440  ;;  %v8760_v37 = vsel %vm8753_vm1, %v20894_v52, %v8688_v21  ;;  %v8509_v21 = vsel %vm8484_vm3, %v20898_v32, %v8459_v42  ;;  %v4209_v52 = vsel %vm4182_vm8, %v20661_v23, %v20900_v63  ;;  %v20905_v32 = vld [vmem:[#allocation224_spill] sm:$0xff] }
 0x99f   : > { %10877 = vmatpush1.msra.mxu0 %v8778_v60  ;;  %10813 = vmatprep.subr.mxu1 %v8510_v4  ;;  %v20896_v60 = vld [vmem:[#allocation257_spill] sm:$0xff]  ;;  %v8501_v42 = vsel %vm8484_vm3, %v8439_v39, %v18570_v38  ;;  %v20906_v63 = vld [vmem:[#allocation88_spill] sm:$0xff] }
 0x9a0   : > { %10878 = vmatprep.subr.mxu0 %v8770_v34  ;;  %7635 = vrot.lane.b32.xlu0 %v18295_v43, %s11624_s24  ;;  %v8419_v61 = vpop.permute.xlu1 %8418  ;;  %v20897_v34 = vld [vmem:[#allocation256_spill] sm:$0xff] }
 0x9a1   : > { %10879 = vmatpush1.msra.mxu0 %v8769_v3  ;;  %7615 = vrot.lane.b32.xlu1 %v18319_v25, %s11624_s24  ;;  %v3142_v4 = vsel %vm3106_vm5, %v20897_v34, %v20896_v60  ;;  %v20903_v34 = vld [vmem:[#allocation233_spill] sm:$0xff]  ;;  %s11530_s24 = smul.u32 36, %s21073_s28 }
 0x9a2   : > { %10880 = vmatprep.subr.mxu0 %v8761_v58  ;;  %v18589_v58 = vld [vmem:[%s18990_s5 + $0x18] sm:$0x7]  ;;  %v18593_v3 = vpop.permute.xlu0 %8420  ;;  %10814 = vmatpush2.msra.mxu1 %v8509_v21  ;;  %v4200_v23 = vsel %vm4182_vm8, %v20665_v20, %v20903_v34 }
 0x9a3   : > { %10881 = vmatpush1.msra.mxu0 %v8760_v37  ;;  %v20901_v37 = vld [vmem:[#allocation241_spill] sm:$0xff]  ;;  %10815 = vmatprep.subr.mxu1 %v8501_v42  ;;  %v8492_v20 = vsel %vm8484_vm3, %v8419_v61, %v18593_v3  ;;  %v20910_v42 = vld [vmem:[#allocation263_spill] sm:$0xff]  ;;  %s18975_s28 = scalar_lea.vmem %s18993_s8, %s11530_s24 }
 0x9a4   : > { %11386 = vmatprep.subr.mxu0 %v4218_v57  ;;  %11370 = vmatmul.mubr.msk.f32.vlgmr.msra.gmra.mxu0 %vm20899_vm4, %v18589_v58  ;;  %v3133_v57 = vsel %vm3106_vm5, %v20902_v14, %v20901_v37  ;;  %v8210_v60 = vpop.permute.xlu1 %8209  ;;  %v8500_v37 = vsel %vm8484_vm3, %v20906_v63, %v8439_v39  ;;  %v20908_v14 = vld [vmem:[#allocation209_spill] sm:$0xff]  ;;  %v20914_v63 = vld [vmem:[#allocation72_spill] sm:$0xff] }
 0x9a5   : > { %11387 = vmatpush3.msra.mxu0 %v3142_v4  ;;  %8751 = vrot.lane.b32.xlu0 %v18233_v6, %s11620_s20  ;;  %v20904_v4 = vld [vmem:[#allocation225_spill] sm:$0xff] }
 0x9a6   : > { %11388 = vmatprep.subr.mxu0 %v4209_v52  ;;  %8731 = vrot.lane.b32.xlu1 %v18265_v2, %s11620_s20  ;;  %v3124_v21 = vsel %vm3106_vm5, %v20905_v32, %v20904_v4  ;;  %v18615_v6 = vpop.permute.xlu0 %8211  ;;  %v20907_v52 = vld [vmem:[#allocation217_spill] sm:$0xff]  ;;  %v20912_v4 = vld [vmem:[#allocation255_spill] sm:$0xff]  ;;  %v20913_v32 = vld [vmem:[#allocation254_spill] sm:$0xff] }
 0x9a7   : > { %11389 = vmatpush3.msra.mxu0 %v3133_v57  ;;  %v4191_v2 = vsel %vm4182_vm8, %v20669_v33, %v20907_v52  ;;  %10816 = vmatpush2.msra.mxu1 %v8500_v37  ;;  %v20909_v57 = vld [vmem:[#allocation208_spill] sm:$0xff]  ;;  %vm20911_vm8 = vcmask 744448  }
 0x9a8   : > { %11390 = vmatprep.subr.mxu0 %v4200_v23  ;;  %v3115_v34 = vsel %vm3106_vm5, %v20909_v57, %v20908_v14  ;;  %v8190_v39 = vpop.permute.xlu1 %8189  ;;  %v3949_v33 = vsel %vm20911_vm8, %v20672_v22, %v20910_v42  ;;  %v9766_v23 = vld [vmem:[%s18991_s6] sm:$0x7]  ;;  %10817 = vmatprep.subr.mxu1 %v8492_v20  ;;  %v20915_v22 = vld [vmem:[#allocation247_spill] sm:$0xff]  ;;  %vm20916_vm5 = vmmov %vm20911_vm8  ;;  %vm20978_vm8 = vcmask 130048  }
 0x9a9   : > { %11391 = vmatpush3.msra.mxu0 %v3124_v21  ;;  %8711 = vrot.lane.b32.xlu0 %v18295_v43, %s11620_s20  ;;  %v2873_v21 = vsel %vm2837_vm6, %v20913_v32, %v20912_v4  ;;  %v8491_v43 = vsel %vm8484_vm3, %v20914_v63, %v8419_v61  ;;  %v3940_v52 = vsel %vm20916_vm5, %v20678_v5, %v20915_v22  ;;  %v20918_v14 = vld [vmem:[#allocation238_spill] sm:$0xff]  ;;  %vm20921_vm13 = vmmov %vm20916_vm5  ;;  %v20922_v5 = vld [vmem:[#allocation223_spill] sm:$0xff] }
 0x9aa   : > { %11392 = vmatprep.subr.mxu0 %v4191_v2  ;;  %8691 = vrot.lane.b32.xlu1 %v18319_v25, %s11620_s20  ;;  %v8250_v25 = vsel %vm8215_vm0, %v8210_v60, %v18615_v6  ;;  %v18642_v37 = vpop.permute.xlu0 %8191  ;;  %v20917_v2 = vld [vmem:[#allocation239_spill] sm:$0xff]  ;;  %v20923_v32 = vld [vmem:[#allocation222_spill] sm:$0xff]  ;;  %v20924_v63 = vld [vmem:[#allocation56_spill] sm:$0xff] }
 0x9ab   : > { %11393 = vmatpush3.msra.mxu0 %v3115_v34  ;;  %10818 = vmatpush2.msra.mxu1 %v8491_v43  ;;  %v2864_v57 = vsel %vm2837_vm6, %v20918_v14, %v20917_v2  ;;  %v8241_v20 = vsel %vm8215_vm0, %v8190_v39, %v18642_v37  ;;  %v20919_v34 = vld [vmem:[#allocation57_spill] sm:$0xff]  ;;  %v8240_v43 = vsel %vm8215_vm0, %v20924_v63, %v8190_v39  ;;  %v20925_v22 = vld [vmem:[#allocation215_spill] sm:$0xff]  ;;  %vm20926_vm15 = vmmov %vm20916_vm5 }
 0x9ac   : > { %11394 = vmatprep.subr.mxu0 %v3949_v33  ;;  %v8170_v61 = vpop.permute.xlu1 %8169  ;;  %v8249_v42 = vsel %vm8215_vm0, %v20919_v34, %v8210_v60  ;;  %v20920_v33 = vld [vmem:[#allocation231_spill] sm:$0xff]  ;;  %10819 = vmatprep.subr.mxu1 %v8250_v25  ;;  %v3922_v60 = vsel %vm20926_vm15, %v20689_v19, %v20925_v22  ;;  %v20928_v14 = vld [vmem:[#allocation261_spill] sm:$0xff]  ;;  %v20938_v63 = vld [vmem:[#allocation40_spill] sm:$0xff] }
 0x9ad   : > { %11395 = vmatpush3.msra.mxu0 %v2873_v21  ;;  %9769 = vperm.xlu0 %11566, %v9766_v23   ;;  %v3931_v4 = vsel %vm20921_vm13, %v20683_v10, %v20920_v33  ;;  %v2855_v21 = vsel %vm2837_vm6, %v20923_v32, %v20922_v5  ;;  %v20927_v25 = vld [vmem:[#allocation207_spill] sm:$0xff]  ;;  %v3680_v39 = vsel %vm3644_vm10, %v20693_v16, %v20928_v14  ;;  %v20930_v19 = vld [vmem:[#allocation253_spill] sm:$0xff]  ;;  %v20934_v5 = vld [vmem:[#allocation454_spill] sm:$0xff] }
 0x9ae   : > { %11396 = vmatprep.subr.mxu0 %v3940_v52  ;;  %10820 = vmatpush2.msra.mxu1 %v8249_v42  ;;  %v18660_v23 = vpop.permute.xlu0 %8171  ;;  %v2846_v52 = vsel %vm2837_vm6, %v20630_v18, %v20927_v25  ;;  %v20933_v18 = vld [vmem:[#allocation245_spill] sm:$0xff]  ;;  %v20936_v32 = vld [vmem:[#allocation236_spill] sm:$0xff]  ;;  %vm20937_vm6 = vmmov %vm20932_vm14 }
 0x9af   : > { %11397 = vmatpush3.msra.mxu0 %v2864_v57  ;;  %10821 = vmatprep.subr.mxu1 %v8241_v20  ;;  %v8232_v10 = vsel %vm8215_vm0, %v8170_v61, %v18660_v23  ;;  %v20929_v57 = vld [vmem:[#allocation41_spill] sm:$0xff]  ;;  %v20931_v20 = vld [vmem:[#allocation252_spill] sm:$0xff]  ;;  %vm20943_vm2 = vmmov %vm20937_vm6 }
 0x9b0   : > { %11398 = vmatprep.subr.mxu0 %v3931_v4  ;;  %10822 = vmatpush2.msra.mxu1 %v8240_v43  ;;  %v8150_v2 = vpop.permute.xlu1 %8149  ;;  %v8231_v34 = vsel %vm8215_vm0, %v20929_v57, %v8170_v61  ;;  %v2604_v42 = vsel %vm20932_vm14, %v20931_v20, %v20930_v19  ;;  %v3671_v4 = vsel %vm3644_vm10, %v20696_v24, %v20933_v18  ;;  %v20935_v61 = vld [vmem:[#allocation237_spill] sm:$0xff]  ;;  %v20944_v57 = vld [vmem:[#allocation487_spill] sm:$0xff]  ;;  %v20948_v18 = vld [vmem:[#allocation204_spill] sm:$0xff]  ;;  %vm20990_vm14 = vcmask 424960  }
 0x9b1   : > { %11399 = vmatpush3.msra.mxu0 %v2855_v21  ;;  %10823 = vmatprep.subr.mxu1 %v8232_v10  ;;  %v2595_v21 = vsel %vm20937_vm6, %v20936_v32, %v20935_v61  ;;  %v8222_v43 = vsel %vm8215_vm0, %v20938_v63, %v8150_v2  ;;  %v20940_v10 = vld [vmem:[#allocation228_spill] sm:$0xff]  ;;  %v20941_v25 = vld [vmem:[#allocation221_spill] sm:$0xff]  ;;  %vm20949_vm4 = vmmov %vm20943_vm2  ;;  %vm20993_vm6 = vcmask 457728  }
 0x9b2   : > { %11400 = vmatprep.subr.mxu0 %v3922_v60  ;;  %10824 = vmatpush2.msra.mxu1 %v8231_v34  ;;  %v18680_v33 = vpop.permute.xlu0 %8151  ;;  %v20939_v60 = vld [vmem:[#allocation229_spill] sm:$0xff]  ;;  %v20951_v32 = vld [vmem:[#allocation259_spill] sm:$0xff]  ;;  %vm20988_vm15 = vmmov %vm20978_vm8 }
 0x9b3   : > { %11401 = vmatpush3.msra.mxu0 %v2846_v52  ;;  %v8223_v16 = vsel %vm8215_vm0, %v8150_v2, %v18680_v33  ;;  %10985 = vmatprep.mubr.f32.mxu0 %v20934_v5  ;;  %v3662_v24 = vsel %vm3644_vm10, %v20940_v10, %v20939_v60  ;;  %v20942_v52 = vld [vmem:[#allocation220_spill] sm:$0xff]  ;;  %v20945_v34 = vld [vmem:[#allocation213_spill] sm:$0xff]  ;;  %v20953_v10 = vld [vmem:[#allocation243_spill] sm:$0xff] }
 0x9b4   : > { %11402 = vmatprep.subr.mxu0 %v3680_v39  ;;  %v7941_v22 = vpop.permute.xlu1 %7940  ;;  %10825 = vmatprep.subr.mxu1 %v8223_v16  ;;  %v2586_v14 = vsel %vm20943_vm2, %v20942_v52, %v20941_v25  ;;  %v20946_v2 = vld [vmem:[#allocation212_spill] sm:$0xff]  ;;  %v20950_v16 = vld [vmem:[#allocation87_spill] sm:$0xff]  ;;  %v2362_v52 = vld [vmem:[#allocation2 + $0xf0] sm:$0xff] }
 0x9b5   : > { %11403 = vmatpush3.msra.mxu0 %v2604_v42  ;;  %10826 = vmatpush2.msra.mxu1 %v8222_v43  ;;  %v3653_v19 = vsel %vm3644_vm10, %v20946_v2, %v20945_v34  ;;  %v20947_v42 = vld [vmem:[#allocation205_spill] sm:$0xff]  ;;  %v7980_v5 = vsel %vm7946_vm7, %v20950_v16, %v7941_v22  ;;  %v20958_v16 = vld [vmem:[#allocation211_spill] sm:$0xff]  ;;  %vm20969_vm10 = vcmask 162816   ;;  %vm20998_vm2 = vmmov %vm20993_vm6 }
 0x9b6   : > { %11404 = vmatprep.subr.mxu0 %v3671_v4  ;;  %v18699_v39 = vpop.permute.xlu0 %7942  ;;  %10843 = vmatprep.mubr.f32.mxu1 %v20944_v57  ;;  %v2577_v4 = vsel %vm20949_vm4, %v20948_v18, %v20947_v42  ;;  %v2371_v43 = vld [vmem:[#allocation2 + $0x148] sm:$0xff]  ;;  %v2353_v18 = vld [vmem:[#allocation2 + $0x98] sm:$0xff]  ;;  %vm20980_vm5 = vmmov %vm20969_vm10 }
 0x9b7   : > { %11405 = vmatpush3.msra.mxu0 %v2595_v21  ;;  %v7981_v20 = vsel %vm7946_vm7, %v7941_v22, %v18699_v39  ;;  %v20952_v21 = vld [vmem:[#allocation258_spill] sm:$0xff]  ;;  %vm20984_vm13 = vmmov %vm20980_vm5 }
 0x9b8   : > { %11406 = vmatprep.subr.mxu0 %v3662_v24  ;;  %v7921_v61 = vpop.permute.xlu1 %7920  ;;  %10827 = vmatprep.subr.mxu1 %v7981_v20  ;;  %v3411_v63 = vsel %vm3375_vm11, %v20952_v21, %v20951_v32  ;;  %v20954_v24 = vld [vmem:[#allocation242_spill] sm:$0xff]  ;;  %v20960_v21 = vld [vmem:[#allocation71_spill] sm:$0xff]  ;;  %vm21000_vm4 = vmmov %vm20978_vm8 }
 0x9b9   : > { %11407 = vmatpush3.msra.mxu0 %v2586_v14  ;;  %10828 = vmatpush2.msra.mxu1 %v7980_v5  ;;  %v3402_v25 = vsel %vm3375_vm11, %v20954_v24, %v20953_v10  ;;  %v20955_v14 = vld [vmem:[#allocation86_spill] sm:$0xff]  ;;  %v20961_v10 = vld [vmem:[#allocation68_spill] sm:$0xff] }
 0x9ba   : > { %11408 = vmatprep.subr.mxu0 %v3653_v19  ;;  %v18715_v60 = vpop.permute.xlu0 %7922  ;;  %v7971_v34 = vsel %vm7946_vm7, %v20955_v14, %v7921_v61  ;;  %v20956_v19 = vld [vmem:[#allocation227_spill] sm:$0xff]  ;;  %v20957_v20 = vld [vmem:[#allocation226_spill] sm:$0xff]  ;;  %v20962_v24 = vld [vmem:[#allocation52_spill] sm:$0xff] }
 0x9bb   : > { %11409 = vmatpush3.msra.mxu0 %v2577_v4  ;;  %v7972_v22 = vsel %vm7946_vm7, %v7921_v61, %v18715_v60  ;;  %v3393_v42 = vsel %vm3375_vm11, %v20957_v20, %v20956_v19  ;;  %v20959_v5 = vld [vmem:[#allocation210_spill] sm:$0xff]  ;;  %v20964_v20 = vld [vmem:[#allocation55_spill] sm:$0xff] }
 0x9bc   : > { %11410 = vmatprep.subr.mxu0 %v3411_v63  ;;  %v7901_v2 = vpop.permute.xlu1 %7900  ;;  %10829 = vmatprep.subr.mxu1 %v7972_v22  ;;  %v3384_v32 = vsel %vm3375_vm11, %v20959_v5, %v20958_v16  ;;  %v20965_v5 = vld [vmem:[#allocation54_spill] sm:$0xff]  ;;  %vm20974_vm11 = vmmov %vm20969_vm10 }
 0x9bd   : > { %11411 = vmatpush3.msra.mxu0 %v2371_v43  ;;  %10830 = vmatpush2.msra.mxu1 %v7971_v34  ;;  %v7962_v63 = vsel %vm7946_vm7, %v20960_v21, %v7901_v2 }
 0x9be   : > { %11412 = vmatprep.subr.mxu0 %v3402_v25  ;;  %v18727_v4 = vpop.permute.xlu0 %7902 }
 0x9bf   : > { %11413 = vmatpush3.msra.mxu0 %v2362_v52  ;;  %v7963_v61 = vsel %vm7946_vm7, %v7901_v2, %v18727_v4  ;;  %v20963_v52 = vld [vmem:[#allocation70_spill] sm:$0xff] }
 0x9c0   : > { %11414 = vmatprep.subr.mxu0 %v3393_v42  ;;  %v7881_v43 = vpop.permute.xlu1 %7880  ;;  %10831 = vmatprep.subr.mxu1 %v7963_v61 }
 0x9c1   : > { %11415 = vmatpush3.msra.mxu0 %v2353_v18  ;;  %10832 = vmatpush2.msra.mxu1 %v7962_v63  ;;  %v7953_v14 = vsel %vm7946_vm7, %v20963_v52, %v7881_v43 }
 0x9c2   : > { %11416 = vmatprep.subr.mxu0 %v3384_v32  ;;  %v18738_v25 = vpop.permute.xlu0 %7882 }
 0x9c3   : > { %11417 = vmatpush3.msra.mxu0 %v20961_v10  ;;  %v7954_v22 = vsel %vm7946_vm7, %v7881_v43, %v18738_v25  ;;  %v20966_v43 = vld [vmem:[#allocation39_spill] sm:$0xff] }
 0x9c4   : > { %10986 = vmatmul.mubr.f32.vlgmr.msra.gmra.mxu0 %v20962_v24  ;;  %v7672_v34 = vpop.permute.xlu1 %7671  ;;  %10833 = vmatprep.subr.mxu1 %v7954_v22 }
 0x9c5   : > { %11125 = vmatprep.mubr.f32.mxu0 %v20944_v57  ;;  %10834 = vmatpush2.msra.mxu1 %v7953_v14  ;;  %v7711_v42 = vsel %vm7677_vm9, %v20964_v20, %v7672_v34  ;;  %v20967_v14 = vld [vmem:[#allocation38_spill] sm:$0xff]  ;;  %v20968_v20 = vld [vmem:[#allocation469_spill] sm:$0xff] }
 0x9c6   : > { %v18745_v2 = vpop.permute.xlu0 %7673 }
 0x9c7   : > { %v7712_v19 = vsel %vm7677_vm9, %v7672_v34, %v18745_v2 }
 0x9c8   : > { %10835 = vmatprep.subr.mxu1 %v7712_v19  ;;  %v7652_v18 = vpop.permute.xlu1 %7651 }
 0x9c9   : > { %10836 = vmatpush2.msra.mxu1 %v7711_v42  ;;  %v7702_v32 = vsel %vm7677_vm9, %v20965_v5, %v7652_v18  ;;  %v6369_v42 = vsel %vm20969_vm10, %v20808_v51, %v20968_v20  ;;  %v20971_v5 = vld [vmem:[#allocation362_spill] sm:$0xff] }
 0x9ca   : > { %v18751_v16 = vpop.permute.xlu0 %7653 }
 0x9cb   : > { %v7703_v57 = vsel %vm7677_vm9, %v7652_v18, %v18751_v16 }
 0x9cc   : > { %10837 = vmatprep.subr.mxu1 %v7703_v57  ;;  %v7632_v61 = vpop.permute.xlu1 %7631  ;;  %v20970_v57 = vld [vmem:[#allocation363_spill] sm:$0xff] }
 0x9cd   : > { %10838 = vmatpush2.msra.mxu1 %v7702_v32  ;;  %v7693_v10 = vsel %vm7677_vm9, %v20966_v43, %v7632_v61  ;;  %v5294_v32 = vsel %vm5258_vm12, %v20971_v5, %v20970_v57  ;;  %v20973_v43 = vld [vmem:[#allocation464_spill] sm:$0xff]  ;;  %v20983_v5 = vld [vmem:[#allocation453_spill] sm:$0xff] }
 0x9ce   : > { %v18757_v21 = vpop.permute.xlu0 %7633 }
 0x9cf   : > { %v7694_v63 = vsel %vm7677_vm9, %v7632_v61, %v18757_v21  ;;  %v20972_v61 = vld [vmem:[#allocation84_spill] sm:$0xff] }
 0x9d0   : > { %10839 = vmatprep.subr.mxu1 %v7694_v63  ;;  %v7612_v24 = vpop.permute.xlu1 %7611 }
 0x9d1   : > { %10840 = vmatpush2.msra.mxu1 %v7693_v10  ;;  %v7684_v34 = vsel %vm7677_vm9, %v20967_v14, %v7612_v24  ;;  %v6360_v10 = vsel %vm20974_vm11, %v20813_v1, %v20973_v43  ;;  %v20977_v14 = vld [vmem:[#allocation85_spill] sm:$0xff]  ;;  %vm21005_vm11 = vmmov %vm20998_vm2 }
 0x9d3   : > { %v18763_v22 = vpop.permute.xlu0 %7613 }
 0x9d4   : > { %v7685_v52 = vsel %vm7677_vm9, %v7612_v24, %v18763_v22  ;;  %v20975_v24 = vld [vmem:[#allocation355_spill] sm:$0xff] }
 0x9d5   : > { %10841 = vmatprep.subr.mxu1 %v7685_v52  ;;  %v20976_v52 = vld [vmem:[#allocation354_spill] sm:$0xff] }
 0x9d6   : > { %v8483_v19 = vpop.permute.xlu1 %8482  ;;  %10842 = vmatpush2.msra.mxu1 %v7684_v34  ;;  %v5285_v51 = vsel %vm5258_vm12, %v20976_v52, %v20975_v24  ;;  %v20989_v24 = vld [vmem:[#allocation447_spill] sm:$0xff] }
 0x9d7   : > { %v8520_v18 = vsel %vm8484_vm3, %v18502_v26, %v8483_v19  ;;  %10844 = vmatmul.mubr.f32.vlgmr.msra.gmra.mxu1 %v20972_v61  ;;  %11421 = vmatprep.subr.mxu1 %v6369_v42  ;;  %v20979_v19 = vld [vmem:[#allocation459_spill] sm:$0xff]  ;;  %v20986_v61 = vld [vmem:[#allocation338_spill] sm:$0xff] }
 0x9d8   : > { %v7408_v63 = vpop.permute.xlu0 %7407  ;;  %11456 = vmatprep.subr.mxu0 %v8520_v18  ;;  %11422 = vmatpush3.msra.mxu1 %v5294_v32  ;;  %v6351_v20 = vsel %vm20980_vm5, %v20818_v0, %v20979_v19  ;;  %v20981_v42 = vld [vmem:[#allocation347_spill] sm:$0xff]  ;;  %v20982_v18 = vld [vmem:[#allocation346_spill] sm:$0xff]  ;;  %v20987_v0 = vld [vmem:[#allocation152_spill] sm:$0xff] }
 0x9d9   : > { %v7444_v26 = vsel %vm20978_vm8, %v20977_v14, %v7408_v63  ;;  %11423 = vmatprep.subr.mxu1 %v6360_v10  ;;  %11055 = vmatprep.mubr.f32.mxu1 %v20585_v28  ;;  %v5276_v1 = vsel %vm5258_vm12, %v20982_v18, %v20981_v42  ;;  %v6342_v28 = vsel %vm20984_vm13, %v20822_v45, %v20983_v5  ;;  %v20985_v32 = vld [vmem:[#allocation339_spill] sm:$0xff]  ;;  %v20997_v42 = vld [vmem:[#allocation322_spill] sm:$0xff]  ;;  %v21001_v5 = vld [vmem:[#allocation433_spill] sm:$0xff] }
 0x9da   : > { %11457 = vmatpush3.msra.mxu0 %v7444_v26  ;;  %11424 = vmatpush3.msra.mxu1 %v5285_v51  ;;  %v5267_v63 = vsel %vm5258_vm12, %v20986_v61, %v20985_v32  ;;  %v20991_v52 = vld [vmem:[#allocation331_spill] sm:$0xff]  ;;  %v20992_v51 = vld [vmem:[#allocation330_spill] sm:$0xff]  ;;  %vm20995_vm12 = vmmov %vm20990_vm14 }
 0x9db   : > { %v8463_v34 = vpop.permute.xlu1 %8462  ;;  %11425 = vmatprep.subr.mxu1 %v6351_v20  ;;  %v5025_v14 = vsel %vm20993_vm6, %v20992_v51, %v20991_v52  ;;  %v20996_v20 = vld [vmem:[#allocation323_spill] sm:$0xff]  ;;  %vm21002_vm10 = vmmov %vm20995_vm12  ;;  %v21004_v32 = vld [vmem:[#allocation314_spill] sm:$0xff] }
 0x9dc   : > { %v8511_v57 = vsel %vm8484_vm3, %v18547_v41, %v8463_v34  ;;  %11426 = vmatpush3.msra.mxu1 %v5276_v1  ;;  %v6101_v41 = vsel %vm20990_vm14, %v20826_v40, %v20989_v24  ;;  %v20994_v34 = vld [vmem:[#allocation440_spill] sm:$0xff]  ;;  %v5016_v18 = vsel %vm20998_vm2, %v20997_v42, %v20996_v20  ;;  %v20999_v1 = vld [vmem:[#allocation69_spill] sm:$0xff]  ;;  %vm21007_vm8 = vmmov %vm21002_vm10 }
 0x9dd   : > { %11458 = vmatprep.subr.mxu0 %v8511_v57  ;;  %v7388_v43 = vpop.permute.xlu0 %7387  ;;  %11427 = vmatprep.subr.mxu1 %v6342_v28  ;;  %v6092_v19 = vsel %vm20995_vm12, %v20831_v7, %v20994_v34  ;;  %v21003_v28 = vld [vmem:[#allocation315_spill] sm:$0xff]  ;;  %v21009_v24 = vld [vmem:[#allocation306_spill] sm:$0xff]  ;;  %vm21010_vm5 = vmmov %vm20998_vm2  ;;  %vm21023_vm12 = vcmask 138240  }
 0x9de   : > { %v7435_v10 = vsel %vm20988_vm15, %v20987_v0, %v7388_v43  ;;  %11428 = vmatpush3.msra.mxu1 %v5267_v63  ;;  %v5007_v61 = vsel %vm21005_vm11, %v21004_v32, %v21003_v28  ;;  %v21006_v43 = vld [vmem:[#allocation426_spill] sm:$0xff]  ;;  %vm21011_vm13 = vmmov %vm21000_vm4  ;;  %v21012_v51 = vld [vmem:[#allocation419_spill] sm:$0xff]  ;;  %vm21013_vm15 = vcmask 433152  }
 0x9df   : > { %11459 = vmatpush3.msra.mxu0 %v7435_v10  ;;  %11429 = vmatprep.subr.mxu1 %v6101_v41  ;;  %v6074_v0 = vsel %vm21007_vm8, %v20841_v49, %v21006_v43  ;;  %v21008_v10 = vld [vmem:[#allocation307_spill] sm:$0xff]  ;;  %vm21018_vm14 = vmmov %vm21013_vm15  ;;  %v21020_v42 = vld [vmem:[#allocation290_spill] sm:$0xff] }
 0x9e0   : > { %v8443_v26 = vpop.permute.xlu1 %8442  ;;  %11430 = vmatpush3.msra.mxu1 %v5025_v14  ;;  %v4998_v41 = vsel %vm21010_vm5, %v21009_v24, %v21008_v10  ;;  %v21014_v14 = vld [vmem:[#allocation299_spill] sm:$0xff]  ;;  %vm21025_vm2 = vmmov %vm21018_vm14  ;;  %v21032_v43 = vld [vmem:[#allocation274_spill] sm:$0xff]  ;;  %vm21037_vm5 = vcmask 441344  }
 0x9e1   : > { %v8502_v45 = vsel %vm8484_vm3, %v18570_v38, %v8443_v26  ;;  %11431 = vmatprep.subr.mxu1 %v6092_v19  ;;  %v6083_v38 = vsel %vm21002_vm10, %v20836_v59, %v21001_v5  ;;  %v21015_v26 = vld [vmem:[#allocation298_spill] sm:$0xff]  ;;  %v21017_v19 = vld [vmem:[#allocation412_spill] sm:$0xff]  ;;  %v21019_v20 = vld [vmem:[#allocation291_spill] sm:$0xff] }
 0x9e2   : > { %v7368_v40 = vpop.permute.xlu0 %7367  ;;  %11460 = vmatprep.subr.mxu0 %v8502_v45  ;;  %11432 = vmatpush3.msra.mxu1 %v5016_v18  ;;  %v21026_v5 = vld [vmem:[#allocation283_spill] sm:$0xff]  ;;  %vm21030_vm10 = vmmov %vm21025_vm2  ;;  %v21034_v10 = vld [vmem:[#allocation37_spill] sm:$0xff] }
 0x9e3   : > { %v7426_v57 = vsel %vm21000_vm4, %v20999_v1, %v7368_v40  ;;  %11433 = vmatprep.subr.mxu1 %v6083_v38  ;;  %v21022_v40 = vld [vmem:[#allocation53_spill] sm:$0xff]  ;;  %v21027_v38 = vld [vmem:[#allocation282_spill] sm:$0xff]  ;;  %vm21035_vm8 = vmmov %vm21023_vm12 }
 0x9e4   : > { %v8423_v7 = vpop.permute.xlu1 %8422  ;;  %11461 = vmatpush3.msra.mxu0 %v7426_v57  ;;  %11434 = vmatpush3.msra.mxu1 %v5007_v61  ;;  %v21024_v57 = vld [vmem:[#allocation405_spill] sm:$0xff]  ;;  %v21029_v61 = vld [vmem:[#allocation398_spill] sm:$0xff] }
 0x9e5   : > { %v8493_v63 = vsel %vm8484_vm3, %v18593_v3, %v8423_v7  ;;  %11435 = vmatprep.subr.mxu1 %v6074_v0  ;;  %v5832_v3 = vsel %vm21013_vm15, %v20846_v56, %v21012_v51  ;;  %vm21016_vm3 = vcmask 719872   ;;  %v5805_v7 = vsel %vm21030_vm10, %v20863_v12, %v21029_v61  ;;  %vm21042_vm15 = vmmov %vm21037_vm5 }
 0x9e6   : > { %v7348_v59 = vpop.permute.xlu0 %7347  ;;  %11462 = vmatprep.subr.mxu0 %v8493_v63  ;;  %11436 = vmatpush3.msra.mxu1 %v4998_v41  ;;  %v4756_v45 = vsel %vm21016_vm3, %v21015_v26, %v21014_v14  ;;  %vm21021_vm6 = vmmov %vm21016_vm3  ;;  %v21031_v63 = vld [vmem:[#allocation275_spill] sm:$0xff] }
 0x9e7   : > { %v7417_v52 = vsel %vm21011_vm13, %v18174_v54, %v7348_v59  ;;  %11437 = vmatprep.subr.mxu1 %v5832_v3  ;;  %v5823_v54 = vsel %vm21018_vm14, %v20851_v36, %v21017_v19  ;;  %v4747_v18 = vsel %vm21021_vm6, %v21020_v42, %v21019_v20  ;;  %vm21028_vm4 = vmmov %vm21016_vm3  ;;  %v21036_v41 = vld [vmem:[#allocation391_spill] sm:$0xff]  ;;  %vm21040_vm13 = vcmask 728064  }
 0x9e8   : > { %v8214_v49 = vpop.permute.xlu1 %8213  ;;  %11463 = vmatpush3.msra.mxu0 %v7417_v52  ;;  %11438 = vmatpush3.msra.mxu1 %v4756_v45  ;;  %v4738_v28 = vsel %vm21028_vm4, %v21027_v38, %v21026_v5  ;;  %vm21033_vm11 = vmmov %vm21016_vm3  ;;  %v21038_v59 = vld [vmem:[#allocation267_spill] sm:$0xff]  ;;  %v21039_v52 = vld [vmem:[#allocation266_spill] sm:$0xff] }
 0x9e9   : > { %v8251_v34 = vsel %vm8215_vm0, %v18615_v6, %v8214_v49  ;;  %11439 = vmatprep.subr.mxu1 %v5823_v54  ;;  %v5814_v6 = vsel %vm21025_vm2, %v20858_v31, %v21024_v57  ;;  %v4729_v0 = vsel %vm21033_vm11, %v21032_v43, %v21031_v63  ;;  %v4487_v51 = vsel %vm21040_vm13, %v21039_v52, %v21038_v59  ;;  %v21041_v14 = vld [vmem:[#allocation383_spill] sm:$0xff]  ;;  %vm21044_vm3 = vmmov %vm21040_vm13  ;;  %v18918_v63 = vpop.f32.mrf.mxu1  ;;  %v21063_v52 = vld [vmem:[#allocation486_spill] sm:$0xff] }
 0x9ea   : > { %v7139_v56 = vpop.permute.xlu0 %7138  ;;  %11464 = vmatprep.subr.mxu0 %v8251_v34  ;;  %11440 = vmatpush3.msra.mxu1 %v4747_v18  ;;  %v5554_v26 = vsel %vm21042_vm15, %v20880_v62, %v21041_v14  ;;  %v21043_v45 = vld [vmem:[#allocation251_spill] sm:$0xff]  ;;  %v21045_v34 = vld [vmem:[#allocation36_spill] sm:$0xff]  ;;  %vm21046_vm14 = vmmov %vm21035_vm8  ;;  %vm21057_vm11 = vcmask 146432  }
 0x9eb   : > { %v7176_v1 = vsel %vm21023_vm12, %v21022_v40, %v7139_v56  ;;  %11441 = vmatprep.subr.mxu1 %v5814_v6  ;;  %v4478_v49 = vsel %vm21044_vm3, %v20792_v15, %v21043_v45  ;;  %v21047_v54 = vld [vmem:[#allocation375_spill] sm:$0xff]  ;;  %vm21048_vm6 = vmmov %vm21037_vm5  ;;  %v21051_v18 = vld [vmem:[#allocation17_spill] sm:$0xff] }
 0x9ec   : > { %v8194_v36 = vpop.permute.xlu1 %8193  ;;  %11465 = vmatpush3.msra.mxu0 %v7176_v1  ;;  %11442 = vmatpush3.msra.mxu1 %v4738_v28  ;;  %v21049_v20 = vld [vmem:[#allocation235_spill] sm:$0xff]  ;;  %vm21050_vm12 = vmmov %vm21044_vm3 }
 0x9ed   : > { %v8242_v32 = vsel %vm8215_vm0, %v18642_v37, %v8194_v36  ;;  %11443 = vmatprep.subr.mxu1 %v5805_v7  ;;  %v5563_v37 = vsel %vm21037_vm5, %v20875_v46, %v21036_v41  ;;  %v4469_v42 = vsel %vm21050_vm12, %v20797_v13, %v21049_v20  ;;  %vm21052_vm2 = vmmov %vm21037_vm5  ;;  %v21053_v40 = vld [vmem:[#allocation219_spill] sm:$0xff]  ;;  %v18914_v7 = vpop.f32.mrf.mxu0  ;;  %v21061_v41 = vld [vmem:[#allocation356_spill] sm:$0xff] }
 0x9ee   : > { %v7119_v31 = vpop.permute.xlu0 %7118  ;;  %11466 = vmatprep.subr.mxu0 %v8242_v32  ;;  %11444 = vmatpush3.msra.mxu1 %v4729_v0  ;;  %v5536_v56 = vsel %vm21052_vm2, %v20888_v47, %v21051_v18  ;;  %vm21054_vm4 = vmmov %vm21044_vm3  ;;  %v21056_v47 = vld [vmem:[#allocation357_spill] sm:$0xff] }
 0x9ef   : > { %v7167_v24 = vsel %vm21035_vm8, %v21034_v10, %v7119_v31  ;;  %11445 = vmatprep.subr.mxu1 %v5563_v37  ;;  %v4460_v1 = vsel %vm21054_vm4, %v20802_v8, %v21053_v40  ;;  %vm21055_vm10 = vmmov %vm21035_vm8  ;;  %v9853_v0 = vpop.f32.mrf.mxu0  ;;  %v18924_v31 = vpop.f32.mrf.mxu1 }
 0x9f0   : > { %v8174_v12 = vpop.permute.xlu1 %8173  ;;  %11467 = vmatpush3.msra.mxu0 %v7167_v24  ;;  %11446 = vmatpush3.msra.mxu1 %v4487_v51  ;;  %vm21058_vm8 = vmmov %vm21057_vm11  ;;  %v21064_v51 = vld [vmem:[#allocation485_spill] sm:$0xff] }
 0x9f1   : > { %v8233_v3 = vsel %vm8215_vm0, %v18660_v23, %v8174_v12  ;;  %11447 = vmatprep.subr.mxu1 %v5554_v26  ;;  %v5545_v23 = vsel %vm21048_vm6, %v20884_v30, %v21047_v54  ;;  %vm21059_vm5 = vmmov %vm21058_vm8  ;;  %v18926_v10 = vpop.f32.mrf.mxu0 }
 0x9f2   : > { %v7099_v46 = vpop.permute.xlu0 %7098  ;;  %11468 = vmatprep.subr.mxu0 %v8233_v3  ;;  %11448 = vmatpush3.msra.mxu1 %v4478_v49  ;;  %vm21060_vm13 = vmmov %vm21059_vm5  ;;  %v21066_v49 = vld [vmem:[#allocation481_spill] sm:$0xff] }
 0x9f3   : > { %v7158_v19 = vsel %vm21046_vm14, %v21045_v34, %v7099_v46  ;;  %11449 = vmatprep.subr.mxu1 %v5545_v23  ;;  %v9995_v12 = vpop.f32.mrf.mxu0  ;;  %v21067_v46 = vld [vmem:[#allocation480_spill] sm:$0xff] }
 0x9f4   : > { %v8154_v62 = vpop.permute.xlu1 %8153  ;;  %11469 = vmatpush3.msra.mxu0 %v7158_v19  ;;  %11450 = vmatpush3.msra.mxu1 %v4469_v42  ;;  %v21069_v23 = vld [vmem:[#allocation364_spill] sm:$0xff] }
 0x9f5   : > { %v8224_v15 = vsel %vm8215_vm0, %v18680_v33, %v8154_v62  ;;  %11451 = vmatprep.subr.mxu1 %v5536_v56  ;;  %vm11625_vm0 = vmmov 0   ;;  %v10206_v19 = vpop.f32.mrf.mxu0 }
 0x9f6   : > { %v7079_v30 = vpop.permute.xlu0 %7078  ;;  %11470 = vmatprep.subr.mxu0 %v8224_v15  ;;  %11452 = vmatpush3.msra.mxu1 %v4460_v1 }
 0x9f7   : > { %v7149_v13 = vsel %vm21055_vm10, %v18281_v29, %v7079_v30  ;;  %11056 = vmatmul.mubr.f32.vlgmr.msra.gmra.mxu1 %v18544_v48  ;;  %11518 = vmatprep.subr.mxu1 %v20893_v44  ;;  %v10208_v15 = vpop.f32.mrf.mxu0 }
 0x9f8   : > { %v7945_v57 = vpop.permute.xlu1 %7944  ;;  %11471 = vmatpush3.msra.mxu0 %v7149_v13  ;;  %11526 = vmatprep.mubr.msk.f32.mxu1 %vm11625_vm0, %v20893_v44 }
 0x9f9   : > { %v7982_v33 = vsel %vm7946_vm7, %v18699_v39, %v7945_v57 }
 0x9fa   : > { %v6870_v8 = vpop.permute.xlu0 %6869  ;;  %11472 = vmatprep.subr.mxu0 %v7982_v33 }
 0x9fb   : > { %v6907_v6 = vsel %vm21057_vm11, %v21056_v47, %v6870_v8 }
 0x9fc   : > { %v7925_v5 = vpop.permute.xlu1 %7924  ;;  %11473 = vmatpush3.msra.mxu0 %v6907_v6 }
 0x9fd   : > { %v7973_v29 = vsel %vm7946_vm7, %v18715_v60, %v7925_v5 }
 0x9fe   : > { %11474 = vmatprep.subr.mxu0 %v7973_v29  ;;  %v6850_v48 = vpop.permute.xlu0 %6849 }
 0x9ff   : > { %v6898_v39 = vsel %vm21058_vm8, %v18329_v50, %v6850_v48 }
 0xa00   : > { %v7905_v38 = vpop.permute.xlu1 %7904  ;;  %11475 = vmatpush3.msra.mxu0 %v6898_v39 }
 0xa01   : > { %v7964_v28 = vsel %vm7946_vm7, %v18727_v4, %v7905_v38 }
 0xa02   : > { %11476 = vmatprep.subr.mxu0 %v7964_v28 }
 0xa03   : > { %v6830_v36 = vpop.permute.xlu0 %6829 }
 0xa04   : > { %v6889_v32 = vsel %vm21059_vm5, %v18360_v9, %v6830_v36 }
 0xa05   : > { %v7885_v61 = vpop.permute.xlu1 %7884  ;;  %11477 = vmatpush3.msra.mxu0 %v6889_v32 }
 0xa06   : > { %v7955_v60 = vsel %vm7946_vm7, %v18738_v25, %v7885_v61  ;;  %v18928_v25 = vpop.f32.mrf.mxu1  ;;  %vm21062_vm7 = vcmask 154624  }
 0xa07   : > { %11478 = vmatprep.subr.mxu0 %v7955_v60  ;;  %vm21065_vm15 = vmmov %vm21062_vm7 }
 0xa08   : > { %v18937_v14 = vpop.f32.mrf.mxu1  ;;  %vm21068_vm3 = vmmov %vm21062_vm7 }
 0xa09   : > { %v6810_v50 = vpop.permute.xlu0 %6809  ;;  %v6620_v34 = vsel %vm21068_vm3, %v21067_v46, %v21066_v49  ;;  %vm21070_vm14 = vmmov %vm21068_vm3 }
 0xa0a   : > { %v6880_v43 = vsel %vm21060_vm13, %v18382_v55, %v6810_v50  ;;  %v7676_v4 = vpop.permute.xlu1 %7675  ;;  %v10135_v54 = vpop.f32.mrf.mxu1  ;;  %v6611_v20 = vsel %vm21070_vm14, %v20872_v35, %v21069_v23 }
 0xa0b   : > { %11479 = vmatpush3.msra.mxu0 %v6880_v43  ;;  %v7713_v9 = vsel %vm7677_vm9, %v18745_v2, %v7676_v4  ;;  %v6629_v2 = vsel %vm21065_vm15, %v21064_v51, %v21063_v52  ;;  %v10348_v35 = vpop.f32.mrf.mxu0 }
 0xa0c   : > { %11480 = vmatprep.subr.mxu0 %v7713_v9  ;;  %v10137_v56 = vpop.f32.mrf.mxu1 }
 0xa0d   : > { %v6601_v24 = vpop.permute.xlu0 %6600  ;;  %v10350_v13 = vpop.f32.mrf.mxu0 }
 0xa0e   : > { %v6638_v37 = vsel %vm21062_vm7, %v21061_v41, %v6601_v24  ;;  %v10277_v30 = vpop.f32.mrf.mxu1 }
 0xa0f   : > { %v7656_v59 = vpop.permute.xlu1 %7655  ;;  %11481 = vmatpush3.msra.mxu0 %v6638_v37  ;;  %v10419_v33 = vpop.f32.mrf.mxu0 }
 0xa10   : > { %v7704_v55 = vsel %vm7677_vm9, %v18751_v16, %v7656_v59  ;;  %v10279_v57 = vpop.f32.mrf.mxu1 }
 0xa11   : > { %11482 = vmatprep.subr.mxu0 %v7704_v55  ;;  %v10421_v47 = vpop.f32.mrf.mxu0 }
 0xa12   : > { %v7636_v3 = vpop.permute.xlu0 %7635  ;;  %11483 = vmatpush3.msra.mxu0 %v6629_v2  ;;  %v10490_v8 = vpop.f32.mrf.mxu1 }
 0xa13   : > { %v7616_v26 = vpop.permute.xlu1 %7615  ;;  %v7695_v45 = vsel %vm7677_vm9, %v18757_v21, %v7636_v3  ;;  %v10561_v6 = vpop.f32.mrf.mxu0 }
 0xa14   : > { %11484 = vmatprep.subr.mxu0 %v7695_v45  ;;  %v7686_v16 = vsel %vm7677_vm9, %v18763_v22, %v7616_v26  ;;  %v11590_v22 = vld [vmem:[%s18990_s5 + $0x10] sm:$0x77]  ;;  %vm21071_vm9 = vcmask 261120  }
 0xa15   : > { %11485 = vmatpush3.msra.mxu0 %v6620_v34  ;;  %v10563_v60 = vpop.f32.mrf.mxu0 }
 0xa16   : > { %11486 = vmatprep.subr.mxu0 %v7686_v16 }
 0xa17   : > { %v8752_v42 = vpop.permute.xlu0 %8751  ;;  %11487 = vmatpush3.msra.mxu0 %v6611_v20 }
 0xa18   : > { %v8789_v21 = vsel %vm8753_vm1, %v18428_v11, %v8752_v42  ;;  %v8732_v62 = vpop.permute.xlu1 %8731  ;;  %11126 = vmatmul.mubr.f32.vlgmr.msra.gmra.mxu0 %v11590_v22 }
 0xa19   : > { %v8780_v18 = vsel %vm8753_vm1, %v18452_v17, %v8732_v62  ;;  %11519 = vmatpush3.msra.mxu1 %v8789_v21 }
 0xa1a   : > { %11520 = vmatprep.subr.mxu1 %v20893_v44 }
 0xa1b   : > { %11521 = vmatpush3.msra.mxu1 %v8780_v18  ;;  %v8712_v40 = vpop.permute.xlu0 %8711 }
 0xa1c   : > { %v8771_v11 = vsel %vm8753_vm1, %v18476_v27, %v8712_v40  ;;  %11522 = vmatprep.subr.mxu1 %v20893_v44  ;;  %v8692_v1 = vpop.permute.xlu1 %8691  ;;  %v10492_v27 = vpop.f32.mrf.mxu1 }
 0xa1d   : > { %v8762_v17 = vsel %vm8753_vm1, %v18522_v53, %v8692_v1  ;;  %11523 = vmatpush3.msra.mxu1 %v8771_v11 }
 0xa1e   : > { %11524 = vmatprep.subr.mxu1 %v20893_v44  ;;  %v10632_v28 = vpop.f32.mrf.mxu1 }
 0xa1f   : > { %11525 = vmatpush3.msra.mxu1 %v8762_v17 }
 0xa20   : > { %11527 = vmatmul.mubr.msk.f32.vlgmr.msra.gmra.mxu1 %vm21071_vm9, %v18589_v58  ;;  %v10634_v37 = vpop.f32.mrf.mxu1 }
 0xa28   : > { %v9770_v5 = vpop.permute.xlu0 %9769 }
 0xa29   : > { %v9852_v29 = vadd.f32 %v18914_v7, %v9770_v5  ;;  %v9854_v48 = vadd.f32 %v9853_v0, %v9770_v5  ;;  %v10136_v53 = vadd.f32 %v10135_v54, %v9770_v5  ;;  %v10138_v39 = vadd.f32 %v10137_v56, %v9770_v5 }
 0xa2a   : > { %v10420_v38 = vadd.f32 %v10419_v33, %v9770_v5  ;;  %v10422_v44 = vadd.f32 %v10421_v47, %v9770_v5 }
 0xa2b   : > { %v9923_v36 = vadd.f32 %v18918_v63, %v9852_v29  ;;  %v9925_v58 = vadd.f32 %v18924_v31, %v9854_v48  ;;  %v10207_v32 = vadd.f32 %v10206_v19, %v10136_v53  ;;  %v10209_v61 = vadd.f32 %v10208_v15, %v10138_v39 }
 0xa2c   : > { %v10491_v50 = vadd.f32 %v10490_v8, %v10420_v38  ;;  %v10493_v43 = vadd.f32 %v10492_v27, %v10422_v44 }
 0xa2d   : > { %v9994_v4 = vadd.f32 %v18926_v10, %v9923_v36  ;;  %v9996_v9 = vadd.f32 %v9995_v12, %v9925_v58  ;;  %v10278_v7 = vadd.f32 %v10277_v30, %v10207_v32  ;;  %v10280_v0 = vadd.f32 %v10279_v57, %v10209_v61 }
 0xa2e   : > { %v10562_v24 = vadd.f32 %v10561_v6, %v10491_v50  ;;  %v10564_v41 = vadd.f32 %v10563_v60, %v10493_v43 }
 0xa2f   : > { %v10065_v59 = vadd.f32 %v18928_v25, %v9994_v4  ;;  %v10067_v63 = vadd.f32 %v18937_v14, %v9996_v9  ;;  %v10349_v55 = vadd.f32 %v10348_v35, %v10278_v7  ;;  %v10351_v31 = vadd.f32 %v10350_v13, %v10280_v0  ;;  %v10703_v25 = vpop.f32.mrf.mxu1 }
 0xa30   : > { %v10633_v52 = vadd.f32 %v10632_v28, %v10562_v24  ;;  %v10635_v10 = vadd.f32 %v10634_v37, %v10564_v41  ;;  %v10704_v26 = vadd.f32 %v10703_v25, %v9770_v5 }
 0xa31   : > { %v11209_v51 = vcombine.low %v10065_v59, %v10067_v63  ;;  %v11210_v2 = vcombine.low %v10349_v55, %v10351_v31  ;;  %v10705_v14 = vpop.f32.mrf.mxu1 }
 0xa32   : > { %v11211_v12 = vcombine.low %v10633_v52, %v10635_v10  ;;  %v10706_v49 = vadd.f32 %v10705_v14, %v9770_v5 }
 0xa33   : > { %11217 = vst [vmem:[%s18975_s28] sm:$0x77] %v11209_v51  ;;  %11218 = vst [vmem:[%s18975_s28 + $0x8] sm:$0x77] %v11210_v2 }
 0xa34   : > { %11219 = vst [vmem:[%s18975_s28 + $0x10] sm:$0x77] %v11211_v12 }
 0xa5c   : > { %v10774_v3 = vpop.f32.mrf.mxu0 }
 0xa5d   : > { %v10775_v46 = vadd.f32 %v10774_v3, %v10704_v26 }
 0xa5e   : > { %v10776_v45 = vpop.f32.mrf.mxu0 }
 0xa5f   : > { %v10777_v16 = vadd.f32 %v10776_v45, %v10706_v49 }
 0xa64   : > { %v10916_v34 = vpop.f32.mrf.mxu0 }
 0xa66   : > { %v10918_v42 = vpop.f32.mrf.mxu0 }
 0xa84   : > { %v11418_v18 = vpop.f32.mrf.mxu0 }
 0xa86   : > { %v11419_v56 = vpop.f32.mrf.mxu0 }
 0xa87   : > { %v11420_v40 = vadd.f32 %v11419_v56, %v11418_v18 }
 0xa89   : > { %v10988_v30 = vadd.f32 %v11420_v40, %v9770_v5 }
 0xa97   : > { %v10845_v19 = vpop.f32.mrf.mxu1 }
 0xa98   : > { %v10846_v54 = vadd.f32 %v10845_v19, %v10775_v46 }
 0xa99   : > { %v10847_v23 = vpop.f32.mrf.mxu1 }
 0xa9a   : > { %v10848_v20 = vadd.f32 %v10847_v23, %v10777_v16  ;;  %v10917_v21 = vadd.f32 %v10916_v34, %v10846_v54 }
 0xa9c   : > { %v10919_v62 = vadd.f32 %v10918_v42, %v10848_v20 }
 0xa9e   : > { %v11212_v15 = vcombine.low %v10917_v21, %v10919_v62 }
 0xaa0   : > { %11220 = vst [vmem:[%s18975_s28 + $0x18] sm:$0x77] %v11212_v15 }
 0xab7   : > { %v11453_v22 = vpop.f32.mrf.mxu1 }
 0xab9   : > { %v11454_v35 = vpop.f32.mrf.mxu1 }
 0xaba   : > { %v11455_v11 = vadd.f32 %v11454_v35, %v11453_v22 }
 0xabc   : > { %v11058_v13 = vadd.f32 %v11455_v11, %v10988_v30 }
 0xad8   : > { %v11488_v1 = vpop.f32.mrf.mxu0 }
 0xada   : > { %v11489_v17 = vpop.f32.mrf.mxu0 }
 0xadb   : > { %v11490_v57 = vadd.f32 %v11489_v17, %v11488_v1 }
 0xadd   : > { %v11128_v33 = vadd.f32 %v11490_v57, %v11058_v13 }
 0xae0   : > { %v11197_v8 = vpop.f32.mrf.mxu1 }
 0xae1   : > { %v11198_v47 = vadd.f32 %v11197_v8, %v11128_v33 }
 0xae2   : > { %v11528_v27 = vpop.f32.mrf.mxu1 }
 0xae3   : > { %11221 = vst [vmem:[%s18975_s28 + $0x20] sm:$0x7] %v11198_v47 }
 0xae4 PF: > { %s18_s27 = sadd.s32 1, %s11597_s27  }
 0xae5   : > { %p15_p4 = scmp.ge.s32.totalorder %s18_s27, 4  }
 0xae7   :  { %17 = sbr.rel (!%p15_p4) target bundleno = 1 (0x1), region = 82 }

</bundles_post_ra>
